<compile_context>
chip_gen: v5e
topology: v5e:2x2
jax: 0.10.0
libtpu: 0.0.40
codegen_flags: <defaults>
</compile_context>

<pallas_src>
import functools

import jax
import jax.numpy as jnp
from jax.experimental import pallas as pl
from jax.experimental.pallas import tpu as pltpu


# ----------------------------------------------------------------------------
# Pallas kernel: per-batch 3x3 conv (padding=1, stride=1, bias), lane-dense.
#   Input  : flat zero-padded image  (Cin, H*W + 2*(W+1))   [bf16]
#   Weights: (9, Cout, Cin) tap stack, taps ordered k = (dh+1)*3 + (dw+1)
#   Output : (Cout, H*W)                                    [bf16]
# The nine taps are realized as static lane-offset slices of the padded row;
# ml/mr zero the wrapped first/last image column for the dw = -1 / +1 taps.
# ----------------------------------------------------------------------------
def _conv3x3_kernel(x_ref, w_ref, b_ref, ml_ref, mr_ref, o_ref, *, W):
    cout = o_ref.shape[1]
    hw = o_ref.shape[-1]
    ml = ml_ref[...]                     # (1, hw) bf16, 0 at w == 0
    mr = mr_ref[...]                     # (1, hw) bf16, 0 at w == W-1
    off0 = W + 1                         # left zero margin of the padded row
    acc = jnp.zeros((cout, hw), jnp.float32)
    for k in range(9):
        dh, dw = k // 3 - 1, k % 3 - 1
        start = off0 + dh * W + dw       # static, in [0, 2W+2]
        xs = x_ref[0, :, pl.ds(start, hw)]          # (Cin, hw) bf16
        if dw == -1:
            xs = xs * ml
        elif dw == 1:
            xs = xs * mr
        acc = acc + jnp.dot(w_ref[k], xs, preferred_element_type=jnp.float32)
    o_ref[0] = (acc + b_ref[...]).astype(o_ref.dtype)


def conv3x3(x, w, b):
    """3x3 conv, padding=1, stride=1, bias (zero-offset DeformableConv2d).

    x: (N, C, H, W) float;  w: (3, 3, Cin, Cout);  b: (Cout,)
    Returns (N, Cout, H, W) bfloat16.
    """
    N, C, H, W = x.shape
    cout = w.shape[-1]
    hw = H * W
    pad = W + 1
    hwp = hw + 2 * pad

    xflat = x.reshape(N, C, hw).astype(jnp.bfloat16)
    xpad = jnp.pad(xflat, ((0, 0), (0, 0), (pad, pad)))            # (N, C, hwp)
    wstack = jnp.transpose(w.reshape(9, C, cout), (0, 2, 1)).astype(jnp.bfloat16)
    bcol = b.reshape(cout, 1).astype(jnp.float32)
    col = jnp.arange(hw, dtype=jnp.int32) % W
    ml = (col != 0).astype(jnp.bfloat16).reshape(1, hw)
    mr = (col != W - 1).astype(jnp.bfloat16).reshape(1, hw)

    out = pl.pallas_call(
        functools.partial(_conv3x3_kernel, W=W),
        out_shape=jax.ShapeDtypeStruct((N, cout, hw), jnp.bfloat16),
        grid_spec=pltpu.PrefetchScalarGridSpec(
            num_scalar_prefetch=0,
            grid=(N,),
            in_specs=[
                pl.BlockSpec((1, C, hwp), lambda n: (n, 0, 0)),
                pl.BlockSpec((9, cout, C), lambda n: (0, 0, 0)),
                pl.BlockSpec((cout, 1), lambda n: (0, 0)),
                pl.BlockSpec((1, hw), lambda n: (0, 0)),
                pl.BlockSpec((1, hw), lambda n: (0, 0)),
            ],
            out_specs=pl.BlockSpec((1, cout, hw), lambda n: (n, 0, 0)),
        ),
        compiler_params=pltpu.CompilerParams(dimension_semantics=("parallel",)),
    )(xpad, wstack, bcol, ml, mr)
    return out.reshape(N, cout, H, W)


# ----------------------------------------------------------------------------
# db4 wavelet filters + analysis / synthesis banded matrices (zero padding,
# matching pytorch_wavelets DWTForward / DWTInverse with wave='db4', mode='zero')
# ----------------------------------------------------------------------------
_L = 8
_DB4_DEC_LO = jnp.array(
    [-0.010597401784997278, 0.032883011666982945, 0.030841381835986965,
     -0.18703481171888114, -0.02798376941698385, 0.6308807679295904,
     0.7148465705525415, 0.23037781330885523], jnp.float32)


def _filters():
    dec_lo = _DB4_DEC_LO
    sign = jnp.where(jnp.arange(_L) % 2 == 0, 1.0, -1.0).astype(jnp.float32)
    rec_lo = dec_lo[::-1]
    rec_hi = sign * dec_lo
    dec_hi = rec_hi[::-1]
    return dec_lo, dec_hi, rec_lo, rec_hi


def _analysis_mats(n_in):
    """A[k, m] such that coeff = A @ x reproduces afb1d(mode='zero')."""
    dec_lo, dec_hi, _, _ = _filters()
    outsize = (n_in + _L - 1) // 2
    p = 2 * (outsize - 1) - n_in + _L          # n_in even -> p even
    ph = p // 2
    k = jnp.arange(outsize)[:, None]
    m = jnp.arange(n_in)[None, :]
    t = m - 2 * k + ph                         # tap index in the reversed filter
    valid = (t >= 0) & (t < _L)
    idx = jnp.clip(_L - 1 - t, 0, _L - 1)
    A_lo = jnp.where(valid, dec_lo[idx], 0.0)
    A_hi = jnp.where(valid, dec_hi[idx], 0.0)
    return A_lo, A_hi


def _synthesis_mats(m_in):
    """S[n, k] such that y = S_lo @ lo + S_hi @ hi reproduces sfb1d(mode='zero')."""
    _, _, rec_lo, rec_hi = _filters()
    n_out = 2 * m_in - _L + 2
    n = jnp.arange(n_out)[:, None]
    k = jnp.arange(m_in)[None, :]
    t = n + (_L - 2) - 2 * k
    valid = (t >= 0) & (t < _L)
    idx = jnp.clip(t, 0, _L - 1)
    S_lo = jnp.where(valid, rec_lo[idx], 0.0)
    S_hi = jnp.where(valid, rec_hi[idx], 0.0)
    return S_lo, S_hi


# ----------------------------------------------------------------------------
# Fused (x2 nearest upsample + single-level 2D db4 DWT) — one kernel per batch.
#   Row (W) pass: Y = X (F*H0, W0) @ Aw_up^T       (kept in VMEM)
#   Col (H) pass per channel: four small dots against Ah_{lo,hi}_up
# Outputs: LL (N, F, Hp, Wp) and HF = [LH | HL | HH] (N, 3F, Hp, Wp)
# ----------------------------------------------------------------------------
def _dwt_kernel(x_ref, awt_lo_ref, awt_hi_ref, ah_lo_ref, ah_hi_ref,
                ll_ref, hf_ref):
    F = ll_ref.shape[1]
    H0 = ah_lo_ref.shape[1]
    x = x_ref[0]                                              # (F*H0, W0) bf16
    y_lo = jnp.dot(x, awt_lo_ref[...],
                   preferred_element_type=jnp.float32).astype(jnp.bfloat16)
    y_hi = jnp.dot(x, awt_hi_ref[...],
                   preferred_element_type=jnp.float32).astype(jnp.bfloat16)
    ah_lo = ah_lo_ref[...]
    ah_hi = ah_hi_ref[...]
    for c in range(F):
        ylo_c = y_lo[c * H0:(c + 1) * H0, :]                  # (H0, Wp)
        yhi_c = y_hi[c * H0:(c + 1) * H0, :]
        ll_ref[0, c] = jnp.dot(
            ah_lo, ylo_c, preferred_element_type=jnp.float32).astype(ll_ref.dtype)
        hf_ref[0, c] = jnp.dot(                               # LH (w-lo, h-hi)
            ah_hi, ylo_c, preferred_element_type=jnp.float32).astype(hf_ref.dtype)
        hf_ref[0, F + c] = jnp.dot(                           # HL (w-hi, h-lo)
            ah_lo, yhi_c, preferred_element_type=jnp.float32).astype(hf_ref.dtype)
        hf_ref[0, 2 * F + c] = jnp.dot(                       # HH
            ah_hi, yhi_c, preferred_element_type=jnp.float32).astype(hf_ref.dtype)


def dwt_forward_upsampled(f):
    """DWT(nearest-x2-upsample(f)) with the upsample folded into the analysis
    matrices.  f: (N, F, H0, W0).  Returns LL (N,F,Hp,Wp), HF (N,3F,Hp,Wp)."""
    N, F, H0, W0 = f.shape
    A_lo_w, A_hi_w = _analysis_mats(2 * W0)
    A_lo_h, A_hi_h = _analysis_mats(2 * H0)
    fold = lambda A: A[:, 0::2] + A[:, 1::2]    # fold x2 nearest upsample
    awt_lo = fold(A_lo_w).T.astype(jnp.bfloat16)              # (W0, Wp)
    awt_hi = fold(A_hi_w).T.astype(jnp.bfloat16)
    ah_lo = fold(A_lo_h).astype(jnp.bfloat16)                 # (Hp, H0)
    ah_hi = fold(A_hi_h).astype(jnp.bfloat16)
    Wp = awt_lo.shape[1]
    Hp = ah_lo.shape[0]

    x2 = f.reshape(N, F * H0, W0).astype(jnp.bfloat16)
    ll, hf = pl.pallas_call(
        _dwt_kernel,
        out_shape=(jax.ShapeDtypeStruct((N, F, Hp, Wp), jnp.bfloat16),
                   jax.ShapeDtypeStruct((N, 3 * F, Hp, Wp), jnp.bfloat16)),
        grid_spec=pltpu.PrefetchScalarGridSpec(
            num_scalar_prefetch=0,
            grid=(N,),
            in_specs=[
                pl.BlockSpec((1, F * H0, W0), lambda n: (n, 0, 0)),
                pl.BlockSpec((W0, Wp), lambda n: (0, 0)),
                pl.BlockSpec((W0, Wp), lambda n: (0, 0)),
                pl.BlockSpec((Hp, H0), lambda n: (0, 0)),
                pl.BlockSpec((Hp, H0), lambda n: (0, 0)),
            ],
            out_specs=[pl.BlockSpec((1, F, Hp, Wp), lambda n: (n, 0, 0, 0)),
                       pl.BlockSpec((1, 3 * F, Hp, Wp), lambda n: (n, 0, 0, 0))],
        ),
        compiler_params=pltpu.CompilerParams(dimension_semantics=("parallel",)),
    )(x2, awt_lo, awt_hi, ah_lo, ah_hi)
    return ll, hf


# ----------------------------------------------------------------------------
# Single-level 2D db4 IDWT — one kernel per batch (col synth + row synth in VMEM)
# ----------------------------------------------------------------------------
def _idwt_kernel(low_ref, high_ref, sh_lo_ref, sh_hi_ref,
                 swt_lo_ref, swt_hi_ref, o_ref):
    OC = low_ref.shape[1]
    sh_lo = sh_lo_ref[...]
    sh_hi = sh_hi_ref[...]
    swt_lo = swt_lo_ref[...]
    swt_hi = swt_hi_ref[...]
    for c in range(OC):
        ll = low_ref[0, c]                   # (Hp, Wp)
        lh = high_ref[0, c]
        hl = high_ref[0, OC + c]
        hh = high_ref[0, 2 * OC + c]
        lo = (jnp.dot(sh_lo, ll, preferred_element_type=jnp.float32)
              + jnp.dot(sh_hi, lh, preferred_element_type=jnp.float32)
              ).astype(jnp.bfloat16)          # (Hout, Wp)
        hi = (jnp.dot(sh_lo, hl, preferred_element_type=jnp.float32)
              + jnp.dot(sh_hi, hh, preferred_element_type=jnp.float32)
              ).astype(jnp.bfloat16)
        o_ref[0, c] = (jnp.dot(lo, swt_lo, preferred_element_type=jnp.float32)
                       + jnp.dot(hi, swt_hi, preferred_element_type=jnp.float32)
                       ).astype(o_ref.dtype)


def dwt_inverse(low, high):
    """low: (N, OC, Hp, Wp); high: (N, 3*OC, Hp, Wp) with band order (LH, HL, HH)."""
    N, OC, Hp, Wp = low.shape
    S_lo_h, S_hi_h = _synthesis_mats(Hp)      # (Hout, Hp)
    S_lo_w, S_hi_w = _synthesis_mats(Wp)      # (Wout, Wp)
    Hout = S_lo_h.shape[0]
    Wout = S_lo_w.shape[0]
    sh_lo = S_lo_h.astype(jnp.bfloat16)
    sh_hi = S_hi_h.astype(jnp.bfloat16)
    swt_lo = S_lo_w.T.astype(jnp.bfloat16)    # (Wp, Wout)
    swt_hi = S_hi_w.T.astype(jnp.bfloat16)

    return pl.pallas_call(
        _idwt_kernel,
        out_shape=jax.ShapeDtypeStruct((N, OC, Hout, Wout), jnp.float32),
        grid_spec=pltpu.PrefetchScalarGridSpec(
            num_scalar_prefetch=0,
            grid=(N,),
            in_specs=[
                pl.BlockSpec((1, OC, Hp, Wp), lambda n: (n, 0, 0, 0)),
                pl.BlockSpec((1, 3 * OC, Hp, Wp), lambda n: (n, 0, 0, 0)),
                pl.BlockSpec((Hout, Hp), lambda n: (0, 0)),
                pl.BlockSpec((Hout, Hp), lambda n: (0, 0)),
                pl.BlockSpec((Wp, Wout), lambda n: (0, 0)),
                pl.BlockSpec((Wp, Wout), lambda n: (0, 0)),
            ],
            out_specs=pl.BlockSpec((1, OC, Hout, Wout), lambda n: (n, 0, 0, 0)),
        ),
        compiler_params=pltpu.CompilerParams(dimension_semantics=("parallel",)),
    )(low.astype(jnp.bfloat16), high.astype(jnp.bfloat16),
      sh_lo, sh_hi, swt_lo, swt_hi)


# ----------------------------------------------------------------------------
# DWTUpsampler forward
# ----------------------------------------------------------------------------
def dwt_upsampler_forward(x, params):
    # inp_process: two deformable (-> regular 3x3) convs
    f = conv3x3(x, *params["inp1"])
    f = conv3x3(f, *params["inp2"])

    # F.interpolate(scale_factor=2, mode='nearest') is folded into the DWT
    # analysis matrices inside dwt_forward_upsampled.
    ll, hf = dwt_forward_upsampled(f)        # LL (N,F,H',W'); HF (N,3F,H',W')

    low = conv3x3(ll, *params["low1"])
    low = conv3x3(low, *params["low2"])      # (N, out_c, H', W')

    high = conv3x3(hf, *params["high1"])
    high = conv3x3(high, *params["high2"])   # (N, 3*out_c, H', W')

    return dwt_inverse(low, high)            # (N, out_c, 2H, 2W) float32


def _init_conv(key, cin, cout, scale=0.1):
    kw, kb = jax.random.split(key)
    w = jax.random.normal(kw, (3, 3, cin, cout), jnp.float32) * scale
    b = jax.random.normal(kb, (cout,), jnp.float32) * scale
    return w, b


if __name__ == "__main__":
    key = jax.random.PRNGKey(0)
    in_c, out_c, nr_feat = 4, 4, 8
    keys = jax.random.split(key, 7)
    params = {
        "inp1": _init_conv(keys[0], in_c, nr_feat),
        "inp2": _init_conv(keys[1], nr_feat, nr_feat),
        "low1": _init_conv(keys[2], nr_feat, nr_feat),
        "low2": _init_conv(keys[3], nr_feat, out_c),
        "high1": _init_conv(keys[4], 3 * nr_feat, nr_feat),
        "high2": _init_conv(keys[5], nr_feat, 3 * out_c),
    }
    x = jax.random.normal(keys[6], (2, in_c, 16, 16), jnp.float32)

    fwd = jax.jit(dwt_upsampler_forward)
    out = jax.block_until_ready(fwd(x, params))
    assert out.shape == (2, out_c, 32, 32), out.shape
    assert bool(jnp.all(jnp.isfinite(out)))
    print("KERNEL_OK")
</pallas_src>

<mosaic_0001>
module attributes {stable_mosaic.version = 11 : i64} {
  func.func @_conv3x3_kernel(%arg0: i32, %arg1: memref<1x4x290xbf16, #tpu.memory_space<vmem>>, %arg2: memref<9x8x4xbf16, #tpu.memory_space<vmem>>, %arg3: memref<8x1xf32, #tpu.memory_space<vmem>>, %arg4: memref<1x256xbf16, #tpu.memory_space<vmem>>, %arg5: memref<1x256xbf16, #tpu.memory_space<vmem>>, %arg6: memref<1x8x256xbf16, #tpu.memory_space<vmem>>) attributes {dimension_semantics = [#tpu.dimension_semantics<parallel>], iteration_bounds = array<i64: 2>, scalar_prefetch = 0 : i64, scratch_operands = 0 : i64, tpu.core_type = #tpu.core_type<tc>, window_params = [{transform_indices = @transform_0, window_bounds = array<i64: 1, 4, 290>}, {pipeline_mode = #tpu.pipeline_mode<synchronous>, transform_indices = @transform_1, window_bounds = array<i64: 9, 8, 4>}, {pipeline_mode = #tpu.pipeline_mode<synchronous>, transform_indices = @transform_2, window_bounds = array<i64: 8, 1>}, {pipeline_mode = #tpu.pipeline_mode<synchronous>, transform_indices = @transform_3, window_bounds = array<i64: 1, 256>}, {pipeline_mode = #tpu.pipeline_mode<synchronous>, transform_indices = @transform_4, window_bounds = array<i64: 1, 256>}, {transform_indices = @transform_5, window_bounds = array<i64: 1, 8, 256>}]} {
    %c0 = arith.constant 0 : index
    %c0_0 = arith.constant 0 : index
    %0 = vector.load %arg4[%c0, %c0_0] : memref<1x256xbf16, #tpu.memory_space<vmem>>, vector<1x256xbf16>
    %c0_1 = arith.constant 0 : index
    %c0_2 = arith.constant 0 : index
    %1 = vector.load %arg5[%c0_1, %c0_2] : memref<1x256xbf16, #tpu.memory_space<vmem>>, vector<1x256xbf16>
    %cst = arith.constant 0.000000e+00 : f32
    %2 = vector.broadcast %cst : f32 to vector<8x256xf32>
    %c0_3 = arith.constant 0 : index
    %c0_4 = arith.constant 0 : index
    %c0_5 = arith.constant 0 : index
    %3 = vector.load %arg1[%c0_3, %c0_4, %c0_5] : memref<1x4x290xbf16, #tpu.memory_space<vmem>>, vector<1x4x256xbf16>
    %4 = vector.shape_cast %3 : vector<1x4x256xbf16> to vector<4x256xbf16>
    %5 = vector.broadcast %0 : vector<1x256xbf16> to vector<4x256xbf16>
    %6 = arith.mulf %4, %5 : vector<4x256xbf16>
    %c0_6 = arith.constant 0 : index
    %c0_7 = arith.constant 0 : index
    %c0_8 = arith.constant 0 : index
    %7 = vector.load %arg2[%c0_6, %c0_7, %c0_8] : memref<9x8x4xbf16, #tpu.memory_space<vmem>>, vector<1x8x4xbf16>
    %8 = vector.shape_cast %7 : vector<1x8x4xbf16> to vector<8x4xbf16>
    %cst_9 = arith.constant dense<0.000000e+00> : vector<8x256xf32>
    %9 = tpu.matmul %8, %6, %cst_9 {dimension_numbers = #tpu.dot_dimension_numbers<[1], [0], [0], [1], [0, 0, 1, 1], [], []>} : vector<8x4xbf16>, vector<4x256xbf16>, vector<8x256xf32> -> vector<8x256xf32>
    %10 = arith.addf %2, %9 : vector<8x256xf32>
    %c0_10 = arith.constant 0 : index
    %c0_11 = arith.constant 0 : index
    %c1 = arith.constant 1 : index
    %11 = vector.load %arg1[%c0_10, %c0_11, %c1] : memref<1x4x290xbf16, #tpu.memory_space<vmem>>, vector<1x4x256xbf16>
    %12 = vector.shape_cast %11 : vector<1x4x256xbf16> to vector<4x256xbf16>
    %c1_12 = arith.constant 1 : index
    %c0_13 = arith.constant 0 : index
    %c0_14 = arith.constant 0 : index
    %13 = vector.load %arg2[%c1_12, %c0_13, %c0_14] : memref<9x8x4xbf16, #tpu.memory_space<vmem>>, vector<1x8x4xbf16>
    %14 = vector.shape_cast %13 : vector<1x8x4xbf16> to vector<8x4xbf16>
    %cst_15 = arith.constant dense<0.000000e+00> : vector<8x256xf32>
    %15 = tpu.matmul %14, %12, %cst_15 {dimension_numbers = #tpu.dot_dimension_numbers<[1], [0], [0], [1], [0, 0, 1, 1], [], []>} : vector<8x4xbf16>, vector<4x256xbf16>, vector<8x256xf32> -> vector<8x256xf32>
    %16 = arith.addf %10, %15 : vector<8x256xf32>
    %c0_16 = arith.constant 0 : index
    %c0_17 = arith.constant 0 : index
    %c2 = arith.constant 2 : index
    %17 = vector.load %arg1[%c0_16, %c0_17, %c2] : memref<1x4x290xbf16, #tpu.memory_space<vmem>>, vector<1x4x256xbf16>
    %18 = vector.shape_cast %17 : vector<1x4x256xbf16> to vector<4x256xbf16>
    %19 = vector.broadcast %1 : vector<1x256xbf16> to vector<4x256xbf16>
    %20 = arith.mulf %18, %19 : vector<4x256xbf16>
    %c2_18 = arith.constant 2 : index
    %c0_19 = arith.constant 0 : index
    %c0_20 = arith.constant 0 : index
    %21 = vector.load %arg2[%c2_18, %c0_19, %c0_20] : memref<9x8x4xbf16, #tpu.memory_space<vmem>>, vector<1x8x4xbf16>
    %22 = vector.shape_cast %21 : vector<1x8x4xbf16> to vector<8x4xbf16>
    %cst_21 = arith.constant dense<0.000000e+00> : vector<8x256xf32>
    %23 = tpu.matmul %22, %20, %cst_21 {dimension_numbers = #tpu.dot_dimension_numbers<[1], [0], [0], [1], [0, 0, 1, 1], [], []>} : vector<8x4xbf16>, vector<4x256xbf16>, vector<8x256xf32> -> vector<8x256xf32>
    %24 = arith.addf %16, %23 : vector<8x256xf32>
    %c0_22 = arith.constant 0 : index
    %c0_23 = arith.constant 0 : index
    %c16 = arith.constant 16 : index
    %25 = vector.load %arg1[%c0_22, %c0_23, %c16] : memref<1x4x290xbf16, #tpu.memory_space<vmem>>, vector<1x4x256xbf16>
    %26 = vector.shape_cast %25 : vector<1x4x256xbf16> to vector<4x256xbf16>
    %27 = vector.broadcast %0 : vector<1x256xbf16> to vector<4x256xbf16>
    %28 = arith.mulf %26, %27 : vector<4x256xbf16>
    %c3 = arith.constant 3 : index
    %c0_24 = arith.constant 0 : index
    %c0_25 = arith.constant 0 : index
    %29 = vector.load %arg2[%c3, %c0_24, %c0_25] : memref<9x8x4xbf16, #tpu.memory_space<vmem>>, vector<1x8x4xbf16>
    %30 = vector.shape_cast %29 : vector<1x8x4xbf16> to vector<8x4xbf16>
    %cst_26 = arith.constant dense<0.000000e+00> : vector<8x256xf32>
    %31 = tpu.matmul %30, %28, %cst_26 {dimension_numbers = #tpu.dot_dimension_numbers<[1], [0], [0], [1], [0, 0, 1, 1], [], []>} : vector<8x4xbf16>, vector<4x256xbf16>, vector<8x256xf32> -> vector<8x256xf32>
    %32 = arith.addf %24, %31 : vector<8x256xf32>
    %c0_27 = arith.constant 0 : index
    %c0_28 = arith.constant 0 : index
    %c17 = arith.constant 17 : index
    %33 = vector.load %arg1[%c0_27, %c0_28, %c17] : memref<1x4x290xbf16, #tpu.memory_space<vmem>>, vector<1x4x256xbf16>
    %34 = vector.shape_cast %33 : vector<1x4x256xbf16> to vector<4x256xbf16>
    %c4 = arith.constant 4 : index
    %c0_29 = arith.constant 0 : index
    %c0_30 = arith.constant 0 : index
    %35 = vector.load %arg2[%c4, %c0_29, %c0_30] : memref<9x8x4xbf16, #tpu.memory_space<vmem>>, vector<1x8x4xbf16>
    %36 = vector.shape_cast %35 : vector<1x8x4xbf16> to vector<8x4xbf16>
    %cst_31 = arith.constant dense<0.000000e+00> : vector<8x256xf32>
    %37 = tpu.matmul %36, %34, %cst_31 {dimension_numbers = #tpu.dot_dimension_numbers<[1], [0], [0], [1], [0, 0, 1, 1], [], []>} : vector<8x4xbf16>, vector<4x256xbf16>, vector<8x256xf32> -> vector<8x256xf32>
    %38 = arith.addf %32, %37 : vector<8x256xf32>
    %c0_32 = arith.constant 0 : index
    %c0_33 = arith.constant 0 : index
    %c18 = arith.constant 18 : index
    %39 = vector.load %arg1[%c0_32, %c0_33, %c18] : memref<1x4x290xbf16, #tpu.memory_space<vmem>>, vector<1x4x256xbf16>
    %40 = vector.shape_cast %39 : vector<1x4x256xbf16> to vector<4x256xbf16>
    %41 = vector.broadcast %1 : vector<1x256xbf16> to vector<4x256xbf16>
    %42 = arith.mulf %40, %41 : vector<4x256xbf16>
    %c5 = arith.constant 5 : index
    %c0_34 = arith.constant 0 : index
    %c0_35 = arith.constant 0 : index
    %43 = vector.load %arg2[%c5, %c0_34, %c0_35] : memref<9x8x4xbf16, #tpu.memory_space<vmem>>, vector<1x8x4xbf16>
    %44 = vector.shape_cast %43 : vector<1x8x4xbf16> to vector<8x4xbf16>
    %cst_36 = arith.constant dense<0.000000e+00> : vector<8x256xf32>
    %45 = tpu.matmul %44, %42, %cst_36 {dimension_numbers = #tpu.dot_dimension_numbers<[1], [0], [0], [1], [0, 0, 1, 1], [], []>} : vector<8x4xbf16>, vector<4x256xbf16>, vector<8x256xf32> -> vector<8x256xf32>
    %46 = arith.addf %38, %45 : vector<8x256xf32>
    %c0_37 = arith.constant 0 : index
    %c0_38 = arith.constant 0 : index
    %c32 = arith.constant 32 : index
    %47 = vector.load %arg1[%c0_37, %c0_38, %c32] : memref<1x4x290xbf16, #tpu.memory_space<vmem>>, vector<1x4x256xbf16>
    %48 = vector.shape_cast %47 : vector<1x4x256xbf16> to vector<4x256xbf16>
    %49 = vector.broadcast %0 : vector<1x256xbf16> to vector<4x256xbf16>
    %50 = arith.mulf %48, %49 : vector<4x256xbf16>
    %c6 = arith.constant 6 : index
    %c0_39 = arith.constant 0 : index
    %c0_40 = arith.constant 0 : index
    %51 = vector.load %arg2[%c6, %c0_39, %c0_40] : memref<9x8x4xbf16, #tpu.memory_space<vmem>>, vector<1x8x4xbf16>
    %52 = vector.shape_cast %51 : vector<1x8x4xbf16> to vector<8x4xbf16>
    %cst_41 = arith.constant dense<0.000000e+00> : vector<8x256xf32>
    %53 = tpu.matmul %52, %50, %cst_41 {dimension_numbers = #tpu.dot_dimension_numbers<[1], [0], [0], [1], [0, 0, 1, 1], [], []>} : vector<8x4xbf16>, vector<4x256xbf16>, vector<8x256xf32> -> vector<8x256xf32>
    %54 = arith.addf %46, %53 : vector<8x256xf32>
    %c0_42 = arith.constant 0 : index
    %c0_43 = arith.constant 0 : index
    %c33 = arith.constant 33 : index
    %55 = vector.load %arg1[%c0_42, %c0_43, %c33] : memref<1x4x290xbf16, #tpu.memory_space<vmem>>, vector<1x4x256xbf16>
    %56 = vector.shape_cast %55 : vector<1x4x256xbf16> to vector<4x256xbf16>
    %c7 = arith.constant 7 : index
    %c0_44 = arith.constant 0 : index
    %c0_45 = arith.constant 0 : index
    %57 = vector.load %arg2[%c7, %c0_44, %c0_45] : memref<9x8x4xbf16, #tpu.memory_space<vmem>>, vector<1x8x4xbf16>
    %58 = vector.shape_cast %57 : vector<1x8x4xbf16> to vector<8x4xbf16>
    %cst_46 = arith.constant dense<0.000000e+00> : vector<8x256xf32>
    %59 = tpu.matmul %58, %56, %cst_46 {dimension_numbers = #tpu.dot_dimension_numbers<[1], [0], [0], [1], [0, 0, 1, 1], [], []>} : vector<8x4xbf16>, vector<4x256xbf16>, vector<8x256xf32> -> vector<8x256xf32>
    %60 = arith.addf %54, %59 : vector<8x256xf32>
    %c0_47 = arith.constant 0 : index
    %c0_48 = arith.constant 0 : index
    %c34 = arith.constant 34 : index
    %61 = vector.load %arg1[%c0_47, %c0_48, %c34] : memref<1x4x290xbf16, #tpu.memory_space<vmem>>, vector<1x4x256xbf16>
    %62 = vector.shape_cast %61 : vector<1x4x256xbf16> to vector<4x256xbf16>
    %63 = vector.broadcast %1 : vector<1x256xbf16> to vector<4x256xbf16>
    %64 = arith.mulf %62, %63 : vector<4x256xbf16>
    %c8 = arith.constant 8 : index
    %c0_49 = arith.constant 0 : index
    %c0_50 = arith.constant 0 : index
    %65 = vector.load %arg2[%c8, %c0_49, %c0_50] : memref<9x8x4xbf16, #tpu.memory_space<vmem>>, vector<1x8x4xbf16>
    %66 = vector.shape_cast %65 : vector<1x8x4xbf16> to vector<8x4xbf16>
    %cst_51 = arith.constant dense<0.000000e+00> : vector<8x256xf32>
    %67 = tpu.matmul %66, %64, %cst_51 {dimension_numbers = #tpu.dot_dimension_numbers<[1], [0], [0], [1], [0, 0, 1, 1], [], []>} : vector<8x4xbf16>, vector<4x256xbf16>, vector<8x256xf32> -> vector<8x256xf32>
    %68 = arith.addf %60, %67 : vector<8x256xf32>
    %c0_52 = arith.constant 0 : index
    %c0_53 = arith.constant 0 : index
    %69 = vector.load %arg3[%c0_52, %c0_53] : memref<8x1xf32, #tpu.memory_space<vmem>>, vector<8x1xf32>
    %70 = vector.broadcast %69 : vector<8x1xf32> to vector<8x256xf32>
    %71 = arith.addf %68, %70 : vector<8x256xf32>
    %72 = arith.truncf %71 : vector<8x256xf32> to vector<8x256xbf16>
    %c0_54 = arith.constant 0 : index
    %c0_55 = arith.constant 0 : index
    %c0_56 = arith.constant 0 : index
    %73 = vector.load %arg6[%c0_54, %c0_55, %c0_56] : memref<1x8x256xbf16, #tpu.memory_space<vmem>>, vector<1x8x256xbf16>
    %74 = vector.shape_cast %73 : vector<1x8x256xbf16> to vector<8x256xbf16>
    %75 = vector.shape_cast %72 : vector<8x256xbf16> to vector<1x8x256xbf16>
    tpu.vector_store %arg6[%c0_54, %c0_55, %c0_56], %75 {strides = array<i32>} : memref<1x8x256xbf16, #tpu.memory_space<vmem>>, vector<1x8x256xbf16>,
    return
  }
  func.func @transform_0(%arg0: i32) -> (i32, i32, i32) {
    %c0_i32 = arith.constant 0 : i32
    %c0_i32_0 = arith.constant 0 : i32
    %c0_i32_1 = arith.constant 0 : i32
    return %arg0, %c0_i32, %c0_i32_0 : i32, i32, i32
  }
  func.func @transform_1(%arg0: i32) -> (i32, i32, i32) {
    %c0_i32 = arith.constant 0 : i32
    %c0_i32_0 = arith.constant 0 : i32
    %c0_i32_1 = arith.constant 0 : i32
    %c0_i32_2 = arith.constant 0 : i32
    return %c0_i32, %c0_i32_0, %c0_i32_1 : i32, i32, i32
  }
  func.func @transform_2(%arg0: i32) -> (i32, i32) {
    %c0_i32 = arith.constant 0 : i32
    %c0_i32_0 = arith.constant 0 : i32
    %c0_i32_1 = arith.constant 0 : i32
    return %c0_i32, %c0_i32_0 : i32, i32
  }
  func.func @transform_3(%arg0: i32) -> (i32, i32) {
    %c0_i32 = arith.constant 0 : i32
    %c0_i32_0 = arith.constant 0 : i32
    %c0_i32_1 = arith.constant 0 : i32
    return %c0_i32, %c0_i32_0 : i32, i32
  }
  func.func @transform_4(%arg0: i32) -> (i32, i32) {
    %c0_i32 = arith.constant 0 : i32
    %c0_i32_0 = arith.constant 0 : i32
    %c0_i32_1 = arith.constant 0 : i32
    return %c0_i32, %c0_i32_0 : i32, i32
  }
  func.func @transform_5(%arg0: i32) -> (i32, i32, i32) {
    %c0_i32 = arith.constant 0 : i32
    %c0_i32_0 = arith.constant 0 : i32
    %c0_i32_1 = arith.constant 0 : i32
    return %arg0, %c0_i32, %c0_i32_0 : i32, i32, i32
  }
}

module attributes {stable_mosaic.version = 11 : i64} {
  func.func @_conv3x3_kernel(%arg0: i32, %arg1: memref<1x8x290xbf16, #tpu.memory_space<vmem>>, %arg2: memref<9x8x8xbf16, #tpu.memory_space<vmem>>, %arg3: memref<8x1xf32, #tpu.memory_space<vmem>>, %arg4: memref<1x256xbf16, #tpu.memory_space<vmem>>, %arg5: memref<1x256xbf16, #tpu.memory_space<vmem>>, %arg6: memref<1x8x256xbf16, #tpu.memory_space<vmem>>) attributes {dimension_semantics = [#tpu.dimension_semantics<parallel>], iteration_bounds = array<i64: 2>, scalar_prefetch = 0 : i64, scratch_operands = 0 : i64, tpu.core_type = #tpu.core_type<tc>, window_params = [{transform_indices = @transform_0, window_bounds = array<i64: 1, 8, 290>}, {pipeline_mode = #tpu.pipeline_mode<synchronous>, transform_indices = @transform_1, window_bounds = array<i64: 9, 8, 8>}, {pipeline_mode = #tpu.pipeline_mode<synchronous>, transform_indices = @transform_2, window_bounds = array<i64: 8, 1>}, {pipeline_mode = #tpu.pipeline_mode<synchronous>, transform_indices = @transform_3, window_bounds = array<i64: 1, 256>}, {pipeline_mode = #tpu.pipeline_mode<synchronous>, transform_indices = @transform_4, window_bounds = array<i64: 1, 256>}, {transform_indices = @transform_5, window_bounds = array<i64: 1, 8, 256>}]} {
    %c0 = arith.constant 0 : index
    %c0_0 = arith.constant 0 : index
    %0 = vector.load %arg4[%c0, %c0_0] : memref<1x256xbf16, #tpu.memory_space<vmem>>, vector<1x256xbf16>
    %c0_1 = arith.constant 0 : index
    %c0_2 = arith.constant 0 : index
    %1 = vector.load %arg5[%c0_1, %c0_2] : memref<1x256xbf16, #tpu.memory_space<vmem>>, vector<1x256xbf16>
    %cst = arith.constant 0.000000e+00 : f32
    %2 = vector.broadcast %cst : f32 to vector<8x256xf32>
    %c0_3 = arith.constant 0 : index
    %c0_4 = arith.constant 0 : index
    %c0_5 = arith.constant 0 : index
    %3 = vector.load %arg1[%c0_3, %c0_4, %c0_5] : memref<1x8x290xbf16, #tpu.memory_space<vmem>>, vector<1x8x256xbf16>
    %4 = vector.shape_cast %3 : vector<1x8x256xbf16> to vector<8x256xbf16>
    %5 = vector.broadcast %0 : vector<1x256xbf16> to vector<8x256xbf16>
    %6 = arith.mulf %4, %5 : vector<8x256xbf16>
    %c0_6 = arith.constant 0 : index
    %c0_7 = arith.constant 0 : index
    %c0_8 = arith.constant 0 : index
    %7 = vector.load %arg2[%c0_6, %c0_7, %c0_8] : memref<9x8x8xbf16, #tpu.memory_space<vmem>>, vector<1x8x8xbf16>
    %8 = vector.shape_cast %7 : vector<1x8x8xbf16> to vector<8x8xbf16>
    %cst_9 = arith.constant dense<0.000000e+00> : vector<8x256xf32>
    %9 = tpu.matmul %8, %6, %cst_9 {dimension_numbers = #tpu.dot_dimension_numbers<[1], [0], [0], [1], [0, 0, 1, 1], [], []>} : vector<8x8xbf16>, vector<8x256xbf16>, vector<8x256xf32> -> vector<8x256xf32>
    %10 = arith.addf %2, %9 : vector<8x256xf32>
    %c0_10 = arith.constant 0 : index
    %c0_11 = arith.constant 0 : index
    %c1 = arith.constant 1 : index
    %11 = vector.load %arg1[%c0_10, %c0_11, %c1] : memref<1x8x290xbf16, #tpu.memory_space<vmem>>, vector<1x8x256xbf16>
    %12 = vector.shape_cast %11 : vector<1x8x256xbf16> to vector<8x256xbf16>
    %c1_12 = arith.constant 1 : index
    %c0_13 = arith.constant 0 : index
    %c0_14 = arith.constant 0 : index
    %13 = vector.load %arg2[%c1_12, %c0_13, %c0_14] : memref<9x8x8xbf16, #tpu.memory_space<vmem>>, vector<1x8x8xbf16>
    %14 = vector.shape_cast %13 : vector<1x8x8xbf16> to vector<8x8xbf16>
    %cst_15 = arith.constant dense<0.000000e+00> : vector<8x256xf32>
    %15 = tpu.matmul %14, %12, %cst_15 {dimension_numbers = #tpu.dot_dimension_numbers<[1], [0], [0], [1], [0, 0, 1, 1], [], []>} : vector<8x8xbf16>, vector<8x256xbf16>, vector<8x256xf32> -> vector<8x256xf32>
    %16 = arith.addf %10, %15 : vector<8x256xf32>
    %c0_16 = arith.constant 0 : index
    %c0_17 = arith.constant 0 : index
    %c2 = arith.constant 2 : index
    %17 = vector.load %arg1[%c0_16, %c0_17, %c2] : memref<1x8x290xbf16, #tpu.memory_space<vmem>>, vector<1x8x256xbf16>
    %18 = vector.shape_cast %17 : vector<1x8x256xbf16> to vector<8x256xbf16>
    %19 = vector.broadcast %1 : vector<1x256xbf16> to vector<8x256xbf16>
    %20 = arith.mulf %18, %19 : vector<8x256xbf16>
    %c2_18 = arith.constant 2 : index
    %c0_19 = arith.constant 0 : index
    %c0_20 = arith.constant 0 : index
    %21 = vector.load %arg2[%c2_18, %c0_19, %c0_20] : memref<9x8x8xbf16, #tpu.memory_space<vmem>>, vector<1x8x8xbf16>
    %22 = vector.shape_cast %21 : vector<1x8x8xbf16> to vector<8x8xbf16>
    %cst_21 = arith.constant dense<0.000000e+00> : vector<8x256xf32>
    %23 = tpu.matmul %22, %20, %cst_21 {dimension_numbers = #tpu.dot_dimension_numbers<[1], [0], [0], [1], [0, 0, 1, 1], [], []>} : vector<8x8xbf16>, vector<8x256xbf16>, vector<8x256xf32> -> vector<8x256xf32>
    %24 = arith.addf %16, %23 : vector<8x256xf32>
    %c0_22 = arith.constant 0 : index
    %c0_23 = arith.constant 0 : index
    %c16 = arith.constant 16 : index
    %25 = vector.load %arg1[%c0_22, %c0_23, %c16] : memref<1x8x290xbf16, #tpu.memory_space<vmem>>, vector<1x8x256xbf16>
    %26 = vector.shape_cast %25 : vector<1x8x256xbf16> to vector<8x256xbf16>
    %27 = vector.broadcast %0 : vector<1x256xbf16> to vector<8x256xbf16>
    %28 = arith.mulf %26, %27 : vector<8x256xbf16>
    %c3 = arith.constant 3 : index
    %c0_24 = arith.constant 0 : index
    %c0_25 = arith.constant 0 : index
    %29 = vector.load %arg2[%c3, %c0_24, %c0_25] : memref<9x8x8xbf16, #tpu.memory_space<vmem>>, vector<1x8x8xbf16>
    %30 = vector.shape_cast %29 : vector<1x8x8xbf16> to vector<8x8xbf16>
    %cst_26 = arith.constant dense<0.000000e+00> : vector<8x256xf32>
    %31 = tpu.matmul %30, %28, %cst_26 {dimension_numbers = #tpu.dot_dimension_numbers<[1], [0], [0], [1], [0, 0, 1, 1], [], []>} : vector<8x8xbf16>, vector<8x256xbf16>, vector<8x256xf32> -> vector<8x256xf32>
    %32 = arith.addf %24, %31 : vector<8x256xf32>
    %c0_27 = arith.constant 0 : index
    %c0_28 = arith.constant 0 : index
    %c17 = arith.constant 17 : index
    %33 = vector.load %arg1[%c0_27, %c0_28, %c17] : memref<1x8x290xbf16, #tpu.memory_space<vmem>>, vector<1x8x256xbf16>
    %34 = vector.shape_cast %33 : vector<1x8x256xbf16> to vector<8x256xbf16>
    %c4 = arith.constant 4 : index
    %c0_29 = arith.constant 0 : index
    %c0_30 = arith.constant 0 : index
    %35 = vector.load %arg2[%c4, %c0_29, %c0_30] : memref<9x8x8xbf16, #tpu.memory_space<vmem>>, vector<1x8x8xbf16>
    %36 = vector.shape_cast %35 : vector<1x8x8xbf16> to vector<8x8xbf16>
    %cst_31 = arith.constant dense<0.000000e+00> : vector<8x256xf32>
    %37 = tpu.matmul %36, %34, %cst_31 {dimension_numbers = #tpu.dot_dimension_numbers<[1], [0], [0], [1], [0, 0, 1, 1], [], []>} : vector<8x8xbf16>, vector<8x256xbf16>, vector<8x256xf32> -> vector<8x256xf32>
    %38 = arith.addf %32, %37 : vector<8x256xf32>
    %c0_32 = arith.constant 0 : index
    %c0_33 = arith.constant 0 : index
    %c18 = arith.constant 18 : index
    %39 = vector.load %arg1[%c0_32, %c0_33, %c18] : memref<1x8x290xbf16, #tpu.memory_space<vmem>>, vector<1x8x256xbf16>
    %40 = vector.shape_cast %39 : vector<1x8x256xbf16> to vector<8x256xbf16>
    %41 = vector.broadcast %1 : vector<1x256xbf16> to vector<8x256xbf16>
    %42 = arith.mulf %40, %41 : vector<8x256xbf16>
    %c5 = arith.constant 5 : index
    %c0_34 = arith.constant 0 : index
    %c0_35 = arith.constant 0 : index
    %43 = vector.load %arg2[%c5, %c0_34, %c0_35] : memref<9x8x8xbf16, #tpu.memory_space<vmem>>, vector<1x8x8xbf16>
    %44 = vector.shape_cast %43 : vector<1x8x8xbf16> to vector<8x8xbf16>
    %cst_36 = arith.constant dense<0.000000e+00> : vector<8x256xf32>
    %45 = tpu.matmul %44, %42, %cst_36 {dimension_numbers = #tpu.dot_dimension_numbers<[1], [0], [0], [1], [0, 0, 1, 1], [], []>} : vector<8x8xbf16>, vector<8x256xbf16>, vector<8x256xf32> -> vector<8x256xf32>
    %46 = arith.addf %38, %45 : vector<8x256xf32>
    %c0_37 = arith.constant 0 : index
    %c0_38 = arith.constant 0 : index
    %c32 = arith.constant 32 : index
    %47 = vector.load %arg1[%c0_37, %c0_38, %c32] : memref<1x8x290xbf16, #tpu.memory_space<vmem>>, vector<1x8x256xbf16>
    %48 = vector.shape_cast %47 : vector<1x8x256xbf16> to vector<8x256xbf16>
    %49 = vector.broadcast %0 : vector<1x256xbf16> to vector<8x256xbf16>
    %50 = arith.mulf %48, %49 : vector<8x256xbf16>
    %c6 = arith.constant 6 : index
    %c0_39 = arith.constant 0 : index
    %c0_40 = arith.constant 0 : index
    %51 = vector.load %arg2[%c6, %c0_39, %c0_40] : memref<9x8x8xbf16, #tpu.memory_space<vmem>>, vector<1x8x8xbf16>
    %52 = vector.shape_cast %51 : vector<1x8x8xbf16> to vector<8x8xbf16>
    %cst_41 = arith.constant dense<0.000000e+00> : vector<8x256xf32>
    %53 = tpu.matmul %52, %50, %cst_41 {dimension_numbers = #tpu.dot_dimension_numbers<[1], [0], [0], [1], [0, 0, 1, 1], [], []>} : vector<8x8xbf16>, vector<8x256xbf16>, vector<8x256xf32> -> vector<8x256xf32>
    %54 = arith.addf %46, %53 : vector<8x256xf32>
    %c0_42 = arith.constant 0 : index
    %c0_43 = arith.constant 0 : index
    %c33 = arith.constant 33 : index
    %55 = vector.load %arg1[%c0_42, %c0_43, %c33] : memref<1x8x290xbf16, #tpu.memory_space<vmem>>, vector<1x8x256xbf16>
    %56 = vector.shape_cast %55 : vector<1x8x256xbf16> to vector<8x256xbf16>
    %c7 = arith.constant 7 : index
    %c0_44 = arith.constant 0 : index
    %c0_45 = arith.constant 0 : index
    %57 = vector.load %arg2[%c7, %c0_44, %c0_45] : memref<9x8x8xbf16, #tpu.memory_space<vmem>>, vector<1x8x8xbf16>
    %58 = vector.shape_cast %57 : vector<1x8x8xbf16> to vector<8x8xbf16>
    %cst_46 = arith.constant dense<0.000000e+00> : vector<8x256xf32>
    %59 = tpu.matmul %58, %56, %cst_46 {dimension_numbers = #tpu.dot_dimension_numbers<[1], [0], [0], [1], [0, 0, 1, 1], [], []>} : vector<8x8xbf16>, vector<8x256xbf16>, vector<8x256xf32> -> vector<8x256xf32>
    %60 = arith.addf %54, %59 : vector<8x256xf32>
    %c0_47 = arith.constant 0 : index
    %c0_48 = arith.constant 0 : index
    %c34 = arith.constant 34 : index
    %61 = vector.load %arg1[%c0_47, %c0_48, %c34] : memref<1x8x290xbf16, #tpu.memory_space<vmem>>, vector<1x8x256xbf16>
    %62 = vector.shape_cast %61 : vector<1x8x256xbf16> to vector<8x256xbf16>
    %63 = vector.broadcast %1 : vector<1x256xbf16> to vector<8x256xbf16>
    %64 = arith.mulf %62, %63 : vector<8x256xbf16>
    %c8 = arith.constant 8 : index
    %c0_49 = arith.constant 0 : index
    %c0_50 = arith.constant 0 : index
    %65 = vector.load %arg2[%c8, %c0_49, %c0_50] : memref<9x8x8xbf16, #tpu.memory_space<vmem>>, vector<1x8x8xbf16>
    %66 = vector.shape_cast %65 : vector<1x8x8xbf16> to vector<8x8xbf16>
    %cst_51 = arith.constant dense<0.000000e+00> : vector<8x256xf32>
    %67 = tpu.matmul %66, %64, %cst_51 {dimension_numbers = #tpu.dot_dimension_numbers<[1], [0], [0], [1], [0, 0, 1, 1], [], []>} : vector<8x8xbf16>, vector<8x256xbf16>, vector<8x256xf32> -> vector<8x256xf32>
    %68 = arith.addf %60, %67 : vector<8x256xf32>
    %c0_52 = arith.constant 0 : index
    %c0_53 = arith.constant 0 : index
    %69 = vector.load %arg3[%c0_52, %c0_53] : memref<8x1xf32, #tpu.memory_space<vmem>>, vector<8x1xf32>
    %70 = vector.broadcast %69 : vector<8x1xf32> to vector<8x256xf32>
    %71 = arith.addf %68, %70 : vector<8x256xf32>
    %72 = arith.truncf %71 : vector<8x256xf32> to vector<8x256xbf16>
    %c0_54 = arith.constant 0 : index
    %c0_55 = arith.constant 0 : index
    %c0_56 = arith.constant 0 : index
    %73 = vector.load %arg6[%c0_54, %c0_55, %c0_56] : memref<1x8x256xbf16, #tpu.memory_space<vmem>>, vector<1x8x256xbf16>
    %74 = vector.shape_cast %73 : vector<1x8x256xbf16> to vector<8x256xbf16>
    %75 = vector.shape_cast %72 : vector<8x256xbf16> to vector<1x8x256xbf16>
    tpu.vector_store %arg6[%c0_54, %c0_55, %c0_56], %75 {strides = array<i32>} : memref<1x8x256xbf16, #tpu.memory_space<vmem>>, vector<1x8x256xbf16>,
    return
  }
  func.func @transform_0(%arg0: i32) -> (i32, i32, i32) {
    %c0_i32 = arith.constant 0 : i32
    %c0_i32_0 = arith.constant 0 : i32
    %c0_i32_1 = arith.constant 0 : i32
    return %arg0, %c0_i32, %c0_i32_0 : i32, i32, i32
  }
  func.func @transform_1(%arg0: i32) -> (i32, i32, i32) {
    %c0_i32 = arith.constant 0 : i32
    %c0_i32_0 = arith.constant 0 : i32
    %c0_i32_1 = arith.constant 0 : i32
    %c0_i32_2 = arith.constant 0 : i32
    return %c0_i32, %c0_i32_0, %c0_i32_1 : i32, i32, i32
  }
  func.func @transform_2(%arg0: i32) -> (i32, i32) {
    %c0_i32 = arith.constant 0 : i32
    %c0_i32_0 = arith.constant 0 : i32
    %c0_i32_1 = arith.constant 0 : i32
    return %c0_i32, %c0_i32_0 : i32, i32
  }
  func.func @transform_3(%arg0: i32) -> (i32, i32) {
    %c0_i32 = arith.constant 0 : i32
    %c0_i32_0 = arith.constant 0 : i32
    %c0_i32_1 = arith.constant 0 : i32
    return %c0_i32, %c0_i32_0 : i32, i32
  }
  func.func @transform_4(%arg0: i32) -> (i32, i32) {
    %c0_i32 = arith.constant 0 : i32
    %c0_i32_0 = arith.constant 0 : i32
    %c0_i32_1 = arith.constant 0 : i32
    return %c0_i32, %c0_i32_0 : i32, i32
  }
  func.func @transform_5(%arg0: i32) -> (i32, i32, i32) {
    %c0_i32 = arith.constant 0 : i32
    %c0_i32_0 = arith.constant 0 : i32
    %c0_i32_1 = arith.constant 0 : i32
    return %arg0, %c0_i32, %c0_i32_0 : i32, i32, i32
  }
}

module attributes {stable_mosaic.version = 11 : i64} {
  func.func @_dwt_kernel(%arg0: i32, %arg1: memref<1x128x16xbf16, #tpu.memory_space<vmem>>, %arg2: memref<16x19xbf16, #tpu.memory_space<vmem>>, %arg3: memref<16x19xbf16, #tpu.memory_space<vmem>>, %arg4: memref<19x16xbf16, #tpu.memory_space<vmem>>, %arg5: memref<19x16xbf16, #tpu.memory_space<vmem>>, %arg6: memref<1x8x19x19xbf16, #tpu.memory_space<vmem>>, %arg7: memref<1x24x19x19xbf16, #tpu.memory_space<vmem>>) attributes {dimension_semantics = [#tpu.dimension_semantics<parallel>], iteration_bounds = array<i64: 2>, scalar_prefetch = 0 : i64, scratch_operands = 0 : i64, tpu.core_type = #tpu.core_type<tc>, window_params = [{transform_indices = @transform_0, window_bounds = array<i64: 1, 128, 16>}, {pipeline_mode = #tpu.pipeline_mode<synchronous>, transform_indices = @transform_1, window_bounds = array<i64: 16, 19>}, {pipeline_mode = #tpu.pipeline_mode<synchronous>, transform_indices = @transform_2, window_bounds = array<i64: 16, 19>}, {pipeline_mode = #tpu.pipeline_mode<synchronous>, transform_indices = @transform_3, window_bounds = array<i64: 19, 16>}, {pipeline_mode = #tpu.pipeline_mode<synchronous>, transform_indices = @transform_4, window_bounds = array<i64: 19, 16>}, {transform_indices = @transform_5, window_bounds = array<i64: 1, 8, 19, 19>}, {transform_indices = @transform_6, window_bounds = array<i64: 1, 24, 19, 19>}]} {
    %c0 = arith.constant 0 : index
    %c0_0 = arith.constant 0 : index
    %c0_1 = arith.constant 0 : index
    %0 = vector.load %arg1[%c0, %c0_0, %c0_1] : memref<1x128x16xbf16, #tpu.memory_space<vmem>>, vector<1x128x16xbf16>
    %1 = vector.shape_cast %0 : vector<1x128x16xbf16> to vector<128x16xbf16>
    %c0_2 = arith.constant 0 : index
    %c0_3 = arith.constant 0 : index
    %2 = vector.load %arg2[%c0_2, %c0_3] : memref<16x19xbf16, #tpu.memory_space<vmem>>, vector<16x19xbf16>
    %cst = arith.constant dense<0.000000e+00> : vector<128x19xf32>
    %3 = tpu.matmul %1, %2, %cst {dimension_numbers = #tpu.dot_dimension_numbers<[1], [0], [0], [1], [0, 0, 1, 1], [], []>} : vector<128x16xbf16>, vector<16x19xbf16>, vector<128x19xf32> -> vector<128x19xf32>
    %4 = arith.truncf %3 : vector<128x19xf32> to vector<128x19xbf16>
    %c0_4 = arith.constant 0 : index
    %c0_5 = arith.constant 0 : index
    %5 = vector.load %arg3[%c0_4, %c0_5] : memref<16x19xbf16, #tpu.memory_space<vmem>>, vector<16x19xbf16>
    %cst_6 = arith.constant dense<0.000000e+00> : vector<128x19xf32>
    %6 = tpu.matmul %1, %5, %cst_6 {dimension_numbers = #tpu.dot_dimension_numbers<[1], [0], [0], [1], [0, 0, 1, 1], [], []>} : vector<128x16xbf16>, vector<16x19xbf16>, vector<128x19xf32> -> vector<128x19xf32>
    %7 = arith.truncf %6 : vector<128x19xf32> to vector<128x19xbf16>
    %c0_7 = arith.constant 0 : index
    %c0_8 = arith.constant 0 : index
    %8 = vector.load %arg4[%c0_7, %c0_8] : memref<19x16xbf16, #tpu.memory_space<vmem>>, vector<19x16xbf16>
    %c0_9 = arith.constant 0 : index
    %c0_10 = arith.constant 0 : index
    %9 = vector.load %arg5[%c0_9, %c0_10] : memref<19x16xbf16, #tpu.memory_space<vmem>>, vector<19x16xbf16>
    %10 = vector.extract_strided_slice %4 {offsets = [0, 0], sizes = [16, 19], strides = [1, 1]} : vector<128x19xbf16> to vector<16x19xbf16>
    %11 = vector.extract_strided_slice %7 {offsets = [0, 0], sizes = [16, 19], strides = [1, 1]} : vector<128x19xbf16> to vector<16x19xbf16>
    %cst_11 = arith.constant dense<0.000000e+00> : vector<19x19xf32>
    %12 = tpu.matmul %8, %10, %cst_11 {dimension_numbers = #tpu.dot_dimension_numbers<[1], [0], [0], [1], [0, 0, 1, 1], [], []>} : vector<19x16xbf16>, vector<16x19xbf16>, vector<19x19xf32> -> vector<19x19xf32>
    %13 = arith.truncf %12 : vector<19x19xf32> to vector<19x19xbf16>
    %c0_12 = arith.constant 0 : index
    %c0_13 = arith.constant 0 : index
    %c0_14 = arith.constant 0 : index
    %c0_15 = arith.constant 0 : index
    %14 = vector.load %arg6[%c0_12, %c0_13, %c0_14, %c0_15] : memref<1x8x19x19xbf16, #tpu.memory_space<vmem>>, vector<1x1x19x19xbf16>
    %15 = vector.shape_cast %14 : vector<1x1x19x19xbf16> to vector<19x19xbf16>
    %16 = vector.shape_cast %13 : vector<19x19xbf16> to vector<1x1x19x19xbf16>
    tpu.vector_store %arg6[%c0_12, %c0_13, %c0_14, %c0_15], %16 {strides = array<i32>} : memref<1x8x19x19xbf16, #tpu.memory_space<vmem>>, vector<1x1x19x19xbf16>,
    %cst_16 = arith.constant dense<0.000000e+00> : vector<19x19xf32>
    %17 = tpu.matmul %9, %10, %cst_16 {dimension_numbers = #tpu.dot_dimension_numbers<[1], [0], [0], [1], [0, 0, 1, 1], [], []>} : vector<19x16xbf16>, vector<16x19xbf16>, vector<19x19xf32> -> vector<19x19xf32>
    %18 = arith.truncf %17 : vector<19x19xf32> to vector<19x19xbf16>
    %c0_17 = arith.constant 0 : index
    %c0_18 = arith.constant 0 : index
    %c0_19 = arith.constant 0 : index
    %c0_20 = arith.constant 0 : index
    %19 = vector.load %arg7[%c0_17, %c0_18, %c0_19, %c0_20] : memref<1x24x19x19xbf16, #tpu.memory_space<vmem>>, vector<1x1x19x19xbf16>
    %20 = vector.shape_cast %19 : vector<1x1x19x19xbf16> to vector<19x19xbf16>
    %21 = vector.shape_cast %18 : vector<19x19xbf16> to vector<1x1x19x19xbf16>
    tpu.vector_store %arg7[%c0_17, %c0_18, %c0_19, %c0_20], %21 {strides = array<i32>} : memref<1x24x19x19xbf16, #tpu.memory_space<vmem>>, vector<1x1x19x19xbf16>,
    %cst_21 = arith.constant dense<0.000000e+00> : vector<19x19xf32>
    %22 = tpu.matmul %8, %11, %cst_21 {dimension_numbers = #tpu.dot_dimension_numbers<[1], [0], [0], [1], [0, 0, 1, 1], [], []>} : vector<19x16xbf16>, vector<16x19xbf16>, vector<19x19xf32> -> vector<19x19xf32>
    %23 = arith.truncf %22 : vector<19x19xf32> to vector<19x19xbf16>
    %c0_22 = arith.constant 0 : index
    %c8 = arith.constant 8 : index
    %c0_23 = arith.constant 0 : index
    %c0_24 = arith.constant 0 : index
    %24 = vector.load %arg7[%c0_22, %c8, %c0_23, %c0_24] : memref<1x24x19x19xbf16, #tpu.memory_space<vmem>>, vector<1x1x19x19xbf16>
    %25 = vector.shape_cast %24 : vector<1x1x19x19xbf16> to vector<19x19xbf16>
    %26 = vector.shape_cast %23 : vector<19x19xbf16> to vector<1x1x19x19xbf16>
    tpu.vector_store %arg7[%c0_22, %c8, %c0_23, %c0_24], %26 {strides = array<i32>} : memref<1x24x19x19xbf16, #tpu.memory_space<vmem>>, vector<1x1x19x19xbf16>,
    %cst_25 = arith.constant dense<0.000000e+00> : vector<19x19xf32>
    %27 = tpu.matmul %9, %11, %cst_25 {dimension_numbers = #tpu.dot_dimension_numbers<[1], [0], [0], [1], [0, 0, 1, 1], [], []>} : vector<19x16xbf16>, vector<16x19xbf16>, vector<19x19xf32> -> vector<19x19xf32>
    %28 = arith.truncf %27 : vector<19x19xf32> to vector<19x19xbf16>
    %c0_26 = arith.constant 0 : index
    %c16 = arith.constant 16 : index
    %c0_27 = arith.constant 0 : index
    %c0_28 = arith.constant 0 : index
    %29 = vector.load %arg7[%c0_26, %c16, %c0_27, %c0_28] : memref<1x24x19x19xbf16, #tpu.memory_space<vmem>>, vector<1x1x19x19xbf16>
    %30 = vector.shape_cast %29 : vector<1x1x19x19xbf16> to vector<19x19xbf16>
    %31 = vector.shape_cast %28 : vector<19x19xbf16> to vector<1x1x19x19xbf16>
    tpu.vector_store %arg7[%c0_26, %c16, %c0_27, %c0_28], %31 {strides = array<i32>} : memref<1x24x19x19xbf16, #tpu.memory_space<vmem>>, vector<1x1x19x19xbf16>,
    %32 = vector.extract_strided_slice %4 {offsets = [16, 0], sizes = [16, 19], strides = [1, 1]} : vector<128x19xbf16> to vector<16x19xbf16>
    %33 = vector.extract_strided_slice %7 {offsets = [16, 0], sizes = [16, 19], strides = [1, 1]} : vector<128x19xbf16> to vector<16x19xbf16>
    %cst_29 = arith.constant dense<0.000000e+00> : vector<19x19xf32>
    %34 = tpu.matmul %8, %32, %cst_29 {dimension_numbers = #tpu.dot_dimension_numbers<[1], [0], [0], [1], [0, 0, 1, 1], [], []>} : vector<19x16xbf16>, vector<16x19xbf16>, vector<19x19xf32> -> vector<19x19xf32>
    %35 = arith.truncf %34 : vector<19x19xf32> to vector<19x19xbf16>
    %c0_30 = arith.constant 0 : index
    %c1 = arith.constant 1 : index
    %c0_31 = arith.constant 0 : index
    %c0_32 = arith.constant 0 : index
    %36 = vector.load %arg6[%c0_30, %c1, %c0_31, %c0_32] : memref<1x8x19x19xbf16, #tpu.memory_space<vmem>>, vector<1x1x19x19xbf16>
    %37 = vector.shape_cast %36 : vector<1x1x19x19xbf16> to vector<19x19xbf16>
    %38 = vector.shape_cast %35 : vector<19x19xbf16> to vector<1x1x19x19xbf16>
    tpu.vector_store %arg6[%c0_30, %c1, %c0_31, %c0_32], %38 {strides = array<i32>} : memref<1x8x19x19xbf16, #tpu.memory_space<vmem>>, vector<1x1x19x19xbf16>,
    %cst_33 = arith.constant dense<0.000000e+00> : vector<19x19xf32>
    %39 = tpu.matmul %9, %32, %cst_33 {dimension_numbers = #tpu.dot_dimension_numbers<[1], [0], [0], [1], [0, 0, 1, 1], [], []>} : vector<19x16xbf16>, vector<16x19xbf16>, vector<19x19xf32> -> vector<19x19xf32>
    %40 = arith.truncf %39 : vector<19x19xf32> to vector<19x19xbf16>
    %c0_34 = arith.constant 0 : index
    %c1_35 = arith.constant 1 : index
    %c0_36 = arith.constant 0 : index
    %c0_37 = arith.constant 0 : index
    %41 = vector.load %arg7[%c0_34, %c1_35, %c0_36, %c0_37] : memref<1x24x19x19xbf16, #tpu.memory_space<vmem>>, vector<1x1x19x19xbf16>
    %42 = vector.shape_cast %41 : vector<1x1x19x19xbf16> to vector<19x19xbf16>
    %43 = vector.shape_cast %40 : vector<19x19xbf16> to vector<1x1x19x19xbf16>
    tpu.vector_store %arg7[%c0_34, %c1_35, %c0_36, %c0_37], %43 {strides = array<i32>} : memref<1x24x19x19xbf16, #tpu.memory_space<vmem>>, vector<1x1x19x19xbf16>,
    %cst_38 = arith.constant dense<0.000000e+00> : vector<19x19xf32>
    %44 = tpu.matmul %8, %33, %cst_38 {dimension_numbers = #tpu.dot_dimension_numbers<[1], [0], [0], [1], [0, 0, 1, 1], [], []>} : vector<19x16xbf16>, vector<16x19xbf16>, vector<19x19xf32> -> vector<19x19xf32>
    %45 = arith.truncf %44 : vector<19x19xf32> to vector<19x19xbf16>
    %c0_39 = arith.constant 0 : index
    %c9 = arith.constant 9 : index
    %c0_40 = arith.constant 0 : index
    %c0_41 = arith.constant 0 : index
    %46 = vector.load %arg7[%c0_39, %c9, %c0_40, %c0_41] : memref<1x24x19x19xbf16, #tpu.memory_space<vmem>>, vector<1x1x19x19xbf16>
    %47 = vector.shape_cast %46 : vector<1x1x19x19xbf16> to vector<19x19xbf16>
    %48 = vector.shape_cast %45 : vector<19x19xbf16> to vector<1x1x19x19xbf16>
    tpu.vector_store %arg7[%c0_39, %c9, %c0_40, %c0_41], %48 {strides = array<i32>} : memref<1x24x19x19xbf16, #tpu.memory_space<vmem>>, vector<1x1x19x19xbf16>,
    %cst_42 = arith.constant dense<0.000000e+00> : vector<19x19xf32>
    %49 = tpu.matmul %9, %33, %cst_42 {dimension_numbers = #tpu.dot_dimension_numbers<[1], [0], [0], [1], [0, 0, 1, 1], [], []>} : vector<19x16xbf16>, vector<16x19xbf16>, vector<19x19xf32> -> vector<19x19xf32>
    %50 = arith.truncf %49 : vector<19x19xf32> to vector<19x19xbf16>
    %c0_43 = arith.constant 0 : index
    %c17 = arith.constant 17 : index
    %c0_44 = arith.constant 0 : index
    %c0_45 = arith.constant 0 : index
    %51 = vector.load %arg7[%c0_43, %c17, %c0_44, %c0_45] : memref<1x24x19x19xbf16, #tpu.memory_space<vmem>>, vector<1x1x19x19xbf16>
    %52 = vector.shape_cast %51 : vector<1x1x19x19xbf16> to vector<19x19xbf16>
    %53 = vector.shape_cast %50 : vector<19x19xbf16> to vector<1x1x19x19xbf16>
    tpu.vector_store %arg7[%c0_43, %c17, %c0_44, %c0_45], %53 {strides = array<i32>} : memref<1x24x19x19xbf16, #tpu.memory_space<vmem>>, vector<1x1x19x19xbf16>,
    %54 = vector.extract_strided_slice %4 {offsets = [32, 0], sizes = [16, 19], strides = [1, 1]} : vector<128x19xbf16> to vector<16x19xbf16>
    %55 = vector.extract_strided_slice %7 {offsets = [32, 0], sizes = [16, 19], strides = [1, 1]} : vector<128x19xbf16> to vector<16x19xbf16>
    %cst_46 = arith.constant dense<0.000000e+00> : vector<19x19xf32>
    %56 = tpu.matmul %8, %54, %cst_46 {dimension_numbers = #tpu.dot_dimension_numbers<[1], [0], [0], [1], [0, 0, 1, 1], [], []>} : vector<19x16xbf16>, vector<16x19xbf16>, vector<19x19xf32> -> vector<19x19xf32>
    %57 = arith.truncf %56 : vector<19x19xf32> to vector<19x19xbf16>
    %c0_47 = arith.constant 0 : index
    %c2 = arith.constant 2 : index
    %c0_48 = arith.constant 0 : index
    %c0_49 = arith.constant 0 : index
    %58 = vector.load %arg6[%c0_47, %c2, %c0_48, %c0_49] : memref<1x8x19x19xbf16, #tpu.memory_space<vmem>>, vector<1x1x19x19xbf16>
    %59 = vector.shape_cast %58 : vector<1x1x19x19xbf16> to vector<19x19xbf16>
    %60 = vector.shape_cast %57 : vector<19x19xbf16> to vector<1x1x19x19xbf16>
    tpu.vector_store %arg6[%c0_47, %c2, %c0_48, %c0_49], %60 {strides = array<i32>} : memref<1x8x19x19xbf16, #tpu.memory_space<vmem>>, vector<1x1x19x19xbf16>,
    %cst_50 = arith.constant dense<0.000000e+00> : vector<19x19xf32>
    %61 = tpu.matmul %9, %54, %cst_50 {dimension_numbers = #tpu.dot_dimension_numbers<[1], [0], [0], [1], [0, 0, 1, 1], [], []>} : vector<19x16xbf16>, vector<16x19xbf16>, vector<19x19xf32> -> vector<19x19xf32>
    %62 = arith.truncf %61 : vector<19x19xf32> to vector<19x19xbf16>
    %c0_51 = arith.constant 0 : index
    %c2_52 = arith.constant 2 : index
    %c0_53 = arith.constant 0 : index
    %c0_54 = arith.constant 0 : index
    %63 = vector.load %arg7[%c0_51, %c2_52, %c0_53, %c0_54] : memref<1x24x19x19xbf16, #tpu.memory_space<vmem>>, vector<1x1x19x19xbf16>
    %64 = vector.shape_cast %63 : vector<1x1x19x19xbf16> to vector<19x19xbf16>
    %65 = vector.shape_cast %62 : vector<19x19xbf16> to vector<1x1x19x19xbf16>
    tpu.vector_store %arg7[%c0_51, %c2_52, %c0_53, %c0_54], %65 {strides = array<i32>} : memref<1x24x19x19xbf16, #tpu.memory_space<vmem>>, vector<1x1x19x19xbf16>,
    %cst_55 = arith.constant dense<0.000000e+00> : vector<19x19xf32>
    %66 = tpu.matmul %8, %55, %cst_55 {dimension_numbers = #tpu.dot_dimension_numbers<[1], [0], [0], [1], [0, 0, 1, 1], [], []>} : vector<19x16xbf16>, vector<16x19xbf16>, vector<19x19xf32> -> vector<19x19xf32>
    %67 = arith.truncf %66 : vector<19x19xf32> to vector<19x19xbf16>
    %c0_56 = arith.constant 0 : index
    %c10 = arith.constant 10 : index
    %c0_57 = arith.constant 0 : index
    %c0_58 = arith.constant 0 : index
    %68 = vector.load %arg7[%c0_56, %c10, %c0_57, %c0_58] : memref<1x24x19x19xbf16, #tpu.memory_space<vmem>>, vector<1x1x19x19xbf16>
    %69 = vector.shape_cast %68 : vector<1x1x19x19xbf16> to vector<19x19xbf16>
    %70 = vector.shape_cast %67 : vector<19x19xbf16> to vector<1x1x19x19xbf16>
    tpu.vector_store %arg7[%c0_56, %c10, %c0_57, %c0_58], %70 {strides = array<i32>} : memref<1x24x19x19xbf16, #tpu.memory_space<vmem>>, vector<1x1x19x19xbf16>,
    %cst_59 = arith.constant dense<0.000000e+00> : vector<19x19xf32>
    %71 = tpu.matmul %9, %55, %cst_59 {dimension_numbers = #tpu.dot_dimension_numbers<[1], [0], [0], [1], [0, 0, 1, 1], [], []>} : vector<19x16xbf16>, vector<16x19xbf16>, vector<19x19xf32> -> vector<19x19xf32>
    %72 = arith.truncf %71 : vector<19x19xf32> to vector<19x19xbf16>
    %c0_60 = arith.constant 0 : index
    %c18 = arith.constant 18 : index
    %c0_61 = arith.constant 0 : index
    %c0_62 = arith.constant 0 : index
    %73 = vector.load %arg7[%c0_60, %c18, %c0_61, %c0_62] : memref<1x24x19x19xbf16, #tpu.memory_space<vmem>>, vector<1x1x19x19xbf16>
    %74 = vector.shape_cast %73 : vector<1x1x19x19xbf16> to vector<19x19xbf16>
    %75 = vector.shape_cast %72 : vector<19x19xbf16> to vector<1x1x19x19xbf16>
    tpu.vector_store %arg7[%c0_60, %c18, %c0_61, %c0_62], %75 {strides = array<i32>} : memref<1x24x19x19xbf16, #tpu.memory_space<vmem>>, vector<1x1x19x19xbf16>,
    %76 = vector.extract_strided_slice %4 {offsets = [48, 0], sizes = [16, 19], strides = [1, 1]} : vector<128x19xbf16> to vector<16x19xbf16>
    %77 = vector.extract_strided_slice %7 {offsets = [48, 0], sizes = [16, 19], strides = [1, 1]} : vector<128x19xbf16> to vector<16x19xbf16>
    %cst_63 = arith.constant dense<0.000000e+00> : vector<19x19xf32>
    %78 = tpu.matmul %8, %76, %cst_63 {dimension_numbers = #tpu.dot_dimension_numbers<[1], [0], [0], [1], [0, 0, 1, 1], [], []>} : vector<19x16xbf16>, vector<16x19xbf16>, vector<19x19xf32> -> vector<19x19xf32>
    %79 = arith.truncf %78 : vector<19x19xf32> to vector<19x19xbf16>
    %c0_64 = arith.constant 0 : index
    %c3 = arith.constant 3 : index
    %c0_65 = arith.constant 0 : index
    %c0_66 = arith.constant 0 : index
    %80 = vector.load %arg6[%c0_64, %c3, %c0_65, %c0_66] : memref<1x8x19x19xbf16, #tpu.memory_space<vmem>>, vector<1x1x19x19xbf16>
    %81 = vector.shape_cast %80 : vector<1x1x19x19xbf16> to vector<19x19xbf16>
    %82 = vector.shape_cast %79 : vector<19x19xbf16> to vector<1x1x19x19xbf16>
    tpu.vector_store %arg6[%c0_64, %c3, %c0_65, %c0_66], %82 {strides = array<i32>} : memref<1x8x19x19xbf16, #tpu.memory_space<vmem>>, vector<1x1x19x19xbf16>,
    %cst_67 = arith.constant dense<0.000000e+00> : vector<19x19xf32>
    %83 = tpu.matmul %9, %76, %cst_67 {dimension_numbers = #tpu.dot_dimension_numbers<[1], [0], [0], [1], [0, 0, 1, 1], [], []>} : vector<19x16xbf16>, vector<16x19xbf16>, vector<19x19xf32> -> vector<19x19xf32>
    %84 = arith.truncf %83 : vector<19x19xf32> to vector<19x19xbf16>
    %c0_68 = arith.constant 0 : index
    %c3_69 = arith.constant 3 : index
    %c0_70 = arith.constant 0 : index
    %c0_71 = arith.constant 0 : index
    %85 = vector.load %arg7[%c0_68, %c3_69, %c0_70, %c0_71] : memref<1x24x19x19xbf16, #tpu.memory_space<vmem>>, vector<1x1x19x19xbf16>
    %86 = vector.shape_cast %85 : vector<1x1x19x19xbf16> to vector<19x19xbf16>
    %87 = vector.shape_cast %84 : vector<19x19xbf16> to vector<1x1x19x19xbf16>
    tpu.vector_store %arg7[%c0_68, %c3_69, %c0_70, %c0_71], %87 {strides = array<i32>} : memref<1x24x19x19xbf16, #tpu.memory_space<vmem>>, vector<1x1x19x19xbf16>,
    %cst_72 = arith.constant dense<0.000000e+00> : vector<19x19xf32>
    %88 = tpu.matmul %8, %77, %cst_72 {dimension_numbers = #tpu.dot_dimension_numbers<[1], [0], [0], [1], [0, 0, 1, 1], [], []>} : vector<19x16xbf16>, vector<16x19xbf16>, vector<19x19xf32> -> vector<19x19xf32>
    %89 = arith.truncf %88 : vector<19x19xf32> to vector<19x19xbf16>
    %c0_73 = arith.constant 0 : index
    %c11 = arith.constant 11 : index
    %c0_74 = arith.constant 0 : index
    %c0_75 = arith.constant 0 : index
    %90 = vector.load %arg7[%c0_73, %c11, %c0_74, %c0_75] : memref<1x24x19x19xbf16, #tpu.memory_space<vmem>>, vector<1x1x19x19xbf16>
    %91 = vector.shape_cast %90 : vector<1x1x19x19xbf16> to vector<19x19xbf16>
    %92 = vector.shape_cast %89 : vector<19x19xbf16> to vector<1x1x19x19xbf16>
    tpu.vector_store %arg7[%c0_73, %c11, %c0_74, %c0_75], %92 {strides = array<i32>} : memref<1x24x19x19xbf16, #tpu.memory_space<vmem>>, vector<1x1x19x19xbf16>,
    %cst_76 = arith.constant dense<0.000000e+00> : vector<19x19xf32>
    %93 = tpu.matmul %9, %77, %cst_76 {dimension_numbers = #tpu.dot_dimension_numbers<[1], [0], [0], [1], [0, 0, 1, 1], [], []>} : vector<19x16xbf16>, vector<16x19xbf16>, vector<19x19xf32> -> vector<19x19xf32>
    %94 = arith.truncf %93 : vector<19x19xf32> to vector<19x19xbf16>
    %c0_77 = arith.constant 0 : index
    %c19 = arith.constant 19 : index
    %c0_78 = arith.constant 0 : index
    %c0_79 = arith.constant 0 : index
    %95 = vector.load %arg7[%c0_77, %c19, %c0_78, %c0_79] : memref<1x24x19x19xbf16, #tpu.memory_space<vmem>>, vector<1x1x19x19xbf16>
    %96 = vector.shape_cast %95 : vector<1x1x19x19xbf16> to vector<19x19xbf16>
    %97 = vector.shape_cast %94 : vector<19x19xbf16> to vector<1x1x19x19xbf16>
    tpu.vector_store %arg7[%c0_77, %c19, %c0_78, %c0_79], %97 {strides = array<i32>} : memref<1x24x19x19xbf16, #tpu.memory_space<vmem>>, vector<1x1x19x19xbf16>,
    %98 = vector.extract_strided_slice %4 {offsets = [64, 0], sizes = [16, 19], strides = [1, 1]} : vector<128x19xbf16> to vector<16x19xbf16>
    %99 = vector.extract_strided_slice %7 {offsets = [64, 0], sizes = [16, 19], strides = [1, 1]} : vector<128x19xbf16> to vector<16x19xbf16>
    %cst_80 = arith.constant dense<0.000000e+00> : vector<19x19xf32>
    %100 = tpu.matmul %8, %98, %cst_80 {dimension_numbers = #tpu.dot_dimension_numbers<[1], [0], [0], [1], [0, 0, 1, 1], [], []>} : vector<19x16xbf16>, vector<16x19xbf16>, vector<19x19xf32> -> vector<19x19xf32>
    %101 = arith.truncf %100 : vector<19x19xf32> to vector<19x19xbf16>
    %c0_81 = arith.constant 0 : index
    %c4 = arith.constant 4 : index
    %c0_82 = arith.constant 0 : index
    %c0_83 = arith.constant 0 : index
    %102 = vector.load %arg6[%c0_81, %c4, %c0_82, %c0_83] : memref<1x8x19x19xbf16, #tpu.memory_space<vmem>>, vector<1x1x19x19xbf16>
    %103 = vector.shape_cast %102 : vector<1x1x19x19xbf16> to vector<19x19xbf16>
    %104 = vector.shape_cast %101 : vector<19x19xbf16> to vector<1x1x19x19xbf16>
    tpu.vector_store %arg6[%c0_81, %c4, %c0_82, %c0_83], %104 {strides = array<i32>} : memref<1x8x19x19xbf16, #tpu.memory_space<vmem>>, vector<1x1x19x19xbf16>,
    %cst_84 = arith.constant dense<0.000000e+00> : vector<19x19xf32>
    %105 = tpu.matmul %9, %98, %cst_84 {dimension_numbers = #tpu.dot_dimension_numbers<[1], [0], [0], [1], [0, 0, 1, 1], [], []>} : vector<19x16xbf16>, vector<16x19xbf16>, vector<19x19xf32> -> vector<19x19xf32>
    %106 = arith.truncf %105 : vector<19x19xf32> to vector<19x19xbf16>
    %c0_85 = arith.constant 0 : index
    %c4_86 = arith.constant 4 : index
    %c0_87 = arith.constant 0 : index
    %c0_88 = arith.constant 0 : index
    %107 = vector.load %arg7[%c0_85, %c4_86, %c0_87, %c0_88] : memref<1x24x19x19xbf16, #tpu.memory_space<vmem>>, vector<1x1x19x19xbf16>
    %108 = vector.shape_cast %107 : vector<1x1x19x19xbf16> to vector<19x19xbf16>
    %109 = vector.shape_cast %106 : vector<19x19xbf16> to vector<1x1x19x19xbf16>
    tpu.vector_store %arg7[%c0_85, %c4_86, %c0_87, %c0_88], %109 {strides = array<i32>} : memref<1x24x19x19xbf16, #tpu.memory_space<vmem>>, vector<1x1x19x19xbf16>,
    %cst_89 = arith.constant dense<0.000000e+00> : vector<19x19xf32>
    %110 = tpu.matmul %8, %99, %cst_89 {dimension_numbers = #tpu.dot_dimension_numbers<[1], [0], [0], [1], [0, 0, 1, 1], [], []>} : vector<19x16xbf16>, vector<16x19xbf16>, vector<19x19xf32> -> vector<19x19xf32>
    %111 = arith.truncf %110 : vector<19x19xf32> to vector<19x19xbf16>
    %c0_90 = arith.constant 0 : index
    %c12 = arith.constant 12 : index
    %c0_91 = arith.constant 0 : index
    %c0_92 = arith.constant 0 : index
    %112 = vector.load %arg7[%c0_90, %c12, %c0_91, %c0_92] : memref<1x24x19x19xbf16, #tpu.memory_space<vmem>>, vector<1x1x19x19xbf16>
    %113 = vector.shape_cast %112 : vector<1x1x19x19xbf16> to vector<19x19xbf16>
    %114 = vector.shape_cast %111 : vector<19x19xbf16> to vector<1x1x19x19xbf16>
    tpu.vector_store %arg7[%c0_90, %c12, %c0_91, %c0_92], %114 {strides = array<i32>} : memref<1x24x19x19xbf16, #tpu.memory_space<vmem>>, vector<1x1x19x19xbf16>,
    %cst_93 = arith.constant dense<0.000000e+00> : vector<19x19xf32>
    %115 = tpu.matmul %9, %99, %cst_93 {dimension_numbers = #tpu.dot_dimension_numbers<[1], [0], [0], [1], [0, 0, 1, 1], [], []>} : vector<19x16xbf16>, vector<16x19xbf16>, vector<19x19xf32> -> vector<19x19xf32>
    %116 = arith.truncf %115 : vector<19x19xf32> to vector<19x19xbf16>
    %c0_94 = arith.constant 0 : index
    %c20 = arith.constant 20 : index
    %c0_95 = arith.constant 0 : index
    %c0_96 = arith.constant 0 : index
    %117 = vector.load %arg7[%c0_94, %c20, %c0_95, %c0_96] : memref<1x24x19x19xbf16, #tpu.memory_space<vmem>>, vector<1x1x19x19xbf16>
    %118 = vector.shape_cast %117 : vector<1x1x19x19xbf16> to vector<19x19xbf16>
    %119 = vector.shape_cast %116 : vector<19x19xbf16> to vector<1x1x19x19xbf16>
    tpu.vector_store %arg7[%c0_94, %c20, %c0_95, %c0_96], %119 {strides = array<i32>} : memref<1x24x19x19xbf16, #tpu.memory_space<vmem>>, vector<1x1x19x19xbf16>,
    %120 = vector.extract_strided_slice %4 {offsets = [80, 0], sizes = [16, 19], strides = [1, 1]} : vector<128x19xbf16> to vector<16x19xbf16>
    %121 = vector.extract_strided_slice %7 {offsets = [80, 0], sizes = [16, 19], strides = [1, 1]} : vector<128x19xbf16> to vector<16x19xbf16>
    %cst_97 = arith.constant dense<0.000000e+00> : vector<19x19xf32>
    %122 = tpu.matmul %8, %120, %cst_97 {dimension_numbers = #tpu.dot_dimension_numbers<[1], [0], [0], [1], [0, 0, 1, 1], [], []>} : vector<19x16xbf16>, vector<16x19xbf16>, vector<19x19xf32> -> vector<19x19xf32>
    %123 = arith.truncf %122 : vector<19x19xf32> to vector<19x19xbf16>
    %c0_98 = arith.constant 0 : index
    %c5 = arith.constant 5 : index
    %c0_99 = arith.constant 0 : index
    %c0_100 = arith.constant 0 : index
    %124 = vector.load %arg6[%c0_98, %c5, %c0_99, %c0_100] : memref<1x8x19x19xbf16, #tpu.memory_space<vmem>>, vector<1x1x19x19xbf16>
    %125 = vector.shape_cast %124 : vector<1x1x19x19xbf16> to vector<19x19xbf16>
    %126 = vector.shape_cast %123 : vector<19x19xbf16> to vector<1x1x19x19xbf16>
    tpu.vector_store %arg6[%c0_98, %c5, %c0_99, %c0_100], %126 {strides = array<i32>} : memref<1x8x19x19xbf16, #tpu.memory_space<vmem>>, vector<1x1x19x19xbf16>,
    %cst_101 = arith.constant dense<0.000000e+00> : vector<19x19xf32>
    %127 = tpu.matmul %9, %120, %cst_101 {dimension_numbers = #tpu.dot_dimension_numbers<[1], [0], [0], [1], [0, 0, 1, 1], [], []>} : vector<19x16xbf16>, vector<16x19xbf16>, vector<19x19xf32> -> vector<19x19xf32>
    %128 = arith.truncf %127 : vector<19x19xf32> to vector<19x19xbf16>
    %c0_102 = arith.constant 0 : index
    %c5_103 = arith.constant 5 : index
    %c0_104 = arith.constant 0 : index
    %c0_105 = arith.constant 0 : index
    %129 = vector.load %arg7[%c0_102, %c5_103, %c0_104, %c0_105] : memref<1x24x19x19xbf16, #tpu.memory_space<vmem>>, vector<1x1x19x19xbf16>
    %130 = vector.shape_cast %129 : vector<1x1x19x19xbf16> to vector<19x19xbf16>
    %131 = vector.shape_cast %128 : vector<19x19xbf16> to vector<1x1x19x19xbf16>
    tpu.vector_store %arg7[%c0_102, %c5_103, %c0_104, %c0_105], %131 {strides = array<i32>} : memref<1x24x19x19xbf16, #tpu.memory_space<vmem>>, vector<1x1x19x19xbf16>,
    %cst_106 = arith.constant dense<0.000000e+00> : vector<19x19xf32>
    %132 = tpu.matmul %8, %121, %cst_106 {dimension_numbers = #tpu.dot_dimension_numbers<[1], [0], [0], [1], [0, 0, 1, 1], [], []>} : vector<19x16xbf16>, vector<16x19xbf16>, vector<19x19xf32> -> vector<19x19xf32>
    %133 = arith.truncf %132 : vector<19x19xf32> to vector<19x19xbf16>
    %c0_107 = arith.constant 0 : index
    %c13 = arith.constant 13 : index
    %c0_108 = arith.constant 0 : index
    %c0_109 = arith.constant 0 : index
    %134 = vector.load %arg7[%c0_107, %c13, %c0_108, %c0_109] : memref<1x24x19x19xbf16, #tpu.memory_space<vmem>>, vector<1x1x19x19xbf16>
    %135 = vector.shape_cast %134 : vector<1x1x19x19xbf16> to vector<19x19xbf16>
    %136 = vector.shape_cast %133 : vector<19x19xbf16> to vector<1x1x19x19xbf16>
    tpu.vector_store %arg7[%c0_107, %c13, %c0_108, %c0_109], %136 {strides = array<i32>} : memref<1x24x19x19xbf16, #tpu.memory_space<vmem>>, vector<1x1x19x19xbf16>,
    %cst_110 = arith.constant dense<0.000000e+00> : vector<19x19xf32>
    %137 = tpu.matmul %9, %121, %cst_110 {dimension_numbers = #tpu.dot_dimension_numbers<[1], [0], [0], [1], [0, 0, 1, 1], [], []>} : vector<19x16xbf16>, vector<16x19xbf16>, vector<19x19xf32> -> vector<19x19xf32>
    %138 = arith.truncf %137 : vector<19x19xf32> to vector<19x19xbf16>
    %c0_111 = arith.constant 0 : index
    %c21 = arith.constant 21 : index
    %c0_112 = arith.constant 0 : index
    %c0_113 = arith.constant 0 : index
    %139 = vector.load %arg7[%c0_111, %c21, %c0_112, %c0_113] : memref<1x24x19x19xbf16, #tpu.memory_space<vmem>>, vector<1x1x19x19xbf16>
    %140 = vector.shape_cast %139 : vector<1x1x19x19xbf16> to vector<19x19xbf16>
    %141 = vector.shape_cast %138 : vector<19x19xbf16> to vector<1x1x19x19xbf16>
    tpu.vector_store %arg7[%c0_111, %c21, %c0_112, %c0_113], %141 {strides = array<i32>} : memref<1x24x19x19xbf16, #tpu.memory_space<vmem>>, vector<1x1x19x19xbf16>,
    %142 = vector.extract_strided_slice %4 {offsets = [96, 0], sizes = [16, 19], strides = [1, 1]} : vector<128x19xbf16> to vector<16x19xbf16>
    %143 = vector.extract_strided_slice %7 {offsets = [96, 0], sizes = [16, 19], strides = [1, 1]} : vector<128x19xbf16> to vector<16x19xbf16>
    %cst_114 = arith.constant dense<0.000000e+00> : vector<19x19xf32>
    %144 = tpu.matmul %8, %142, %cst_114 {dimension_numbers = #tpu.dot_dimension_numbers<[1], [0], [0], [1], [0, 0, 1, 1], [], []>} : vector<19x16xbf16>, vector<16x19xbf16>, vector<19x19xf32> -> vector<19x19xf32>
    %145 = arith.truncf %144 : vector<19x19xf32> to vector<19x19xbf16>
    %c0_115 = arith.constant 0 : index
    %c6 = arith.constant 6 : index
    %c0_116 = arith.constant 0 : index
    %c0_117 = arith.constant 0 : index
    %146 = vector.load %arg6[%c0_115, %c6, %c0_116, %c0_117] : memref<1x8x19x19xbf16, #tpu.memory_space<vmem>>, vector<1x1x19x19xbf16>
    %147 = vector.shape_cast %146 : vector<1x1x19x19xbf16> to vector<19x19xbf16>
    %148 = vector.shape_cast %145 : vector<19x19xbf16> to vector<1x1x19x19xbf16>
    tpu.vector_store %arg6[%c0_115, %c6, %c0_116, %c0_117], %148 {strides = array<i32>} : memref<1x8x19x19xbf16, #tpu.memory_space<vmem>>, vector<1x1x19x19xbf16>,
    %cst_118 = arith.constant dense<0.000000e+00> : vector<19x19xf32>
    %149 = tpu.matmul %9, %142, %cst_118 {dimension_numbers = #tpu.dot_dimension_numbers<[1], [0], [0], [1], [0, 0, 1, 1], [], []>} : vector<19x16xbf16>, vector<16x19xbf16>, vector<19x19xf32> -> vector<19x19xf32>
    %150 = arith.truncf %149 : vector<19x19xf32> to vector<19x19xbf16>
    %c0_119 = arith.constant 0 : index
    %c6_120 = arith.constant 6 : index
    %c0_121 = arith.constant 0 : index
    %c0_122 = arith.constant 0 : index
    %151 = vector.load %arg7[%c0_119, %c6_120, %c0_121, %c0_122] : memref<1x24x19x19xbf16, #tpu.memory_space<vmem>>, vector<1x1x19x19xbf16>
    %152 = vector.shape_cast %151 : vector<1x1x19x19xbf16> to vector<19x19xbf16>
    %153 = vector.shape_cast %150 : vector<19x19xbf16> to vector<1x1x19x19xbf16>
    tpu.vector_store %arg7[%c0_119, %c6_120, %c0_121, %c0_122], %153 {strides = array<i32>} : memref<1x24x19x19xbf16, #tpu.memory_space<vmem>>, vector<1x1x19x19xbf16>,
    %cst_123 = arith.constant dense<0.000000e+00> : vector<19x19xf32>
    %154 = tpu.matmul %8, %143, %cst_123 {dimension_numbers = #tpu.dot_dimension_numbers<[1], [0], [0], [1], [0, 0, 1, 1], [], []>} : vector<19x16xbf16>, vector<16x19xbf16>, vector<19x19xf32> -> vector<19x19xf32>
    %155 = arith.truncf %154 : vector<19x19xf32> to vector<19x19xbf16>
    %c0_124 = arith.constant 0 : index
    %c14 = arith.constant 14 : index
    %c0_125 = arith.constant 0 : index
    %c0_126 = arith.constant 0 : index
    %156 = vector.load %arg7[%c0_124, %c14, %c0_125, %c0_126] : memref<1x24x19x19xbf16, #tpu.memory_space<vmem>>, vector<1x1x19x19xbf16>
    %157 = vector.shape_cast %156 : vector<1x1x19x19xbf16> to vector<19x19xbf16>
    %158 = vector.shape_cast %155 : vector<19x19xbf16> to vector<1x1x19x19xbf16>
    tpu.vector_store %arg7[%c0_124, %c14, %c0_125, %c0_126], %158 {strides = array<i32>} : memref<1x24x19x19xbf16, #tpu.memory_space<vmem>>, vector<1x1x19x19xbf16>,
    %cst_127 = arith.constant dense<0.000000e+00> : vector<19x19xf32>
    %159 = tpu.matmul %9, %143, %cst_127 {dimension_numbers = #tpu.dot_dimension_numbers<[1], [0], [0], [1], [0, 0, 1, 1], [], []>} : vector<19x16xbf16>, vector<16x19xbf16>, vector<19x19xf32> -> vector<19x19xf32>
    %160 = arith.truncf %159 : vector<19x19xf32> to vector<19x19xbf16>
    %c0_128 = arith.constant 0 : index
    %c22 = arith.constant 22 : index
    %c0_129 = arith.constant 0 : index
    %c0_130 = arith.constant 0 : index
    %161 = vector.load %arg7[%c0_128, %c22, %c0_129, %c0_130] : memref<1x24x19x19xbf16, #tpu.memory_space<vmem>>, vector<1x1x19x19xbf16>
    %162 = vector.shape_cast %161 : vector<1x1x19x19xbf16> to vector<19x19xbf16>
    %163 = vector.shape_cast %160 : vector<19x19xbf16> to vector<1x1x19x19xbf16>
    tpu.vector_store %arg7[%c0_128, %c22, %c0_129, %c0_130], %163 {strides = array<i32>} : memref<1x24x19x19xbf16, #tpu.memory_space<vmem>>, vector<1x1x19x19xbf16>,
    %164 = vector.extract_strided_slice %4 {offsets = [112, 0], sizes = [16, 19], strides = [1, 1]} : vector<128x19xbf16> to vector<16x19xbf16>
    %165 = vector.extract_strided_slice %7 {offsets = [112, 0], sizes = [16, 19], strides = [1, 1]} : vector<128x19xbf16> to vector<16x19xbf16>
    %cst_131 = arith.constant dense<0.000000e+00> : vector<19x19xf32>
    %166 = tpu.matmul %8, %164, %cst_131 {dimension_numbers = #tpu.dot_dimension_numbers<[1], [0], [0], [1], [0, 0, 1, 1], [], []>} : vector<19x16xbf16>, vector<16x19xbf16>, vector<19x19xf32> -> vector<19x19xf32>
    %167 = arith.truncf %166 : vector<19x19xf32> to vector<19x19xbf16>
    %c0_132 = arith.constant 0 : index
    %c7 = arith.constant 7 : index
    %c0_133 = arith.constant 0 : index
    %c0_134 = arith.constant 0 : index
    %168 = vector.load %arg6[%c0_132, %c7, %c0_133, %c0_134] : memref<1x8x19x19xbf16, #tpu.memory_space<vmem>>, vector<1x1x19x19xbf16>
    %169 = vector.shape_cast %168 : vector<1x1x19x19xbf16> to vector<19x19xbf16>
    %170 = vector.shape_cast %167 : vector<19x19xbf16> to vector<1x1x19x19xbf16>
    tpu.vector_store %arg6[%c0_132, %c7, %c0_133, %c0_134], %170 {strides = array<i32>} : memref<1x8x19x19xbf16, #tpu.memory_space<vmem>>, vector<1x1x19x19xbf16>,
    %cst_135 = arith.constant dense<0.000000e+00> : vector<19x19xf32>
    %171 = tpu.matmul %9, %164, %cst_135 {dimension_numbers = #tpu.dot_dimension_numbers<[1], [0], [0], [1], [0, 0, 1, 1], [], []>} : vector<19x16xbf16>, vector<16x19xbf16>, vector<19x19xf32> -> vector<19x19xf32>
    %172 = arith.truncf %171 : vector<19x19xf32> to vector<19x19xbf16>
    %c0_136 = arith.constant 0 : index
    %c7_137 = arith.constant 7 : index
    %c0_138 = arith.constant 0 : index
    %c0_139 = arith.constant 0 : index
    %173 = vector.load %arg7[%c0_136, %c7_137, %c0_138, %c0_139] : memref<1x24x19x19xbf16, #tpu.memory_space<vmem>>, vector<1x1x19x19xbf16>
    %174 = vector.shape_cast %173 : vector<1x1x19x19xbf16> to vector<19x19xbf16>
    %175 = vector.shape_cast %172 : vector<19x19xbf16> to vector<1x1x19x19xbf16>
    tpu.vector_store %arg7[%c0_136, %c7_137, %c0_138, %c0_139], %175 {strides = array<i32>} : memref<1x24x19x19xbf16, #tpu.memory_space<vmem>>, vector<1x1x19x19xbf16>,
    %cst_140 = arith.constant dense<0.000000e+00> : vector<19x19xf32>
    %176 = tpu.matmul %8, %165, %cst_140 {dimension_numbers = #tpu.dot_dimension_numbers<[1], [0], [0], [1], [0, 0, 1, 1], [], []>} : vector<19x16xbf16>, vector<16x19xbf16>, vector<19x19xf32> -> vector<19x19xf32>
    %177 = arith.truncf %176 : vector<19x19xf32> to vector<19x19xbf16>
    %c0_141 = arith.constant 0 : index
    %c15 = arith.constant 15 : index
    %c0_142 = arith.constant 0 : index
    %c0_143 = arith.constant 0 : index
    %178 = vector.load %arg7[%c0_141, %c15, %c0_142, %c0_143] : memref<1x24x19x19xbf16, #tpu.memory_space<vmem>>, vector<1x1x19x19xbf16>
    %179 = vector.shape_cast %178 : vector<1x1x19x19xbf16> to vector<19x19xbf16>
    %180 = vector.shape_cast %177 : vector<19x19xbf16> to vector<1x1x19x19xbf16>
    tpu.vector_store %arg7[%c0_141, %c15, %c0_142, %c0_143], %180 {strides = array<i32>} : memref<1x24x19x19xbf16, #tpu.memory_space<vmem>>, vector<1x1x19x19xbf16>,
    %cst_144 = arith.constant dense<0.000000e+00> : vector<19x19xf32>
    %181 = tpu.matmul %9, %165, %cst_144 {dimension_numbers = #tpu.dot_dimension_numbers<[1], [0], [0], [1], [0, 0, 1, 1], [], []>} : vector<19x16xbf16>, vector<16x19xbf16>, vector<19x19xf32> -> vector<19x19xf32>
    %182 = arith.truncf %181 : vector<19x19xf32> to vector<19x19xbf16>
    %c0_145 = arith.constant 0 : index
    %c23 = arith.constant 23 : index
    %c0_146 = arith.constant 0 : index
    %c0_147 = arith.constant 0 : index
    %183 = vector.load %arg7[%c0_145, %c23, %c0_146, %c0_147] : memref<1x24x19x19xbf16, #tpu.memory_space<vmem>>, vector<1x1x19x19xbf16>
    %184 = vector.shape_cast %183 : vector<1x1x19x19xbf16> to vector<19x19xbf16>
    %185 = vector.shape_cast %182 : vector<19x19xbf16> to vector<1x1x19x19xbf16>
    tpu.vector_store %arg7[%c0_145, %c23, %c0_146, %c0_147], %185 {strides = array<i32>} : memref<1x24x19x19xbf16, #tpu.memory_space<vmem>>, vector<1x1x19x19xbf16>,
    return
  }
  func.func @transform_0(%arg0: i32) -> (i32, i32, i32) {
    %c0_i32 = arith.constant 0 : i32
    %c0_i32_0 = arith.constant 0 : i32
    %c0_i32_1 = arith.constant 0 : i32
    return %arg0, %c0_i32, %c0_i32_0 : i32, i32, i32
  }
  func.func @transform_1(%arg0: i32) -> (i32, i32) {
    %c0_i32 = arith.constant 0 : i32
    %c0_i32_0 = arith.constant 0 : i32
    %c0_i32_1 = arith.constant 0 : i32
    return %c0_i32, %c0_i32_0 : i32, i32
  }
  func.func @transform_2(%arg0: i32) -> (i32, i32) {
    %c0_i32 = arith.constant 0 : i32
    %c0_i32_0 = arith.constant 0 : i32
    %c0_i32_1 = arith.constant 0 : i32
    return %c0_i32, %c0_i32_0 : i32, i32
  }
  func.func @transform_3(%arg0: i32) -> (i32, i32) {
    %c0_i32 = arith.constant 0 : i32
    %c0_i32_0 = arith.constant 0 : i32
    %c0_i32_1 = arith.constant 0 : i32
    return %c0_i32, %c0_i32_0 : i32, i32
  }
  func.func @transform_4(%arg0: i32) -> (i32, i32) {
    %c0_i32 = arith.constant 0 : i32
    %c0_i32_0 = arith.constant 0 : i32
    %c0_i32_1 = arith.constant 0 : i32
    return %c0_i32, %c0_i32_0 : i32, i32
  }
  func.func @transform_5(%arg0: i32) -> (i32, i32, i32, i32) {
    %c0_i32 = arith.constant 0 : i32
    %c0_i32_0 = arith.constant 0 : i32
    %c0_i32_1 = arith.constant 0 : i32
    %c0_i32_2 = arith.constant 0 : i32
    return %arg0, %c0_i32, %c0_i32_0, %c0_i32_1 : i32, i32, i32, i32
  }
  func.func @transform_6(%arg0: i32) -> (i32, i32, i32, i32) {
    %c0_i32 = arith.constant 0 : i32
    %c0_i32_0 = arith.constant 0 : i32
    %c0_i32_1 = arith.constant 0 : i32
    %c0_i32_2 = arith.constant 0 : i32
    return %arg0, %c0_i32, %c0_i32_0, %c0_i32_1 : i32, i32, i32, i32
  }
}

module attributes {stable_mosaic.version = 11 : i64} {
  func.func @_conv3x3_kernel(%arg0: i32, %arg1: memref<1x8x401xbf16, #tpu.memory_space<vmem>>, %arg2: memref<9x12x8xbf16, #tpu.memory_space<vmem>>, %arg3: memref<12x1xf32, #tpu.memory_space<vmem>>, %arg4: memref<1x361xbf16, #tpu.memory_space<vmem>>, %arg5: memref<1x361xbf16, #tpu.memory_space<vmem>>, %arg6: memref<1x12x361xbf16, #tpu.memory_space<vmem>>) attributes {dimension_semantics = [#tpu.dimension_semantics<parallel>], iteration_bounds = array<i64: 2>, scalar_prefetch = 0 : i64, scratch_operands = 0 : i64, tpu.core_type = #tpu.core_type<tc>, window_params = [{transform_indices = @transform_0, window_bounds = array<i64: 1, 8, 401>}, {pipeline_mode = #tpu.pipeline_mode<synchronous>, transform_indices = @transform_1, window_bounds = array<i64: 9, 12, 8>}, {pipeline_mode = #tpu.pipeline_mode<synchronous>, transform_indices = @transform_2, window_bounds = array<i64: 12, 1>}, {pipeline_mode = #tpu.pipeline_mode<synchronous>, transform_indices = @transform_3, window_bounds = array<i64: 1, 361>}, {pipeline_mode = #tpu.pipeline_mode<synchronous>, transform_indices = @transform_4, window_bounds = array<i64: 1, 361>}, {transform_indices = @transform_5, window_bounds = array<i64: 1, 12, 361>}]} {
    %c0 = arith.constant 0 : index
    %c0_0 = arith.constant 0 : index
    %0 = vector.load %arg4[%c0, %c0_0] : memref<1x361xbf16, #tpu.memory_space<vmem>>, vector<1x361xbf16>
    %c0_1 = arith.constant 0 : index
    %c0_2 = arith.constant 0 : index
    %1 = vector.load %arg5[%c0_1, %c0_2] : memref<1x361xbf16, #tpu.memory_space<vmem>>, vector<1x361xbf16>
    %cst = arith.constant 0.000000e+00 : f32
    %2 = vector.broadcast %cst : f32 to vector<12x361xf32>
    %c0_3 = arith.constant 0 : index
    %c0_4 = arith.constant 0 : index
    %c0_5 = arith.constant 0 : index
    %3 = vector.load %arg1[%c0_3, %c0_4, %c0_5] : memref<1x8x401xbf16, #tpu.memory_space<vmem>>, vector<1x8x361xbf16>
    %4 = vector.shape_cast %3 : vector<1x8x361xbf16> to vector<8x361xbf16>
    %5 = vector.broadcast %0 : vector<1x361xbf16> to vector<8x361xbf16>
    %6 = arith.mulf %4, %5 : vector<8x361xbf16>
    %c0_6 = arith.constant 0 : index
    %c0_7 = arith.constant 0 : index
    %c0_8 = arith.constant 0 : index
    %7 = vector.load %arg2[%c0_6, %c0_7, %c0_8] : memref<9x12x8xbf16, #tpu.memory_space<vmem>>, vector<1x12x8xbf16>
    %8 = vector.shape_cast %7 : vector<1x12x8xbf16> to vector<12x8xbf16>
    %cst_9 = arith.constant dense<0.000000e+00> : vector<12x361xf32>
    %9 = tpu.matmul %8, %6, %cst_9 {dimension_numbers = #tpu.dot_dimension_numbers<[1], [0], [0], [1], [0, 0, 1, 1], [], []>} : vector<12x8xbf16>, vector<8x361xbf16>, vector<12x361xf32> -> vector<12x361xf32>
    %10 = arith.addf %2, %9 : vector<12x361xf32>
    %c0_10 = arith.constant 0 : index
    %c0_11 = arith.constant 0 : index
    %c1 = arith.constant 1 : index
    %11 = vector.load %arg1[%c0_10, %c0_11, %c1] : memref<1x8x401xbf16, #tpu.memory_space<vmem>>, vector<1x8x361xbf16>
    %12 = vector.shape_cast %11 : vector<1x8x361xbf16> to vector<8x361xbf16>
    %c1_12 = arith.constant 1 : index
    %c0_13 = arith.constant 0 : index
    %c0_14 = arith.constant 0 : index
    %13 = vector.load %arg2[%c1_12, %c0_13, %c0_14] : memref<9x12x8xbf16, #tpu.memory_space<vmem>>, vector<1x12x8xbf16>
    %14 = vector.shape_cast %13 : vector<1x12x8xbf16> to vector<12x8xbf16>
    %cst_15 = arith.constant dense<0.000000e+00> : vector<12x361xf32>
    %15 = tpu.matmul %14, %12, %cst_15 {dimension_numbers = #tpu.dot_dimension_numbers<[1], [0], [0], [1], [0, 0, 1, 1], [], []>} : vector<12x8xbf16>, vector<8x361xbf16>, vector<12x361xf32> -> vector<12x361xf32>
    %16 = arith.addf %10, %15 : vector<12x361xf32>
    %c0_16 = arith.constant 0 : index
    %c0_17 = arith.constant 0 : index
    %c2 = arith.constant 2 : index
    %17 = vector.load %arg1[%c0_16, %c0_17, %c2] : memref<1x8x401xbf16, #tpu.memory_space<vmem>>, vector<1x8x361xbf16>
    %18 = vector.shape_cast %17 : vector<1x8x361xbf16> to vector<8x361xbf16>
    %19 = vector.broadcast %1 : vector<1x361xbf16> to vector<8x361xbf16>
    %20 = arith.mulf %18, %19 : vector<8x361xbf16>
    %c2_18 = arith.constant 2 : index
    %c0_19 = arith.constant 0 : index
    %c0_20 = arith.constant 0 : index
    %21 = vector.load %arg2[%c2_18, %c0_19, %c0_20] : memref<9x12x8xbf16, #tpu.memory_space<vmem>>, vector<1x12x8xbf16>
    %22 = vector.shape_cast %21 : vector<1x12x8xbf16> to vector<12x8xbf16>
    %cst_21 = arith.constant dense<0.000000e+00> : vector<12x361xf32>
    %23 = tpu.matmul %22, %20, %cst_21 {dimension_numbers = #tpu.dot_dimension_numbers<[1], [0], [0], [1], [0, 0, 1, 1], [], []>} : vector<12x8xbf16>, vector<8x361xbf16>, vector<12x361xf32> -> vector<12x361xf32>
    %24 = arith.addf %16, %23 : vector<12x361xf32>
    %c0_22 = arith.constant 0 : index
    %c0_23 = arith.constant 0 : index
    %c19 = arith.constant 19 : index
    %25 = vector.load %arg1[%c0_22, %c0_23, %c19] : memref<1x8x401xbf16, #tpu.memory_space<vmem>>, vector<1x8x361xbf16>
    %26 = vector.shape_cast %25 : vector<1x8x361xbf16> to vector<8x361xbf16>
    %27 = vector.broadcast %0 : vector<1x361xbf16> to vector<8x361xbf16>
    %28 = arith.mulf %26, %27 : vector<8x361xbf16>
    %c3 = arith.constant 3 : index
    %c0_24 = arith.constant 0 : index
    %c0_25 = arith.constant 0 : index
    %29 = vector.load %arg2[%c3, %c0_24, %c0_25] : memref<9x12x8xbf16, #tpu.memory_space<vmem>>, vector<1x12x8xbf16>
    %30 = vector.shape_cast %29 : vector<1x12x8xbf16> to vector<12x8xbf16>
    %cst_26 = arith.constant dense<0.000000e+00> : vector<12x361xf32>
    %31 = tpu.matmul %30, %28, %cst_26 {dimension_numbers = #tpu.dot_dimension_numbers<[1], [0], [0], [1], [0, 0, 1, 1], [], []>} : vector<12x8xbf16>, vector<8x361xbf16>, vector<12x361xf32> -> vector<12x361xf32>
    %32 = arith.addf %24, %31 : vector<12x361xf32>
    %c0_27 = arith.constant 0 : index
    %c0_28 = arith.constant 0 : index
    %c20 = arith.constant 20 : index
    %33 = vector.load %arg1[%c0_27, %c0_28, %c20] : memref<1x8x401xbf16, #tpu.memory_space<vmem>>, vector<1x8x361xbf16>
    %34 = vector.shape_cast %33 : vector<1x8x361xbf16> to vector<8x361xbf16>
    %c4 = arith.constant 4 : index
    %c0_29 = arith.constant 0 : index
    %c0_30 = arith.constant 0 : index
    %35 = vector.load %arg2[%c4, %c0_29, %c0_30] : memref<9x12x8xbf16, #tpu.memory_space<vmem>>, vector<1x12x8xbf16>
    %36 = vector.shape_cast %35 : vector<1x12x8xbf16> to vector<12x8xbf16>
    %cst_31 = arith.constant dense<0.000000e+00> : vector<12x361xf32>
    %37 = tpu.matmul %36, %34, %cst_31 {dimension_numbers = #tpu.dot_dimension_numbers<[1], [0], [0], [1], [0, 0, 1, 1], [], []>} : vector<12x8xbf16>, vector<8x361xbf16>, vector<12x361xf32> -> vector<12x361xf32>
    %38 = arith.addf %32, %37 : vector<12x361xf32>
    %c0_32 = arith.constant 0 : index
    %c0_33 = arith.constant 0 : index
    %c21 = arith.constant 21 : index
    %39 = vector.load %arg1[%c0_32, %c0_33, %c21] : memref<1x8x401xbf16, #tpu.memory_space<vmem>>, vector<1x8x361xbf16>
    %40 = vector.shape_cast %39 : vector<1x8x361xbf16> to vector<8x361xbf16>
    %41 = vector.broadcast %1 : vector<1x361xbf16> to vector<8x361xbf16>
    %42 = arith.mulf %40, %41 : vector<8x361xbf16>
    %c5 = arith.constant 5 : index
    %c0_34 = arith.constant 0 : index
    %c0_35 = arith.constant 0 : index
    %43 = vector.load %arg2[%c5, %c0_34, %c0_35] : memref<9x12x8xbf16, #tpu.memory_space<vmem>>, vector<1x12x8xbf16>
    %44 = vector.shape_cast %43 : vector<1x12x8xbf16> to vector<12x8xbf16>
    %cst_36 = arith.constant dense<0.000000e+00> : vector<12x361xf32>
    %45 = tpu.matmul %44, %42, %cst_36 {dimension_numbers = #tpu.dot_dimension_numbers<[1], [0], [0], [1], [0, 0, 1, 1], [], []>} : vector<12x8xbf16>, vector<8x361xbf16>, vector<12x361xf32> -> vector<12x361xf32>
    %46 = arith.addf %38, %45 : vector<12x361xf32>
    %c0_37 = arith.constant 0 : index
    %c0_38 = arith.constant 0 : index
    %c38 = arith.constant 38 : index
    %47 = vector.load %arg1[%c0_37, %c0_38, %c38] : memref<1x8x401xbf16, #tpu.memory_space<vmem>>, vector<1x8x361xbf16>
    %48 = vector.shape_cast %47 : vector<1x8x361xbf16> to vector<8x361xbf16>
    %49 = vector.broadcast %0 : vector<1x361xbf16> to vector<8x361xbf16>
    %50 = arith.mulf %48, %49 : vector<8x361xbf16>
    %c6 = arith.constant 6 : index
    %c0_39 = arith.constant 0 : index
    %c0_40 = arith.constant 0 : index
    %51 = vector.load %arg2[%c6, %c0_39, %c0_40] : memref<9x12x8xbf16, #tpu.memory_space<vmem>>, vector<1x12x8xbf16>
    %52 = vector.shape_cast %51 : vector<1x12x8xbf16> to vector<12x8xbf16>
    %cst_41 = arith.constant dense<0.000000e+00> : vector<12x361xf32>
    %53 = tpu.matmul %52, %50, %cst_41 {dimension_numbers = #tpu.dot_dimension_numbers<[1], [0], [0], [1], [0, 0, 1, 1], [], []>} : vector<12x8xbf16>, vector<8x361xbf16>, vector<12x361xf32> -> vector<12x361xf32>
    %54 = arith.addf %46, %53 : vector<12x361xf32>
    %c0_42 = arith.constant 0 : index
    %c0_43 = arith.constant 0 : index
    %c39 = arith.constant 39 : index
    %55 = vector.load %arg1[%c0_42, %c0_43, %c39] : memref<1x8x401xbf16, #tpu.memory_space<vmem>>, vector<1x8x361xbf16>
    %56 = vector.shape_cast %55 : vector<1x8x361xbf16> to vector<8x361xbf16>
    %c7 = arith.constant 7 : index
    %c0_44 = arith.constant 0 : index
    %c0_45 = arith.constant 0 : index
    %57 = vector.load %arg2[%c7, %c0_44, %c0_45] : memref<9x12x8xbf16, #tpu.memory_space<vmem>>, vector<1x12x8xbf16>
    %58 = vector.shape_cast %57 : vector<1x12x8xbf16> to vector<12x8xbf16>
    %cst_46 = arith.constant dense<0.000000e+00> : vector<12x361xf32>
    %59 = tpu.matmul %58, %56, %cst_46 {dimension_numbers = #tpu.dot_dimension_numbers<[1], [0], [0], [1], [0, 0, 1, 1], [], []>} : vector<12x8xbf16>, vector<8x361xbf16>, vector<12x361xf32> -> vector<12x361xf32>
    %60 = arith.addf %54, %59 : vector<12x361xf32>
    %c0_47 = arith.constant 0 : index
    %c0_48 = arith.constant 0 : index
    %c40 = arith.constant 40 : index
    %61 = vector.load %arg1[%c0_47, %c0_48, %c40] : memref<1x8x401xbf16, #tpu.memory_space<vmem>>, vector<1x8x361xbf16>
    %62 = vector.shape_cast %61 : vector<1x8x361xbf16> to vector<8x361xbf16>
    %63 = vector.broadcast %1 : vector<1x361xbf16> to vector<8x361xbf16>
    %64 = arith.mulf %62, %63 : vector<8x361xbf16>
    %c8 = arith.constant 8 : index
    %c0_49 = arith.constant 0 : index
    %c0_50 = arith.constant 0 : index
    %65 = vector.load %arg2[%c8, %c0_49, %c0_50] : memref<9x12x8xbf16, #tpu.memory_space<vmem>>, vector<1x12x8xbf16>
    %66 = vector.shape_cast %65 : vector<1x12x8xbf16> to vector<12x8xbf16>
    %cst_51 = arith.constant dense<0.000000e+00> : vector<12x361xf32>
    %67 = tpu.matmul %66, %64, %cst_51 {dimension_numbers = #tpu.dot_dimension_numbers<[1], [0], [0], [1], [0, 0, 1, 1], [], []>} : vector<12x8xbf16>, vector<8x361xbf16>, vector<12x361xf32> -> vector<12x361xf32>
    %68 = arith.addf %60, %67 : vector<12x361xf32>
    %c0_52 = arith.constant 0 : index
    %c0_53 = arith.constant 0 : index
    %69 = vector.load %arg3[%c0_52, %c0_53] : memref<12x1xf32, #tpu.memory_space<vmem>>, vector<12x1xf32>
    %70 = vector.broadcast %69 : vector<12x1xf32> to vector<12x361xf32>
    %71 = arith.addf %68, %70 : vector<12x361xf32>
    %72 = arith.truncf %71 : vector<12x361xf32> to vector<12x361xbf16>
    %c0_54 = arith.constant 0 : index
    %c0_55 = arith.constant 0 : index
    %c0_56 = arith.constant 0 : index
    %73 = vector.load %arg6[%c0_54, %c0_55, %c0_56] : memref<1x12x361xbf16, #tpu.memory_space<vmem>>, vector<1x12x361xbf16>
    %74 = vector.shape_cast %73 : vector<1x12x361xbf16> to vector<12x361xbf16>
    %75 = vector.shape_cast %72 : vector<12x361xbf16> to vector<1x12x361xbf16>
    tpu.vector_store %arg6[%c0_54, %c0_55, %c0_56], %75 {strides = array<i32>} : memref<1x12x361xbf16, #tpu.memory_space<vmem>>, vector<1x12x361xbf16>,
    return
  }
  func.func @transform_0(%arg0: i32) -> (i32, i32, i32) {
    %c0_i32 = arith.constant 0 : i32
    %c0_i32_0 = arith.constant 0 : i32
    %c0_i32_1 = arith.constant 0 : i32
    return %arg0, %c0_i32, %c0_i32_0 : i32, i32, i32
  }
  func.func @transform_1(%arg0: i32) -> (i32, i32, i32) {
    %c0_i32 = arith.constant 0 : i32
    %c0_i32_0 = arith.constant 0 : i32
    %c0_i32_1 = arith.constant 0 : i32
    %c0_i32_2 = arith.constant 0 : i32
    return %c0_i32, %c0_i32_0, %c0_i32_1 : i32, i32, i32
  }
  func.func @transform_2(%arg0: i32) -> (i32, i32) {
    %c0_i32 = arith.constant 0 : i32
    %c0_i32_0 = arith.constant 0 : i32
    %c0_i32_1 = arith.constant 0 : i32
    return %c0_i32, %c0_i32_0 : i32, i32
  }
  func.func @transform_3(%arg0: i32) -> (i32, i32) {
    %c0_i32 = arith.constant 0 : i32
    %c0_i32_0 = arith.constant 0 : i32
    %c0_i32_1 = arith.constant 0 : i32
    return %c0_i32, %c0_i32_0 : i32, i32
  }
  func.func @transform_4(%arg0: i32) -> (i32, i32) {
    %c0_i32 = arith.constant 0 : i32
    %c0_i32_0 = arith.constant 0 : i32
    %c0_i32_1 = arith.constant 0 : i32
    return %c0_i32, %c0_i32_0 : i32, i32
  }
  func.func @transform_5(%arg0: i32) -> (i32, i32, i32) {
    %c0_i32 = arith.constant 0 : i32
    %c0_i32_0 = arith.constant 0 : i32
    %c0_i32_1 = arith.constant 0 : i32
    return %arg0, %c0_i32, %c0_i32_0 : i32, i32, i32
  }
}

module attributes {stable_mosaic.version = 11 : i64} {
  func.func @_conv3x3_kernel(%arg0: i32, %arg1: memref<1x24x401xbf16, #tpu.memory_space<vmem>>, %arg2: memref<9x8x24xbf16, #tpu.memory_space<vmem>>, %arg3: memref<8x1xf32, #tpu.memory_space<vmem>>, %arg4: memref<1x361xbf16, #tpu.memory_space<vmem>>, %arg5: memref<1x361xbf16, #tpu.memory_space<vmem>>, %arg6: memref<1x8x361xbf16, #tpu.memory_space<vmem>>) attributes {dimension_semantics = [#tpu.dimension_semantics<parallel>], iteration_bounds = array<i64: 2>, scalar_prefetch = 0 : i64, scratch_operands = 0 : i64, tpu.core_type = #tpu.core_type<tc>, window_params = [{transform_indices = @transform_0, window_bounds = array<i64: 1, 24, 401>}, {pipeline_mode = #tpu.pipeline_mode<synchronous>, transform_indices = @transform_1, window_bounds = array<i64: 9, 8, 24>}, {pipeline_mode = #tpu.pipeline_mode<synchronous>, transform_indices = @transform_2, window_bounds = array<i64: 8, 1>}, {pipeline_mode = #tpu.pipeline_mode<synchronous>, transform_indices = @transform_3, window_bounds = array<i64: 1, 361>}, {pipeline_mode = #tpu.pipeline_mode<synchronous>, transform_indices = @transform_4, window_bounds = array<i64: 1, 361>}, {transform_indices = @transform_5, window_bounds = array<i64: 1, 8, 361>}]} {
    %c0 = arith.constant 0 : index
    %c0_0 = arith.constant 0 : index
    %0 = vector.load %arg4[%c0, %c0_0] : memref<1x361xbf16, #tpu.memory_space<vmem>>, vector<1x361xbf16>
    %c0_1 = arith.constant 0 : index
    %c0_2 = arith.constant 0 : index
    %1 = vector.load %arg5[%c0_1, %c0_2] : memref<1x361xbf16, #tpu.memory_space<vmem>>, vector<1x361xbf16>
    %cst = arith.constant 0.000000e+00 : f32
    %2 = vector.broadcast %cst : f32 to vector<8x361xf32>
    %c0_3 = arith.constant 0 : index
    %c0_4 = arith.constant 0 : index
    %c0_5 = arith.constant 0 : index
    %3 = vector.load %arg1[%c0_3, %c0_4, %c0_5] : memref<1x24x401xbf16, #tpu.memory_space<vmem>>, vector<1x24x361xbf16>
    %4 = vector.shape_cast %3 : vector<1x24x361xbf16> to vector<24x361xbf16>
    %5 = vector.broadcast %0 : vector<1x361xbf16> to vector<24x361xbf16>
    %6 = arith.mulf %4, %5 : vector<24x361xbf16>
    %c0_6 = arith.constant 0 : index
    %c0_7 = arith.constant 0 : index
    %c0_8 = arith.constant 0 : index
    %7 = vector.load %arg2[%c0_6, %c0_7, %c0_8] : memref<9x8x24xbf16, #tpu.memory_space<vmem>>, vector<1x8x24xbf16>
    %8 = vector.shape_cast %7 : vector<1x8x24xbf16> to vector<8x24xbf16>
    %cst_9 = arith.constant dense<0.000000e+00> : vector<8x361xf32>
    %9 = tpu.matmul %8, %6, %cst_9 {dimension_numbers = #tpu.dot_dimension_numbers<[1], [0], [0], [1], [0, 0, 1, 1], [], []>} : vector<8x24xbf16>, vector<24x361xbf16>, vector<8x361xf32> -> vector<8x361xf32>
    %10 = arith.addf %2, %9 : vector<8x361xf32>
    %c0_10 = arith.constant 0 : index
    %c0_11 = arith.constant 0 : index
    %c1 = arith.constant 1 : index
    %11 = vector.load %arg1[%c0_10, %c0_11, %c1] : memref<1x24x401xbf16, #tpu.memory_space<vmem>>, vector<1x24x361xbf16>
    %12 = vector.shape_cast %11 : vector<1x24x361xbf16> to vector<24x361xbf16>
    %c1_12 = arith.constant 1 : index
    %c0_13 = arith.constant 0 : index
    %c0_14 = arith.constant 0 : index
    %13 = vector.load %arg2[%c1_12, %c0_13, %c0_14] : memref<9x8x24xbf16, #tpu.memory_space<vmem>>, vector<1x8x24xbf16>
    %14 = vector.shape_cast %13 : vector<1x8x24xbf16> to vector<8x24xbf16>
    %cst_15 = arith.constant dense<0.000000e+00> : vector<8x361xf32>
    %15 = tpu.matmul %14, %12, %cst_15 {dimension_numbers = #tpu.dot_dimension_numbers<[1], [0], [0], [1], [0, 0, 1, 1], [], []>} : vector<8x24xbf16>, vector<24x361xbf16>, vector<8x361xf32> -> vector<8x361xf32>
    %16 = arith.addf %10, %15 : vector<8x361xf32>
    %c0_16 = arith.constant 0 : index
    %c0_17 = arith.constant 0 : index
    %c2 = arith.constant 2 : index
    %17 = vector.load %arg1[%c0_16, %c0_17, %c2] : memref<1x24x401xbf16, #tpu.memory_space<vmem>>, vector<1x24x361xbf16>
    %18 = vector.shape_cast %17 : vector<1x24x361xbf16> to vector<24x361xbf16>
    %19 = vector.broadcast %1 : vector<1x361xbf16> to vector<24x361xbf16>
    %20 = arith.mulf %18, %19 : vector<24x361xbf16>
    %c2_18 = arith.constant 2 : index
    %c0_19 = arith.constant 0 : index
    %c0_20 = arith.constant 0 : index
    %21 = vector.load %arg2[%c2_18, %c0_19, %c0_20] : memref<9x8x24xbf16, #tpu.memory_space<vmem>>, vector<1x8x24xbf16>
    %22 = vector.shape_cast %21 : vector<1x8x24xbf16> to vector<8x24xbf16>
    %cst_21 = arith.constant dense<0.000000e+00> : vector<8x361xf32>
    %23 = tpu.matmul %22, %20, %cst_21 {dimension_numbers = #tpu.dot_dimension_numbers<[1], [0], [0], [1], [0, 0, 1, 1], [], []>} : vector<8x24xbf16>, vector<24x361xbf16>, vector<8x361xf32> -> vector<8x361xf32>
    %24 = arith.addf %16, %23 : vector<8x361xf32>
    %c0_22 = arith.constant 0 : index
    %c0_23 = arith.constant 0 : index
    %c19 = arith.constant 19 : index
    %25 = vector.load %arg1[%c0_22, %c0_23, %c19] : memref<1x24x401xbf16, #tpu.memory_space<vmem>>, vector<1x24x361xbf16>
    %26 = vector.shape_cast %25 : vector<1x24x361xbf16> to vector<24x361xbf16>
    %27 = vector.broadcast %0 : vector<1x361xbf16> to vector<24x361xbf16>
    %28 = arith.mulf %26, %27 : vector<24x361xbf16>
    %c3 = arith.constant 3 : index
    %c0_24 = arith.constant 0 : index
    %c0_25 = arith.constant 0 : index
    %29 = vector.load %arg2[%c3, %c0_24, %c0_25] : memref<9x8x24xbf16, #tpu.memory_space<vmem>>, vector<1x8x24xbf16>
    %30 = vector.shape_cast %29 : vector<1x8x24xbf16> to vector<8x24xbf16>
    %cst_26 = arith.constant dense<0.000000e+00> : vector<8x361xf32>
    %31 = tpu.matmul %30, %28, %cst_26 {dimension_numbers = #tpu.dot_dimension_numbers<[1], [0], [0], [1], [0, 0, 1, 1], [], []>} : vector<8x24xbf16>, vector<24x361xbf16>, vector<8x361xf32> -> vector<8x361xf32>
    %32 = arith.addf %24, %31 : vector<8x361xf32>
    %c0_27 = arith.constant 0 : index
    %c0_28 = arith.constant 0 : index
    %c20 = arith.constant 20 : index
    %33 = vector.load %arg1[%c0_27, %c0_28, %c20] : memref<1x24x401xbf16, #tpu.memory_space<vmem>>, vector<1x24x361xbf16>
    %34 = vector.shape_cast %33 : vector<1x24x361xbf16> to vector<24x361xbf16>
    %c4 = arith.constant 4 : index
    %c0_29 = arith.constant 0 : index
    %c0_30 = arith.constant 0 : index
    %35 = vector.load %arg2[%c4, %c0_29, %c0_30] : memref<9x8x24xbf16, #tpu.memory_space<vmem>>, vector<1x8x24xbf16>
    %36 = vector.shape_cast %35 : vector<1x8x24xbf16> to vector<8x24xbf16>
    %cst_31 = arith.constant dense<0.000000e+00> : vector<8x361xf32>
    %37 = tpu.matmul %36, %34, %cst_31 {dimension_numbers = #tpu.dot_dimension_numbers<[1], [0], [0], [1], [0, 0, 1, 1], [], []>} : vector<8x24xbf16>, vector<24x361xbf16>, vector<8x361xf32> -> vector<8x361xf32>
    %38 = arith.addf %32, %37 : vector<8x361xf32>
    %c0_32 = arith.constant 0 : index
    %c0_33 = arith.constant 0 : index
    %c21 = arith.constant 21 : index
    %39 = vector.load %arg1[%c0_32, %c0_33, %c21] : memref<1x24x401xbf16, #tpu.memory_space<vmem>>, vector<1x24x361xbf16>
    %40 = vector.shape_cast %39 : vector<1x24x361xbf16> to vector<24x361xbf16>
    %41 = vector.broadcast %1 : vector<1x361xbf16> to vector<24x361xbf16>
    %42 = arith.mulf %40, %41 : vector<24x361xbf16>
    %c5 = arith.constant 5 : index
    %c0_34 = arith.constant 0 : index
    %c0_35 = arith.constant 0 : index
    %43 = vector.load %arg2[%c5, %c0_34, %c0_35] : memref<9x8x24xbf16, #tpu.memory_space<vmem>>, vector<1x8x24xbf16>
    %44 = vector.shape_cast %43 : vector<1x8x24xbf16> to vector<8x24xbf16>
    %cst_36 = arith.constant dense<0.000000e+00> : vector<8x361xf32>
    %45 = tpu.matmul %44, %42, %cst_36 {dimension_numbers = #tpu.dot_dimension_numbers<[1], [0], [0], [1], [0, 0, 1, 1], [], []>} : vector<8x24xbf16>, vector<24x361xbf16>, vector<8x361xf32> -> vector<8x361xf32>
    %46 = arith.addf %38, %45 : vector<8x361xf32>
    %c0_37 = arith.constant 0 : index
    %c0_38 = arith.constant 0 : index
    %c38 = arith.constant 38 : index
    %47 = vector.load %arg1[%c0_37, %c0_38, %c38] : memref<1x24x401xbf16, #tpu.memory_space<vmem>>, vector<1x24x361xbf16>
    %48 = vector.shape_cast %47 : vector<1x24x361xbf16> to vector<24x361xbf16>
    %49 = vector.broadcast %0 : vector<1x361xbf16> to vector<24x361xbf16>
    %50 = arith.mulf %48, %49 : vector<24x361xbf16>
    %c6 = arith.constant 6 : index
    %c0_39 = arith.constant 0 : index
    %c0_40 = arith.constant 0 : index
    %51 = vector.load %arg2[%c6, %c0_39, %c0_40] : memref<9x8x24xbf16, #tpu.memory_space<vmem>>, vector<1x8x24xbf16>
    %52 = vector.shape_cast %51 : vector<1x8x24xbf16> to vector<8x24xbf16>
    %cst_41 = arith.constant dense<0.000000e+00> : vector<8x361xf32>
    %53 = tpu.matmul %52, %50, %cst_41 {dimension_numbers = #tpu.dot_dimension_numbers<[1], [0], [0], [1], [0, 0, 1, 1], [], []>} : vector<8x24xbf16>, vector<24x361xbf16>, vector<8x361xf32> -> vector<8x361xf32>
    %54 = arith.addf %46, %53 : vector<8x361xf32>
    %c0_42 = arith.constant 0 : index
    %c0_43 = arith.constant 0 : index
    %c39 = arith.constant 39 : index
    %55 = vector.load %arg1[%c0_42, %c0_43, %c39] : memref<1x24x401xbf16, #tpu.memory_space<vmem>>, vector<1x24x361xbf16>
    %56 = vector.shape_cast %55 : vector<1x24x361xbf16> to vector<24x361xbf16>
    %c7 = arith.constant 7 : index
    %c0_44 = arith.constant 0 : index
    %c0_45 = arith.constant 0 : index
    %57 = vector.load %arg2[%c7, %c0_44, %c0_45] : memref<9x8x24xbf16, #tpu.memory_space<vmem>>, vector<1x8x24xbf16>
    %58 = vector.shape_cast %57 : vector<1x8x24xbf16> to vector<8x24xbf16>
    %cst_46 = arith.constant dense<0.000000e+00> : vector<8x361xf32>
    %59 = tpu.matmul %58, %56, %cst_46 {dimension_numbers = #tpu.dot_dimension_numbers<[1], [0], [0], [1], [0, 0, 1, 1], [], []>} : vector<8x24xbf16>, vector<24x361xbf16>, vector<8x361xf32> -> vector<8x361xf32>
    %60 = arith.addf %54, %59 : vector<8x361xf32>
    %c0_47 = arith.constant 0 : index
    %c0_48 = arith.constant 0 : index
    %c40 = arith.constant 40 : index
    %61 = vector.load %arg1[%c0_47, %c0_48, %c40] : memref<1x24x401xbf16, #tpu.memory_space<vmem>>, vector<1x24x361xbf16>
    %62 = vector.shape_cast %61 : vector<1x24x361xbf16> to vector<24x361xbf16>
    %63 = vector.broadcast %1 : vector<1x361xbf16> to vector<24x361xbf16>
    %64 = arith.mulf %62, %63 : vector<24x361xbf16>
    %c8 = arith.constant 8 : index
    %c0_49 = arith.constant 0 : index
    %c0_50 = arith.constant 0 : index
    %65 = vector.load %arg2[%c8, %c0_49, %c0_50] : memref<9x8x24xbf16, #tpu.memory_space<vmem>>, vector<1x8x24xbf16>
    %66 = vector.shape_cast %65 : vector<1x8x24xbf16> to vector<8x24xbf16>
    %cst_51 = arith.constant dense<0.000000e+00> : vector<8x361xf32>
    %67 = tpu.matmul %66, %64, %cst_51 {dimension_numbers = #tpu.dot_dimension_numbers<[1], [0], [0], [1], [0, 0, 1, 1], [], []>} : vector<8x24xbf16>, vector<24x361xbf16>, vector<8x361xf32> -> vector<8x361xf32>
    %68 = arith.addf %60, %67 : vector<8x361xf32>
    %c0_52 = arith.constant 0 : index
    %c0_53 = arith.constant 0 : index
    %69 = vector.load %arg3[%c0_52, %c0_53] : memref<8x1xf32, #tpu.memory_space<vmem>>, vector<8x1xf32>
    %70 = vector.broadcast %69 : vector<8x1xf32> to vector<8x361xf32>
    %71 = arith.addf %68, %70 : vector<8x361xf32>
    %72 = arith.truncf %71 : vector<8x361xf32> to vector<8x361xbf16>
    %c0_54 = arith.constant 0 : index
    %c0_55 = arith.constant 0 : index
    %c0_56 = arith.constant 0 : index
    %73 = vector.load %arg6[%c0_54, %c0_55, %c0_56] : memref<1x8x361xbf16, #tpu.memory_space<vmem>>, vector<1x8x361xbf16>
    %74 = vector.shape_cast %73 : vector<1x8x361xbf16> to vector<8x361xbf16>
    %75 = vector.shape_cast %72 : vector<8x361xbf16> to vector<1x8x361xbf16>
    tpu.vector_store %arg6[%c0_54, %c0_55, %c0_56], %75 {strides = array<i32>} : memref<1x8x361xbf16, #tpu.memory_space<vmem>>, vector<1x8x361xbf16>,
    return
  }
  func.func @transform_0(%arg0: i32) -> (i32, i32, i32) {
    %c0_i32 = arith.constant 0 : i32
    %c0_i32_0 = arith.constant 0 : i32
    %c0_i32_1 = arith.constant 0 : i32
    return %arg0, %c0_i32, %c0_i32_0 : i32, i32, i32
  }
  func.func @transform_1(%arg0: i32) -> (i32, i32, i32) {
    %c0_i32 = arith.constant 0 : i32
    %c0_i32_0 = arith.constant 0 : i32
    %c0_i32_1 = arith.constant 0 : i32
    %c0_i32_2 = arith.constant 0 : i32
    return %c0_i32, %c0_i32_0, %c0_i32_1 : i32, i32, i32
  }
  func.func @transform_2(%arg0: i32) -> (i32, i32) {
    %c0_i32 = arith.constant 0 : i32
    %c0_i32_0 = arith.constant 0 : i32
    %c0_i32_1 = arith.constant 0 : i32
    return %c0_i32, %c0_i32_0 : i32, i32
  }
  func.func @transform_3(%arg0: i32) -> (i32, i32) {
    %c0_i32 = arith.constant 0 : i32
    %c0_i32_0 = arith.constant 0 : i32
    %c0_i32_1 = arith.constant 0 : i32
    return %c0_i32, %c0_i32_0 : i32, i32
  }
  func.func @transform_4(%arg0: i32) -> (i32, i32) {
    %c0_i32 = arith.constant 0 : i32
    %c0_i32_0 = arith.constant 0 : i32
    %c0_i32_1 = arith.constant 0 : i32
    return %c0_i32, %c0_i32_0 : i32, i32
  }
  func.func @transform_5(%arg0: i32) -> (i32, i32, i32) {
    %c0_i32 = arith.constant 0 : i32
    %c0_i32_0 = arith.constant 0 : i32
    %c0_i32_1 = arith.constant 0 : i32
    return %arg0, %c0_i32, %c0_i32_0 : i32, i32, i32
  }
}

module attributes {stable_mosaic.version = 11 : i64} {
  func.func @_conv3x3_kernel(%arg0: i32, %arg1: memref<1x8x401xbf16, #tpu.memory_space<vmem>>, %arg2: memref<9x8x8xbf16, #tpu.memory_space<vmem>>, %arg3: memref<8x1xf32, #tpu.memory_space<vmem>>, %arg4: memref<1x361xbf16, #tpu.memory_space<vmem>>, %arg5: memref<1x361xbf16, #tpu.memory_space<vmem>>, %arg6: memref<1x8x361xbf16, #tpu.memory_space<vmem>>) attributes {dimension_semantics = [#tpu.dimension_semantics<parallel>], iteration_bounds = array<i64: 2>, scalar_prefetch = 0 : i64, scratch_operands = 0 : i64, tpu.core_type = #tpu.core_type<tc>, window_params = [{transform_indices = @transform_0, window_bounds = array<i64: 1, 8, 401>}, {pipeline_mode = #tpu.pipeline_mode<synchronous>, transform_indices = @transform_1, window_bounds = array<i64: 9, 8, 8>}, {pipeline_mode = #tpu.pipeline_mode<synchronous>, transform_indices = @transform_2, window_bounds = array<i64: 8, 1>}, {pipeline_mode = #tpu.pipeline_mode<synchronous>, transform_indices = @transform_3, window_bounds = array<i64: 1, 361>}, {pipeline_mode = #tpu.pipeline_mode<synchronous>, transform_indices = @transform_4, window_bounds = array<i64: 1, 361>}, {transform_indices = @transform_5, window_bounds = array<i64: 1, 8, 361>}]} {
    %c0 = arith.constant 0 : index
    %c0_0 = arith.constant 0 : index
    %0 = vector.load %arg4[%c0, %c0_0] : memref<1x361xbf16, #tpu.memory_space<vmem>>, vector<1x361xbf16>
    %c0_1 = arith.constant 0 : index
    %c0_2 = arith.constant 0 : index
    %1 = vector.load %arg5[%c0_1, %c0_2] : memref<1x361xbf16, #tpu.memory_space<vmem>>, vector<1x361xbf16>
    %cst = arith.constant 0.000000e+00 : f32
    %2 = vector.broadcast %cst : f32 to vector<8x361xf32>
    %c0_3 = arith.constant 0 : index
    %c0_4 = arith.constant 0 : index
    %c0_5 = arith.constant 0 : index
    %3 = vector.load %arg1[%c0_3, %c0_4, %c0_5] : memref<1x8x401xbf16, #tpu.memory_space<vmem>>, vector<1x8x361xbf16>
    %4 = vector.shape_cast %3 : vector<1x8x361xbf16> to vector<8x361xbf16>
    %5 = vector.broadcast %0 : vector<1x361xbf16> to vector<8x361xbf16>
    %6 = arith.mulf %4, %5 : vector<8x361xbf16>
    %c0_6 = arith.constant 0 : index
    %c0_7 = arith.constant 0 : index
    %c0_8 = arith.constant 0 : index
    %7 = vector.load %arg2[%c0_6, %c0_7, %c0_8] : memref<9x8x8xbf16, #tpu.memory_space<vmem>>, vector<1x8x8xbf16>
    %8 = vector.shape_cast %7 : vector<1x8x8xbf16> to vector<8x8xbf16>
    %cst_9 = arith.constant dense<0.000000e+00> : vector<8x361xf32>
    %9 = tpu.matmul %8, %6, %cst_9 {dimension_numbers = #tpu.dot_dimension_numbers<[1], [0], [0], [1], [0, 0, 1, 1], [], []>} : vector<8x8xbf16>, vector<8x361xbf16>, vector<8x361xf32> -> vector<8x361xf32>
    %10 = arith.addf %2, %9 : vector<8x361xf32>
    %c0_10 = arith.constant 0 : index
    %c0_11 = arith.constant 0 : index
    %c1 = arith.constant 1 : index
    %11 = vector.load %arg1[%c0_10, %c0_11, %c1] : memref<1x8x401xbf16, #tpu.memory_space<vmem>>, vector<1x8x361xbf16>
    %12 = vector.shape_cast %11 : vector<1x8x361xbf16> to vector<8x361xbf16>
    %c1_12 = arith.constant 1 : index
    %c0_13 = arith.constant 0 : index
    %c0_14 = arith.constant 0 : index
    %13 = vector.load %arg2[%c1_12, %c0_13, %c0_14] : memref<9x8x8xbf16, #tpu.memory_space<vmem>>, vector<1x8x8xbf16>
    %14 = vector.shape_cast %13 : vector<1x8x8xbf16> to vector<8x8xbf16>
    %cst_15 = arith.constant dense<0.000000e+00> : vector<8x361xf32>
    %15 = tpu.matmul %14, %12, %cst_15 {dimension_numbers = #tpu.dot_dimension_numbers<[1], [0], [0], [1], [0, 0, 1, 1], [], []>} : vector<8x8xbf16>, vector<8x361xbf16>, vector<8x361xf32> -> vector<8x361xf32>
    %16 = arith.addf %10, %15 : vector<8x361xf32>
    %c0_16 = arith.constant 0 : index
    %c0_17 = arith.constant 0 : index
    %c2 = arith.constant 2 : index
    %17 = vector.load %arg1[%c0_16, %c0_17, %c2] : memref<1x8x401xbf16, #tpu.memory_space<vmem>>, vector<1x8x361xbf16>
    %18 = vector.shape_cast %17 : vector<1x8x361xbf16> to vector<8x361xbf16>
    %19 = vector.broadcast %1 : vector<1x361xbf16> to vector<8x361xbf16>
    %20 = arith.mulf %18, %19 : vector<8x361xbf16>
    %c2_18 = arith.constant 2 : index
    %c0_19 = arith.constant 0 : index
    %c0_20 = arith.constant 0 : index
    %21 = vector.load %arg2[%c2_18, %c0_19, %c0_20] : memref<9x8x8xbf16, #tpu.memory_space<vmem>>, vector<1x8x8xbf16>
    %22 = vector.shape_cast %21 : vector<1x8x8xbf16> to vector<8x8xbf16>
    %cst_21 = arith.constant dense<0.000000e+00> : vector<8x361xf32>
    %23 = tpu.matmul %22, %20, %cst_21 {dimension_numbers = #tpu.dot_dimension_numbers<[1], [0], [0], [1], [0, 0, 1, 1], [], []>} : vector<8x8xbf16>, vector<8x361xbf16>, vector<8x361xf32> -> vector<8x361xf32>
    %24 = arith.addf %16, %23 : vector<8x361xf32>
    %c0_22 = arith.constant 0 : index
    %c0_23 = arith.constant 0 : index
    %c19 = arith.constant 19 : index
    %25 = vector.load %arg1[%c0_22, %c0_23, %c19] : memref<1x8x401xbf16, #tpu.memory_space<vmem>>, vector<1x8x361xbf16>
    %26 = vector.shape_cast %25 : vector<1x8x361xbf16> to vector<8x361xbf16>
    %27 = vector.broadcast %0 : vector<1x361xbf16> to vector<8x361xbf16>
    %28 = arith.mulf %26, %27 : vector<8x361xbf16>
    %c3 = arith.constant 3 : index
    %c0_24 = arith.constant 0 : index
    %c0_25 = arith.constant 0 : index
    %29 = vector.load %arg2[%c3, %c0_24, %c0_25] : memref<9x8x8xbf16, #tpu.memory_space<vmem>>, vector<1x8x8xbf16>
    %30 = vector.shape_cast %29 : vector<1x8x8xbf16> to vector<8x8xbf16>
    %cst_26 = arith.constant dense<0.000000e+00> : vector<8x361xf32>
    %31 = tpu.matmul %30, %28, %cst_26 {dimension_numbers = #tpu.dot_dimension_numbers<[1], [0], [0], [1], [0, 0, 1, 1], [], []>} : vector<8x8xbf16>, vector<8x361xbf16>, vector<8x361xf32> -> vector<8x361xf32>
    %32 = arith.addf %24, %31 : vector<8x361xf32>
    %c0_27 = arith.constant 0 : index
    %c0_28 = arith.constant 0 : index
    %c20 = arith.constant 20 : index
    %33 = vector.load %arg1[%c0_27, %c0_28, %c20] : memref<1x8x401xbf16, #tpu.memory_space<vmem>>, vector<1x8x361xbf16>
    %34 = vector.shape_cast %33 : vector<1x8x361xbf16> to vector<8x361xbf16>
    %c4 = arith.constant 4 : index
    %c0_29 = arith.constant 0 : index
    %c0_30 = arith.constant 0 : index
    %35 = vector.load %arg2[%c4, %c0_29, %c0_30] : memref<9x8x8xbf16, #tpu.memory_space<vmem>>, vector<1x8x8xbf16>
    %36 = vector.shape_cast %35 : vector<1x8x8xbf16> to vector<8x8xbf16>
    %cst_31 = arith.constant dense<0.000000e+00> : vector<8x361xf32>
    %37 = tpu.matmul %36, %34, %cst_31 {dimension_numbers = #tpu.dot_dimension_numbers<[1], [0], [0], [1], [0, 0, 1, 1], [], []>} : vector<8x8xbf16>, vector<8x361xbf16>, vector<8x361xf32> -> vector<8x361xf32>
    %38 = arith.addf %32, %37 : vector<8x361xf32>
    %c0_32 = arith.constant 0 : index
    %c0_33 = arith.constant 0 : index
    %c21 = arith.constant 21 : index
    %39 = vector.load %arg1[%c0_32, %c0_33, %c21] : memref<1x8x401xbf16, #tpu.memory_space<vmem>>, vector<1x8x361xbf16>
    %40 = vector.shape_cast %39 : vector<1x8x361xbf16> to vector<8x361xbf16>
    %41 = vector.broadcast %1 : vector<1x361xbf16> to vector<8x361xbf16>
    %42 = arith.mulf %40, %41 : vector<8x361xbf16>
    %c5 = arith.constant 5 : index
    %c0_34 = arith.constant 0 : index
    %c0_35 = arith.constant 0 : index
    %43 = vector.load %arg2[%c5, %c0_34, %c0_35] : memref<9x8x8xbf16, #tpu.memory_space<vmem>>, vector<1x8x8xbf16>
    %44 = vector.shape_cast %43 : vector<1x8x8xbf16> to vector<8x8xbf16>
    %cst_36 = arith.constant dense<0.000000e+00> : vector<8x361xf32>
    %45 = tpu.matmul %44, %42, %cst_36 {dimension_numbers = #tpu.dot_dimension_numbers<[1], [0], [0], [1], [0, 0, 1, 1], [], []>} : vector<8x8xbf16>, vector<8x361xbf16>, vector<8x361xf32> -> vector<8x361xf32>
    %46 = arith.addf %38, %45 : vector<8x361xf32>
    %c0_37 = arith.constant 0 : index
    %c0_38 = arith.constant 0 : index
    %c38 = arith.constant 38 : index
    %47 = vector.load %arg1[%c0_37, %c0_38, %c38] : memref<1x8x401xbf16, #tpu.memory_space<vmem>>, vector<1x8x361xbf16>
    %48 = vector.shape_cast %47 : vector<1x8x361xbf16> to vector<8x361xbf16>
    %49 = vector.broadcast %0 : vector<1x361xbf16> to vector<8x361xbf16>
    %50 = arith.mulf %48, %49 : vector<8x361xbf16>
    %c6 = arith.constant 6 : index
    %c0_39 = arith.constant 0 : index
    %c0_40 = arith.constant 0 : index
    %51 = vector.load %arg2[%c6, %c0_39, %c0_40] : memref<9x8x8xbf16, #tpu.memory_space<vmem>>, vector<1x8x8xbf16>
    %52 = vector.shape_cast %51 : vector<1x8x8xbf16> to vector<8x8xbf16>
    %cst_41 = arith.constant dense<0.000000e+00> : vector<8x361xf32>
    %53 = tpu.matmul %52, %50, %cst_41 {dimension_numbers = #tpu.dot_dimension_numbers<[1], [0], [0], [1], [0, 0, 1, 1], [], []>} : vector<8x8xbf16>, vector<8x361xbf16>, vector<8x361xf32> -> vector<8x361xf32>
    %54 = arith.addf %46, %53 : vector<8x361xf32>
    %c0_42 = arith.constant 0 : index
    %c0_43 = arith.constant 0 : index
    %c39 = arith.constant 39 : index
    %55 = vector.load %arg1[%c0_42, %c0_43, %c39] : memref<1x8x401xbf16, #tpu.memory_space<vmem>>, vector<1x8x361xbf16>
    %56 = vector.shape_cast %55 : vector<1x8x361xbf16> to vector<8x361xbf16>
    %c7 = arith.constant 7 : index
    %c0_44 = arith.constant 0 : index
    %c0_45 = arith.constant 0 : index
    %57 = vector.load %arg2[%c7, %c0_44, %c0_45] : memref<9x8x8xbf16, #tpu.memory_space<vmem>>, vector<1x8x8xbf16>
    %58 = vector.shape_cast %57 : vector<1x8x8xbf16> to vector<8x8xbf16>
    %cst_46 = arith.constant dense<0.000000e+00> : vector<8x361xf32>
    %59 = tpu.matmul %58, %56, %cst_46 {dimension_numbers = #tpu.dot_dimension_numbers<[1], [0], [0], [1], [0, 0, 1, 1], [], []>} : vector<8x8xbf16>, vector<8x361xbf16>, vector<8x361xf32> -> vector<8x361xf32>
    %60 = arith.addf %54, %59 : vector<8x361xf32>
    %c0_47 = arith.constant 0 : index
    %c0_48 = arith.constant 0 : index
    %c40 = arith.constant 40 : index
    %61 = vector.load %arg1[%c0_47, %c0_48, %c40] : memref<1x8x401xbf16, #tpu.memory_space<vmem>>, vector<1x8x361xbf16>
    %62 = vector.shape_cast %61 : vector<1x8x361xbf16> to vector<8x361xbf16>
    %63 = vector.broadcast %1 : vector<1x361xbf16> to vector<8x361xbf16>
    %64 = arith.mulf %62, %63 : vector<8x361xbf16>
    %c8 = arith.constant 8 : index
    %c0_49 = arith.constant 0 : index
    %c0_50 = arith.constant 0 : index
    %65 = vector.load %arg2[%c8, %c0_49, %c0_50] : memref<9x8x8xbf16, #tpu.memory_space<vmem>>, vector<1x8x8xbf16>
    %66 = vector.shape_cast %65 : vector<1x8x8xbf16> to vector<8x8xbf16>
    %cst_51 = arith.constant dense<0.000000e+00> : vector<8x361xf32>
    %67 = tpu.matmul %66, %64, %cst_51 {dimension_numbers = #tpu.dot_dimension_numbers<[1], [0], [0], [1], [0, 0, 1, 1], [], []>} : vector<8x8xbf16>, vector<8x361xbf16>, vector<8x361xf32> -> vector<8x361xf32>
    %68 = arith.addf %60, %67 : vector<8x361xf32>
    %c0_52 = arith.constant 0 : index
    %c0_53 = arith.constant 0 : index
    %69 = vector.load %arg3[%c0_52, %c0_53] : memref<8x1xf32, #tpu.memory_space<vmem>>, vector<8x1xf32>
    %70 = vector.broadcast %69 : vector<8x1xf32> to vector<8x361xf32>
    %71 = arith.addf %68, %70 : vector<8x361xf32>
    %72 = arith.truncf %71 : vector<8x361xf32> to vector<8x361xbf16>
    %c0_54 = arith.constant 0 : index
    %c0_55 = arith.constant 0 : index
    %c0_56 = arith.constant 0 : index
    %73 = vector.load %arg6[%c0_54, %c0_55, %c0_56] : memref<1x8x361xbf16, #tpu.memory_space<vmem>>, vector<1x8x361xbf16>
    %74 = vector.shape_cast %73 : vector<1x8x361xbf16> to vector<8x361xbf16>
    %75 = vector.shape_cast %72 : vector<8x361xbf16> to vector<1x8x361xbf16>
    tpu.vector_store %arg6[%c0_54, %c0_55, %c0_56], %75 {strides = array<i32>} : memref<1x8x361xbf16, #tpu.memory_space<vmem>>, vector<1x8x361xbf16>,
    return
  }
  func.func @transform_0(%arg0: i32) -> (i32, i32, i32) {
    %c0_i32 = arith.constant 0 : i32
    %c0_i32_0 = arith.constant 0 : i32
    %c0_i32_1 = arith.constant 0 : i32
    return %arg0, %c0_i32, %c0_i32_0 : i32, i32, i32
  }
  func.func @transform_1(%arg0: i32) -> (i32, i32, i32) {
    %c0_i32 = arith.constant 0 : i32
    %c0_i32_0 = arith.constant 0 : i32
    %c0_i32_1 = arith.constant 0 : i32
    %c0_i32_2 = arith.constant 0 : i32
    return %c0_i32, %c0_i32_0, %c0_i32_1 : i32, i32, i32
  }
  func.func @transform_2(%arg0: i32) -> (i32, i32) {
    %c0_i32 = arith.constant 0 : i32
    %c0_i32_0 = arith.constant 0 : i32
    %c0_i32_1 = arith.constant 0 : i32
    return %c0_i32, %c0_i32_0 : i32, i32
  }
  func.func @transform_3(%arg0: i32) -> (i32, i32) {
    %c0_i32 = arith.constant 0 : i32
    %c0_i32_0 = arith.constant 0 : i32
    %c0_i32_1 = arith.constant 0 : i32
    return %c0_i32, %c0_i32_0 : i32, i32
  }
  func.func @transform_4(%arg0: i32) -> (i32, i32) {
    %c0_i32 = arith.constant 0 : i32
    %c0_i32_0 = arith.constant 0 : i32
    %c0_i32_1 = arith.constant 0 : i32
    return %c0_i32, %c0_i32_0 : i32, i32
  }
  func.func @transform_5(%arg0: i32) -> (i32, i32, i32) {
    %c0_i32 = arith.constant 0 : i32
    %c0_i32_0 = arith.constant 0 : i32
    %c0_i32_1 = arith.constant 0 : i32
    return %arg0, %c0_i32, %c0_i32_0 : i32, i32, i32
  }
}

module attributes {stable_mosaic.version = 11 : i64} {
  func.func @_conv3x3_kernel(%arg0: i32, %arg1: memref<1x8x401xbf16, #tpu.memory_space<vmem>>, %arg2: memref<9x4x8xbf16, #tpu.memory_space<vmem>>, %arg3: memref<4x1xf32, #tpu.memory_space<vmem>>, %arg4: memref<1x361xbf16, #tpu.memory_space<vmem>>, %arg5: memref<1x361xbf16, #tpu.memory_space<vmem>>, %arg6: memref<1x4x361xbf16, #tpu.memory_space<vmem>>) attributes {dimension_semantics = [#tpu.dimension_semantics<parallel>], iteration_bounds = array<i64: 2>, scalar_prefetch = 0 : i64, scratch_operands = 0 : i64, tpu.core_type = #tpu.core_type<tc>, window_params = [{transform_indices = @transform_0, window_bounds = array<i64: 1, 8, 401>}, {pipeline_mode = #tpu.pipeline_mode<synchronous>, transform_indices = @transform_1, window_bounds = array<i64: 9, 4, 8>}, {pipeline_mode = #tpu.pipeline_mode<synchronous>, transform_indices = @transform_2, window_bounds = array<i64: 4, 1>}, {pipeline_mode = #tpu.pipeline_mode<synchronous>, transform_indices = @transform_3, window_bounds = array<i64: 1, 361>}, {pipeline_mode = #tpu.pipeline_mode<synchronous>, transform_indices = @transform_4, window_bounds = array<i64: 1, 361>}, {transform_indices = @transform_5, window_bounds = array<i64: 1, 4, 361>}]} {
    %c0 = arith.constant 0 : index
    %c0_0 = arith.constant 0 : index
    %0 = vector.load %arg4[%c0, %c0_0] : memref<1x361xbf16, #tpu.memory_space<vmem>>, vector<1x361xbf16>
    %c0_1 = arith.constant 0 : index
    %c0_2 = arith.constant 0 : index
    %1 = vector.load %arg5[%c0_1, %c0_2] : memref<1x361xbf16, #tpu.memory_space<vmem>>, vector<1x361xbf16>
    %cst = arith.constant 0.000000e+00 : f32
    %2 = vector.broadcast %cst : f32 to vector<4x361xf32>
    %c0_3 = arith.constant 0 : index
    %c0_4 = arith.constant 0 : index
    %c0_5 = arith.constant 0 : index
    %3 = vector.load %arg1[%c0_3, %c0_4, %c0_5] : memref<1x8x401xbf16, #tpu.memory_space<vmem>>, vector<1x8x361xbf16>
    %4 = vector.shape_cast %3 : vector<1x8x361xbf16> to vector<8x361xbf16>
    %5 = vector.broadcast %0 : vector<1x361xbf16> to vector<8x361xbf16>
    %6 = arith.mulf %4, %5 : vector<8x361xbf16>
    %c0_6 = arith.constant 0 : index
    %c0_7 = arith.constant 0 : index
    %c0_8 = arith.constant 0 : index
    %7 = vector.load %arg2[%c0_6, %c0_7, %c0_8] : memref<9x4x8xbf16, #tpu.memory_space<vmem>>, vector<1x4x8xbf16>
    %8 = vector.shape_cast %7 : vector<1x4x8xbf16> to vector<4x8xbf16>
    %cst_9 = arith.constant dense<0.000000e+00> : vector<4x361xf32>
    %9 = tpu.matmul %8, %6, %cst_9 {dimension_numbers = #tpu.dot_dimension_numbers<[1], [0], [0], [1], [0, 0, 1, 1], [], []>} : vector<4x8xbf16>, vector<8x361xbf16>, vector<4x361xf32> -> vector<4x361xf32>
    %10 = arith.addf %2, %9 : vector<4x361xf32>
    %c0_10 = arith.constant 0 : index
    %c0_11 = arith.constant 0 : index
    %c1 = arith.constant 1 : index
    %11 = vector.load %arg1[%c0_10, %c0_11, %c1] : memref<1x8x401xbf16, #tpu.memory_space<vmem>>, vector<1x8x361xbf16>
    %12 = vector.shape_cast %11 : vector<1x8x361xbf16> to vector<8x361xbf16>
    %c1_12 = arith.constant 1 : index
    %c0_13 = arith.constant 0 : index
    %c0_14 = arith.constant 0 : index
    %13 = vector.load %arg2[%c1_12, %c0_13, %c0_14] : memref<9x4x8xbf16, #tpu.memory_space<vmem>>, vector<1x4x8xbf16>
    %14 = vector.shape_cast %13 : vector<1x4x8xbf16> to vector<4x8xbf16>
    %cst_15 = arith.constant dense<0.000000e+00> : vector<4x361xf32>
    %15 = tpu.matmul %14, %12, %cst_15 {dimension_numbers = #tpu.dot_dimension_numbers<[1], [0], [0], [1], [0, 0, 1, 1], [], []>} : vector<4x8xbf16>, vector<8x361xbf16>, vector<4x361xf32> -> vector<4x361xf32>
    %16 = arith.addf %10, %15 : vector<4x361xf32>
    %c0_16 = arith.constant 0 : index
    %c0_17 = arith.constant 0 : index
    %c2 = arith.constant 2 : index
    %17 = vector.load %arg1[%c0_16, %c0_17, %c2] : memref<1x8x401xbf16, #tpu.memory_space<vmem>>, vector<1x8x361xbf16>
    %18 = vector.shape_cast %17 : vector<1x8x361xbf16> to vector<8x361xbf16>
    %19 = vector.broadcast %1 : vector<1x361xbf16> to vector<8x361xbf16>
    %20 = arith.mulf %18, %19 : vector<8x361xbf16>
    %c2_18 = arith.constant 2 : index
    %c0_19 = arith.constant 0 : index
    %c0_20 = arith.constant 0 : index
    %21 = vector.load %arg2[%c2_18, %c0_19, %c0_20] : memref<9x4x8xbf16, #tpu.memory_space<vmem>>, vector<1x4x8xbf16>
    %22 = vector.shape_cast %21 : vector<1x4x8xbf16> to vector<4x8xbf16>
    %cst_21 = arith.constant dense<0.000000e+00> : vector<4x361xf32>
    %23 = tpu.matmul %22, %20, %cst_21 {dimension_numbers = #tpu.dot_dimension_numbers<[1], [0], [0], [1], [0, 0, 1, 1], [], []>} : vector<4x8xbf16>, vector<8x361xbf16>, vector<4x361xf32> -> vector<4x361xf32>
    %24 = arith.addf %16, %23 : vector<4x361xf32>
    %c0_22 = arith.constant 0 : index
    %c0_23 = arith.constant 0 : index
    %c19 = arith.constant 19 : index
    %25 = vector.load %arg1[%c0_22, %c0_23, %c19] : memref<1x8x401xbf16, #tpu.memory_space<vmem>>, vector<1x8x361xbf16>
    %26 = vector.shape_cast %25 : vector<1x8x361xbf16> to vector<8x361xbf16>
    %27 = vector.broadcast %0 : vector<1x361xbf16> to vector<8x361xbf16>
    %28 = arith.mulf %26, %27 : vector<8x361xbf16>
    %c3 = arith.constant 3 : index
    %c0_24 = arith.constant 0 : index
    %c0_25 = arith.constant 0 : index
    %29 = vector.load %arg2[%c3, %c0_24, %c0_25] : memref<9x4x8xbf16, #tpu.memory_space<vmem>>, vector<1x4x8xbf16>
    %30 = vector.shape_cast %29 : vector<1x4x8xbf16> to vector<4x8xbf16>
    %cst_26 = arith.constant dense<0.000000e+00> : vector<4x361xf32>
    %31 = tpu.matmul %30, %28, %cst_26 {dimension_numbers = #tpu.dot_dimension_numbers<[1], [0], [0], [1], [0, 0, 1, 1], [], []>} : vector<4x8xbf16>, vector<8x361xbf16>, vector<4x361xf32> -> vector<4x361xf32>
    %32 = arith.addf %24, %31 : vector<4x361xf32>
    %c0_27 = arith.constant 0 : index
    %c0_28 = arith.constant 0 : index
    %c20 = arith.constant 20 : index
    %33 = vector.load %arg1[%c0_27, %c0_28, %c20] : memref<1x8x401xbf16, #tpu.memory_space<vmem>>, vector<1x8x361xbf16>
    %34 = vector.shape_cast %33 : vector<1x8x361xbf16> to vector<8x361xbf16>
    %c4 = arith.constant 4 : index
    %c0_29 = arith.constant 0 : index
    %c0_30 = arith.constant 0 : index
    %35 = vector.load %arg2[%c4, %c0_29, %c0_30] : memref<9x4x8xbf16, #tpu.memory_space<vmem>>, vector<1x4x8xbf16>
    %36 = vector.shape_cast %35 : vector<1x4x8xbf16> to vector<4x8xbf16>
    %cst_31 = arith.constant dense<0.000000e+00> : vector<4x361xf32>
    %37 = tpu.matmul %36, %34, %cst_31 {dimension_numbers = #tpu.dot_dimension_numbers<[1], [0], [0], [1], [0, 0, 1, 1], [], []>} : vector<4x8xbf16>, vector<8x361xbf16>, vector<4x361xf32> -> vector<4x361xf32>
    %38 = arith.addf %32, %37 : vector<4x361xf32>
    %c0_32 = arith.constant 0 : index
    %c0_33 = arith.constant 0 : index
    %c21 = arith.constant 21 : index
    %39 = vector.load %arg1[%c0_32, %c0_33, %c21] : memref<1x8x401xbf16, #tpu.memory_space<vmem>>, vector<1x8x361xbf16>
    %40 = vector.shape_cast %39 : vector<1x8x361xbf16> to vector<8x361xbf16>
    %41 = vector.broadcast %1 : vector<1x361xbf16> to vector<8x361xbf16>
    %42 = arith.mulf %40, %41 : vector<8x361xbf16>
    %c5 = arith.constant 5 : index
    %c0_34 = arith.constant 0 : index
    %c0_35 = arith.constant 0 : index
    %43 = vector.load %arg2[%c5, %c0_34, %c0_35] : memref<9x4x8xbf16, #tpu.memory_space<vmem>>, vector<1x4x8xbf16>
    %44 = vector.shape_cast %43 : vector<1x4x8xbf16> to vector<4x8xbf16>
    %cst_36 = arith.constant dense<0.000000e+00> : vector<4x361xf32>
    %45 = tpu.matmul %44, %42, %cst_36 {dimension_numbers = #tpu.dot_dimension_numbers<[1], [0], [0], [1], [0, 0, 1, 1], [], []>} : vector<4x8xbf16>, vector<8x361xbf16>, vector<4x361xf32> -> vector<4x361xf32>
    %46 = arith.addf %38, %45 : vector<4x361xf32>
    %c0_37 = arith.constant 0 : index
    %c0_38 = arith.constant 0 : index
    %c38 = arith.constant 38 : index
    %47 = vector.load %arg1[%c0_37, %c0_38, %c38] : memref<1x8x401xbf16, #tpu.memory_space<vmem>>, vector<1x8x361xbf16>
    %48 = vector.shape_cast %47 : vector<1x8x361xbf16> to vector<8x361xbf16>
    %49 = vector.broadcast %0 : vector<1x361xbf16> to vector<8x361xbf16>
    %50 = arith.mulf %48, %49 : vector<8x361xbf16>
    %c6 = arith.constant 6 : index
    %c0_39 = arith.constant 0 : index
    %c0_40 = arith.constant 0 : index
    %51 = vector.load %arg2[%c6, %c0_39, %c0_40] : memref<9x4x8xbf16, #tpu.memory_space<vmem>>, vector<1x4x8xbf16>
    %52 = vector.shape_cast %51 : vector<1x4x8xbf16> to vector<4x8xbf16>
    %cst_41 = arith.constant dense<0.000000e+00> : vector<4x361xf32>
    %53 = tpu.matmul %52, %50, %cst_41 {dimension_numbers = #tpu.dot_dimension_numbers<[1], [0], [0], [1], [0, 0, 1, 1], [], []>} : vector<4x8xbf16>, vector<8x361xbf16>, vector<4x361xf32> -> vector<4x361xf32>
    %54 = arith.addf %46, %53 : vector<4x361xf32>
    %c0_42 = arith.constant 0 : index
    %c0_43 = arith.constant 0 : index
    %c39 = arith.constant 39 : index
    %55 = vector.load %arg1[%c0_42, %c0_43, %c39] : memref<1x8x401xbf16, #tpu.memory_space<vmem>>, vector<1x8x361xbf16>
    %56 = vector.shape_cast %55 : vector<1x8x361xbf16> to vector<8x361xbf16>
    %c7 = arith.constant 7 : index
    %c0_44 = arith.constant 0 : index
    %c0_45 = arith.constant 0 : index
    %57 = vector.load %arg2[%c7, %c0_44, %c0_45] : memref<9x4x8xbf16, #tpu.memory_space<vmem>>, vector<1x4x8xbf16>
    %58 = vector.shape_cast %57 : vector<1x4x8xbf16> to vector<4x8xbf16>
    %cst_46 = arith.constant dense<0.000000e+00> : vector<4x361xf32>
    %59 = tpu.matmul %58, %56, %cst_46 {dimension_numbers = #tpu.dot_dimension_numbers<[1], [0], [0], [1], [0, 0, 1, 1], [], []>} : vector<4x8xbf16>, vector<8x361xbf16>, vector<4x361xf32> -> vector<4x361xf32>
    %60 = arith.addf %54, %59 : vector<4x361xf32>
    %c0_47 = arith.constant 0 : index
    %c0_48 = arith.constant 0 : index
    %c40 = arith.constant 40 : index
    %61 = vector.load %arg1[%c0_47, %c0_48, %c40] : memref<1x8x401xbf16, #tpu.memory_space<vmem>>, vector<1x8x361xbf16>
    %62 = vector.shape_cast %61 : vector<1x8x361xbf16> to vector<8x361xbf16>
    %63 = vector.broadcast %1 : vector<1x361xbf16> to vector<8x361xbf16>
    %64 = arith.mulf %62, %63 : vector<8x361xbf16>
    %c8 = arith.constant 8 : index
    %c0_49 = arith.constant 0 : index
    %c0_50 = arith.constant 0 : index
    %65 = vector.load %arg2[%c8, %c0_49, %c0_50] : memref<9x4x8xbf16, #tpu.memory_space<vmem>>, vector<1x4x8xbf16>
    %66 = vector.shape_cast %65 : vector<1x4x8xbf16> to vector<4x8xbf16>
    %cst_51 = arith.constant dense<0.000000e+00> : vector<4x361xf32>
    %67 = tpu.matmul %66, %64, %cst_51 {dimension_numbers = #tpu.dot_dimension_numbers<[1], [0], [0], [1], [0, 0, 1, 1], [], []>} : vector<4x8xbf16>, vector<8x361xbf16>, vector<4x361xf32> -> vector<4x361xf32>
    %68 = arith.addf %60, %67 : vector<4x361xf32>
    %c0_52 = arith.constant 0 : index
    %c0_53 = arith.constant 0 : index
    %69 = vector.load %arg3[%c0_52, %c0_53] : memref<4x1xf32, #tpu.memory_space<vmem>>, vector<4x1xf32>
    %70 = vector.broadcast %69 : vector<4x1xf32> to vector<4x361xf32>
    %71 = arith.addf %68, %70 : vector<4x361xf32>
    %72 = arith.truncf %71 : vector<4x361xf32> to vector<4x361xbf16>
    %c0_54 = arith.constant 0 : index
    %c0_55 = arith.constant 0 : index
    %c0_56 = arith.constant 0 : index
    %73 = vector.load %arg6[%c0_54, %c0_55, %c0_56] : memref<1x4x361xbf16, #tpu.memory_space<vmem>>, vector<1x4x361xbf16>
    %74 = vector.shape_cast %73 : vector<1x4x361xbf16> to vector<4x361xbf16>
    %75 = vector.shape_cast %72 : vector<4x361xbf16> to vector<1x4x361xbf16>
    tpu.vector_store %arg6[%c0_54, %c0_55, %c0_56], %75 {strides = array<i32>} : memref<1x4x361xbf16, #tpu.memory_space<vmem>>, vector<1x4x361xbf16>,
    return
  }
  func.func @transform_0(%arg0: i32) -> (i32, i32, i32) {
    %c0_i32 = arith.constant 0 : i32
    %c0_i32_0 = arith.constant 0 : i32
    %c0_i32_1 = arith.constant 0 : i32
    return %arg0, %c0_i32, %c0_i32_0 : i32, i32, i32
  }
  func.func @transform_1(%arg0: i32) -> (i32, i32, i32) {
    %c0_i32 = arith.constant 0 : i32
    %c0_i32_0 = arith.constant 0 : i32
    %c0_i32_1 = arith.constant 0 : i32
    %c0_i32_2 = arith.constant 0 : i32
    return %c0_i32, %c0_i32_0, %c0_i32_1 : i32, i32, i32
  }
  func.func @transform_2(%arg0: i32) -> (i32, i32) {
    %c0_i32 = arith.constant 0 : i32
    %c0_i32_0 = arith.constant 0 : i32
    %c0_i32_1 = arith.constant 0 : i32
    return %c0_i32, %c0_i32_0 : i32, i32
  }
  func.func @transform_3(%arg0: i32) -> (i32, i32) {
    %c0_i32 = arith.constant 0 : i32
    %c0_i32_0 = arith.constant 0 : i32
    %c0_i32_1 = arith.constant 0 : i32
    return %c0_i32, %c0_i32_0 : i32, i32
  }
  func.func @transform_4(%arg0: i32) -> (i32, i32) {
    %c0_i32 = arith.constant 0 : i32
    %c0_i32_0 = arith.constant 0 : i32
    %c0_i32_1 = arith.constant 0 : i32
    return %c0_i32, %c0_i32_0 : i32, i32
  }
  func.func @transform_5(%arg0: i32) -> (i32, i32, i32) {
    %c0_i32 = arith.constant 0 : i32
    %c0_i32_0 = arith.constant 0 : i32
    %c0_i32_1 = arith.constant 0 : i32
    return %arg0, %c0_i32, %c0_i32_0 : i32, i32, i32
  }
}

module attributes {stable_mosaic.version = 11 : i64} {
  func.func @_idwt_kernel(%arg0: i32, %arg1: memref<1x4x19x19xbf16, #tpu.memory_space<vmem>>, %arg2: memref<1x12x19x19xbf16, #tpu.memory_space<vmem>>, %arg3: memref<32x19xbf16, #tpu.memory_space<vmem>>, %arg4: memref<32x19xbf16, #tpu.memory_space<vmem>>, %arg5: memref<19x32xbf16, #tpu.memory_space<vmem>>, %arg6: memref<19x32xbf16, #tpu.memory_space<vmem>>, %arg7: memref<1x4x32x32xf32, #tpu.memory_space<vmem>>) attributes {dimension_semantics = [#tpu.dimension_semantics<parallel>], iteration_bounds = array<i64: 2>, scalar_prefetch = 0 : i64, scratch_operands = 0 : i64, tpu.core_type = #tpu.core_type<tc>, window_params = [{transform_indices = @transform_0, window_bounds = array<i64: 1, 4, 19, 19>}, {transform_indices = @transform_1, window_bounds = array<i64: 1, 12, 19, 19>}, {pipeline_mode = #tpu.pipeline_mode<synchronous>, transform_indices = @transform_2, window_bounds = array<i64: 32, 19>}, {pipeline_mode = #tpu.pipeline_mode<synchronous>, transform_indices = @transform_3, window_bounds = array<i64: 32, 19>}, {pipeline_mode = #tpu.pipeline_mode<synchronous>, transform_indices = @transform_4, window_bounds = array<i64: 19, 32>}, {pipeline_mode = #tpu.pipeline_mode<synchronous>, transform_indices = @transform_5, window_bounds = array<i64: 19, 32>}, {transform_indices = @transform_6, window_bounds = array<i64: 1, 4, 32, 32>}]} {
    %c0 = arith.constant 0 : index
    %c0_0 = arith.constant 0 : index
    %0 = vector.load %arg3[%c0, %c0_0] : memref<32x19xbf16, #tpu.memory_space<vmem>>, vector<32x19xbf16>
    %c0_1 = arith.constant 0 : index
    %c0_2 = arith.constant 0 : index
    %1 = vector.load %arg4[%c0_1, %c0_2] : memref<32x19xbf16, #tpu.memory_space<vmem>>, vector<32x19xbf16>
    %c0_3 = arith.constant 0 : index
    %c0_4 = arith.constant 0 : index
    %2 = vector.load %arg5[%c0_3, %c0_4] : memref<19x32xbf16, #tpu.memory_space<vmem>>, vector<19x32xbf16>
    %c0_5 = arith.constant 0 : index
    %c0_6 = arith.constant 0 : index
    %3 = vector.load %arg6[%c0_5, %c0_6] : memref<19x32xbf16, #tpu.memory_space<vmem>>, vector<19x32xbf16>
    %c0_7 = arith.constant 0 : index
    %c0_8 = arith.constant 0 : index
    %c0_9 = arith.constant 0 : index
    %c0_10 = arith.constant 0 : index
    %4 = vector.load %arg1[%c0_7, %c0_8, %c0_9, %c0_10] : memref<1x4x19x19xbf16, #tpu.memory_space<vmem>>, vector<1x1x19x19xbf16>
    %5 = vector.shape_cast %4 : vector<1x1x19x19xbf16> to vector<19x19xbf16>
    %c0_11 = arith.constant 0 : index
    %c0_12 = arith.constant 0 : index
    %c0_13 = arith.constant 0 : index
    %c0_14 = arith.constant 0 : index
    %6 = vector.load %arg2[%c0_11, %c0_12, %c0_13, %c0_14] : memref<1x12x19x19xbf16, #tpu.memory_space<vmem>>, vector<1x1x19x19xbf16>
    %7 = vector.shape_cast %6 : vector<1x1x19x19xbf16> to vector<19x19xbf16>
    %c0_15 = arith.constant 0 : index
    %c4 = arith.constant 4 : index
    %c0_16 = arith.constant 0 : index
    %c0_17 = arith.constant 0 : index
    %8 = vector.load %arg2[%c0_15, %c4, %c0_16, %c0_17] : memref<1x12x19x19xbf16, #tpu.memory_space<vmem>>, vector<1x1x19x19xbf16>
    %9 = vector.shape_cast %8 : vector<1x1x19x19xbf16> to vector<19x19xbf16>
    %c0_18 = arith.constant 0 : index
    %c8 = arith.constant 8 : index
    %c0_19 = arith.constant 0 : index
    %c0_20 = arith.constant 0 : index
    %10 = vector.load %arg2[%c0_18, %c8, %c0_19, %c0_20] : memref<1x12x19x19xbf16, #tpu.memory_space<vmem>>, vector<1x1x19x19xbf16>
    %11 = vector.shape_cast %10 : vector<1x1x19x19xbf16> to vector<19x19xbf16>
    %cst = arith.constant dense<0.000000e+00> : vector<32x19xf32>
    %12 = tpu.matmul %0, %5, %cst {dimension_numbers = #tpu.dot_dimension_numbers<[1], [0], [0], [1], [0, 0, 1, 1], [], []>} : vector<32x19xbf16>, vector<19x19xbf16>, vector<32x19xf32> -> vector<32x19xf32>
    %cst_21 = arith.constant dense<0.000000e+00> : vector<32x19xf32>
    %13 = tpu.matmul %1, %7, %cst_21 {dimension_numbers = #tpu.dot_dimension_numbers<[1], [0], [0], [1], [0, 0, 1, 1], [], []>} : vector<32x19xbf16>, vector<19x19xbf16>, vector<32x19xf32> -> vector<32x19xf32>
    %14 = arith.addf %12, %13 : vector<32x19xf32>
    %15 = arith.truncf %14 : vector<32x19xf32> to vector<32x19xbf16>
    %cst_22 = arith.constant dense<0.000000e+00> : vector<32x19xf32>
    %16 = tpu.matmul %0, %9, %cst_22 {dimension_numbers = #tpu.dot_dimension_numbers<[1], [0], [0], [1], [0, 0, 1, 1], [], []>} : vector<32x19xbf16>, vector<19x19xbf16>, vector<32x19xf32> -> vector<32x19xf32>
    %cst_23 = arith.constant dense<0.000000e+00> : vector<32x19xf32>
    %17 = tpu.matmul %1, %11, %cst_23 {dimension_numbers = #tpu.dot_dimension_numbers<[1], [0], [0], [1], [0, 0, 1, 1], [], []>} : vector<32x19xbf16>, vector<19x19xbf16>, vector<32x19xf32> -> vector<32x19xf32>
    %18 = arith.addf %16, %17 : vector<32x19xf32>
    %19 = arith.truncf %18 : vector<32x19xf32> to vector<32x19xbf16>
    %cst_24 = arith.constant dense<0.000000e+00> : vector<32x32xf32>
    %20 = tpu.matmul %15, %2, %cst_24 {dimension_numbers = #tpu.dot_dimension_numbers<[1], [0], [0], [1], [0, 0, 1, 1], [], []>} : vector<32x19xbf16>, vector<19x32xbf16>, vector<32x32xf32> -> vector<32x32xf32>
    %cst_25 = arith.constant dense<0.000000e+00> : vector<32x32xf32>
    %21 = tpu.matmul %19, %3, %cst_25 {dimension_numbers = #tpu.dot_dimension_numbers<[1], [0], [0], [1], [0, 0, 1, 1], [], []>} : vector<32x19xbf16>, vector<19x32xbf16>, vector<32x32xf32> -> vector<32x32xf32>
    %22 = arith.addf %20, %21 : vector<32x32xf32>
    %c0_26 = arith.constant 0 : index
    %c0_27 = arith.constant 0 : index
    %c0_28 = arith.constant 0 : index
    %c0_29 = arith.constant 0 : index
    %23 = vector.load %arg7[%c0_26, %c0_27, %c0_28, %c0_29] : memref<1x4x32x32xf32, #tpu.memory_space<vmem>>, vector<1x1x32x32xf32>
    %24 = vector.shape_cast %23 : vector<1x1x32x32xf32> to vector<32x32xf32>
    %25 = vector.shape_cast %22 : vector<32x32xf32> to vector<1x1x32x32xf32>
    tpu.vector_store %arg7[%c0_26, %c0_27, %c0_28, %c0_29], %25 {strides = array<i32>} : memref<1x4x32x32xf32, #tpu.memory_space<vmem>>, vector<1x1x32x32xf32>,
    %c0_30 = arith.constant 0 : index
    %c1 = arith.constant 1 : index
    %c0_31 = arith.constant 0 : index
    %c0_32 = arith.constant 0 : index
    %26 = vector.load %arg1[%c0_30, %c1, %c0_31, %c0_32] : memref<1x4x19x19xbf16, #tpu.memory_space<vmem>>, vector<1x1x19x19xbf16>
    %27 = vector.shape_cast %26 : vector<1x1x19x19xbf16> to vector<19x19xbf16>
    %c0_33 = arith.constant 0 : index
    %c1_34 = arith.constant 1 : index
    %c0_35 = arith.constant 0 : index
    %c0_36 = arith.constant 0 : index
    %28 = vector.load %arg2[%c0_33, %c1_34, %c0_35, %c0_36] : memref<1x12x19x19xbf16, #tpu.memory_space<vmem>>, vector<1x1x19x19xbf16>
    %29 = vector.shape_cast %28 : vector<1x1x19x19xbf16> to vector<19x19xbf16>
    %c0_37 = arith.constant 0 : index
    %c5 = arith.constant 5 : index
    %c0_38 = arith.constant 0 : index
    %c0_39 = arith.constant 0 : index
    %30 = vector.load %arg2[%c0_37, %c5, %c0_38, %c0_39] : memref<1x12x19x19xbf16, #tpu.memory_space<vmem>>, vector<1x1x19x19xbf16>
    %31 = vector.shape_cast %30 : vector<1x1x19x19xbf16> to vector<19x19xbf16>
    %c0_40 = arith.constant 0 : index
    %c9 = arith.constant 9 : index
    %c0_41 = arith.constant 0 : index
    %c0_42 = arith.constant 0 : index
    %32 = vector.load %arg2[%c0_40, %c9, %c0_41, %c0_42] : memref<1x12x19x19xbf16, #tpu.memory_space<vmem>>, vector<1x1x19x19xbf16>
    %33 = vector.shape_cast %32 : vector<1x1x19x19xbf16> to vector<19x19xbf16>
    %cst_43 = arith.constant dense<0.000000e+00> : vector<32x19xf32>
    %34 = tpu.matmul %0, %27, %cst_43 {dimension_numbers = #tpu.dot_dimension_numbers<[1], [0], [0], [1], [0, 0, 1, 1], [], []>} : vector<32x19xbf16>, vector<19x19xbf16>, vector<32x19xf32> -> vector<32x19xf32>
    %cst_44 = arith.constant dense<0.000000e+00> : vector<32x19xf32>
    %35 = tpu.matmul %1, %29, %cst_44 {dimension_numbers = #tpu.dot_dimension_numbers<[1], [0], [0], [1], [0, 0, 1, 1], [], []>} : vector<32x19xbf16>, vector<19x19xbf16>, vector<32x19xf32> -> vector<32x19xf32>
    %36 = arith.addf %34, %35 : vector<32x19xf32>
    %37 = arith.truncf %36 : vector<32x19xf32> to vector<32x19xbf16>
    %cst_45 = arith.constant dense<0.000000e+00> : vector<32x19xf32>
    %38 = tpu.matmul %0, %31, %cst_45 {dimension_numbers = #tpu.dot_dimension_numbers<[1], [0], [0], [1], [0, 0, 1, 1], [], []>} : vector<32x19xbf16>, vector<19x19xbf16>, vector<32x19xf32> -> vector<32x19xf32>
    %cst_46 = arith.constant dense<0.000000e+00> : vector<32x19xf32>
    %39 = tpu.matmul %1, %33, %cst_46 {dimension_numbers = #tpu.dot_dimension_numbers<[1], [0], [0], [1], [0, 0, 1, 1], [], []>} : vector<32x19xbf16>, vector<19x19xbf16>, vector<32x19xf32> -> vector<32x19xf32>
    %40 = arith.addf %38, %39 : vector<32x19xf32>
    %41 = arith.truncf %40 : vector<32x19xf32> to vector<32x19xbf16>
    %cst_47 = arith.constant dense<0.000000e+00> : vector<32x32xf32>
    %42 = tpu.matmul %37, %2, %cst_47 {dimension_numbers = #tpu.dot_dimension_numbers<[1], [0], [0], [1], [0, 0, 1, 1], [], []>} : vector<32x19xbf16>, vector<19x32xbf16>, vector<32x32xf32> -> vector<32x32xf32>
    %cst_48 = arith.constant dense<0.000000e+00> : vector<32x32xf32>
    %43 = tpu.matmul %41, %3, %cst_48 {dimension_numbers = #tpu.dot_dimension_numbers<[1], [0], [0], [1], [0, 0, 1, 1], [], []>} : vector<32x19xbf16>, vector<19x32xbf16>, vector<32x32xf32> -> vector<32x32xf32>
    %44 = arith.addf %42, %43 : vector<32x32xf32>
    %c0_49 = arith.constant 0 : index
    %c1_50 = arith.constant 1 : index
    %c0_51 = arith.constant 0 : index
    %c0_52 = arith.constant 0 : index
    %45 = vector.load %arg7[%c0_49, %c1_50, %c0_51, %c0_52] : memref<1x4x32x32xf32, #tpu.memory_space<vmem>>, vector<1x1x32x32xf32>
    %46 = vector.shape_cast %45 : vector<1x1x32x32xf32> to vector<32x32xf32>
    %47 = vector.shape_cast %44 : vector<32x32xf32> to vector<1x1x32x32xf32>
    tpu.vector_store %arg7[%c0_49, %c1_50, %c0_51, %c0_52], %47 {strides = array<i32>} : memref<1x4x32x32xf32, #tpu.memory_space<vmem>>, vector<1x1x32x32xf32>,
    %c0_53 = arith.constant 0 : index
    %c2 = arith.constant 2 : index
    %c0_54 = arith.constant 0 : index
    %c0_55 = arith.constant 0 : index
    %48 = vector.load %arg1[%c0_53, %c2, %c0_54, %c0_55] : memref<1x4x19x19xbf16, #tpu.memory_space<vmem>>, vector<1x1x19x19xbf16>
    %49 = vector.shape_cast %48 : vector<1x1x19x19xbf16> to vector<19x19xbf16>
    %c0_56 = arith.constant 0 : index
    %c2_57 = arith.constant 2 : index
    %c0_58 = arith.constant 0 : index
    %c0_59 = arith.constant 0 : index
    %50 = vector.load %arg2[%c0_56, %c2_57, %c0_58, %c0_59] : memref<1x12x19x19xbf16, #tpu.memory_space<vmem>>, vector<1x1x19x19xbf16>
    %51 = vector.shape_cast %50 : vector<1x1x19x19xbf16> to vector<19x19xbf16>
    %c0_60 = arith.constant 0 : index
    %c6 = arith.constant 6 : index
    %c0_61 = arith.constant 0 : index
    %c0_62 = arith.constant 0 : index
    %52 = vector.load %arg2[%c0_60, %c6, %c0_61, %c0_62] : memref<1x12x19x19xbf16, #tpu.memory_space<vmem>>, vector<1x1x19x19xbf16>
    %53 = vector.shape_cast %52 : vector<1x1x19x19xbf16> to vector<19x19xbf16>
    %c0_63 = arith.constant 0 : index
    %c10 = arith.constant 10 : index
    %c0_64 = arith.constant 0 : index
    %c0_65 = arith.constant 0 : index
    %54 = vector.load %arg2[%c0_63, %c10, %c0_64, %c0_65] : memref<1x12x19x19xbf16, #tpu.memory_space<vmem>>, vector<1x1x19x19xbf16>
    %55 = vector.shape_cast %54 : vector<1x1x19x19xbf16> to vector<19x19xbf16>
    %cst_66 = arith.constant dense<0.000000e+00> : vector<32x19xf32>
    %56 = tpu.matmul %0, %49, %cst_66 {dimension_numbers = #tpu.dot_dimension_numbers<[1], [0], [0], [1], [0, 0, 1, 1], [], []>} : vector<32x19xbf16>, vector<19x19xbf16>, vector<32x19xf32> -> vector<32x19xf32>
    %cst_67 = arith.constant dense<0.000000e+00> : vector<32x19xf32>
    %57 = tpu.matmul %1, %51, %cst_67 {dimension_numbers = #tpu.dot_dimension_numbers<[1], [0], [0], [1], [0, 0, 1, 1], [], []>} : vector<32x19xbf16>, vector<19x19xbf16>, vector<32x19xf32> -> vector<32x19xf32>
    %58 = arith.addf %56, %57 : vector<32x19xf32>
    %59 = arith.truncf %58 : vector<32x19xf32> to vector<32x19xbf16>
    %cst_68 = arith.constant dense<0.000000e+00> : vector<32x19xf32>
    %60 = tpu.matmul %0, %53, %cst_68 {dimension_numbers = #tpu.dot_dimension_numbers<[1], [0], [0], [1], [0, 0, 1, 1], [], []>} : vector<32x19xbf16>, vector<19x19xbf16>, vector<32x19xf32> -> vector<32x19xf32>
    %cst_69 = arith.constant dense<0.000000e+00> : vector<32x19xf32>
    %61 = tpu.matmul %1, %55, %cst_69 {dimension_numbers = #tpu.dot_dimension_numbers<[1], [0], [0], [1], [0, 0, 1, 1], [], []>} : vector<32x19xbf16>, vector<19x19xbf16>, vector<32x19xf32> -> vector<32x19xf32>
    %62 = arith.addf %60, %61 : vector<32x19xf32>
    %63 = arith.truncf %62 : vector<32x19xf32> to vector<32x19xbf16>
    %cst_70 = arith.constant dense<0.000000e+00> : vector<32x32xf32>
    %64 = tpu.matmul %59, %2, %cst_70 {dimension_numbers = #tpu.dot_dimension_numbers<[1], [0], [0], [1], [0, 0, 1, 1], [], []>} : vector<32x19xbf16>, vector<19x32xbf16>, vector<32x32xf32> -> vector<32x32xf32>
    %cst_71 = arith.constant dense<0.000000e+00> : vector<32x32xf32>
    %65 = tpu.matmul %63, %3, %cst_71 {dimension_numbers = #tpu.dot_dimension_numbers<[1], [0], [0], [1], [0, 0, 1, 1], [], []>} : vector<32x19xbf16>, vector<19x32xbf16>, vector<32x32xf32> -> vector<32x32xf32>
    %66 = arith.addf %64, %65 : vector<32x32xf32>
    %c0_72 = arith.constant 0 : index
    %c2_73 = arith.constant 2 : index
    %c0_74 = arith.constant 0 : index
    %c0_75 = arith.constant 0 : index
    %67 = vector.load %arg7[%c0_72, %c2_73, %c0_74, %c0_75] : memref<1x4x32x32xf32, #tpu.memory_space<vmem>>, vector<1x1x32x32xf32>
    %68 = vector.shape_cast %67 : vector<1x1x32x32xf32> to vector<32x32xf32>
    %69 = vector.shape_cast %66 : vector<32x32xf32> to vector<1x1x32x32xf32>
    tpu.vector_store %arg7[%c0_72, %c2_73, %c0_74, %c0_75], %69 {strides = array<i32>} : memref<1x4x32x32xf32, #tpu.memory_space<vmem>>, vector<1x1x32x32xf32>,
    %c0_76 = arith.constant 0 : index
    %c3 = arith.constant 3 : index
    %c0_77 = arith.constant 0 : index
    %c0_78 = arith.constant 0 : index
    %70 = vector.load %arg1[%c0_76, %c3, %c0_77, %c0_78] : memref<1x4x19x19xbf16, #tpu.memory_space<vmem>>, vector<1x1x19x19xbf16>
    %71 = vector.shape_cast %70 : vector<1x1x19x19xbf16> to vector<19x19xbf16>
    %c0_79 = arith.constant 0 : index
    %c3_80 = arith.constant 3 : index
    %c0_81 = arith.constant 0 : index
    %c0_82 = arith.constant 0 : index
    %72 = vector.load %arg2[%c0_79, %c3_80, %c0_81, %c0_82] : memref<1x12x19x19xbf16, #tpu.memory_space<vmem>>, vector<1x1x19x19xbf16>
    %73 = vector.shape_cast %72 : vector<1x1x19x19xbf16> to vector<19x19xbf16>
    %c0_83 = arith.constant 0 : index
    %c7 = arith.constant 7 : index
    %c0_84 = arith.constant 0 : index
    %c0_85 = arith.constant 0 : index
    %74 = vector.load %arg2[%c0_83, %c7, %c0_84, %c0_85] : memref<1x12x19x19xbf16, #tpu.memory_space<vmem>>, vector<1x1x19x19xbf16>
    %75 = vector.shape_cast %74 : vector<1x1x19x19xbf16> to vector<19x19xbf16>
    %c0_86 = arith.constant 0 : index
    %c11 = arith.constant 11 : index
    %c0_87 = arith.constant 0 : index
    %c0_88 = arith.constant 0 : index
    %76 = vector.load %arg2[%c0_86, %c11, %c0_87, %c0_88] : memref<1x12x19x19xbf16, #tpu.memory_space<vmem>>, vector<1x1x19x19xbf16>
    %77 = vector.shape_cast %76 : vector<1x1x19x19xbf16> to vector<19x19xbf16>
    %cst_89 = arith.constant dense<0.000000e+00> : vector<32x19xf32>
    %78 = tpu.matmul %0, %71, %cst_89 {dimension_numbers = #tpu.dot_dimension_numbers<[1], [0], [0], [1], [0, 0, 1, 1], [], []>} : vector<32x19xbf16>, vector<19x19xbf16>, vector<32x19xf32> -> vector<32x19xf32>
    %cst_90 = arith.constant dense<0.000000e+00> : vector<32x19xf32>
    %79 = tpu.matmul %1, %73, %cst_90 {dimension_numbers = #tpu.dot_dimension_numbers<[1], [0], [0], [1], [0, 0, 1, 1], [], []>} : vector<32x19xbf16>, vector<19x19xbf16>, vector<32x19xf32> -> vector<32x19xf32>
    %80 = arith.addf %78, %79 : vector<32x19xf32>
    %81 = arith.truncf %80 : vector<32x19xf32> to vector<32x19xbf16>
    %cst_91 = arith.constant dense<0.000000e+00> : vector<32x19xf32>
    %82 = tpu.matmul %0, %75, %cst_91 {dimension_numbers = #tpu.dot_dimension_numbers<[1], [0], [0], [1], [0, 0, 1, 1], [], []>} : vector<32x19xbf16>, vector<19x19xbf16>, vector<32x19xf32> -> vector<32x19xf32>
    %cst_92 = arith.constant dense<0.000000e+00> : vector<32x19xf32>
    %83 = tpu.matmul %1, %77, %cst_92 {dimension_numbers = #tpu.dot_dimension_numbers<[1], [0], [0], [1], [0, 0, 1, 1], [], []>} : vector<32x19xbf16>, vector<19x19xbf16>, vector<32x19xf32> -> vector<32x19xf32>
    %84 = arith.addf %82, %83 : vector<32x19xf32>
    %85 = arith.truncf %84 : vector<32x19xf32> to vector<32x19xbf16>
    %cst_93 = arith.constant dense<0.000000e+00> : vector<32x32xf32>
    %86 = tpu.matmul %81, %2, %cst_93 {dimension_numbers = #tpu.dot_dimension_numbers<[1], [0], [0], [1], [0, 0, 1, 1], [], []>} : vector<32x19xbf16>, vector<19x32xbf16>, vector<32x32xf32> -> vector<32x32xf32>
    %cst_94 = arith.constant dense<0.000000e+00> : vector<32x32xf32>
    %87 = tpu.matmul %85, %3, %cst_94 {dimension_numbers = #tpu.dot_dimension_numbers<[1], [0], [0], [1], [0, 0, 1, 1], [], []>} : vector<32x19xbf16>, vector<19x32xbf16>, vector<32x32xf32> -> vector<32x32xf32>
    %88 = arith.addf %86, %87 : vector<32x32xf32>
    %c0_95 = arith.constant 0 : index
    %c3_96 = arith.constant 3 : index
    %c0_97 = arith.constant 0 : index
    %c0_98 = arith.constant 0 : index
    %89 = vector.load %arg7[%c0_95, %c3_96, %c0_97, %c0_98] : memref<1x4x32x32xf32, #tpu.memory_space<vmem>>, vector<1x1x32x32xf32>
    %90 = vector.shape_cast %89 : vector<1x1x32x32xf32> to vector<32x32xf32>
    %91 = vector.shape_cast %88 : vector<32x32xf32> to vector<1x1x32x32xf32>
    tpu.vector_store %arg7[%c0_95, %c3_96, %c0_97, %c0_98], %91 {strides = array<i32>} : memref<1x4x32x32xf32, #tpu.memory_space<vmem>>, vector<1x1x32x32xf32>,
    return
  }
  func.func @transform_0(%arg0: i32) -> (i32, i32, i32, i32) {
    %c0_i32 = arith.constant 0 : i32
    %c0_i32_0 = arith.constant 0 : i32
    %c0_i32_1 = arith.constant 0 : i32
    %c0_i32_2 = arith.constant 0 : i32
    return %arg0, %c0_i32, %c0_i32_0, %c0_i32_1 : i32, i32, i32, i32
  }
  func.func @transform_1(%arg0: i32) -> (i32, i32, i32, i32) {
    %c0_i32 = arith.constant 0 : i32
    %c0_i32_0 = arith.constant 0 : i32
    %c0_i32_1 = arith.constant 0 : i32
    %c0_i32_2 = arith.constant 0 : i32
    return %arg0, %c0_i32, %c0_i32_0, %c0_i32_1 : i32, i32, i32, i32
  }
  func.func @transform_2(%arg0: i32) -> (i32, i32) {
    %c0_i32 = arith.constant 0 : i32
    %c0_i32_0 = arith.constant 0 : i32
    %c0_i32_1 = arith.constant 0 : i32
    return %c0_i32, %c0_i32_0 : i32, i32
  }
  func.func @transform_3(%arg0: i32) -> (i32, i32) {
    %c0_i32 = arith.constant 0 : i32
    %c0_i32_0 = arith.constant 0 : i32
    %c0_i32_1 = arith.constant 0 : i32
    return %c0_i32, %c0_i32_0 : i32, i32
  }
  func.func @transform_4(%arg0: i32) -> (i32, i32) {
    %c0_i32 = arith.constant 0 : i32
    %c0_i32_0 = arith.constant 0 : i32
    %c0_i32_1 = arith.constant 0 : i32
    return %c0_i32, %c0_i32_0 : i32, i32
  }
  func.func @transform_5(%arg0: i32) -> (i32, i32) {
    %c0_i32 = arith.constant 0 : i32
    %c0_i32_0 = arith.constant 0 : i32
    %c0_i32_1 = arith.constant 0 : i32
    return %c0_i32, %c0_i32_0 : i32, i32
  }
  func.func @transform_6(%arg0: i32) -> (i32, i32, i32, i32) {
    %c0_i32 = arith.constant 0 : i32
    %c0_i32_0 = arith.constant 0 : i32
    %c0_i32_1 = arith.constant 0 : i32
    %c0_i32_2 = arith.constant 0 : i32
    return %arg0, %c0_i32, %c0_i32_0, %c0_i32_1 : i32, i32, i32, i32
  }
}

</mosaic_0001>

<bundles_post_ra>
// kernel: dwt_upsampler_forward.8
= control target key start
LH: loop header
LB: loop body
LE: loop exit
PB: predicated region body
PF: predicated region fallthrough
CT: control target
= control target key end

     0   :  { %s1044_s18 = smov 0   ;;  %s1158_s0 = inlined_call_operand.vmem [shape: bf16[2,4,290], index: 0, kind: input, shape index: {}]   ;;  %s1159_s1 = inlined_call_operand.vmem [shape: bf16[9,8,4], index: 1, kind: input, shape index: {}]   ;;  %s1160_s2 = inlined_call_operand.vmem [shape: f32[8,1], index: 2, kind: input, shape index: {}]   ;;  %s1161_s3 = inlined_call_operand.vmem [shape: bf16[1,256], index: 3, kind: input, shape index: {}]   ;;  %s1162_s4 = inlined_call_operand.vmem [shape: bf16[1,256], index: 4, kind: input, shape index: {}]   ;;  %s1163_s5 = inlined_call_operand.vmem [shape: bf16[2,8,256], index: 5, kind: output, shape index: {}]  }
   0x1 LB: > { %s930_s19 = sadd.s32 4294967295, %s998_s18   ;;  %p934_p0 = scmp.ge.s32.totalorder %s998_s18, 1  ;;  %s998_s18 = sphi %s1044_s18, %s15_s18  }
   0x2   : > { %p187_p1 = scmp.lt.s32.totalorder %s998_s18, 3 }
   0x4   : > { %p188_p2 = pnand %p934_p0, %p187_p1 }
   0x5   : > { %p215_p3 = scmp.lt.s32.totalorder (!%p188_p2), %s930_s19, 1  ;;  %s1000_s28 = smov (!%p188_p2), 127  }
   0x6   : > { %191 = sbr.rel (%p188_p2) target bundleno = 501 (0x1f5), region = 40  ;;  %s1001_s29 = smov (!%p188_p2), 2  }
   0x7   : > { %s1002_s30 = smov (!%p188_p2), 18   ;;  %s1003_s6 = smov (!%p188_p2), 16  }
   0x8   : > { %s1004_s7 = smov (!%p188_p2), 32   ;;  %s1005_s8 = smov (!%p188_p2), 34  }
   0x9   : > { %s1006_s9 = smov (!%p188_p2), 126   ;;  %s1007_s10 = smov (!%p188_p2), 112  }
   0xa   : > { %s1008_s11 = smov (!%p188_p2), 111   ;;  %s1009_s12 = smov (!%p188_p2), 110  }
   0xb   : > { %v226_v0 = vld [vmem:[%s1161_s3] sm:$0x3]  ;;  %s1165_s19 = smov (!%p215_p3, %s930_s19), 1  ;;  %vm245_vm0 = vcmask 1043456   ;;  %vm372_vm1 = vcmask 15360   ;;  %vm449_vm2 = vcmask 130048  }
   0xc   : > { %230 = vst [vmem:[#allocation1] ss:$9 sm:$0xff] %v226_v0  ;;  %s967_s22 = smul.u32 6, %s1165_s19  ;;  %v227_v17 = vld [vmem:[%s1162_s4] sm:$0x3]  ;;  %vm583_vm3 = vcmask 146432  }
   0xd   : > { %vm660_vm4 = vcmask 261120   ;;  %s1010_s13 = smov 96   ;;  %vm794_vm5 = vcmask 277504   ;;  %s1011_s14 = smov 95   ;;  %vm275_vm6 = vcmask 1039360   ;;  %vm282_vm7 = vcmask 1041408  }
   0xe   : > { %s1061_s25 = scalar_lea.vmem %s1158_s0, %s967_s22  ;;  %s1012_s15 = smov 94   ;;  %vm278_vm8 = vcmask 31744   ;;  %vm403_vm9 = vcmask 1031168   ;;  %vm480_vm10 = vcmask 916480   ;;  %vm537_vm11 = vcmask 908288  }
   0xf   : > { %v228_v5 = vld [vmem:[%s1061_s25] sm:$0xf]  ;;  %vm614_vm12 = vcmask 900096   ;;  %vm691_vm13 = vcmask 785408   ;;  %vm748_vm14 = vcmask 777216   ;;  %vm825_vm15 = vcmask 769024  }
  0x10   : > { %v239_v10 = vunpack.c.l.bf16 %v228_v5  ;;  %v258_v14 = vld [vmem:[%s1061_s25] sm:$0x3f] }
  0x11   : > { %v350_v31 = vld [vmem:[%s1061_s25] sm:$0x3f] }
  0x12   : > { %v362_v32 = vunpack.c.h.bf16 %v350_v31  ;;  %v361_v33 = vunpack.c.l.bf16 %v350_v31  ;;  %v443_v39 = vld [vmem:[%s1061_s25] sm:$0x3f] }
  0x13   : > { %v231_v1 = vld [vmem:[#allocation1] sm:$0xff]  ;;  %v232_v2 = vld [vmem:[#allocation1 + $0x9] sm:$0xff]  ;;  %v445_v40 = vunpack.c.h.bf16 %v443_v39  ;;  %v444_v41 = vunpack.c.l.bf16 %v443_v39 }
  0x14   : > { %v233_v3 = vpack.i.b16 %v231_v1, %v231_v1  ;;  %v236_v4 = vpack.i.b16 %v232_v2, %v232_v2  ;;  %v520_v53 = vld [vmem:[%s1061_s25] sm:$0x3f] }
  0x15   : > { %v577_v55 = vld [vmem:[%s1061_s25] sm:$0x3f] }
  0x16   : > { %v235_v6 = vperm.slane %v233_v3, 0  ;;  %v238_v7 = vperm.slane %v236_v4, 0  ;;  %v579_v60 = vunpack.c.h.bf16 %v577_v55  ;;  %v578_v0 = vunpack.c.l.bf16 %v577_v55  ;;  %v654_v3 = vld [vmem:[%s1061_s25] sm:$0x3f] }
  0x18   : > { %v240_v8 = vunpack.c.l.bf16 %v235_v6  ;;  %v241_v9 = vunpack.c.l.bf16 %v238_v7 }
  0x1a   : > { %v244_v11 = vrot.slane %v241_v9, 4 }
  0x1c   : > { %v246_v12 = vsel %vm245_vm0, %v240_v8, %v244_v11  ;;  %v656_v8 = vunpack.c.h.bf16 %v654_v3  ;;  %v655_v11 = vunpack.c.l.bf16 %v654_v3 }
  0x1d   : > { %v248_v13 = vmul.f32 %v246_v12, %v239_v10 }
  0x1f   : > { %250 = vst [vmem:[#allocation1] ss:$2 sm:$0xff] %v248_v13 }
  0x26   : > { %v1066_v15 = vld.sshfl [vmem:[#allocation1] sm:$0xff pattern:$0x75316420]  ;;  %v1068_v16 = vld.sshfl [vmem:[#allocation1 + $0x8] sm:$0xff pattern:$0x75316420] }
  0x27   : > { %262 = vst [vmem:[#allocation1] ss:$4 sm:$0xff] %v258_v14  ;;  %v256_v55 = vpack.c.bf16 %v1068_v16, %v1068_v16 }
  0x2e   : > { %v263_v18 = vld.sshfl [vmem:[#allocation1] sm:$0xff pattern:$0x73625140]  ;;  %v265_v19 = vld.sshfl [vmem:[#allocation1 + $0x8] sm:$0xff pattern:$0x73625140] }
  0x2f   : > { %v267_v20 = vld.sshfl [vmem:[#allocation1 + $0x10] sm:$0xff pattern:$0x73625140]  ;;  %269 = vrot.lane.b32.xlu2 %v263_v18, %s1000_s28 }
  0x30   : > { %352 = vst [vmem:[#allocation1] ss:$9 sm:$0xff] %v227_v17 }
  0x37   : > { %v353_v21 = vld [vmem:[#allocation1] sm:$0xff]  ;;  %v354_v22 = vld [vmem:[#allocation1 + $0x9] sm:$0xff]  ;;  %271 = vrot.lane.b32.xlu2 %v265_v19, %s1000_s28 }
  0x38   : > { %v355_v23 = vpack.i.b16 %v353_v21, %v353_v21  ;;  %v358_v24 = vpack.i.b16 %v354_v22, %v354_v22 }
  0x3a   : > { %v357_v25 = vperm.slane %v355_v23, 0  ;;  %v360_v26 = vperm.slane %v358_v24, 0  ;;  %v731_v23 = vld [vmem:[%s1061_s25] sm:$0x3f] }
  0x3b   : > { %v788_v24 = vld [vmem:[%s1061_s25] sm:$0x3f] }
  0x3c   : > { %v363_v27 = vunpack.c.l.bf16 %v357_v25  ;;  %v364_v28 = vunpack.c.l.bf16 %v360_v26 }
  0x3e   : > { %v367_v29 = vrot.slane %v364_v28, 4 }
  0x40   : > { %v368_v30 = vsel %vm245_vm0, %v363_v27, %v367_v29 }
  0x41   : > { %369 = vrot.lane.b32.xlu0 %v368_v30, %s1001_s29  ;;  %580 = vrot.lane.b32.xlu1 %v368_v30, %s1002_s30 }
  0x49   : > { %446 = vrot.lane.b32.xlu0 %v246_v12, %s1003_s6  ;;  %657 = vrot.lane.b32.xlu1 %v246_v12, %s1004_s7 }
  0x51   : > { %791 = vrot.lane.b32.xlu1 %v368_v30, %s1005_s8  ;;  %273 = vrot.lane.b32.xlu0 %v267_v20, %s1000_s28  ;;  %v790_v30 = vunpack.c.h.bf16 %v788_v24 }
  0xb3   : > { %v370_v34 = vpop.permute.xlu0 %369  ;;  %v581_v54 = vpop.permute.xlu1 %580 }
  0xb4   : > { %v371_v35 = vrot.slane %v370_v34, 4  ;;  %v582_v61 = vrot.slane %v581_v54, 4 }
  0xb6   : > { %v373_v36 = vsel %vm372_vm1, %v371_v35, %v370_v34  ;;  %v377_v37 = vmul.f32 %v371_v35, %v362_v32  ;;  %v584_v1 = vsel %vm583_vm3, %v582_v61, %v581_v54  ;;  %v588_v2 = vmul.f32 %v582_v61, %v579_v60 }
  0xb7   : > { %v376_v38 = vmul.f32 %v373_v36, %v361_v33  ;;  %v587_v5 = vmul.f32 %v584_v1, %v578_v0  ;;  %v789_v34 = vunpack.c.l.bf16 %v788_v24  ;;  %v255_v54 = vpack.c.bf16 %v1066_v15, %v1066_v15  ;;  %v257_v15 = vld [vmem:[%s1159_s1] sm:$0xf] }
  0xb8   : > { %382 = vst [vmem:[#allocation1 + $0x10] ss:$2 sm:$0xff] %v377_v37 }
  0xb9   : > { %380 = vst [vmem:[#allocation1] ss:$2 sm:$0xff] %v376_v38 }
  0xbb   : > { %v447_v42 = vpop.permute.xlu0 %446  ;;  %v658_v4 = vpop.permute.xlu1 %657 }
  0xbc   : > { %v448_v43 = vrot.slane %v447_v42, 4  ;;  %v659_v10 = vrot.slane %v658_v4, 4 }
  0xbe   : > { %v450_v44 = vsel %vm449_vm2, %v448_v43, %v447_v42  ;;  %v454_v45 = vmul.f32 %v448_v43, %v445_v40  ;;  %v665_v12 = vmul.f32 %v659_v10, %v656_v8  ;;  %v661_v13 = vsel %vm660_vm4, %v659_v10, %v658_v4  ;;  %v946_v10 = vld [vmem:[%s1159_s1 + $0xc] sm:$0xf] }
  0xbf   : > { %v453_v46 = vmul.f32 %v450_v44, %v444_v41  ;;  %v385_v47 = vld.sshfl [vmem:[#allocation1 + $0x10] sm:$0xff pattern:$0x75316420]  ;;  %v664_v17 = vmul.f32 %v661_v13, %v655_v11 }
  0xc0   : > { %v391_v48 = vpack.c.bf16 %v385_v47, %v385_v47  ;;  %459 = vst [vmem:[#allocation1 + $0x10] ss:$2 sm:$0xff] %v454_v45  ;;  %v384_v49 = vld.sshfl [vmem:[#allocation1 + $0x8] sm:$0xff pattern:$0x75316420]  ;;  %v270_v47 = vpop.permute.xlu2 %269 }
  0xc1   : > { %v390_v50 = vpack.c.bf16 %v384_v49, %v384_v49  ;;  %v383_v51 = vld.sshfl [vmem:[#allocation1] sm:$0xff pattern:$0x75316420] }
  0xc2   : > { %401 = vrot.lane.b32.xlu1 %v391_v48, %s1006_s9  ;;  %v389_v52 = vpack.c.bf16 %v383_v51, %v383_v51  ;;  %457 = vst [vmem:[#allocation1] ss:$2 sm:$0xff] %v453_v46 }
  0xc3   : > { %399 = vrot.lane.b32.xlu0 %v390_v50, %s1006_s9  ;;  %v792_v25 = vpop.permute.xlu1 %791  ;;  %v274_v49 = vpop.permute.xlu0 %273 }
  0xc4   : > { %397 = vrot.lane.b32.xlu2 %v389_v52, %s1006_s9  ;;  %v793_v31 = vrot.slane %v792_v25, 4 }
  0xc6   : > { %v795_v35 = vsel %vm794_vm5, %v793_v31, %v792_v25  ;;  %v799_v36 = vmul.f32 %v793_v31, %v790_v30 }
  0xc7   : > { %v462_v56 = vld.sshfl [vmem:[#allocation1 + $0x10] sm:$0xff pattern:$0x75316420]  ;;  %v798_v37 = vmul.f32 %v795_v35, %v789_v34 }
  0xc8   : > { %v468_v57 = vpack.c.bf16 %v462_v56, %v462_v56  ;;  %v272_v48 = vpop.permute.xlu2 %271  ;;  %v319_v56 = vsel %vm282_vm7, %v255_v54, 0 }
  0xc9   : > { %v461_v58 = vld.sshfl [vmem:[#allocation1 + $0x8] sm:$0xff pattern:$0x75316420]  ;;  %v460_v59 = vld.sshfl [vmem:[#allocation1] sm:$0xff pattern:$0x75316420]  ;;  %v276_v50 = vsel %vm275_vm6, %v270_v47, %v272_v48  ;;  %v277_v51 = vsel %vm275_vm6, %v272_v48, %v274_v49  ;;  %331 = vmatpush.bf16.msra.mxu2 %v319_v56 }
  0xca   : > { %478 = vrot.lane.b32.xlu1 %v468_v57, %s1007_s10  ;;  %v467_v62 = vpack.c.bf16 %v461_v58, %v461_v58  ;;  %v466_v63 = vpack.c.bf16 %v460_v59, %v460_v59  ;;  %524 = vst [vmem:[#allocation1] ss:$4 sm:$0xff] %v520_v53  ;;  %v284_v52 = vsel %vm282_vm7, %v276_v50, 0  ;;  %v287_v53 = vsel %vm282_vm7, %v277_v51, 0  ;;  %v938_v58 = vld [vmem:[%s1159_s1 + $0x4] sm:$0xf] }
  0xcb   : > { %296 = vmatpush.bf16.msra.mxu0 %v284_v52  ;;  %309 = vmatpush.bf16.msra.mxu1 %v287_v53  ;;  %v322_v57 = vsel %vm282_vm7, %v256_v55, 0  ;;  %v961_v53 = vld [vmem:[%s1159_s1 + $0x20] sm:$0xf] }
  0xcc   : > { %476 = vrot.lane.b32.xlu0 %v467_v62, %s1007_s10  ;;  %474 = vrot.lane.b32.xlu2 %v466_v63, %s1007_s10 }
  0xcd   : > { %344 = vmatpush.bf16.msra.mxu3 %v322_v57  ;;  %941 = vmatmul.msk.bf16.vlgmr.msra.gmra.mxu2 %vm278_vm8, %v257_v15 }
  0xce   : > { %939 = vmatmul.msk.bf16.vlgmr.msra.gmra.mxu0 %vm278_vm8, %v938_v58  ;;  %940 = vmatmul.msk.bf16.vlgmr.msra.gmra.mxu1 %vm278_vm8, %v938_v58 }
  0xd0   : > { %942 = vmatmul.msk.bf16.vlgmr.msra.gmra.mxu3 %vm278_vm8, %v257_v15 }
  0xd1   : > { %v529_v6 = vld.sshfl [vmem:[#allocation1 + $0x10] sm:$0xff pattern:$0x73625140]  ;;  %v527_v7 = vld.sshfl [vmem:[#allocation1 + $0x8] sm:$0xff pattern:$0x73625140] }
  0xd2   : > { %535 = vrot.lane.b32.xlu1 %v529_v6, %s1008_s11  ;;  %593 = vst [vmem:[#allocation1 + $0x10] ss:$2 sm:$0xff] %v588_v2  ;;  %v525_v9 = vld.sshfl [vmem:[#allocation1] sm:$0xff pattern:$0x73625140] }
  0xd3   : > { %591 = vst [vmem:[#allocation1] ss:$2 sm:$0xff] %v587_v5  ;;  %v943_v2 = vld [vmem:[%s1159_s1 + $0x8] sm:$0xf] }
  0xd4   : > { %533 = vrot.lane.b32.xlu0 %v527_v7, %s1008_s11  ;;  %531 = vrot.lane.b32.xlu2 %v525_v9, %s1008_s11 }
  0xd9   : > { %v596_v14 = vld.sshfl [vmem:[#allocation1 + $0x10] sm:$0xff pattern:$0x75316420] }
  0xda   : > { %v602_v18 = vpack.c.bf16 %v596_v14, %v596_v14  ;;  %670 = vst [vmem:[#allocation1 + $0x10] ss:$2 sm:$0xff] %v665_v12  ;;  %v595_v19 = vld.sshfl [vmem:[#allocation1 + $0x8] sm:$0xff pattern:$0x75316420] }
  0xdb   : > { %v601_v20 = vpack.c.bf16 %v595_v19, %v595_v19  ;;  %v594_v21 = vld.sshfl [vmem:[#allocation1] sm:$0xff pattern:$0x75316420]  ;;  %v949_v19 = vld [vmem:[%s1159_s1 + $0x10] sm:$0xf] }
  0xdc   : > { %612 = vrot.lane.b32.xlu1 %v602_v18, %s1009_s12  ;;  %v600_v22 = vpack.c.bf16 %v594_v21, %v594_v21  ;;  %668 = vst [vmem:[#allocation1] ss:$2 sm:$0xff] %v664_v17 }
  0xdd   : > { %610 = vrot.lane.b32.xlu0 %v601_v20, %s1009_s12 }
  0xde   : > { %608 = vrot.lane.b32.xlu2 %v600_v22, %s1009_s12 }
  0xe1   : > { %v673_v26 = vld.sshfl [vmem:[#allocation1 + $0x10] sm:$0xff pattern:$0x75316420] }
  0xe2   : > { %v679_v27 = vpack.c.bf16 %v673_v26, %v673_v26  ;;  %v1013_v26 = vmov 0  }
  0xe3   : > { %v672_v28 = vld.sshfl [vmem:[#allocation1 + $0x8] sm:$0xff pattern:$0x75316420]  ;;  %v671_v29 = vld.sshfl [vmem:[#allocation1] sm:$0xff pattern:$0x75316420]  ;;  %990 = vset.pattern.permute.xlu2 %v1013_v26  ;;  %991 = vset.pattern.permute.xlu0 %v1013_v26 }
  0xe4   : > { %689 = vrot.lane.b32.xlu1 %v679_v27, %s1010_s13  ;;  %v678_v32 = vpack.c.bf16 %v672_v28, %v672_v28  ;;  %v677_v33 = vpack.c.bf16 %v671_v29, %v671_v29  ;;  %735 = vst [vmem:[#allocation1] ss:$4 sm:$0xff] %v731_v23  ;;  %v865_v23 = vld [vmem:[%s1160_s2] sm:$0xff]  ;;  %v952_v29 = vld [vmem:[%s1159_s1 + $0x14] sm:$0xf] }
  0xe6   : > { %687 = vrot.lane.b32.xlu0 %v678_v32, %s1010_s13  ;;  %685 = vrot.lane.b32.xlu2 %v677_v33, %s1010_s13  ;;  %s966_s13 = sshll.u32 %s1165_s19, 3 }
  0xe7   : > { %s224_s16 = scalar_lea.vmem %s1163_s5, %s966_s13 }
  0xeb   : > { %v740_v38 = vld.sshfl [vmem:[#allocation1 + $0x10] sm:$0xff pattern:$0x73625140]  ;;  %v738_v39 = vld.sshfl [vmem:[#allocation1 + $0x8] sm:$0xff pattern:$0x73625140] }
  0xec   : > { %746 = vrot.lane.b32.xlu1 %v740_v38, %s1011_s14  ;;  %804 = vst [vmem:[#allocation1 + $0x10] ss:$2 sm:$0xff] %v799_v36  ;;  %v736_v40 = vld.sshfl [vmem:[#allocation1] sm:$0xff pattern:$0x73625140] }
  0xed   : > { %802 = vst [vmem:[#allocation1] ss:$2 sm:$0xff] %v798_v37  ;;  %v955_v37 = vld [vmem:[%s1159_s1 + $0x18] sm:$0xf] }
  0xee   : > { %744 = vrot.lane.b32.xlu0 %v738_v39, %s1011_s14  ;;  %742 = vrot.lane.b32.xlu2 %v736_v40, %s1011_s14 }
  0xf3   : > { %v807_v41 = vld.sshfl [vmem:[#allocation1 + $0x10] sm:$0xff pattern:$0x75316420] }
  0xf4   : > { %v813_v42 = vpack.c.bf16 %v807_v41, %v807_v41  ;;  %v806_v43 = vld.sshfl [vmem:[#allocation1 + $0x8] sm:$0xff pattern:$0x75316420]  ;;  %v805_v44 = vld.sshfl [vmem:[#allocation1] sm:$0xff pattern:$0x75316420] }
  0xf5   : > { %v812_v45 = vpack.c.bf16 %v806_v43, %v806_v43  ;;  %v811_v46 = vpack.c.bf16 %v805_v44, %v805_v44 }
  0xf6   : > { %823 = vrot.lane.b32.xlu1 %v813_v42, %s1012_s15 }
  0xf7   : > { %821 = vrot.lane.b32.xlu0 %v812_v45, %s1012_s15  ;;  %819 = vrot.lane.b32.xlu2 %v811_v46, %s1012_s15  ;;  %v958_v45 = vld [vmem:[%s1159_s1 + $0x1c] sm:$0xf] }
  0xff   : > { %868 = vperm.xlu2 %990, %v865_v23  }
 0x11e   : > { %v398_v16 = vpop.permute.xlu2 %397 }
 0x126   : > { %v475_v63 = vpop.permute.xlu2 %474 }
 0x12e   : > { %v532_v9 = vpop.permute.xlu2 %531 }
 0x134   : > { %v402_v59 = vpop.permute.xlu1 %401 }
 0x135   : > { %v400_v60 = vpop.permute.xlu0 %399 }
 0x136   : > { %v404_v61 = vsel %vm403_vm9, %v398_v16, %v400_v60  ;;  %v405_v62 = vsel %vm403_vm9, %v400_v60, %v402_v59 }
 0x137   : > { %v410_v0 = vsel %vm282_vm7, %v404_v61, 0  ;;  %v413_v1 = vsel %vm282_vm7, %v405_v62, 0 }
 0x138   : > { %422 = vmatpush.bf16.msrb.mxu0 %v410_v0  ;;  %435 = vmatpush.bf16.msrb.mxu1 %v413_v1  ;;  %v609_v20 = vpop.permute.xlu2 %608 }
 0x13b   : > { %944 = vmatmul.msk.bf16.vlgmr.msrb.gmra.mxu0 %vm278_vm8, %v943_v2  ;;  %945 = vmatmul.msk.bf16.vlgmr.msrb.gmra.mxu1 %vm278_vm8, %v943_v2 }
 0x13c   : > { %v479_v3 = vpop.permute.xlu1 %478 }
 0x13e   : > { %v477_v4 = vpop.permute.xlu0 %476 }
 0x13f   : > { %v481_v5 = vsel %vm480_vm10, %v475_v63, %v477_v4  ;;  %v482_v6 = vsel %vm480_vm10, %v477_v4, %v479_v3 }
 0x140   : > { %v487_v7 = vsel %vm282_vm7, %v481_v5, 0  ;;  %v490_v8 = vsel %vm282_vm7, %v482_v6, 0  ;;  %v686_v30 = vpop.permute.xlu2 %685 }
 0x141   : > { %499 = vmatpush.bf16.msrb.mxu2 %v487_v7  ;;  %512 = vmatpush.bf16.msrb.mxu3 %v490_v8 }
 0x144   : > { %947 = vmatmul.msk.bf16.vlgmr.msrb.gmra.mxu2 %vm278_vm8, %v946_v10  ;;  %948 = vmatmul.msk.bf16.vlgmr.msrb.gmra.mxu3 %vm278_vm8, %v946_v10  ;;  %v536_v11 = vpop.permute.xlu1 %535 }
 0x146   : > { %v534_v12 = vpop.permute.xlu0 %533 }
 0x147   : > { %v538_v13 = vsel %vm537_vm11, %v532_v9, %v534_v12  ;;  %v539_v14 = vsel %vm537_vm11, %v534_v12, %v536_v11 }
 0x148   : > { %v544_v17 = vsel %vm282_vm7, %v538_v13, 0  ;;  %v547_v18 = vsel %vm282_vm7, %v539_v14, 0  ;;  %v743_v39 = vpop.permute.xlu2 %742 }
 0x149   : > { %556 = vmatpush.bf16.msra.mxu0 %v544_v17  ;;  %569 = vmatpush.bf16.msra.mxu1 %v547_v18 }
 0x14b   : > { %v298_v54 = vpop.f32.mrf.mxu0  ;;  %v311_v55 = vpop.f32.mrf.mxu1 }
 0x14c   : > { %950 = vmatmul.msk.bf16.vlgmr.msra.gmra.mxu0 %vm278_vm8, %v949_v19  ;;  %951 = vmatmul.msk.bf16.vlgmr.msra.gmra.mxu1 %vm278_vm8, %v949_v19 }
 0x14e   : > { %v613_v21 = vpop.permute.xlu1 %612 }
 0x14f   : > { %v611_v22 = vpop.permute.xlu0 %610 }
 0x150   : > { %v615_v24 = vsel %vm614_vm12, %v609_v20, %v611_v22  ;;  %v616_v25 = vsel %vm614_vm12, %v611_v22, %v613_v21  ;;  %v333_v58 = vpop.f32.mrf.mxu2 }
 0x151   : > { %v621_v27 = vsel %vm282_vm7, %v615_v24, 0  ;;  %v624_v28 = vsel %vm282_vm7, %v616_v25, 0  ;;  %v820_v47 = vpop.permute.xlu2 %819  ;;  %v334_v16 = vadd.f32 %v333_v58, %v298_v54 }
 0x152   : > { %633 = vmatpush.bf16.msra.mxu2 %v621_v27  ;;  %646 = vmatpush.bf16.msra.mxu3 %v624_v28 }
 0x153   : > { %v300_v56 = vpop.f32.mrf.mxu0  ;;  %v313_v57 = vpop.f32.mrf.mxu1 }
 0x154   : > { %v346_v15 = vpop.f32.mrf.mxu3 }
 0x155   : > { %953 = vmatmul.msk.bf16.vlgmr.msra.gmra.mxu2 %vm278_vm8, %v952_v29  ;;  %954 = vmatmul.msk.bf16.vlgmr.msra.gmra.mxu3 %vm278_vm8, %v952_v29  ;;  %v347_v59 = vadd.f32 %v346_v15, %v311_v55 }
 0x156   : > { %v690_v31 = vpop.permute.xlu1 %689 }
 0x158   : > { %v688_v32 = vpop.permute.xlu0 %687  ;;  %v335_v60 = vpop.f32.mrf.mxu2 }
 0x159   : > { %v692_v33 = vsel %vm691_vm13, %v686_v30, %v688_v32  ;;  %v693_v34 = vsel %vm691_vm13, %v688_v32, %v690_v31 }
 0x15a   : > { %v698_v35 = vsel %vm282_vm7, %v692_v33, 0  ;;  %v701_v36 = vsel %vm282_vm7, %v693_v34, 0  ;;  %v869_v34 = vpop.permute.xlu2 %868 }
 0x15b   : > { %710 = vmatpush.bf16.msrb.mxu0 %v698_v35  ;;  %723 = vmatpush.bf16.msrb.mxu1 %v701_v36 }
 0x15c   : > { %v348_v61 = vpop.f32.mrf.mxu3 }
 0x15e   : > { %956 = vmatmul.msk.bf16.vlgmr.msrb.gmra.mxu0 %vm278_vm8, %v955_v37  ;;  %957 = vmatmul.msk.bf16.vlgmr.msrb.gmra.mxu1 %vm278_vm8, %v955_v37  ;;  %v747_v38 = vpop.permute.xlu1 %746 }
 0x160   : > { %v745_v40 = vpop.permute.xlu0 %744 }
 0x161   : > { %v749_v41 = vsel %vm748_vm14, %v743_v39, %v745_v40  ;;  %v750_v42 = vsel %vm748_vm14, %v745_v40, %v747_v38 }
 0x162   : > { %v755_v43 = vsel %vm282_vm7, %v749_v41, 0  ;;  %v758_v44 = vsel %vm282_vm7, %v750_v42, 0 }
 0x163   : > { %767 = vmatpush.bf16.msrb.mxu2 %v755_v43  ;;  %780 = vmatpush.bf16.msrb.mxu3 %v758_v44 }
 0x166   : > { %959 = vmatmul.msk.bf16.vlgmr.msrb.gmra.mxu2 %vm278_vm8, %v958_v45  ;;  %960 = vmatmul.msk.bf16.vlgmr.msrb.gmra.mxu3 %vm278_vm8, %v958_v45 }
 0x168   : > { %v824_v46 = vpop.permute.xlu1 %823 }
 0x169   : > { %v822_v48 = vpop.permute.xlu0 %821 }
 0x16a   : > { %v826_v49 = vsel %vm825_vm15, %v820_v47, %v822_v48  ;;  %v827_v50 = vsel %vm825_vm15, %v822_v48, %v824_v46 }
 0x16b   : > { %v832_v51 = vsel %vm282_vm7, %v826_v49, 0  ;;  %v835_v52 = vsel %vm282_vm7, %v827_v50, 0 }
 0x16c   : > { %844 = vmatpush.bf16.msra.mxu0 %v832_v51  ;;  %857 = vmatpush.bf16.msra.mxu1 %v835_v52 }
 0x16f   : > { %962 = vmatmul.msk.bf16.vlgmr.msra.gmra.mxu0 %vm278_vm8, %v961_v53  ;;  %963 = vmatmul.msk.bf16.vlgmr.msra.gmra.mxu1 %vm278_vm8, %v961_v53 }
 0x1b8   : > { %v424_v62 = vpop.f32.mrf.mxu0  ;;  %v437_v63 = vpop.f32.mrf.mxu1 }
 0x1b9   : > { %v441_v14 = vadd.f32 %v424_v62, %v334_v16  ;;  %v442_v17 = vadd.f32 %v437_v63, %v347_v59 }
 0x1c0   : > { %v426_v0 = vpop.f32.mrf.mxu0  ;;  %v439_v1 = vpop.f32.mrf.mxu1 }
 0x1c7   : > { %v501_v2 = vpop.f32.mrf.mxu2  ;;  %v514_v3 = vpop.f32.mrf.mxu3 }
 0x1c8   : > { %v518_v18 = vadd.f32 %v501_v2, %v441_v14  ;;  %v519_v19 = vadd.f32 %v514_v3, %v442_v17 }
 0x1c9   : > { %v558_v4 = vpop.f32.mrf.mxu0  ;;  %v571_v5 = vpop.f32.mrf.mxu1 }
 0x1ca   : > { %v575_v22 = vadd.f32 %v558_v4, %v518_v18  ;;  %v576_v23 = vadd.f32 %v571_v5, %v519_v19 }
 0x1cf   : > { %v503_v6 = vpop.f32.mrf.mxu2  ;;  %v516_v7 = vpop.f32.mrf.mxu3 }
 0x1d1   : > { %v560_v8 = vpop.f32.mrf.mxu0  ;;  %v573_v9 = vpop.f32.mrf.mxu1 }
 0x1d8   : > { %v635_v10 = vpop.f32.mrf.mxu2  ;;  %v648_v11 = vpop.f32.mrf.mxu3 }
 0x1d9   : > { %v652_v26 = vadd.f32 %v635_v10, %v575_v22  ;;  %v653_v27 = vadd.f32 %v648_v11, %v576_v23 }
 0x1db   : > { %v712_v12 = vpop.f32.mrf.mxu0  ;;  %v725_v13 = vpop.f32.mrf.mxu1 }
 0x1dc   : > { %v729_v28 = vadd.f32 %v712_v12, %v652_v26  ;;  %v730_v29 = vadd.f32 %v725_v13, %v653_v27 }
 0x1e0   : > { %v637_v20 = vpop.f32.mrf.mxu2  ;;  %v650_v21 = vpop.f32.mrf.mxu3 }
 0x1e3   : > { %v714_v24 = vpop.f32.mrf.mxu0  ;;  %v727_v25 = vpop.f32.mrf.mxu1 }
 0x1e9   : > { %v769_v30 = vpop.f32.mrf.mxu2  ;;  %v782_v31 = vpop.f32.mrf.mxu3 }
 0x1ea   : > { %v786_v32 = vadd.f32 %v769_v30, %v729_v28  ;;  %v787_v33 = vadd.f32 %v782_v31, %v730_v29 }
 0x1ec   : > { %v846_v35 = vpop.f32.mrf.mxu0  ;;  %v859_v36 = vpop.f32.mrf.mxu1 }
 0x1ed   : > { %v863_v37 = vadd.f32 %v846_v35, %v786_v32  ;;  %v864_v38 = vadd.f32 %v859_v36, %v787_v33 }
 0x1ef   : > { %v871_v39 = vadd.f32 %v869_v34, %v863_v37  ;;  %v872_v40 = vadd.f32 %v869_v34, %v864_v38 }
 0x1f1   : > { %v873_v41 = vpack.c.bf16 %v872_v40, %v871_v39  ;;  %v771_v42 = vpop.f32.mrf.mxu2  ;;  %v784_v43 = vpop.f32.mrf.mxu3 }
 0x1f3   : > { %874 = vst [vmem:[%s224_s16] sm:$0xff] %v873_v41 }
 0x1f4   : > { %v848_v44 = vpop.f32.mrf.mxu0  ;;  %v861_v45 = vpop.f32.mrf.mxu1 }
 0x1f5 PF: > { %s15_s18 = sadd.s32 1, %s998_s18  }
 0x1f6   : > { %p12_p4 = scmp.ge.s32.totalorder %s15_s18, 4  }
 0x1f8   :  { %14 = sbr.rel (!%p12_p4) target bundleno = 1 (0x1), region = 83 }

// kernel: dwt_upsampler_forward.9
= control target key start
LH: loop header
LB: loop body
LE: loop exit
PB: predicated region body
PF: predicated region fallthrough
CT: control target
= control target key end

     0   :  { %s1003_s18 = smov 0   ;;  %s1156_s0 = inlined_call_operand.vmem [shape: bf16[2,8,290], index: 0, kind: input, shape index: {}]   ;;  %s1157_s1 = inlined_call_operand.vmem [shape: bf16[9,8,8], index: 1, kind: input, shape index: {}]   ;;  %s1158_s2 = inlined_call_operand.vmem [shape: f32[8,1], index: 2, kind: input, shape index: {}]   ;;  %s1159_s3 = inlined_call_operand.vmem [shape: bf16[1,256], index: 3, kind: input, shape index: {}]   ;;  %s1160_s4 = inlined_call_operand.vmem [shape: bf16[1,256], index: 4, kind: input, shape index: {}]   ;;  %s1161_s5 = inlined_call_operand.vmem [shape: bf16[2,8,256], index: 5, kind: output, shape index: {}]  }
   0x1 LB: > { %s864_s19 = sadd.s32 4294967295, %s957_s18   ;;  %p868_p0 = scmp.ge.s32.totalorder %s957_s18, 1  ;;  %s957_s18 = sphi %s1003_s18, %s15_s18  }
   0x2   : > { %p187_p1 = scmp.lt.s32.totalorder %s957_s18, 3 }
   0x4   : > { %p188_p2 = pnand %p868_p0, %p187_p1 }
   0x5   : > { %p215_p3 = scmp.lt.s32.totalorder (!%p188_p2), %s864_s19, 1  ;;  %s959_s28 = smov (!%p188_p2), 127  }
   0x6   : > { %191 = sbr.rel (%p188_p2) target bundleno = 460 (0x1cc), region = 40  ;;  %s960_s29 = smov (!%p188_p2), 2  }
   0x7   : > { %s961_s30 = smov (!%p188_p2), 18   ;;  %s962_s6 = smov (!%p188_p2), 16  }
   0x8   : > { %s963_s7 = smov (!%p188_p2), 32   ;;  %s964_s8 = smov (!%p188_p2), 34  }
   0x9   : > { %s965_s9 = smov (!%p188_p2), 126   ;;  %s966_s10 = smov (!%p188_p2), 112  }
   0xa   : > { %s967_s11 = smov (!%p188_p2), 111   ;;  %s968_s12 = smov (!%p188_p2), 110  }
   0xb   : > { %v226_v0 = vld [vmem:[%s1159_s3] sm:$0x3]  ;;  %s1163_s19 = smov (!%p215_p3, %s864_s19), 1  ;;  %vm362_vm0 = vcmask 15360   ;;  %vm435_vm1 = vcmask 130048   ;;  %vm266_vm2 = vcmask 1039360  }
   0xc   : > { %230 = vst [vmem:[#allocation1] ss:$9 sm:$0xff] %v226_v0  ;;  %v227_v1 = vld [vmem:[%s1160_s4] sm:$0x3]  ;;  %s901_s24 = smul.u32 12, %s1163_s19  ;;  %vm273_vm3 = vcmask 1043456  }
   0xd   : > { %vm557_vm4 = vcmask 146432   ;;  %vm623_vm5 = vcmask 261120   ;;  %s969_s13 = smov 96   ;;  %vm737_vm6 = vcmask 277504   ;;  %s970_s14 = smov 95   ;;  %vm269_vm7 = vcmask 64512  }
   0xe   : > { %s1023_s27 = scalar_lea.vmem %s1156_s0, %s901_s24  ;;  %s971_s15 = smov 94   ;;  %vm384_vm8 = vcmask 1031168   ;;  %vm457_vm9 = vcmask 916480   ;;  %vm513_vm10 = vcmask 908288   ;;  %vm579_vm11 = vcmask 900096  }
   0xf   : > { %v248_v4 = vld [vmem:[%s1023_s27] sm:$0xff]  ;;  %v249_v25 = vld [vmem:[%s1023_s27 + $0x8] sm:$0xf]  ;;  %vm645_vm12 = vcmask 785408   ;;  %vm693_vm13 = vcmask 777216   ;;  %vm759_vm14 = vcmask 769024  }
  0x10   : > { %v255_v5 = vunpack.c.h.b16 %v248_v4  ;;  %v254_v22 = vunpack.c.l.b16 %v248_v4  ;;  %v256_v26 = vunpack.c.l.b16 %v249_v25  ;;  %v1046_v28 = vunpack.c.l.bf16 %v248_v4  ;;  %v425_v38 = vld [vmem:[%s1023_s27 + $0x8] sm:$0xf] }
  0x11   : > { %v353_v29 = vunpack.c.l.bf16 %v249_v25  ;;  %v1048_v31 = vunpack.c.h.bf16 %v248_v4  ;;  %v1053_v43 = vunpack.c.l.bf16 %v425_v38  ;;  %v503_v58 = vunpack.c.l.b16 %v425_v38 }
  0x12   : > { %v1026_v6 = vpack.c.b16 %v255_v5, %v255_v5  ;;  %v1040_v24 = vpack.c.b16 %v254_v22, %v254_v22  ;;  %v259_v27 = vpack.c.b16 %v256_v26, %v256_v26 }
  0x13   : > { %v231_v2 = vld [vmem:[#allocation1] sm:$0xff]  ;;  %v232_v3 = vld [vmem:[#allocation1 + $0x9] sm:$0xff]  ;;  %v506_v61 = vpack.c.b16 %v503_v58, %v503_v58 }
  0x14   : > { %342 = vst [vmem:[#allocation1] ss:$9 sm:$0xff] %v227_v1  ;;  %262 = vrot.lane.b32.xlu2 %v1026_v6, %s959_s28  ;;  %v233_v11 = vpack.i.b16 %v231_v2, %v231_v2  ;;  %v236_v12 = vpack.i.b16 %v232_v3, %v232_v3 }
  0x16   : > { %v1030_v17 = vperm.slane %v233_v11, 0  ;;  %v1032_v18 = vperm.slane %v236_v12, 0 }
  0x18   : > { %v241_v20 = vunpack.c.l.bf16 %v1030_v17  ;;  %v242_v21 = vunpack.c.l.bf16 %v1032_v18  ;;  %v872_v17 = vld [vmem:[%s1157_s1 + $0x4] sm:$0xf]  ;;  %v247_v18 = vld [vmem:[%s1157_s1] sm:$0xf] }
  0x1a   : > { %v929_v23 = vpack.i.bf16 %v242_v21, %v241_v20 }
  0x1b   : > { %v343_v7 = vld [vmem:[#allocation1] sm:$0xff]  ;;  %v344_v8 = vld [vmem:[#allocation1 + $0x9] sm:$0xff] }
  0x1c   : > { %v345_v9 = vpack.i.b16 %v343_v7, %v343_v7  ;;  %v348_v10 = vpack.i.b16 %v344_v8, %v344_v8  ;;  %264 = vrot.lane.b32.xlu2 %v259_v27, %s959_s28 }
  0x1e   : > { %v347_v13 = vperm.slane %v345_v9, 0  ;;  %v350_v14 = vperm.slane %v348_v10, 0 }
  0x20   : > { %v354_v15 = vunpack.c.l.bf16 %v347_v13  ;;  %v355_v16 = vunpack.c.l.bf16 %v350_v14 }
  0x22   : > { %v924_v19 = vpack.i.bf16 %v355_v16, %v354_v15 }
  0x24   : > { %925 = vrot.lane.b32.xlu0 %v924_v19, %s960_s29  ;;  %935 = vrot.lane.b32.xlu1 %v924_v19, %s961_s30 }
  0x2c   : > { %930 = vrot.lane.b32.xlu0 %v929_v23, %s962_s6  ;;  %260 = vrot.lane.b32.xlu1 %v1040_v24, %s959_s28 }
  0x34   : > { %940 = vrot.lane.b32.xlu0 %v929_v23, %s963_s7  ;;  %945 = vrot.lane.b32.xlu1 %v924_v19, %s964_s8 }
  0x6e   : > { %v1055_v45 = vpop.permute.xlu2 %262 }
  0x96   : > { %v926_v30 = vpop.permute.xlu0 %925  ;;  %v936_v34 = vpop.permute.xlu1 %935 }
  0x97   : > { %v928_v32 = vunpack.i.h.bf16 %v926_v30  ;;  %v927_v33 = vunpack.i.l.bf16 %v926_v30  ;;  %v938_v59 = vunpack.i.h.bf16 %v936_v34  ;;  %v937_v60 = vunpack.i.l.bf16 %v936_v34 }
  0x98   : > { %v243_v34 = vmul.f32 %v1046_v28, %v241_v20 }
  0x99   : > { %v367_v35 = vmul.f32 %v927_v33, %v1046_v28  ;;  %v369_v36 = vmul.f32 %v928_v32, %v353_v29  ;;  %v363_v37 = vsel %vm362_vm0, %v927_v33, %v928_v32  ;;  %v558_v62 = vsel %vm557_vm4, %v937_v60, %v938_v59  ;;  %v265_v33 = vpop.permute.xlu2 %264 }
  0x9a   : > { %v368_v39 = vmul.f32 %v363_v37, %v1048_v31  ;;  %v564_v0 = vmul.f32 %v938_v59, %v1053_v43  ;;  %v562_v1 = vmul.f32 %v937_v60, %v1046_v28  ;;  %v563_v2 = vmul.f32 %v558_v62, %v1048_v31  ;;  %v883_v60 = vld [vmem:[%s1157_s1 + $0x10] sm:$0xf] }
  0x9b   : > { %v372_v40 = vpack.c.bf16 %v369_v36, %v369_v36  ;;  %v370_v41 = vpack.c.bf16 %v367_v35, %v367_v35  ;;  %v245_v36 = vpack.c.bf16 %v243_v34, %v243_v34 }
  0x9c   : > { %v371_v42 = vpack.c.bf16 %v368_v39, %v368_v39  ;;  %v567_v5 = vpack.c.bf16 %v564_v0, %v564_v0  ;;  %v566_v7 = vpack.c.bf16 %v563_v2, %v563_v2  ;;  %v565_v8 = vpack.c.bf16 %v562_v1, %v562_v1 }
  0x9d   : > { %382 = vrot.lane.b32.xlu0 %v372_v40, %s965_s9  ;;  %378 = vrot.lane.b32.xlu1 %v370_v41, %s965_s9  ;;  %v310_v38 = vsel %vm273_vm3, %v245_v36, 0 }
  0x9e   : > { %v931_v44 = vpop.permute.xlu0 %930  ;;  %380 = vrot.lane.b32.xlu2 %v371_v42, %s965_s9  ;;  %v261_v48 = vpop.permute.xlu1 %260  ;;  %322 = vmatpush.bf16.msra.mxu2 %v310_v38 }
  0x9f   : > { %v933_v46 = vunpack.i.h.bf16 %v931_v44  ;;  %v932_v47 = vunpack.i.l.bf16 %v931_v44  ;;  %v267_v49 = vsel %vm266_vm2, %v261_v48, %v1055_v45  ;;  %v877_v44 = vld [vmem:[%s1157_s1 + $0x8] sm:$0xf] }
  0xa0   : > { %v275_v53 = vsel %vm273_vm3, %v267_v49, 0 }
  0xa1   : > { %v440_v50 = vmul.f32 %v932_v47, %v1046_v28  ;;  %v442_v51 = vmul.f32 %v933_v46, %v1053_v43  ;;  %v436_v52 = vsel %vm435_vm1, %v932_v47, %v933_v46  ;;  %287 = vmatpush.bf16.msra.mxu0 %v275_v53  ;;  %875 = vmatmul.msk.bf16.vlgmr.msra.gmra.mxu2 %vm269_vm7, %v247_v18 }
  0xa2   : > { %v441_v54 = vmul.f32 %v436_v52, %v1048_v31  ;;  %v880_v52 = vld [vmem:[%s1157_s1 + $0xc] sm:$0xf] }
  0xa3   : > { %v445_v55 = vpack.c.bf16 %v442_v51, %v442_v51  ;;  %v443_v56 = vpack.c.bf16 %v440_v50, %v440_v50 }
  0xa4   : > { %v444_v57 = vpack.c.bf16 %v441_v54, %v441_v54  ;;  %873 = vmatmul.msk.bf16.vlgmr.msra.gmra.mxu0 %vm269_vm7, %v872_v17 }
  0xa5   : > { %455 = vrot.lane.b32.xlu1 %v445_v55, %s966_s10 }
  0xa6   : > { %453 = vrot.lane.b32.xlu0 %v444_v57, %s966_s10  ;;  %451 = vrot.lane.b32.xlu2 %v443_v56, %s966_s10  ;;  %v941_v63 = vpop.permute.xlu0 %940  ;;  %v946_v16 = vpop.permute.xlu1 %945 }
  0xa7   : > { %v943_v3 = vunpack.i.h.bf16 %v941_v63  ;;  %v942_v4 = vunpack.i.l.bf16 %v941_v63  ;;  %v948_v19 = vunpack.i.h.bf16 %v946_v16  ;;  %v947_v22 = vunpack.i.l.bf16 %v946_v16 }
  0xa8   : > { %v972_v63 = vmov 0  }
  0xa9   : > { %v624_v9 = vsel %vm623_vm5, %v942_v4, %v943_v3  ;;  %v630_v10 = vmul.f32 %v943_v3, %v1053_v43  ;;  %v628_v11 = vmul.f32 %v942_v4, %v1046_v28  ;;  %v738_v23 = vsel %vm737_vm6, %v947_v22, %v948_v19  ;;  %949 = vset.pattern.permute.xlu2 %v972_v63 }
  0xaa   : > { %v629_v12 = vmul.f32 %v624_v9, %v1048_v31  ;;  %v744_v25 = vmul.f32 %v948_v19, %v1053_v43  ;;  %v742_v26 = vmul.f32 %v947_v22, %v1046_v28  ;;  %v743_v27 = vmul.f32 %v738_v23, %v1048_v31  ;;  %950 = vset.pattern.permute.xlu0 %v972_v63 }
  0xab   : > { %v633_v13 = vpack.c.bf16 %v630_v10, %v630_v10  ;;  %v631_v15 = vpack.c.bf16 %v628_v11, %v628_v11 }
  0xac   : > { %v632_v14 = vpack.c.bf16 %v629_v12, %v629_v12  ;;  %v747_v29 = vpack.c.bf16 %v744_v25, %v744_v25  ;;  %v745_v30 = vpack.c.bf16 %v742_v26, %v742_v26  ;;  %v746_v32 = vpack.c.bf16 %v743_v27, %v743_v27  ;;  %v892_v27 = vld [vmem:[%s1157_s1 + $0x1c] sm:$0xf] }
  0xad   : > { %511 = vrot.lane.b32.xlu1 %v506_v61, %s967_s11 }
  0xae   : > { %509 = vrot.lane.b32.xlu0 %v1026_v6, %s967_s11  ;;  %507 = vrot.lane.b32.xlu2 %v1040_v24, %s967_s11 }
  0xb5   : > { %577 = vrot.lane.b32.xlu1 %v567_v5, %s968_s12  ;;  %v886_v5 = vld [vmem:[%s1157_s1 + $0x14] sm:$0xf] }
  0xb6   : > { %575 = vrot.lane.b32.xlu0 %v566_v7, %s968_s12  ;;  %573 = vrot.lane.b32.xlu2 %v565_v8, %s968_s12 }
  0xbd   : > { %643 = vrot.lane.b32.xlu1 %v633_v13, %s969_s13 }
  0xbe   : > { %641 = vrot.lane.b32.xlu0 %v632_v14, %s969_s13  ;;  %639 = vrot.lane.b32.xlu2 %v631_v15, %s969_s13  ;;  %v889_v14 = vld [vmem:[%s1157_s1 + $0x18] sm:$0xf]  ;;  %s900_s13 = sshll.u32 %s1163_s19, 3 }
  0xbf   : > { %s224_s16 = scalar_lea.vmem %s1161_s5, %s900_s13 }
  0xc5   : > { %691 = vrot.lane.b32.xlu1 %v506_v61, %s970_s14  ;;  %v799_v61 = vld [vmem:[%s1158_s2] sm:$0xff] }
  0xc6   : > { %689 = vrot.lane.b32.xlu0 %v1026_v6, %s970_s14  ;;  %687 = vrot.lane.b32.xlu2 %v1040_v24, %s970_s14  ;;  %v244_v6 = vmul.f32 %v1048_v31, %v242_v21  ;;  %v268_v24 = vsel %vm266_vm2, %v1055_v45, %v265_v33 }
  0xc7   : > { %v278_v35 = vsel %vm273_vm3, %v268_v24, 0 }
  0xc8   : > { %v246_v37 = vpack.c.bf16 %v244_v6, %v244_v6  ;;  %300 = vmatpush.bf16.msra.mxu1 %v278_v35  ;;  %v895_v35 = vld [vmem:[%s1157_s1 + $0x20] sm:$0xf] }
  0xca   : > { %v313_v39 = vsel %vm273_vm3, %v246_v37, 0 }
  0xcb   : > { %335 = vmatpush.bf16.msra.mxu3 %v313_v39  ;;  %874 = vmatmul.msk.bf16.vlgmr.msra.gmra.mxu1 %vm269_vm7, %v872_v17 }
  0xcd   : > { %757 = vrot.lane.b32.xlu1 %v747_v29, %s971_s15 }
  0xce   : > { %753 = vrot.lane.b32.xlu2 %v745_v30, %s971_s15  ;;  %755 = vrot.lane.b32.xlu0 %v746_v32, %s971_s15 }
  0xcf   : > { %876 = vmatmul.msk.bf16.vlgmr.msra.gmra.mxu3 %vm269_vm7, %v247_v18 }
  0xd6   : > { %802 = vperm.xlu2 %949, %v799_v61  }
  0xf8   : > { %v381_v20 = vpop.permute.xlu2 %380 }
 0x100   : > { %v452_v21 = vpop.permute.xlu2 %451 }
 0x108   : > { %v508_v46 = vpop.permute.xlu2 %507 }
 0x10f   : > { %v383_v28 = vpop.permute.xlu0 %382  ;;  %v379_v31 = vpop.permute.xlu1 %378 }
 0x110   : > { %v385_v40 = vsel %vm384_vm8, %v379_v31, %v381_v20  ;;  %v386_v41 = vsel %vm384_vm8, %v381_v20, %v383_v28  ;;  %v574_v57 = vpop.permute.xlu2 %573 }
 0x111   : > { %v391_v42 = vsel %vm273_vm3, %v385_v40, 0  ;;  %v394_v43 = vsel %vm273_vm3, %v386_v41, 0 }
 0x112   : > { %403 = vmatpush.bf16.msrb.mxu0 %v391_v42  ;;  %416 = vmatpush.bf16.msrb.mxu1 %v394_v43 }
 0x115   : > { %878 = vmatmul.msk.bf16.vlgmr.msrb.gmra.mxu0 %vm269_vm7, %v877_v44  ;;  %879 = vmatmul.msk.bf16.vlgmr.msrb.gmra.mxu1 %vm269_vm7, %v877_v44 }
 0x117   : > { %v456_v45 = vpop.permute.xlu1 %455 }
 0x118   : > { %v454_v47 = vpop.permute.xlu0 %453  ;;  %v640_v7 = vpop.permute.xlu2 %639 }
 0x119   : > { %v458_v48 = vsel %vm457_vm9, %v452_v21, %v454_v47  ;;  %v459_v49 = vsel %vm457_vm9, %v454_v47, %v456_v45 }
 0x11a   : > { %v464_v50 = vsel %vm273_vm3, %v458_v48, 0  ;;  %v467_v51 = vsel %vm273_vm3, %v459_v49, 0 }
 0x11b   : > { %476 = vmatpush.bf16.msrb.mxu2 %v464_v50  ;;  %489 = vmatpush.bf16.msrb.mxu3 %v467_v51 }
 0x11e   : > { %881 = vmatmul.msk.bf16.vlgmr.msrb.gmra.mxu2 %vm269_vm7, %v880_v52  ;;  %882 = vmatmul.msk.bf16.vlgmr.msrb.gmra.mxu3 %vm269_vm7, %v880_v52 }
 0x11f   : > { %v512_v53 = vpop.permute.xlu1 %511 }
 0x120   : > { %v510_v54 = vpop.permute.xlu0 %509  ;;  %v688_v15 = vpop.permute.xlu2 %687 }
 0x121   : > { %v514_v55 = vsel %vm513_vm10, %v508_v46, %v510_v54  ;;  %v515_v56 = vsel %vm513_vm10, %v510_v54, %v512_v53  ;;  %v289_v36 = vpop.f32.mrf.mxu0 }
 0x122   : > { %v520_v58 = vsel %vm273_vm3, %v514_v55, 0  ;;  %v523_v59 = vsel %vm273_vm3, %v515_v56, 0 }
 0x123   : > { %532 = vmatpush.bf16.msra.mxu0 %v520_v58  ;;  %545 = vmatpush.bf16.msra.mxu1 %v523_v59 }
 0x124   : > { %v324_v17 = vpop.f32.mrf.mxu2 }
 0x125   : > { %v325_v20 = vadd.f32 %v324_v17, %v289_v36 }
 0x126   : > { %884 = vmatmul.msk.bf16.vlgmr.msra.gmra.mxu0 %vm269_vm7, %v883_v60  ;;  %885 = vmatmul.msk.bf16.vlgmr.msra.gmra.mxu1 %vm269_vm7, %v883_v60 }
 0x127   : > { %v578_v62 = vpop.permute.xlu1 %577 }
 0x128   : > { %v576_v0 = vpop.permute.xlu0 %575  ;;  %v754_v30 = vpop.permute.xlu2 %753 }
 0x129   : > { %v580_v1 = vsel %vm579_vm11, %v574_v57, %v576_v0  ;;  %v581_v2 = vsel %vm579_vm11, %v576_v0, %v578_v62  ;;  %v291_v38 = vpop.f32.mrf.mxu0 }
 0x12a   : > { %v586_v3 = vsel %vm273_vm3, %v580_v1, 0  ;;  %v589_v4 = vsel %vm273_vm3, %v581_v2, 0 }
 0x12b   : > { %598 = vmatpush.bf16.msra.mxu2 %v586_v3  ;;  %611 = vmatpush.bf16.msra.mxu3 %v589_v4 }
 0x12c   : > { %v326_v28 = vpop.f32.mrf.mxu2 }
 0x12e   : > { %887 = vmatmul.msk.bf16.vlgmr.msra.gmra.mxu2 %vm269_vm7, %v886_v5  ;;  %888 = vmatmul.msk.bf16.vlgmr.msra.gmra.mxu3 %vm269_vm7, %v886_v5 }
 0x12f   : > { %v644_v8 = vpop.permute.xlu1 %643 }
 0x130   : > { %v642_v9 = vpop.permute.xlu0 %641 }
 0x131   : > { %v646_v10 = vsel %vm645_vm12, %v640_v7, %v642_v9  ;;  %v647_v11 = vsel %vm645_vm12, %v642_v9, %v644_v8 }
 0x132   : > { %v652_v12 = vsel %vm273_vm3, %v646_v10, 0  ;;  %v655_v13 = vsel %vm273_vm3, %v647_v11, 0  ;;  %v803_v11 = vpop.permute.xlu2 %802 }
 0x133   : > { %664 = vmatpush.bf16.msrb.mxu0 %v652_v12  ;;  %677 = vmatpush.bf16.msrb.mxu1 %v655_v13 }
 0x136   : > { %890 = vmatmul.msk.bf16.vlgmr.msrb.gmra.mxu0 %vm269_vm7, %v889_v14  ;;  %891 = vmatmul.msk.bf16.vlgmr.msrb.gmra.mxu1 %vm269_vm7, %v889_v14 }
 0x137   : > { %v692_v16 = vpop.permute.xlu1 %691 }
 0x138   : > { %v690_v19 = vpop.permute.xlu0 %689 }
 0x139   : > { %v694_v22 = vsel %vm693_vm13, %v688_v15, %v690_v19  ;;  %v695_v23 = vsel %vm693_vm13, %v690_v19, %v692_v16 }
 0x13a   : > { %v700_v25 = vsel %vm273_vm3, %v694_v22, 0  ;;  %v703_v26 = vsel %vm273_vm3, %v695_v23, 0 }
 0x13b   : > { %712 = vmatpush.bf16.msrb.mxu2 %v700_v25  ;;  %725 = vmatpush.bf16.msrb.mxu3 %v703_v26 }
 0x13e   : > { %893 = vmatmul.msk.bf16.vlgmr.msrb.gmra.mxu2 %vm269_vm7, %v892_v27  ;;  %894 = vmatmul.msk.bf16.vlgmr.msrb.gmra.mxu3 %vm269_vm7, %v892_v27 }
 0x13f   : > { %v758_v29 = vpop.permute.xlu1 %757 }
 0x140   : > { %v756_v32 = vpop.permute.xlu0 %755 }
 0x141   : > { %v760_v33 = vsel %vm759_vm14, %v754_v30, %v756_v32  ;;  %v761_v34 = vsel %vm759_vm14, %v756_v32, %v758_v29 }
 0x142   : > { %v766_v6 = vsel %vm273_vm3, %v760_v33, 0  ;;  %v769_v24 = vsel %vm273_vm3, %v761_v34, 0 }
 0x143   : > { %778 = vmatpush.bf16.msra.mxu0 %v766_v6  ;;  %791 = vmatpush.bf16.msra.mxu1 %v769_v24 }
 0x146   : > { %896 = vmatmul.msk.bf16.vlgmr.msra.gmra.mxu0 %vm269_vm7, %v895_v35  ;;  %897 = vmatmul.msk.bf16.vlgmr.msra.gmra.mxu1 %vm269_vm7, %v895_v35 }
 0x148   : > { %v302_v37 = vpop.f32.mrf.mxu1 }
 0x150   : > { %v304_v39 = vpop.f32.mrf.mxu1 }
 0x152   : > { %v337_v18 = vpop.f32.mrf.mxu3 }
 0x153   : > { %v338_v21 = vadd.f32 %v337_v18, %v302_v37 }
 0x15a   : > { %v339_v31 = vpop.f32.mrf.mxu3 }
 0x192   : > { %v405_v40 = vpop.f32.mrf.mxu0  ;;  %v418_v41 = vpop.f32.mrf.mxu1 }
 0x193   : > { %v422_v56 = vadd.f32 %v405_v40, %v325_v20  ;;  %v423_v57 = vadd.f32 %v418_v41, %v338_v21 }
 0x19a   : > { %v407_v42 = vpop.f32.mrf.mxu0  ;;  %v420_v43 = vpop.f32.mrf.mxu1 }
 0x1a1   : > { %v478_v44 = vpop.f32.mrf.mxu2  ;;  %v491_v45 = vpop.f32.mrf.mxu3 }
 0x1a2   : > { %v495_v58 = vadd.f32 %v478_v44, %v422_v56  ;;  %v496_v59 = vadd.f32 %v491_v45, %v423_v57 }
 0x1a3   : > { %v534_v46 = vpop.f32.mrf.mxu0  ;;  %v547_v47 = vpop.f32.mrf.mxu1 }
 0x1a4   : > { %v551_v62 = vadd.f32 %v534_v46, %v495_v58  ;;  %v552_v63 = vadd.f32 %v547_v47, %v496_v59 }
 0x1a9   : > { %v480_v48 = vpop.f32.mrf.mxu2  ;;  %v493_v49 = vpop.f32.mrf.mxu3 }
 0x1ab   : > { %v536_v50 = vpop.f32.mrf.mxu0  ;;  %v549_v51 = vpop.f32.mrf.mxu1 }
 0x1b1   : > { %v600_v52 = vpop.f32.mrf.mxu2  ;;  %v613_v53 = vpop.f32.mrf.mxu3 }
 0x1b2   : > { %v617_v2 = vadd.f32 %v600_v52, %v551_v62  ;;  %v618_v3 = vadd.f32 %v613_v53, %v552_v63 }
 0x1b3   : > { %v666_v54 = vpop.f32.mrf.mxu0  ;;  %v679_v55 = vpop.f32.mrf.mxu1 }
 0x1b4   : > { %v683_v4 = vadd.f32 %v666_v54, %v617_v2  ;;  %v684_v5 = vadd.f32 %v679_v55, %v618_v3 }
 0x1b9   : > { %v602_v60 = vpop.f32.mrf.mxu2  ;;  %v615_v61 = vpop.f32.mrf.mxu3 }
 0x1bb   : > { %v668_v0 = vpop.f32.mrf.mxu0  ;;  %v681_v1 = vpop.f32.mrf.mxu1 }
 0x1c1   : > { %v714_v7 = vpop.f32.mrf.mxu2  ;;  %v727_v8 = vpop.f32.mrf.mxu3 }
 0x1c2   : > { %v731_v9 = vadd.f32 %v714_v7, %v683_v4  ;;  %v732_v10 = vadd.f32 %v727_v8, %v684_v5 }
 0x1c3   : > { %v780_v12 = vpop.f32.mrf.mxu0  ;;  %v793_v13 = vpop.f32.mrf.mxu1 }
 0x1c4   : > { %v797_v14 = vadd.f32 %v780_v12, %v731_v9  ;;  %v798_v15 = vadd.f32 %v793_v13, %v732_v10 }
 0x1c6   : > { %v805_v16 = vadd.f32 %v803_v11, %v797_v14  ;;  %v806_v19 = vadd.f32 %v803_v11, %v798_v15 }
 0x1c8   : > { %v807_v22 = vpack.c.bf16 %v806_v19, %v805_v16 }
 0x1c9   : > { %v716_v23 = vpop.f32.mrf.mxu2  ;;  %v729_v25 = vpop.f32.mrf.mxu3 }
 0x1ca   : > { %808 = vst [vmem:[%s224_s16] sm:$0xff] %v807_v22 }
 0x1cb   : > { %v782_v26 = vpop.f32.mrf.mxu0  ;;  %v795_v27 = vpop.f32.mrf.mxu1 }
 0x1cc PF: > { %s15_s18 = sadd.s32 1, %s957_s18  }
 0x1cd   : > { %p12_p4 = scmp.ge.s32.totalorder %s15_s18, 4  }
 0x1cf   :  { %14 = sbr.rel (!%p12_p4) target bundleno = 1 (0x1), region = 78 }

// kernel: dwt_upsampler_forward.10
= control target key start
LH: loop header
LB: loop body
LE: loop exit
PB: predicated region body
PF: predicated region fallthrough
CT: control target
= control target key end

     0   :  { %s1902_s21 = smov 0   ;;  %s2371_s0 = inlined_call_operand.vmem [shape: bf16[2,128,16], index: 0, kind: input, shape index: {}]   ;;  %s2372_s1 = inlined_call_operand.vmem [shape: bf16[16,19], index: 1, kind: input, shape index: {}]   ;;  %s2373_s2 = inlined_call_operand.vmem [shape: bf16[16,19], index: 2, kind: input, shape index: {}]   ;;  %s2374_s3 = inlined_call_operand.vmem [shape: bf16[19,16], index: 3, kind: input, shape index: {}]   ;;  %s2375_s4 = inlined_call_operand.vmem [shape: bf16[19,16], index: 4, kind: input, shape index: {}]   ;;  %s2376_s5 = inlined_call_operand.vmem [shape: bf16[2,8,19,19], index: 5, kind: output, shape index: {0}]   ;;  %s2377_s6 = inlined_call_operand.vmem [shape: bf16[2,24,19,19], index: 6, kind: output, shape index: {1}]  }
   0x1 LB: > { %s1577_s22 = sadd.s32 4294967295, %s1865_s21   ;;  %p1581_p0 = scmp.ge.s32.totalorder %s1865_s21, 1  ;;  %s1865_s21 = sphi %s1902_s21, %s17_s21  }
   0x2   : > { %p215_p1 = scmp.lt.s32.totalorder %s1865_s21, 3 }
   0x4   : > { %p216_p2 = pnand %p1581_p0, %p215_p1 }
   0x5   : > { %p250_p3 = scmp.lt.s32.totalorder (!%p216_p2), %s1577_s22, 1 }
   0x6   : > { %219 = sbr.rel (%p216_p2) target bundleno = 602 (0x25a), region = 40 }
   0xb   : > { %v1845_v0 = vld [vmem:[%s2372_s1] sm:$0xff]  ;;  %s2381_s22 = smov (!%p250_p3, %s1577_s22), 1  ;;  %vm330_vm0 = vcmask 130048   ;;  %v495_v25 = vld [vmem:[%s2374_s3 + $0x8] sm:$0x3]  ;;  %vm540_vm1 = vcmask 150528  }
   0xc   : > { %v1846_v1 = vld [vmem:[%s2373_s2] sm:$0xff]  ;;  %362 = vmatpush.bf16.msra.mxu0 %v1845_v0  ;;  %s1836_s27 = sshll.u32 %s2381_s22, 6  ;;  %v498_v26 = vld [vmem:[%s2375_s4 + $0x8] sm:$0x3]  ;;  %v504_v30 = vunpack.c.l.b16 %v495_v25  ;;  %s1849_s15 = smul.u32 96, %s2381_s22  ;;  %vm543_vm2 = vcmask 148480  }
   0xd   : > { %435 = vmatpush.bf16.msra.mxu1 %v1846_v1  ;;  %s1922_s30 = scalar_lea.vmem %s2371_s0, %s1836_s27  ;;  %v1939_v20 = vld [vmem:[%s2374_s3] sm:$0xff]  ;;  %v554_v31 = vunpack.c.l.b16 %v498_v26  ;;  %s1850_s16 = smul.u32 288, %s2381_s22  ;;  %vm544_vm3 = vsmask.f32 1280 }
   0xe   : > { %v1837_v2 = vld [vmem:[%s1922_s30] sm:$0xff]  ;;  %v1838_v3 = vld [vmem:[%s1922_s30 + $0x8] sm:$0xff]  ;;  %v1839_v4 = vld [vmem:[%s1922_s30 + $0x10] sm:$0xff]  ;;  %v1959_v34 = vpack.c.b16 %v504_v30, %v504_v30  ;;  %s2021_s19 = scalar_lea.vmem %s2376_s5, %s1849_s15 }
   0xf   : > { %1622 = vmatmul.msk.bf16.vlgmr.msra.gmra.mxu0 %vm330_vm0, %v1837_v2  ;;  %v1840_v5 = vld [vmem:[%s1922_s30 + $0x18] sm:$0xff]  ;;  %v1944_v21 = vld [vmem:[%s2375_s4] sm:$0xff]  ;;  %v1961_v35 = vpack.c.b16 %v554_v31, %v554_v31  ;;  %v1842_v38 = vld [vmem:[%s1922_s30 + $0x28] sm:$0xff]  ;;  %s2026_s24 = scalar_lea.vmem %s2377_s6, %s1850_s16 }
  0x10   : > { %1634 = vmatmul.msk.bf16.vlgmr.msra.gmra.mxu1 %vm330_vm0, %v1837_v2  ;;  %v1841_v22 = vld [vmem:[%s1922_s30 + $0x20] sm:$0xff]  ;;  %v1843_v52 = vld [vmem:[%s1922_s30 + $0x30] sm:$0xff]  ;;  %v1844_v59 = vld [vmem:[%s1922_s30 + $0x38] sm:$0xff] }
  0x11   : > { %vm2044_vm4 = vmand %vm543_vm2, %vm544_vm3 }
  0x1f   : > { %1623 = vmatmul.msk.bf16.gmra.mxu0 %vm330_vm0, %v1838_v3 }
  0x20   : > { %1635 = vmatmul.msk.bf16.gmra.mxu1 %vm330_vm0, %v1838_v3 }
  0x2f   : > { %1624 = vmatmul.msk.bf16.gmra.mxu0 %vm330_vm0, %v1839_v4 }
  0x30   : > { %1636 = vmatmul.msk.bf16.gmra.mxu1 %vm330_vm0, %v1839_v4 }
  0x3f   : > { %1625 = vmatmul.msk.bf16.gmra.mxu0 %vm330_vm0, %v1840_v5 }
  0x40   : > { %1637 = vmatmul.msk.bf16.gmra.mxu1 %vm330_vm0, %v1840_v5 }
  0x4f   : > { %1626 = vmatmul.msk.bf16.gmra.mxu0 %vm330_vm0, %v1841_v22 }
  0x50   : > { %1638 = vmatmul.msk.bf16.gmra.mxu1 %vm330_vm0, %v1841_v22 }
  0x5f   : > { %1627 = vmatmul.msk.bf16.gmra.mxu0 %vm330_vm0, %v1842_v38 }
  0x60   : > { %1639 = vmatmul.msk.bf16.gmra.mxu1 %vm330_vm0, %v1842_v38 }
  0x6f   : > { %1628 = vmatmul.msk.bf16.gmra.mxu0 %vm330_vm0, %v1843_v52 }
  0x70   : > { %1640 = vmatmul.msk.bf16.gmra.mxu1 %vm330_vm0, %v1843_v52 }
  0x7f   : > { %1629 = vmatmul.msk.bf16.gmra.mxu0 %vm330_vm0, %v1844_v59 }
  0x80   : > { %1641 = vmatmul.msk.bf16.gmra.mxu1 %vm330_vm0, %v1844_v59 }
  0x8c   : > { %v364_v6 = vpop.f32.mrf.mxu0 }
  0x8d   : > { %v437_v7 = vpop.f32.mrf.mxu1  ;;  %v404_v9 = vpack.c.bf16 %v364_v6, %v364_v6 }
  0x8e   : > { %v477_v8 = vpack.c.bf16 %v437_v7, %v437_v7 }
  0x8f   : > { %v509_v15 = vunpack.c.l.b16 %v404_v9 }
  0x90   : > { %v591_v13 = vunpack.c.l.b16 %v477_v8 }
  0x94   : > { %v366_v10 = vpop.f32.mrf.mxu0 }
  0x95   : > { %v439_v11 = vpop.f32.mrf.mxu1  ;;  %v405_v12 = vpack.c.bf16 %v366_v10, %v366_v10 }
  0x96   : > { %v478_v14 = vpack.c.bf16 %v439_v11, %v439_v11 }
  0x97   : > { %v510_v16 = vunpack.c.l.b16 %v405_v12 }
  0x98   : > { %v592_v17 = vunpack.c.l.b16 %v478_v14 }
  0x99   : > { %v511_v18 = vpack.c.b16 %v510_v16, %v509_v15 }
  0x9a   : > { %v593_v19 = vpack.c.b16 %v592_v17, %v591_v13 }
  0x9b   : > { %526 = vmatpush.bf16.msra.mxu2 %v511_v18  ;;  %570 = vmatpush.bf16.msra.mxu3 %v511_v18 }
  0x9c   : > { %v369_v23 = vpop.f32.mrf.mxu0 }
  0x9d   : > { %v406_v24 = vpack.c.bf16 %v369_v23, %v369_v23  ;;  %v442_v37 = vpop.f32.mrf.mxu1 }
  0x9e   : > { %1646 = vmatmul.msk.bf16.vlgmr.msra.gmra.mxu2 %vm330_vm0, %v1939_v20  ;;  %1652 = vmatmul.msk.bf16.vlgmr.msra.gmra.mxu3 %vm330_vm0, %v1944_v21  ;;  %v479_v40 = vpack.c.bf16 %v442_v37, %v442_v37 }
  0x9f   : > { %602 = vmatpush.bf16.msrb.mxu2 %v593_v19  ;;  %629 = vmatpush.bf16.msrb.mxu3 %v593_v19  ;;  %v651_v28 = vunpack.c.l.b16 %v406_v24 }
  0xa0   : > { %v711_v46 = vunpack.c.l.b16 %v479_v40 }
  0xa4   : > { %v371_v27 = vpop.f32.mrf.mxu0 }
  0xa5   : > { %v407_v29 = vpack.c.bf16 %v371_v27, %v371_v27  ;;  %v444_v44 = vpop.f32.mrf.mxu1 }
  0xa6   : > { %v480_v47 = vpack.c.bf16 %v444_v44, %v444_v44 }
  0xa7   : > { %v652_v32 = vunpack.c.l.b16 %v407_v29 }
  0xa8   : > { %v712_v49 = vunpack.c.l.b16 %v480_v47 }
  0xa9   : > { %v653_v33 = vpack.c.b16 %v652_v32, %v651_v28 }
  0xaa   : > { %v713_v50 = vpack.c.b16 %v712_v49, %v711_v46 }
  0xab   : > { %662 = vmatpush.bf16.msra.mxu2 %v653_v33  ;;  %689 = vmatpush.bf16.msra.mxu3 %v653_v33 }
  0xac   : > { %v374_v36 = vpop.f32.mrf.mxu0 }
  0xad   : > { %v408_v39 = vpack.c.bf16 %v374_v36, %v374_v36  ;;  %v447_v51 = vpop.f32.mrf.mxu1 }
  0xae   : > { %1647 = vmatmul.msk.bf16.gmra.mxu2 %vm330_vm0, %v1959_v34  ;;  %1653 = vmatmul.msk.bf16.gmra.mxu3 %vm330_vm0, %v1961_v35  ;;  %v481_v53 = vpack.c.bf16 %v447_v51, %v447_v51 }
  0xaf   : > { %v771_v42 = vunpack.c.l.b16 %v408_v39  ;;  %v546_v39 = vld [vmem:[%s2021_s19 + $0x8] sm:$0x3] }
  0xb0   : > { %v831_v55 = vunpack.c.l.b16 %v481_v53 }
  0xb4   : > { %v376_v41 = vpop.f32.mrf.mxu0 }
  0xb5   : > { %v409_v43 = vpack.c.bf16 %v376_v41, %v376_v41  ;;  %v449_v54 = vpop.f32.mrf.mxu1  ;;  %v586_v41 = vld [vmem:[%s2026_s24 + $0x8] sm:$0x3] }
  0xb6   : > { %v482_v56 = vpack.c.bf16 %v449_v54, %v449_v54 }
  0xb7   : > { %v772_v45 = vunpack.c.l.b16 %v409_v43 }
  0xb8   : > { %v832_v57 = vunpack.c.l.b16 %v482_v56 }
  0xb9   : > { %v773_v48 = vpack.c.b16 %v772_v45, %v771_v42 }
  0xba   : > { %v833_v58 = vpack.c.b16 %v832_v57, %v831_v55 }
  0xbb   : > { %782 = vmatpush.bf16.msrb.mxu0 %v773_v48  ;;  %809 = vmatpush.bf16.msrb.mxu1 %v773_v48 }
  0xbc   : > { %v379_v61 = vpop.f32.mrf.mxu0 }
  0xbd   : > { %v452_v60 = vpop.f32.mrf.mxu1  ;;  %v410_v63 = vpack.c.bf16 %v379_v61, %v379_v61 }
  0xbe   : > { %1654 = vmatmul.msk.bf16.vlgmr.msrb.gmra.mxu2 %vm330_vm0, %v1939_v20  ;;  %1660 = vmatmul.msk.bf16.vlgmr.msrb.gmra.mxu3 %vm330_vm0, %v1944_v21  ;;  %v483_v62 = vpack.c.bf16 %v452_v60, %v452_v60 }
  0xbf   : > { %722 = vmatpush.bf16.msrb.mxu2 %v713_v50  ;;  %749 = vmatpush.bf16.msrb.mxu3 %v713_v50  ;;  %v891_v3 = vunpack.c.l.b16 %v410_v63 }
  0xc0   : > { %1690 = vmatmul.msk.bf16.vlgmr.msrb.gmra.mxu0 %vm330_vm0, %v1939_v20  ;;  %1696 = vmatmul.msk.bf16.vlgmr.msrb.gmra.mxu1 %vm330_vm0, %v1944_v21  ;;  %v951_v2 = vunpack.c.l.b16 %v483_v62 }
  0xc4   : > { %v381_v1 = vpop.f32.mrf.mxu0 }
  0xc5   : > { %v454_v0 = vpop.f32.mrf.mxu1  ;;  %v411_v5 = vpack.c.bf16 %v381_v1, %v381_v1 }
  0xc6   : > { %v484_v4 = vpack.c.bf16 %v454_v0, %v454_v0 }
  0xc7   : > { %v892_v7 = vunpack.c.l.b16 %v411_v5 }
  0xc8   : > { %v952_v6 = vunpack.c.l.b16 %v484_v4 }
  0xc9   : > { %v893_v9 = vpack.c.b16 %v892_v7, %v891_v3  ;;  %v1658_v7 = vld [vmem:[%s2026_s24 + $0x68] sm:$0x3] }
  0xca   : > { %v953_v8 = vpack.c.b16 %v952_v6, %v951_v2 }
  0xcb   : > { %902 = vmatpush.bf16.msra.mxu0 %v893_v9  ;;  %929 = vmatpush.bf16.msra.mxu1 %v893_v9  ;;  %v1664_v9 = vld [vmem:[%s2026_s24 + $0xc8] sm:$0x3] }
  0xcc   : > { %v384_v11 = vpop.f32.mrf.mxu0 }
  0xcd   : > { %v457_v10 = vpop.f32.mrf.mxu1  ;;  %v412_v13 = vpack.c.bf16 %v384_v11, %v384_v11 }
  0xce   : > { %1655 = vmatmul.msk.bf16.gmra.mxu2 %vm330_vm0, %v1959_v34  ;;  %1661 = vmatmul.msk.bf16.gmra.mxu3 %vm330_vm0, %v1961_v35  ;;  %v485_v12 = vpack.c.bf16 %v457_v10, %v457_v10 }
  0xcf   : > { %v1011_v23 = vunpack.c.l.b16 %v412_v13 }
  0xd0   : > { %1691 = vmatmul.msk.bf16.gmra.mxu0 %vm330_vm0, %v1959_v34  ;;  %1697 = vmatmul.msk.bf16.gmra.mxu1 %vm330_vm0, %v1961_v35  ;;  %v1071_v22 = vunpack.c.l.b16 %v485_v12 }
  0xd4   : > { %v386_v19 = vpop.f32.mrf.mxu0 }
  0xd5   : > { %v459_v18 = vpop.f32.mrf.mxu1  ;;  %v413_v25 = vpack.c.bf16 %v386_v19, %v386_v19 }
  0xd6   : > { %v486_v24 = vpack.c.bf16 %v459_v18, %v459_v18 }
  0xd7   : > { %v1012_v27 = vunpack.c.l.b16 %v413_v25 }
  0xd8   : > { %v1072_v26 = vunpack.c.l.b16 %v486_v24 }
  0xd9   : > { %v1013_v29 = vpack.c.b16 %v1012_v27, %v1011_v23 }
  0xda   : > { %v1073_v28 = vpack.c.b16 %v1072_v26, %v1071_v22 }
  0xdb   : > { %1022 = vmatpush.bf16.msrb.mxu0 %v1013_v29  ;;  %1049 = vmatpush.bf16.msrb.mxu1 %v1013_v29 }
  0xdc   : > { %v389_v47 = vpop.f32.mrf.mxu0 }
  0xdd   : > { %v462_v36 = vpop.f32.mrf.mxu1  ;;  %v414_v54 = vpack.c.bf16 %v389_v47, %v389_v47 }
  0xde   : > { %1666 = vmatmul.msk.bf16.vlgmr.msra.gmra.mxu2 %vm330_vm0, %v1939_v20  ;;  %1672 = vmatmul.msk.bf16.vlgmr.msra.gmra.mxu3 %vm330_vm0, %v1944_v21  ;;  %v487_v44 = vpack.c.bf16 %v462_v36, %v462_v36 }
  0xdf   : > { %842 = vmatpush.bf16.msra.mxu2 %v833_v58  ;;  %869 = vmatpush.bf16.msra.mxu3 %v833_v58  ;;  %v1131_v57 = vunpack.c.l.b16 %v414_v54 }
  0xe0   : > { %1714 = vmatmul.msk.bf16.vlgmr.msra.gmra.mxu0 %vm330_vm0, %v1939_v20  ;;  %1720 = vmatmul.msk.bf16.vlgmr.msra.gmra.mxu1 %vm330_vm0, %v1944_v21  ;;  %v1191_v49 = vunpack.c.l.b16 %v487_v44 }
  0xe4   : > { %v391_v56 = vpop.f32.mrf.mxu0 }
  0xe5   : > { %v464_v48 = vpop.f32.mrf.mxu1  ;;  %v415_v58 = vpack.c.bf16 %v391_v56, %v391_v56 }
  0xe6   : > { %v488_v50 = vpack.c.bf16 %v464_v48, %v464_v48  ;;  %v1676_v48 = vld [vmem:[%s2026_s24 + $0x14] sm:$0x3] }
  0xe7   : > { %v1132_v61 = vunpack.c.l.b16 %v415_v58 }
  0xe8   : > { %v1192_v53 = vunpack.c.l.b16 %v488_v50 }
  0xe9   : > { %v1133_v0 = vpack.c.b16 %v1132_v61, %v1131_v57 }
  0xea   : > { %v1193_v55 = vpack.c.b16 %v1192_v53, %v1191_v49 }
  0xeb   : > { %1142 = vmatpush.bf16.msra.mxu0 %v1133_v0  ;;  %1169 = vmatpush.bf16.msra.mxu1 %v1133_v0 }
  0xed   : > { %v467_v5 = vpop.f32.mrf.mxu1 }
  0xee   : > { %1667 = vmatmul.msk.bf16.gmra.mxu2 %vm330_vm0, %v1959_v34  ;;  %1673 = vmatmul.msk.bf16.gmra.mxu3 %vm330_vm0, %v1961_v35  ;;  %v489_v12 = vpack.c.bf16 %v467_v5, %v467_v5 }
  0xf0   : > { %1715 = vmatmul.msk.bf16.gmra.mxu0 %vm330_vm0, %v1959_v34  ;;  %1721 = vmatmul.msk.bf16.gmra.mxu1 %vm330_vm0, %v1961_v35 }
  0xfe   : > { %1678 = vmatmul.msk.bf16.vlgmr.msrb.gmra.mxu2 %vm330_vm0, %v1939_v20  ;;  %1684 = vmatmul.msk.bf16.vlgmr.msrb.gmra.mxu3 %vm330_vm0, %v1944_v21 }
  0xff   : > { %962 = vmatpush.bf16.msrb.mxu2 %v953_v8  ;;  %989 = vmatpush.bf16.msrb.mxu3 %v953_v8 }
 0x100   : > { %1738 = vmatmul.msk.bf16.vlgmr.msrb.gmra.mxu0 %vm330_vm0, %v1939_v20  ;;  %1744 = vmatmul.msk.bf16.vlgmr.msrb.gmra.mxu1 %vm330_vm0, %v1944_v21 }
 0x10e   : > { %1679 = vmatmul.msk.bf16.gmra.mxu2 %vm330_vm0, %v1959_v34  ;;  %1685 = vmatmul.msk.bf16.gmra.mxu3 %vm330_vm0, %v1961_v35 }
 0x110   : > { %1739 = vmatmul.msk.bf16.gmra.mxu0 %vm330_vm0, %v1959_v34  ;;  %1745 = vmatmul.msk.bf16.gmra.mxu1 %vm330_vm0, %v1961_v35 }
 0x11e   : > { %1702 = vmatmul.msk.bf16.vlgmr.msra.gmra.mxu2 %vm330_vm0, %v1939_v20  ;;  %1708 = vmatmul.msk.bf16.vlgmr.msra.gmra.mxu3 %vm330_vm0, %v1944_v21 }
 0x11f   : > { %1082 = vmatpush.bf16.msra.mxu2 %v1073_v28  ;;  %1109 = vmatpush.bf16.msra.mxu3 %v1073_v28 }
 0x120   : > { %1762 = vmatmul.msk.bf16.vlgmr.msra.gmra.mxu0 %vm330_vm0, %v1939_v20  ;;  %1768 = vmatmul.msk.bf16.vlgmr.msra.gmra.mxu1 %vm330_vm0, %v1944_v21 }
 0x121   : > { %v528_v14 = vpop.f32.mrf.mxu2  ;;  %v572_v15 = vpop.f32.mrf.mxu3 }
 0x122   : > { %v537_v16 = vpack.c.bf16 %v528_v14, %v528_v14  ;;  %v581_v17 = vpack.c.bf16 %v572_v15, %v572_v15  ;;  %v394_v15 = vpop.f32.mrf.mxu0 }
 0x123   : > { %v416_v24 = vpack.c.bf16 %v394_v15, %v394_v15 }
 0x124   : > { %541 = vst.msk [vmem:[%s2021_s19] sm:$0xf] %vm540_vm1, %v537_v16  ;;  %v469_v16 = vpop.f32.mrf.mxu1 }
 0x125   : > { %584 = vst.msk [vmem:[%s2026_s24] sm:$0xf] %vm540_vm1, %v581_v17  ;;  %v1311_v17 = vunpack.c.l.b16 %v489_v12  ;;  %v490_v18 = vpack.c.bf16 %v469_v16, %v469_v16  ;;  %v1251_v27 = vunpack.c.l.b16 %v416_v24 }
 0x127   : > { %v1312_v23 = vunpack.c.l.b16 %v490_v18 }
 0x129   : > { %v530_v30 = vpop.f32.mrf.mxu2  ;;  %v574_v31 = vpop.f32.mrf.mxu3  ;;  %v1313_v25 = vpack.c.b16 %v1312_v23, %v1311_v17  ;;  %v1694_v23 = vld [vmem:[%s2021_s19 + $0x20] sm:$0x3] }
 0x12a   : > { %v538_v32 = vpack.c.bf16 %v530_v30, %v530_v30  ;;  %v582_v33 = vpack.c.bf16 %v574_v31, %v574_v31  ;;  %v396_v26 = vpop.f32.mrf.mxu0 }
 0x12b   : > { %v417_v28 = vpack.c.bf16 %v396_v26, %v396_v26 }
 0x12c   : > { %542 = vst.msk [vmem:[%s2021_s19 + $0x4] sm:$0xf] %vm540_vm1, %v538_v32 }
 0x12d   : > { %585 = vst.msk [vmem:[%s2026_s24 + $0x4] sm:$0xf] %vm540_vm1, %v582_v33  ;;  %v1252_v31 = vunpack.c.l.b16 %v417_v28 }
 0x12e   : > { %1703 = vmatmul.msk.bf16.gmra.mxu2 %vm330_vm0, %v1959_v34  ;;  %1709 = vmatmul.msk.bf16.gmra.mxu3 %vm330_vm0, %v1961_v35 }
 0x12f   : > { %v1253_v36 = vpack.c.b16 %v1252_v31, %v1251_v27  ;;  %v1688_v31 = vld [vmem:[%s2026_s24 + $0xd4] sm:$0x3] }
 0x130   : > { %1763 = vmatmul.msk.bf16.gmra.mxu0 %vm330_vm0, %v1959_v34  ;;  %1769 = vmatmul.msk.bf16.gmra.mxu1 %vm330_vm0, %v1961_v35 }
 0x131   : > { %v533_v37 = vpop.f32.mrf.mxu2  ;;  %v577_v40 = vpop.f32.mrf.mxu3  ;;  %1262 = vmatpush.bf16.msrb.mxu0 %v1253_v36  ;;  %1289 = vmatpush.bf16.msrb.mxu1 %v1253_v36 }
 0x132   : > { %v539_v42 = vpack.c.bf16 %v533_v37, %v533_v37  ;;  %v583_v43 = vpack.c.bf16 %v577_v40, %v577_v40 }
 0x134   : > { %v547_v45 = vsel %vm2044_vm4, %v539_v42, %v546_v39  ;;  %v587_v46 = vsel %vm2044_vm4, %v583_v43, %v586_v41  ;;  %v472_v42 = vpop.f32.mrf.mxu1  ;;  %v399_v43 = vpop.f32.mrf.mxu0 }
 0x135   : > { %548 = vst [vmem:[%s2021_s19 + $0x8] sm:$0x3] %v547_v45  ;;  %v418_v44 = vpack.c.bf16 %v399_v43, %v399_v43  ;;  %v491_v53 = vpack.c.bf16 %v472_v42, %v472_v42 }
 0x136   : > { %588 = vst [vmem:[%s2026_s24 + $0x8] sm:$0x3] %v587_v46  ;;  %v1670_v46 = vld [vmem:[%s2021_s19 + $0x14] sm:$0x3] }
 0x137   : > { %v1371_v54 = vunpack.c.l.b16 %v418_v44 }
 0x139   : > { %v535_v51 = vpop.f32.mrf.mxu2  ;;  %v579_v52 = vpop.f32.mrf.mxu3 }
 0x13c   : > { %v474_v51 = vpop.f32.mrf.mxu1  ;;  %v401_v52 = vpop.f32.mrf.mxu0 }
 0x13d   : > { %v419_v56 = vpack.c.bf16 %v401_v52, %v401_v52 }
 0x13e   : > { %1726 = vmatmul.msk.bf16.vlgmr.msrb.gmra.mxu2 %vm330_vm0, %v1939_v20  ;;  %1732 = vmatmul.msk.bf16.vlgmr.msrb.gmra.mxu3 %vm330_vm0, %v1944_v21 }
 0x13f   : > { %1202 = vmatpush.bf16.msrb.mxu2 %v1193_v55  ;;  %1229 = vmatpush.bf16.msrb.mxu3 %v1193_v55  ;;  %v492_v55 = vpack.c.bf16 %v474_v51, %v474_v51 }
 0x140   : > { %1786 = vmatmul.msk.bf16.vlgmr.msrb.gmra.mxu0 %vm330_vm0, %v1939_v20  ;;  %1792 = vmatmul.msk.bf16.vlgmr.msrb.gmra.mxu1 %vm330_vm0, %v1944_v21 }
 0x141   : > { %v604_v59 = vpop.f32.mrf.mxu2  ;;  %v631_v60 = vpop.f32.mrf.mxu3  ;;  %v1432_v61 = vunpack.c.l.b16 %v492_v55 }
 0x142   : > { %v613_v62 = vpack.c.bf16 %v604_v59, %v604_v59  ;;  %v640_v63 = vpack.c.bf16 %v631_v60, %v631_v60  ;;  %v1372_v59 = vunpack.c.l.b16 %v419_v56  ;;  %v1431_v60 = vunpack.c.l.b16 %v491_v53 }
 0x144   : > { %1656 = vst.msk [vmem:[%s2026_s24 + $0x60] sm:$0xf] %vm540_vm1, %v613_v62  ;;  %v1373_v62 = vpack.c.b16 %v1372_v59, %v1371_v54 }
 0x145   : > { %1662 = vst.msk [vmem:[%s2026_s24 + $0xc0] sm:$0xf] %vm540_vm1, %v640_v63 }
 0x146   : > { %1382 = vmatpush.bf16.msra.mxu0 %v1373_v62  ;;  %1409 = vmatpush.bf16.msra.mxu1 %v1373_v62  ;;  %v1718_v62 = vld [vmem:[%s2021_s19 + $0x2c] sm:$0x3] }
 0x149   : > { %v606_v1 = vpop.f32.mrf.mxu2  ;;  %v633_v2 = vpop.f32.mrf.mxu3 }
 0x14a   : > { %v614_v3 = vpack.c.bf16 %v606_v1, %v606_v1  ;;  %v641_v4 = vpack.c.bf16 %v633_v2, %v633_v2  ;;  %v784_v1 = vpop.f32.mrf.mxu0  ;;  %v811_v2 = vpop.f32.mrf.mxu1 }
 0x14b   : > { %v820_v5 = vpack.c.bf16 %v811_v2, %v811_v2 }
 0x14c   : > { %1657 = vst.msk [vmem:[%s2026_s24 + $0x64] sm:$0xf] %vm540_vm1, %v614_v3  ;;  %v1433_v3 = vpack.c.b16 %v1432_v61, %v1431_v60 }
 0x14d   : > { %1663 = vst.msk [vmem:[%s2026_s24 + $0xc4] sm:$0xf] %vm540_vm1, %v641_v4  ;;  %v793_v4 = vpack.c.bf16 %v784_v1, %v784_v1 }
 0x14e   : > { %1727 = vmatmul.msk.bf16.gmra.mxu2 %vm330_vm0, %v1959_v34  ;;  %1733 = vmatmul.msk.bf16.gmra.mxu3 %vm330_vm0, %v1961_v35  ;;  %1698 = vst.msk [vmem:[%s2026_s24 + $0x18] sm:$0xf] %vm540_vm1, %v820_v5 }
 0x14f   : > { %1692 = vst.msk [vmem:[%s2021_s19 + $0x18] sm:$0xf] %vm540_vm1, %v793_v4  ;;  %v1706_v4 = vld [vmem:[%s2026_s24 + $0x80] sm:$0x3] }
 0x150   : > { %1787 = vmatmul.msk.bf16.gmra.mxu0 %vm330_vm0, %v1959_v34  ;;  %1793 = vmatmul.msk.bf16.gmra.mxu1 %vm330_vm0, %v1961_v35 }
 0x151   : > { %v609_v6 = vpop.f32.mrf.mxu2  ;;  %v636_v8 = vpop.f32.mrf.mxu3 }
 0x152   : > { %v615_v10 = vpack.c.bf16 %v609_v6, %v609_v6  ;;  %v642_v11 = vpack.c.bf16 %v636_v8, %v636_v8 }
 0x154   : > { %v620_v13 = vsel %vm2044_vm4, %v615_v10, %v1658_v7  ;;  %v647_v14 = vsel %vm2044_vm4, %v642_v11, %v1664_v9  ;;  %v786_v10 = vpop.f32.mrf.mxu0  ;;  %v813_v11 = vpop.f32.mrf.mxu1 }
 0x155   : > { %1659 = vst [vmem:[%s2026_s24 + $0x68] sm:$0x3] %v620_v13  ;;  %v794_v12 = vpack.c.bf16 %v786_v10, %v786_v10  ;;  %v821_v13 = vpack.c.bf16 %v813_v11, %v813_v11 }
 0x156   : > { %1665 = vst [vmem:[%s2026_s24 + $0xc8] sm:$0x3] %v647_v14 }
 0x157   : > { %1693 = vst.msk [vmem:[%s2021_s19 + $0x1c] sm:$0xf] %vm540_vm1, %v794_v12 }
 0x158   : > { %1699 = vst.msk [vmem:[%s2026_s24 + $0x1c] sm:$0xf] %vm540_vm1, %v821_v13 }
 0x159   : > { %v611_v19 = vpop.f32.mrf.mxu2  ;;  %v638_v22 = vpop.f32.mrf.mxu3 }
 0x15c   : > { %v789_v18 = vpop.f32.mrf.mxu0  ;;  %v816_v19 = vpop.f32.mrf.mxu1 }
 0x15d   : > { %v795_v22 = vpack.c.bf16 %v789_v18, %v789_v18  ;;  %v822_v24 = vpack.c.bf16 %v816_v19, %v816_v19 }
 0x15e   : > { %1750 = vmatmul.msk.bf16.vlgmr.msra.gmra.mxu2 %vm330_vm0, %v1939_v20  ;;  %1756 = vmatmul.msk.bf16.vlgmr.msra.gmra.mxu3 %vm330_vm0, %v1944_v21 }
 0x15f   : > { %1322 = vmatpush.bf16.msra.mxu2 %v1313_v25  ;;  %1349 = vmatpush.bf16.msra.mxu3 %v1313_v25  ;;  %v1700_v25 = vld [vmem:[%s2026_s24 + $0x20] sm:$0x3]  ;;  %v800_v26 = vsel %vm2044_vm4, %v795_v22, %v1694_v23 }
 0x160   : > { %v827_v27 = vsel %vm2044_vm4, %v822_v24, %v1700_v25  ;;  %1695 = vst [vmem:[%s2021_s19 + $0x20] sm:$0x3] %v800_v26  ;;  %1810 = vmatmul.msk.bf16.vlgmr.msra.gmra.mxu0 %vm330_vm0, %v1939_v20  ;;  %1816 = vmatmul.msk.bf16.vlgmr.msra.gmra.mxu1 %vm330_vm0, %v1944_v21 }
 0x161   : > { %v664_v29 = vpop.f32.mrf.mxu2  ;;  %v691_v30 = vpop.f32.mrf.mxu3  ;;  %1701 = vst [vmem:[%s2026_s24 + $0x20] sm:$0x3] %v827_v27 }
 0x162   : > { %v673_v32 = vpack.c.bf16 %v664_v29, %v664_v29  ;;  %v700_v33 = vpack.c.bf16 %v691_v30, %v691_v30  ;;  %v1682_v29 = vld [vmem:[%s2026_s24 + $0x74] sm:$0x3] }
 0x164   : > { %1668 = vst.msk [vmem:[%s2021_s19 + $0xc] sm:$0xf] %vm540_vm1, %v673_v32  ;;  %v791_v36 = vpop.f32.mrf.mxu0 }
 0x165   : > { %1674 = vst.msk [vmem:[%s2026_s24 + $0xc] sm:$0xf] %vm540_vm1, %v700_v33  ;;  %v1742_v36 = vld [vmem:[%s2021_s19 + $0x38] sm:$0x3] }
 0x169   : > { %v666_v37 = vpop.f32.mrf.mxu2  ;;  %v693_v39 = vpop.f32.mrf.mxu3 }
 0x16a   : > { %v674_v40 = vpack.c.bf16 %v666_v37, %v666_v37  ;;  %v701_v41 = vpack.c.bf16 %v693_v39, %v693_v39  ;;  %v818_v37 = vpop.f32.mrf.mxu1 }
 0x16c   : > { %1669 = vst.msk [vmem:[%s2021_s19 + $0x10] sm:$0xf] %vm540_vm1, %v674_v40  ;;  %v904_v43 = vpop.f32.mrf.mxu0 }
 0x16d   : > { %1675 = vst.msk [vmem:[%s2026_s24 + $0x10] sm:$0xf] %vm540_vm1, %v701_v41 }
 0x16e   : > { %1751 = vmatmul.msk.bf16.gmra.mxu2 %vm330_vm0, %v1959_v34  ;;  %1757 = vmatmul.msk.bf16.gmra.mxu3 %vm330_vm0, %v1961_v35 }
 0x170   : > { %1811 = vmatmul.msk.bf16.gmra.mxu0 %vm330_vm0, %v1959_v34  ;;  %1817 = vmatmul.msk.bf16.gmra.mxu1 %vm330_vm0, %v1961_v35 }
 0x171   : > { %v669_v45 = vpop.f32.mrf.mxu2  ;;  %v696_v47 = vpop.f32.mrf.mxu3 }
 0x172   : > { %v675_v49 = vpack.c.bf16 %v669_v45, %v669_v45  ;;  %v702_v50 = vpack.c.bf16 %v696_v47, %v696_v47  ;;  %v931_v44 = vpop.f32.mrf.mxu1  ;;  %v913_v45 = vpack.c.bf16 %v904_v43, %v904_v43  ;;  %v1730_v43 = vld [vmem:[%s2026_s24 + $0x8c] sm:$0x3] }
 0x174   : > { %v680_v57 = vsel %vm2044_vm4, %v675_v49, %v1670_v46  ;;  %v707_v58 = vsel %vm2044_vm4, %v702_v50, %v1676_v48  ;;  %v940_v46 = vpack.c.bf16 %v931_v44, %v931_v44  ;;  %1716 = vst.msk [vmem:[%s2021_s19 + $0x24] sm:$0xf] %vm540_vm1, %v913_v45  ;;  %v906_v51 = vpop.f32.mrf.mxu0  ;;  %v1736_v45 = vld [vmem:[%s2026_s24 + $0xec] sm:$0x3] }
 0x175   : > { %1671 = vst [vmem:[%s2021_s19 + $0x14] sm:$0x3] %v680_v57  ;;  %v914_v53 = vpack.c.bf16 %v906_v51, %v906_v51 }
 0x176   : > { %1677 = vst [vmem:[%s2026_s24 + $0x14] sm:$0x3] %v707_v58 }
 0x177   : > { %1722 = vst.msk [vmem:[%s2026_s24 + $0x24] sm:$0xf] %vm540_vm1, %v940_v46 }
 0x178   : > { %1717 = vst.msk [vmem:[%s2021_s19 + $0x28] sm:$0xf] %vm540_vm1, %v914_v53 }
 0x179   : > { %v671_v63 = vpop.f32.mrf.mxu2  ;;  %v698_v0 = vpop.f32.mrf.mxu3 }
 0x17a   : > { %v933_v52 = vpop.f32.mrf.mxu1  ;;  %v1724_v0 = vld [vmem:[%s2026_s24 + $0x2c] sm:$0x3] }
 0x17b   : > { %v941_v54 = vpack.c.bf16 %v933_v52, %v933_v52 }
 0x17c   : > { %v909_v59 = vpop.f32.mrf.mxu0 }
 0x17d   : > { %1723 = vst.msk [vmem:[%s2026_s24 + $0x28] sm:$0xf] %vm540_vm1, %v941_v54  ;;  %v915_v61 = vpack.c.bf16 %v909_v59, %v909_v59 }
 0x17e   : > { %1774 = vmatmul.msk.bf16.vlgmr.msrb.gmra.mxu2 %vm330_vm0, %v1939_v20  ;;  %1780 = vmatmul.msk.bf16.vlgmr.msrb.gmra.mxu3 %vm330_vm0, %v1944_v21 }
 0x17f   : > { %1442 = vmatpush.bf16.msrb.mxu2 %v1433_v3  ;;  %1469 = vmatpush.bf16.msrb.mxu3 %v1433_v3  ;;  %v920_v1 = vsel %vm2044_vm4, %v915_v61, %v1718_v62 }
 0x180   : > { %1719 = vst [vmem:[%s2021_s19 + $0x2c] sm:$0x3] %v920_v1 }
 0x181   : > { %v724_v6 = vpop.f32.mrf.mxu2  ;;  %v751_v7 = vpop.f32.mrf.mxu3 }
 0x182   : > { %v733_v8 = vpack.c.bf16 %v724_v6, %v724_v6  ;;  %v760_v9 = vpack.c.bf16 %v751_v7, %v751_v7  ;;  %v936_v60 = vpop.f32.mrf.mxu1  ;;  %v1712_v6 = vld [vmem:[%s2026_s24 + $0xe0] sm:$0x3] }
 0x183   : > { %v942_v63 = vpack.c.bf16 %v936_v60, %v936_v60 }
 0x184   : > { %1680 = vst.msk [vmem:[%s2026_s24 + $0x6c] sm:$0xf] %vm540_vm1, %v733_v8 }
 0x185   : > { %1686 = vst.msk [vmem:[%s2026_s24 + $0xcc] sm:$0xf] %vm540_vm1, %v760_v9  ;;  %v947_v2 = vsel %vm2044_vm4, %v942_v63, %v1724_v0  ;;  %v911_v9 = vpop.f32.mrf.mxu0 }
 0x186   : > { %1725 = vst [vmem:[%s2026_s24 + $0x2c] sm:$0x3] %v947_v2  ;;  %v1772_v9 = vld [vmem:[%s2026_s24 + $0x44] sm:$0x3] }
 0x189   : > { %v726_v14 = vpop.f32.mrf.mxu2  ;;  %v753_v15 = vpop.f32.mrf.mxu3 }
 0x18a   : > { %v734_v16 = vpack.c.bf16 %v726_v14, %v726_v14  ;;  %v761_v17 = vpack.c.bf16 %v753_v15, %v753_v15  ;;  %v938_v10 = vpop.f32.mrf.mxu1 }
 0x18c   : > { %1681 = vst.msk [vmem:[%s2026_s24 + $0x70] sm:$0xf] %vm540_vm1, %v734_v16 }
 0x18d   : > { %1687 = vst.msk [vmem:[%s2026_s24 + $0xd0] sm:$0xf] %vm540_vm1, %v761_v17  ;;  %v1024_v15 = vpop.f32.mrf.mxu0 }
 0x18e   : > { %1775 = vmatmul.msk.bf16.gmra.mxu2 %vm330_vm0, %v1959_v34  ;;  %1781 = vmatmul.msk.bf16.gmra.mxu3 %vm330_vm0, %v1961_v35  ;;  %v1033_v17 = vpack.c.bf16 %v1024_v15, %v1024_v15  ;;  %v1760_v15 = vld [vmem:[%s2026_s24 + $0xf8] sm:$0x3] }
 0x190   : > { %1740 = vst.msk [vmem:[%s2021_s19 + $0x30] sm:$0xf] %vm540_vm1, %v1033_v17 }
 0x191   : > { %v729_v28 = vpop.f32.mrf.mxu2  ;;  %v756_v30 = vpop.f32.mrf.mxu3 }
 0x192   : > { %v735_v32 = vpack.c.bf16 %v729_v28, %v729_v28  ;;  %v762_v33 = vpack.c.bf16 %v756_v30, %v756_v30  ;;  %v1051_v16 = vpop.f32.mrf.mxu1 }
 0x193   : > { %v1060_v18 = vpack.c.bf16 %v1051_v16, %v1051_v16 }
 0x194   : > { %v740_v39 = vsel %vm2044_vm4, %v735_v32, %v1682_v29  ;;  %v767_v40 = vsel %vm2044_vm4, %v762_v33, %v1688_v31 }
 0x195   : > { %1683 = vst [vmem:[%s2026_s24 + $0x74] sm:$0x3] %v740_v39  ;;  %v1026_v25 = vpop.f32.mrf.mxu0  ;;  %v1748_v39 = vld [vmem:[%s2026_s24 + $0x38] sm:$0x3] }
 0x196   : > { %1689 = vst [vmem:[%s2026_s24 + $0xd4] sm:$0x3] %v767_v40  ;;  %v1034_v27 = vpack.c.bf16 %v1026_v25, %v1026_v25 }
 0x197   : > { %1746 = vst.msk [vmem:[%s2026_s24 + $0x30] sm:$0xf] %vm540_vm1, %v1060_v18 }
 0x198   : > { %1741 = vst.msk [vmem:[%s2021_s19 + $0x34] sm:$0xf] %vm540_vm1, %v1034_v27 }
 0x199   : > { %v731_v41 = vpop.f32.mrf.mxu2  ;;  %v758_v42 = vpop.f32.mrf.mxu3 }
 0x19a   : > { %v1053_v26 = vpop.f32.mrf.mxu1 }
 0x19b   : > { %v1061_v28 = vpack.c.bf16 %v1053_v26, %v1053_v26 }
 0x19d   : > { %1747 = vst.msk [vmem:[%s2026_s24 + $0x34] sm:$0xf] %vm540_vm1, %v1061_v28  ;;  %v1029_v31 = vpop.f32.mrf.mxu0 }
 0x19e   : > { %1798 = vmatmul.msk.bf16.vlgmr.msra.gmra.mxu2 %vm330_vm0, %v1939_v20  ;;  %1804 = vmatmul.msk.bf16.vlgmr.msra.gmra.mxu3 %vm330_vm0, %v1944_v21  ;;  %v1035_v33 = vpack.c.bf16 %v1029_v31, %v1029_v31 }
 0x1a0   : > { %v1040_v40 = vsel %vm2044_vm4, %v1035_v33, %v1742_v36 }
 0x1a1   : > { %v844_v47 = vpop.f32.mrf.mxu2  ;;  %v871_v48 = vpop.f32.mrf.mxu3  ;;  %1743 = vst [vmem:[%s2021_s19 + $0x38] sm:$0x3] %v1040_v40 }
 0x1a2   : > { %v853_v49 = vpack.c.bf16 %v844_v47, %v844_v47  ;;  %v880_v50 = vpack.c.bf16 %v871_v48, %v871_v48  ;;  %v1056_v32 = vpop.f32.mrf.mxu1 }
 0x1a3   : > { %v1062_v37 = vpack.c.bf16 %v1056_v32, %v1056_v32 }
 0x1a4   : > { %1704 = vst.msk [vmem:[%s2026_s24 + $0x78] sm:$0xf] %vm540_vm1, %v853_v49 }
 0x1a5   : > { %1710 = vst.msk [vmem:[%s2026_s24 + $0xd8] sm:$0xf] %vm540_vm1, %v880_v50  ;;  %v1067_v41 = vsel %vm2044_vm4, %v1062_v37, %v1748_v39  ;;  %v1031_v47 = vpop.f32.mrf.mxu0 }
 0x1a6   : > { %1749 = vst [vmem:[%s2026_s24 + $0x38] sm:$0x3] %v1067_v41  ;;  %v1796_v47 = vld [vmem:[%s2026_s24 + $0x50] sm:$0x3] }
 0x1a9   : > { %v846_v55 = vpop.f32.mrf.mxu2  ;;  %v873_v56 = vpop.f32.mrf.mxu3 }
 0x1aa   : > { %v854_v57 = vpack.c.bf16 %v846_v55, %v846_v55  ;;  %v881_v58 = vpack.c.bf16 %v873_v56, %v873_v56  ;;  %v1058_v48 = vpop.f32.mrf.mxu1 }
 0x1ac   : > { %1705 = vst.msk [vmem:[%s2026_s24 + $0x7c] sm:$0xf] %vm540_vm1, %v854_v57 }
 0x1ad   : > { %1711 = vst.msk [vmem:[%s2026_s24 + $0xdc] sm:$0xf] %vm540_vm1, %v881_v58  ;;  %v1144_v52 = vpop.f32.mrf.mxu0 }
 0x1ae   : > { %1799 = vmatmul.msk.bf16.gmra.mxu2 %vm330_vm0, %v1959_v34  ;;  %1805 = vmatmul.msk.bf16.gmra.mxu3 %vm330_vm0, %v1961_v35  ;;  %v1153_v54 = vpack.c.bf16 %v1144_v52, %v1144_v52  ;;  %v1784_v52 = vld [vmem:[%s2026_s24 + $0x104] sm:$0x3] }
 0x1b0   : > { %1764 = vst.msk [vmem:[%s2021_s19 + $0x3c] sm:$0xf] %vm540_vm1, %v1153_v54 }
 0x1b1   : > { %v849_v3 = vpop.f32.mrf.mxu2  ;;  %v876_v5 = vpop.f32.mrf.mxu3 }
 0x1b2   : > { %v855_v7 = vpack.c.bf16 %v849_v3, %v849_v3  ;;  %v882_v8 = vpack.c.bf16 %v876_v5, %v876_v5  ;;  %v1171_v53 = vpop.f32.mrf.mxu1 }
 0x1b3   : > { %v1180_v55 = vpack.c.bf16 %v1171_v53, %v1171_v53 }
 0x1b4   : > { %v860_v11 = vsel %vm2044_vm4, %v855_v7, %v1706_v4  ;;  %v887_v12 = vsel %vm2044_vm4, %v882_v8, %v1712_v6  ;;  %v1766_v7 = vld [vmem:[%s2021_s19 + $0x44] sm:$0x3] }
 0x1b5   : > { %1707 = vst [vmem:[%s2026_s24 + $0x80] sm:$0x3] %v860_v11  ;;  %v1146_v60 = vpop.f32.mrf.mxu0 }
 0x1b6   : > { %1713 = vst [vmem:[%s2026_s24 + $0xe0] sm:$0x3] %v887_v12  ;;  %v1154_v62 = vpack.c.bf16 %v1146_v60, %v1146_v60 }
 0x1b7   : > { %1770 = vst.msk [vmem:[%s2026_s24 + $0x3c] sm:$0xf] %vm540_vm1, %v1180_v55 }
 0x1b8   : > { %1765 = vst.msk [vmem:[%s2021_s19 + $0x40] sm:$0xf] %vm540_vm1, %v1154_v62 }
 0x1b9   : > { %v851_v13 = vpop.f32.mrf.mxu2  ;;  %v878_v14 = vpop.f32.mrf.mxu3 }
 0x1ba   : > { %v1173_v61 = vpop.f32.mrf.mxu1  ;;  %v1754_v13 = vld [vmem:[%s2026_s24 + $0x98] sm:$0x3] }
 0x1bb   : > { %v1181_v63 = vpack.c.bf16 %v1173_v61, %v1173_v61 }
 0x1bd   : > { %1771 = vst.msk [vmem:[%s2026_s24 + $0x40] sm:$0xf] %vm540_vm1, %v1181_v63  ;;  %v1149_v4 = vpop.f32.mrf.mxu0 }
 0x1be   : > { %1822 = vmatmul.msk.bf16.vlgmr.msrb.gmra.mxu2 %vm330_vm0, %v1939_v20  ;;  %1828 = vmatmul.msk.bf16.vlgmr.msrb.gmra.mxu3 %vm330_vm0, %v1944_v21  ;;  %v1155_v6 = vpack.c.bf16 %v1149_v4, %v1149_v4 }
 0x1c0   : > { %v1160_v10 = vsel %vm2044_vm4, %v1155_v6, %v1766_v7 }
 0x1c1   : > { %v964_v19 = vpop.f32.mrf.mxu2  ;;  %v991_v22 = vpop.f32.mrf.mxu3  ;;  %1767 = vst [vmem:[%s2021_s19 + $0x44] sm:$0x3] %v1160_v10 }
 0x1c2   : > { %v973_v23 = vpack.c.bf16 %v964_v19, %v964_v19  ;;  %v1000_v24 = vpack.c.bf16 %v991_v22, %v991_v22  ;;  %v1176_v5 = vpop.f32.mrf.mxu1 }
 0x1c3   : > { %v1182_v8 = vpack.c.bf16 %v1176_v5, %v1176_v5 }
 0x1c4   : > { %1728 = vst.msk [vmem:[%s2026_s24 + $0x84] sm:$0xf] %vm540_vm1, %v973_v23 }
 0x1c5   : > { %1734 = vst.msk [vmem:[%s2026_s24 + $0xe4] sm:$0xf] %vm540_vm1, %v1000_v24  ;;  %v1187_v11 = vsel %vm2044_vm4, %v1182_v8, %v1772_v9  ;;  %v1151_v18 = vpop.f32.mrf.mxu0 }
 0x1c6   : > { %1773 = vst [vmem:[%s2026_s24 + $0x44] sm:$0x3] %v1187_v11  ;;  %v1820_v18 = vld [vmem:[%s2026_s24 + $0x5c] sm:$0x3] }
 0x1c9   : > { %v966_v20 = vpop.f32.mrf.mxu2  ;;  %v993_v21 = vpop.f32.mrf.mxu3 }
 0x1ca   : > { %v974_v29 = vpack.c.bf16 %v966_v20, %v966_v20  ;;  %v1001_v30 = vpack.c.bf16 %v993_v21, %v993_v21  ;;  %v1178_v19 = vpop.f32.mrf.mxu1 }
 0x1cc   : > { %1729 = vst.msk [vmem:[%s2026_s24 + $0x88] sm:$0xf] %vm540_vm1, %v974_v29 }
 0x1cd   : > { %1735 = vst.msk [vmem:[%s2026_s24 + $0xe8] sm:$0xf] %vm540_vm1, %v1001_v30  ;;  %v1264_v26 = vpop.f32.mrf.mxu0 }
 0x1ce   : > { %1823 = vmatmul.msk.bf16.gmra.mxu2 %vm330_vm0, %v1959_v34  ;;  %1829 = vmatmul.msk.bf16.gmra.mxu3 %vm330_vm0, %v1961_v35  ;;  %v1273_v28 = vpack.c.bf16 %v1264_v26, %v1264_v26  ;;  %v1808_v26 = vld [vmem:[%s2026_s24 + $0x110] sm:$0x3] }
 0x1d0   : > { %1788 = vst.msk [vmem:[%s2021_s19 + $0x48] sm:$0xf] %vm540_vm1, %v1273_v28 }
 0x1d1   : > { %v969_v42 = vpop.f32.mrf.mxu2  ;;  %v996_v44 = vpop.f32.mrf.mxu3 }
 0x1d2   : > { %v975_v34 = vpack.c.bf16 %v969_v42, %v969_v42  ;;  %v1002_v46 = vpack.c.bf16 %v996_v44, %v996_v44  ;;  %v1291_v27 = vpop.f32.mrf.mxu1 }
 0x1d3   : > { %v1300_v20 = vpack.c.bf16 %v1291_v27, %v1291_v27 }
 0x1d4   : > { %v980_v35 = vsel %vm2044_vm4, %v975_v34, %v1730_v43  ;;  %v1007_v49 = vsel %vm2044_vm4, %v1002_v46, %v1736_v45  ;;  %v1790_v34 = vld [vmem:[%s2021_s19 + $0x50] sm:$0x3] }
 0x1d5   : > { %1731 = vst [vmem:[%s2026_s24 + $0x8c] sm:$0x3] %v980_v35  ;;  %v1266_v32 = vpop.f32.mrf.mxu0 }
 0x1d6   : > { %1737 = vst [vmem:[%s2026_s24 + $0xec] sm:$0x3] %v1007_v49  ;;  %v1274_v36 = vpack.c.bf16 %v1266_v32, %v1266_v32 }
 0x1d7   : > { %1794 = vst.msk [vmem:[%s2026_s24 + $0x48] sm:$0xf] %vm540_vm1, %v1300_v20 }
 0x1d8   : > { %1789 = vst.msk [vmem:[%s2021_s19 + $0x4c] sm:$0xf] %vm540_vm1, %v1274_v36 }
 0x1d9   : > { %v971_v50 = vpop.f32.mrf.mxu2  ;;  %v998_v51 = vpop.f32.mrf.mxu3 }
 0x1da   : > { %v1293_v33 = vpop.f32.mrf.mxu1  ;;  %v1778_v50 = vld [vmem:[%s2026_s24 + $0xa4] sm:$0x3] }
 0x1db   : > { %v1301_v37 = vpack.c.bf16 %v1293_v33, %v1293_v33 }
 0x1dd   : > { %1795 = vst.msk [vmem:[%s2026_s24 + $0x4c] sm:$0xf] %vm540_vm1, %v1301_v37  ;;  %v1269_v43 = vpop.f32.mrf.mxu0 }
 0x1de   : > { %v1275_v45 = vpack.c.bf16 %v1269_v43, %v1269_v43 }
 0x1e0   : > { %v1280_v48 = vsel %vm2044_vm4, %v1275_v45, %v1790_v34  ;;  %v1826_v45 = vld [vmem:[%s2026_s24 + $0xbc] sm:$0x3] }
 0x1e1   : > { %v1084_v56 = vpop.f32.mrf.mxu2  ;;  %v1111_v57 = vpop.f32.mrf.mxu3  ;;  %1791 = vst [vmem:[%s2021_s19 + $0x50] sm:$0x3] %v1280_v48 }
 0x1e2   : > { %v1093_v58 = vpack.c.bf16 %v1084_v56, %v1084_v56  ;;  %v1120_v59 = vpack.c.bf16 %v1111_v57, %v1111_v57  ;;  %v1296_v44 = vpop.f32.mrf.mxu1 }
 0x1e3   : > { %v1302_v46 = vpack.c.bf16 %v1296_v44, %v1296_v44 }
 0x1e4   : > { %1752 = vst.msk [vmem:[%s2026_s24 + $0x90] sm:$0xf] %vm540_vm1, %v1093_v58 }
 0x1e5   : > { %1758 = vst.msk [vmem:[%s2026_s24 + $0xf0] sm:$0xf] %vm540_vm1, %v1120_v59  ;;  %v1307_v35 = vsel %vm2044_vm4, %v1302_v46, %v1796_v47  ;;  %v1271_v55 = vpop.f32.mrf.mxu0  ;;  %v1832_v46 = vld [vmem:[%s2026_s24 + $0x11c] sm:$0x3] }
 0x1e6   : > { %1797 = vst [vmem:[%s2026_s24 + $0x50] sm:$0x3] %v1307_v35 }
 0x1e9   : > { %v1086_v0 = vpop.f32.mrf.mxu2  ;;  %v1113_v1 = vpop.f32.mrf.mxu3 }
 0x1ea   : > { %v1094_v2 = vpack.c.bf16 %v1086_v0, %v1086_v0  ;;  %v1121_v3 = vpack.c.bf16 %v1113_v1, %v1113_v1  ;;  %v1298_v56 = vpop.f32.mrf.mxu1 }
 0x1ec   : > { %1753 = vst.msk [vmem:[%s2026_s24 + $0x94] sm:$0xf] %vm540_vm1, %v1094_v2 }
 0x1ed   : > { %1759 = vst.msk [vmem:[%s2026_s24 + $0xf4] sm:$0xf] %vm540_vm1, %v1121_v3  ;;  %v1384_v61 = vpop.f32.mrf.mxu0 }
 0x1ee   : > { %v1393_v63 = vpack.c.bf16 %v1384_v61, %v1384_v61 }
 0x1f0   : > { %1812 = vst.msk [vmem:[%s2021_s19 + $0x54] sm:$0xf] %vm540_vm1, %v1393_v63 }
 0x1f1   : > { %v1089_v12 = vpop.f32.mrf.mxu2  ;;  %v1116_v14 = vpop.f32.mrf.mxu3 }
 0x1f2   : > { %v1095_v16 = vpack.c.bf16 %v1089_v12, %v1089_v12  ;;  %v1122_v17 = vpack.c.bf16 %v1116_v14, %v1116_v14  ;;  %v1411_v62 = vpop.f32.mrf.mxu1 }
 0x1f3   : > { %v1420_v0 = vpack.c.bf16 %v1411_v62, %v1411_v62 }
 0x1f4   : > { %v1100_v22 = vsel %vm2044_vm4, %v1095_v16, %v1754_v13  ;;  %v1127_v23 = vsel %vm2044_vm4, %v1122_v17, %v1760_v15  ;;  %v1814_v16 = vld [vmem:[%s2021_s19 + $0x5c] sm:$0x3] }
 0x1f5   : > { %1755 = vst [vmem:[%s2026_s24 + $0x98] sm:$0x3] %v1100_v22  ;;  %v1386_v5 = vpop.f32.mrf.mxu0 }
 0x1f6   : > { %1761 = vst [vmem:[%s2026_s24 + $0xf8] sm:$0x3] %v1127_v23  ;;  %v1394_v7 = vpack.c.bf16 %v1386_v5, %v1386_v5 }
 0x1f7   : > { %1818 = vst.msk [vmem:[%s2026_s24 + $0x54] sm:$0xf] %vm540_vm1, %v1420_v0 }
 0x1f8   : > { %1813 = vst.msk [vmem:[%s2021_s19 + $0x58] sm:$0xf] %vm540_vm1, %v1394_v7 }
 0x1f9   : > { %v1091_v24 = vpop.f32.mrf.mxu2  ;;  %v1118_v25 = vpop.f32.mrf.mxu3 }
 0x1fa   : > { %v1413_v6 = vpop.f32.mrf.mxu1  ;;  %v1802_v24 = vld [vmem:[%s2026_s24 + $0xb0] sm:$0x3] }
 0x1fb   : > { %v1421_v8 = vpack.c.bf16 %v1413_v6, %v1413_v6 }
 0x1fd   : > { %1819 = vst.msk [vmem:[%s2026_s24 + $0x58] sm:$0xf] %vm540_vm1, %v1421_v8  ;;  %v1389_v13 = vpop.f32.mrf.mxu0 }
 0x1fe   : > { %v1395_v15 = vpack.c.bf16 %v1389_v13, %v1389_v13 }
 0x200   : > { %v1400_v19 = vsel %vm2044_vm4, %v1395_v15, %v1814_v16 }
 0x201   : > { %v1204_v21 = vpop.f32.mrf.mxu2  ;;  %v1231_v29 = vpop.f32.mrf.mxu3  ;;  %1815 = vst [vmem:[%s2021_s19 + $0x5c] sm:$0x3] %v1400_v19 }
 0x202   : > { %v1213_v30 = vpack.c.bf16 %v1204_v21, %v1204_v21  ;;  %v1240_v31 = vpack.c.bf16 %v1231_v29, %v1231_v29  ;;  %v1416_v14 = vpop.f32.mrf.mxu1 }
 0x203   : > { %v1422_v17 = vpack.c.bf16 %v1416_v14, %v1416_v14 }
 0x204   : > { %1776 = vst.msk [vmem:[%s2026_s24 + $0x9c] sm:$0xf] %vm540_vm1, %v1213_v30 }
 0x205   : > { %1782 = vst.msk [vmem:[%s2026_s24 + $0xfc] sm:$0xf] %vm540_vm1, %v1240_v31  ;;  %v1427_v22 = vsel %vm2044_vm4, %v1422_v17, %v1820_v18  ;;  %v1391_v20 = vpop.f32.mrf.mxu0 }
 0x206   : > { %1821 = vst [vmem:[%s2026_s24 + $0x5c] sm:$0x3] %v1427_v22 }
 0x209   : > { %v1206_v39 = vpop.f32.mrf.mxu2  ;;  %v1233_v40 = vpop.f32.mrf.mxu3 }
 0x20a   : > { %v1214_v41 = vpack.c.bf16 %v1206_v39, %v1206_v39  ;;  %v1241_v42 = vpack.c.bf16 %v1233_v40, %v1233_v40  ;;  %v1418_v21 = vpop.f32.mrf.mxu1 }
 0x20c   : > { %1777 = vst.msk [vmem:[%s2026_s24 + $0xa0] sm:$0xf] %vm540_vm1, %v1214_v41 }
 0x20d   : > { %1783 = vst.msk [vmem:[%s2026_s24 + $0x100] sm:$0xf] %vm540_vm1, %v1241_v42 }
 0x211   : > { %v1209_v49 = vpop.f32.mrf.mxu2  ;;  %v1236_v51 = vpop.f32.mrf.mxu3 }
 0x212   : > { %v1215_v53 = vpack.c.bf16 %v1209_v49, %v1209_v49  ;;  %v1242_v54 = vpack.c.bf16 %v1236_v51, %v1236_v51 }
 0x214   : > { %v1220_v57 = vsel %vm2044_vm4, %v1215_v53, %v1778_v50  ;;  %v1247_v58 = vsel %vm2044_vm4, %v1242_v54, %v1784_v52 }
 0x215   : > { %1779 = vst [vmem:[%s2026_s24 + $0xa4] sm:$0x3] %v1220_v57 }
 0x216   : > { %1785 = vst [vmem:[%s2026_s24 + $0x104] sm:$0x3] %v1247_v58 }
 0x219   : > { %v1211_v59 = vpop.f32.mrf.mxu2  ;;  %v1238_v60 = vpop.f32.mrf.mxu3 }
 0x221   : > { %v1324_v1 = vpop.f32.mrf.mxu2  ;;  %v1351_v2 = vpop.f32.mrf.mxu3 }
 0x222   : > { %v1333_v3 = vpack.c.bf16 %v1324_v1, %v1324_v1  ;;  %v1360_v4 = vpack.c.bf16 %v1351_v2, %v1351_v2 }
 0x224   : > { %1800 = vst.msk [vmem:[%s2026_s24 + $0xa8] sm:$0xf] %vm540_vm1, %v1333_v3 }
 0x225   : > { %1806 = vst.msk [vmem:[%s2026_s24 + $0x108] sm:$0xf] %vm540_vm1, %v1360_v4 }
 0x229   : > { %v1326_v9 = vpop.f32.mrf.mxu2  ;;  %v1353_v10 = vpop.f32.mrf.mxu3 }
 0x22a   : > { %v1334_v11 = vpack.c.bf16 %v1326_v9, %v1326_v9  ;;  %v1361_v12 = vpack.c.bf16 %v1353_v10, %v1353_v10 }
 0x22c   : > { %1801 = vst.msk [vmem:[%s2026_s24 + $0xac] sm:$0xf] %vm540_vm1, %v1334_v11 }
 0x22d   : > { %1807 = vst.msk [vmem:[%s2026_s24 + $0x10c] sm:$0xf] %vm540_vm1, %v1361_v12 }
 0x231   : > { %v1329_v23 = vpop.f32.mrf.mxu2  ;;  %v1356_v25 = vpop.f32.mrf.mxu3 }
 0x232   : > { %v1335_v27 = vpack.c.bf16 %v1329_v23, %v1329_v23  ;;  %v1362_v28 = vpack.c.bf16 %v1356_v25, %v1356_v25 }
 0x234   : > { %v1340_v29 = vsel %vm2044_vm4, %v1335_v27, %v1802_v24  ;;  %v1367_v30 = vsel %vm2044_vm4, %v1362_v28, %v1808_v26 }
 0x235   : > { %1803 = vst [vmem:[%s2026_s24 + $0xb0] sm:$0x3] %v1340_v29 }
 0x236   : > { %1809 = vst [vmem:[%s2026_s24 + $0x110] sm:$0x3] %v1367_v30 }
 0x239   : > { %v1331_v31 = vpop.f32.mrf.mxu2  ;;  %v1358_v32 = vpop.f32.mrf.mxu3 }
 0x241   : > { %v1444_v33 = vpop.f32.mrf.mxu2  ;;  %v1471_v36 = vpop.f32.mrf.mxu3 }
 0x242   : > { %v1453_v37 = vpack.c.bf16 %v1444_v33, %v1444_v33  ;;  %v1480_v39 = vpack.c.bf16 %v1471_v36, %v1471_v36 }
 0x244   : > { %1824 = vst.msk [vmem:[%s2026_s24 + $0xb4] sm:$0xf] %vm540_vm1, %v1453_v37 }
 0x245   : > { %1830 = vst.msk [vmem:[%s2026_s24 + $0x114] sm:$0xf] %vm540_vm1, %v1480_v39 }
 0x249   : > { %v1446_v40 = vpop.f32.mrf.mxu2  ;;  %v1473_v41 = vpop.f32.mrf.mxu3 }
 0x24a   : > { %v1454_v42 = vpack.c.bf16 %v1446_v40, %v1446_v40  ;;  %v1481_v43 = vpack.c.bf16 %v1473_v41, %v1473_v41 }
 0x24c   : > { %1825 = vst.msk [vmem:[%s2026_s24 + $0xb8] sm:$0xf] %vm540_vm1, %v1454_v42 }
 0x24d   : > { %1831 = vst.msk [vmem:[%s2026_s24 + $0x118] sm:$0xf] %vm540_vm1, %v1481_v43 }
 0x251   : > { %v1449_v44 = vpop.f32.mrf.mxu2  ;;  %v1476_v34 = vpop.f32.mrf.mxu3 }
 0x252   : > { %v1455_v47 = vpack.c.bf16 %v1449_v44, %v1449_v44  ;;  %v1482_v48 = vpack.c.bf16 %v1476_v34, %v1476_v34 }
 0x254   : > { %v1460_v35 = vsel %vm2044_vm4, %v1455_v47, %v1826_v45  ;;  %v1487_v49 = vsel %vm2044_vm4, %v1482_v48, %v1832_v46 }
 0x255   : > { %1827 = vst [vmem:[%s2026_s24 + $0xbc] sm:$0x3] %v1460_v35 }
 0x256   : > { %1833 = vst [vmem:[%s2026_s24 + $0x11c] sm:$0x3] %v1487_v49 }
 0x259   : > { %v1451_v50 = vpop.f32.mrf.mxu2  ;;  %v1478_v51 = vpop.f32.mrf.mxu3 }
 0x25a PF: > { %s17_s21 = sadd.s32 1, %s1865_s21  }
 0x25b   : > { %p14_p4 = scmp.ge.s32.totalorder %s17_s21, 4  }
 0x25d   :  { %16 = sbr.rel (!%p14_p4) target bundleno = 1 (0x1), region = 112 }

// kernel: dwt_upsampler_forward.14
= control target key start
LH: loop header
LB: loop body
LE: loop exit
PB: predicated region body
PF: predicated region fallthrough
CT: control target
= control target key end

     0   :  { %s1401_s18 = smov 0   ;;  %s1688_s0 = inlined_call_operand.vmem [shape: bf16[2,8,401], index: 0, kind: input, shape index: {}]   ;;  %s1689_s1 = inlined_call_operand.vmem [shape: bf16[9,12,8], index: 1, kind: input, shape index: {}]   ;;  %s1690_s2 = inlined_call_operand.vmem [shape: f32[12,1], index: 2, kind: input, shape index: {}]   ;;  %s1691_s3 = inlined_call_operand.vmem [shape: bf16[1,361], index: 3, kind: input, shape index: {}]   ;;  %s1692_s4 = inlined_call_operand.vmem [shape: bf16[1,361], index: 4, kind: input, shape index: {}]   ;;  %s1693_s5 = inlined_call_operand.vmem [shape: bf16[2,12,361], index: 5, kind: output, shape index: {}]  }
   0x1 LB: > { %s1199_s19 = sadd.s32 4294967295, %s1355_s18   ;;  %p1203_p0 = scmp.ge.s32.totalorder %s1355_s18, 1  ;;  %s1355_s18 = sphi %s1401_s18, %s15_s18  }
   0x2   : > { %p187_p1 = scmp.lt.s32.totalorder %s1355_s18, 3 }
   0x4   : > { %p188_p2 = pnand %p1203_p0, %p187_p1 }
   0x5   : > { %p215_p3 = scmp.lt.s32.totalorder (!%p188_p2), %s1199_s19, 1  ;;  %s1357_s28 = smov (!%p188_p2), 19  }
   0x6   : > { %191 = sbr.rel (%p188_p2) target bundleno = 586 (0x24a), region = 40  ;;  %s1358_s29 = smov (!%p188_p2), 127  }
   0x7   : > { %s1359_s30 = smov (!%p188_p2), 2   ;;  %s1360_s6 = smov (!%p188_p2), 21  }
   0x8   : > { %s1361_s7 = smov (!%p188_p2), 126   ;;  %s1362_s8 = smov (!%p188_p2), 38  }
   0x9   : > { %s1363_s9 = smov (!%p188_p2), 109   ;;  %s1364_s10 = smov (!%p188_p2), 40  }
   0xa   : > { %s1365_s11 = smov (!%p188_p2), 108   ;;  %s1366_s12 = smov (!%p188_p2), 107  }
   0xb   : > { %v226_v0 = vld [vmem:[%s1691_s3] sm:$0x7]  ;;  %s1695_s19 = smov (!%p215_p3, %s1199_s19), 1  ;;  %vm429_vm0 = vcmask 15360   ;;  %vm535_vm1 = vcmask 154624   ;;  %vm718_vm2 = vcmask 171008  }
   0xc   : > { %231 = vst [vmem:[#allocation1] ss:$9 sm:$0xff] %v226_v0  ;;  %v227_v1 = vld [vmem:[%s1692_s4] sm:$0x7]  ;;  %s1288_s24 = sshll.u32 %s1695_s19, 4  ;;  %vm282_vm3 = vcmask 1039360  }
   0xd   : > { %s1433_s27 = scalar_lea.vmem %s1688_s0, %s1288_s24  ;;  %vm289_vm4 = vcmask 1043456   ;;  %vm285_vm5 = vcmask 64512   ;;  %vm458_vm6 = vcmask 1031168   ;;  %vm822_vm7 = vcmask 310272  }
   0xe   : > { %v259_v18 = vld [vmem:[%s1433_s27 + $0x8] sm:$0xf]  ;;  %v258_v31 = vld [vmem:[%s1433_s27] sm:$0xff]  ;;  %vm564_vm8 = vcmask 891904   ;;  %vm649_vm9 = vcmask 883712   ;;  %vm1017_vm10 = vcmask 326656  }
   0xf   : > { %v272_v20 = vunpack.c.l.b16 %v259_v18  ;;  %v271_v32 = vunpack.c.h.b16 %v258_v31  ;;  %v270_v34 = vunpack.c.l.b16 %v258_v31  ;;  %v1458_v36 = vunpack.c.l.bf16 %v258_v31  ;;  %v1467_v52 = vld [vmem:[%s1433_s27 + $0x8] sm:$0xf] }
  0x10   : > { %v1460_v38 = vunpack.c.h.bf16 %v258_v31  ;;  %v416_v46 = vunpack.c.l.bf16 %v259_v18  ;;  %v525_v57 = vunpack.c.l.bf16 %v1467_v52  ;;  %vm747_vm11 = vcmask 875520  }
  0x11   : > { %v275_v23 = vpack.c.b16 %v272_v20, %v272_v20  ;;  %v1451_v33 = vpack.c.b16 %v271_v32, %v271_v32  ;;  %v1455_v35 = vpack.c.b16 %v270_v34, %v270_v34  ;;  %vm857_vm12 = vcmask 736256  }
  0x12   : > { %vm947_vm13 = vcmask 728064   ;;  %vm1052_vm14 = vcmask 719872   ;;  %vm1139_vm15 = vcmask 855040  }
  0x13   : > { %v232_v2 = vld [vmem:[#allocation1] sm:$0xff]  ;;  %v233_v3 = vld [vmem:[#allocation1 + $0x9] sm:$0xff]  ;;  %v234_v4 = vld [vmem:[#allocation1 + $0x12] sm:$0xff]  ;;  %280 = vrot.lane.b32.xlu2 %v275_v23, %s1358_s29 }
  0x14   : > { %401 = vst [vmem:[#allocation1] ss:$9 sm:$0xff] %v227_v1  ;;  %v235_v5 = vpack.i.b16 %v232_v2, %v232_v2  ;;  %v238_v6 = vpack.i.b16 %v233_v3, %v233_v3  ;;  %v241_v11 = vpack.i.b16 %v234_v4, %v234_v4  ;;  %v639_v2 = vunpack.c.l.b16 %v1467_v52 }
  0x16   : > { %v1417_v7 = vperm.slane %v235_v5, 0  ;;  %v1419_v8 = vperm.slane %v238_v6, 0  ;;  %v243_v17 = vperm.slane %v241_v11, 0  ;;  %v642_v4 = vpack.c.b16 %v639_v2, %v639_v2 }
  0x18   : > { %v247_v9 = vunpack.c.l.bf16 %v1417_v7  ;;  %v248_v10 = vunpack.c.l.bf16 %v1419_v8  ;;  %v1443_v27 = vunpack.c.l.bf16 %v243_v17 }
  0x1a   : > { %v1428_v12 = vpack.i.bf16 %v248_v10, %v247_v9 }
  0x1b   : > { %v402_v13 = vld [vmem:[#allocation1] sm:$0xff]  ;;  %v403_v14 = vld [vmem:[#allocation1 + $0x9] sm:$0xff]  ;;  %v404_v19 = vld [vmem:[#allocation1 + $0x12] sm:$0xff]  ;;  %276 = vrot.lane.b32.xlu2 %v1455_v35, %s1358_s29 }
  0x1c   : > { %v405_v15 = vpack.i.b16 %v402_v13, %v402_v13  ;;  %v408_v16 = vpack.i.b16 %v403_v14, %v403_v14  ;;  %1327 = vrot.lane.b32.xlu1 %v1428_v12, %s1357_s28  ;;  %v411_v26 = vpack.i.b16 %v404_v19, %v404_v19 }
  0x1e   : > { %v1437_v21 = vperm.slane %v405_v15, 0  ;;  %v1439_v22 = vperm.slane %v408_v16, 0  ;;  %v413_v29 = vperm.slane %v411_v26, 0 }
  0x20   : > { %v417_v24 = vunpack.c.l.bf16 %v1437_v21  ;;  %v418_v25 = vunpack.c.l.bf16 %v1439_v22  ;;  %v419_v30 = vunpack.c.l.bf16 %v413_v29  ;;  %v1290_v29 = vld [vmem:[%s1689_s1 + $0x8] sm:$0x30] }
  0x22   : > { %v1321_v28 = vpack.i.bf16 %v418_v25, %v417_v24  ;;  %v1341_v1 = vpack.i.bf16 %v419_v30, %v418_v25  ;;  %v250_v25 = vmul.f32 %v1458_v36, %v247_v9 }
  0x24   : > { %1322 = vrot.lane.b32.xlu0 %v1321_v28, %s1359_s30  ;;  %533 = vrot.lane.b32.xlu1 %v1443_v27, %s1357_s28  ;;  %s1368_s28 = smov 90  }
  0x2c   : > { %427 = vrot.lane.b32.xlu0 %v419_v30, %s1359_s30 }
  0x34   : > { %278 = vrot.lane.b32.xlu0 %v1451_v33, %s1358_s29 }
  0x3c   : > { %1332 = vrot.lane.b32.xlu0 %v1321_v28, %s1360_s6  ;;  %v1211_v28 = vld [vmem:[%s1689_s1 + $0x8] sm:$0xf] }
  0x3d   : > { %v1212_v32 = vor.u32 %v1290_v29, %v1211_v28 }
  0x6d   : > { %v281_v17 = vpop.permute.xlu2 %280 }
  0x6e   : > { %v297_v23 = vsel %vm289_vm4, %v281_v17, 0 }
  0x6f   : > { %334 = vmatpush.bf16.msra.mxu2 %v297_v23 }
  0x72   : > { %1215 = vmatmul.msk.bf16.vlgmr.msra.gmra.mxu2 %vm285_vm5, %v1212_v32 }
  0x75   : > { %v277_v18 = vpop.permute.xlu2 %276 }
  0x8e   : > { %v1328_v41 = vpop.permute.xlu1 %1327 }
  0x8f   : > { %v1330_v49 = vunpack.i.h.bf16 %v1328_v41  ;;  %v1329_v50 = vunpack.i.l.bf16 %v1328_v41 }
  0x91   : > { %v536_v56 = vsel %vm535_vm1, %v1329_v50, %v1330_v49  ;;  %v541_v0 = vmul.f32 %v1329_v50, %v1458_v36 }
  0x92   : > { %v542_v59 = vmul.f32 %v536_v56, %v1460_v38 }
  0x93   : > { %v544_v3 = vpack.c.bf16 %v541_v0, %v541_v0 }
  0x94   : > { %v545_v61 = vpack.c.bf16 %v542_v59, %v542_v59 }
  0x96   : > { %v1323_v37 = vpop.permute.xlu0 %1322  ;;  %v534_v54 = vpop.permute.xlu1 %533 }
  0x97   : > { %v1325_v39 = vunpack.i.h.bf16 %v1323_v37  ;;  %v1324_v40 = vunpack.i.l.bf16 %v1323_v37  ;;  %v537_v58 = vsel %vm535_vm1, %v1330_v49, %v534_v54 }
  0x98   : > { %v543_v60 = vmul.f32 %v537_v58, %v525_v57 }
  0x99   : > { %v435_v42 = vmul.f32 %v1324_v40, %v1458_v36  ;;  %v430_v43 = vsel %vm429_vm0, %v1324_v40, %v1325_v39  ;;  %v1289_v40 = vld [vmem:[%s1689_s1] sm:$0x30] }
  0x9a   : > { %v436_v44 = vmul.f32 %v430_v43, %v1460_v38  ;;  %v546_v62 = vpack.c.bf16 %v543_v60, %v543_v60 }
  0x9b   : > { %v438_v45 = vpack.c.bf16 %v435_v42, %v435_v42  ;;  %v229_v42 = vld [vmem:[%s1433_s27 + $0x8] sm:$0xf] }
  0x9c   : > { %v439_v47 = vpack.c.bf16 %v436_v44, %v436_v44  ;;  %v246_v43 = vunpack.c.l.bf16 %v229_v42 }
  0x9d   : > { %452 = vrot.lane.b32.xlu1 %v438_v45, %s1361_s7  ;;  %v1524_v45 = vld [vmem:[%s1433_s27 + $0x8] sm:$0xff]  ;;  %s1367_s27 = smov 89  }
  0x9e   : > { %v428_v48 = vpop.permute.xlu0 %427  ;;  %454 = vrot.lane.b32.xlu2 %v439_v47, %s1361_s7  ;;  %v252_v44 = vmul.f32 %v1443_v27, %v246_v43  ;;  %v933_v47 = vunpack.c.l.b16 %v1524_v45  ;;  %v934_v59 = vunpack.c.h.b16 %v1524_v45  ;;  %v815_v23 = vunpack.c.h.bf16 %v1524_v45 }
  0x9f   : > { %v431_v51 = vsel %vm429_vm0, %v1325_v39, %v428_v48  ;;  %v1218_v39 = vld [vmem:[%s1689_s1] sm:$0xf]  ;;  %vm1142_vm0 = vcmask 852992  }
  0xa0   : > { %v437_v53 = vmul.f32 %v431_v51, %v416_v46  ;;  %v1219_v41 = vor.u32 %v1289_v40, %v1218_v39  ;;  %v255_v48 = vpack.c.bf16 %v252_v44, %v252_v44  ;;  %v937_v51 = vpack.c.b16 %v933_v47, %v933_v47  ;;  %v1245_v39 = vld [vmem:[%s1689_s1 + $0x20] sm:$0xf]  ;;  %v1293_v40 = vld [vmem:[%s1689_s1 + $0x20] sm:$0x30] }
  0xa1   : > { %v1246_v47 = vor.u32 %v1293_v40, %v1245_v39 }
  0xa2   : > { %v440_v55 = vpack.c.bf16 %v437_v53, %v437_v53  ;;  %v356_v52 = vsel %vm289_vm4, %v255_v48, 0  ;;  %v1227_v53 = vld [vmem:[%s1689_s1 + $0x10] sm:$0xf] }
  0xa4   : > { %456 = vrot.lane.b32.xlu0 %v440_v55, %s1361_s7 }
  0xa5   : > { %1337 = vrot.lane.b32.xlu1 %v1428_v12, %s1362_s8 }
  0xa6   : > { %716 = vrot.lane.b32.xlu2 %v419_v30, %s1360_s6  ;;  %v279_v63 = vpop.permute.xlu0 %278  ;;  %v253_v30 = vpack.c.bf16 %v250_v25, %v250_v25 }
  0xa7   : > { %v283_v19 = vsel %vm282_vm3, %v277_v18, %v279_v63  ;;  %v284_v20 = vsel %vm282_vm3, %v279_v63, %v281_v17  ;;  %v938_v63 = vpack.c.b16 %v934_v59, %v934_v59 }
  0xa8   : > { %v291_v21 = vsel %vm289_vm4, %v283_v19, 0  ;;  %v294_v22 = vsel %vm289_vm4, %v284_v20, 0  ;;  %v350_v8 = vsel %vm289_vm4, %v253_v30, 0 }
  0xa9   : > { %306 = vmatpush.bf16.msra.mxu0 %v291_v21  ;;  %320 = vmatpush.bf16.msra.mxu1 %v294_v22 }
  0xaa   : > { %365 = vmatpush.bf16.msra.mxu3 %v350_v8 }
  0xac   : > { %820 = vrot.lane.b32.xlu0 %v1443_v27, %s1362_s8  ;;  %1213 = vmatmul.msk.bf16.vlgmr.msra.gmra.mxu0 %vm285_vm5, %v1212_v32  ;;  %v1291_v27 = vld [vmem:[%s1689_s1 + $0x10] sm:$0x30] }
  0xad   : > { %560 = vrot.lane.b32.xlu1 %v545_v61, %s1363_s9  ;;  %1214 = vmatmul.msk.bf16.vlgmr.msra.gmra.mxu1 %vm285_vm5, %v1212_v32  ;;  %v1228_v54 = vor.u32 %v1291_v27, %v1227_v53 }
  0xae   : > { %562 = vrot.lane.b32.xlu2 %v546_v62, %s1363_s9  ;;  %v1333_v5 = vpop.permute.xlu0 %1332  ;;  %1220 = vmatmul.msk.bf16.vlgmr.msra.gmra.mxu3 %vm285_vm5, %v1219_v41 }
  0xaf   : > { %v1334_v6 = vunpack.i.l.bf16 %v1333_v5  ;;  %v1335_v13 = vunpack.i.h.bf16 %v1333_v5  ;;  %393 = vmatpush.bf16.msrb.mxu1 %v356_v52  ;;  %v814_v5 = vunpack.c.l.bf16 %v1524_v45  ;;  %v1294_v52 = vld [vmem:[%s1689_s1 + $0x28] sm:$0x30] }
  0xb1   : > { %v724_v11 = vmul.f32 %v1334_v6, %v1458_v36  ;;  %v719_v14 = vsel %vm718_vm2, %v1334_v6, %v1335_v13 }
  0xb2   : > { %v725_v15 = vmul.f32 %v719_v14, %v1460_v38  ;;  %v1292_v14 = vld [vmem:[%s1689_s1 + $0x18] sm:$0x30] }
  0xb3   : > { %v727_v12 = vpack.c.bf16 %v724_v11, %v724_v11 }
  0xb4   : > { %1342 = vrot.lane.b32.xlu0 %v1341_v1, %s1364_s10  ;;  %v728_v16 = vpack.c.bf16 %v725_v15, %v725_v15 }
  0xb5   : > { %558 = vrot.lane.b32.xlu1 %v544_v3, %s1363_s9 }
  0xb6   : > { %647 = vrot.lane.b32.xlu2 %v642_v4, %s1365_s11 }
  0xbc   : > { %1011 = vrot.lane.b32.xlu0 %v417_v24, %s1364_s10  ;;  %v251_v24 = vmul.f32 %v1460_v38, %v248_v10  ;;  %s1298_s10 = smul.u32 24, %s1695_s19 }
  0xbd   : > { %643 = vrot.lane.b32.xlu1 %v1455_v35, %s1365_s11  ;;  %1222 = vmatmul.msk.bf16.vlgmr.msrb.gmra.mxu1 %vm285_vm5, %v1219_v41 }
  0xbe   : > { %645 = vrot.lane.b32.xlu2 %v1451_v33, %s1365_s11  ;;  %v254_v26 = vpack.c.bf16 %v251_v24, %v251_v24  ;;  %s1678_s13 = scalar_lea.vmem %s1693_s5, %s1298_s10 }
  0xc0   : > { %v353_v31 = vsel %vm289_vm4, %v254_v26, 0 }
  0xc1   : > { %379 = vmatpush.bf16.msrb.mxu0 %v353_v31 }
  0xc4   : > { %1221 = vmatmul.msk.bf16.vlgmr.msrb.gmra.mxu0 %vm285_vm5, %v1219_v41 }
  0xc5   : > { %741 = vrot.lane.b32.xlu1 %v727_v12, %s1366_s12 }
  0xc6   : > { %743 = vrot.lane.b32.xlu2 %v728_v16, %s1366_s12 }
  0xf8   : > { %v455_v7 = vpop.permute.xlu2 %454 }
 0x100   : > { %v717_v9 = vpop.permute.xlu2 %716 }
 0x101   : > { %v720_v10 = vsel %vm718_vm2, %v1335_v13, %v717_v9  ;;  %v1236_v13 = vld [vmem:[%s1689_s1 + $0x18] sm:$0xf] }
 0x102   : > { %v726_v34 = vmul.f32 %v720_v10, %v525_v57  ;;  %v1237_v20 = vor.u32 %v1292_v14, %v1236_v13 }
 0x104   : > { %v729_v37 = vpack.c.bf16 %v726_v34, %v726_v34 }
 0x106   : > { %745 = vrot.lane.b32.xlu2 %v729_v37, %s1366_s12  ;;  %s1369_s12 = smov 88  }
 0x108   : > { %v563_v0 = vpop.permute.xlu2 %562 }
 0x109   : > { %v577_v12 = vsel %vm289_vm4, %v563_v0, 0 }
 0x10e   : > { %943 = vrot.lane.b32.xlu2 %v937_v51, %s1367_s27 }
 0x10f   : > { %v453_v46 = vpop.permute.xlu1 %452 }
 0x110   : > { %v459_v49 = vsel %vm458_vm6, %v453_v46, %v455_v7  ;;  %v648_v21 = vpop.permute.xlu2 %647 }
 0x111   : > { %v465_v50 = vsel %vm289_vm4, %v459_v49, 0  ;;  %v662_v22 = vsel %vm289_vm4, %v648_v21, 0 }
 0x112   : > { %480 = vmatpush.bf16.msrb.mxu2 %v465_v50 }
 0x115   : > { %1229 = vmatmul.msk.bf16.vlgmr.msrb.gmra.mxu2 %vm285_vm5, %v1228_v54 }
 0x116   : > { %v457_v55 = vpop.permute.xlu0 %456  ;;  %945 = vrot.lane.b32.xlu2 %v938_v63, %s1367_s27 }
 0x117   : > { %v471_v56 = vsel %vm289_vm4, %v457_v55, 0  ;;  %v1338_v57 = vpop.permute.xlu1 %1337  ;;  %v460_v58 = vsel %vm458_vm6, %v455_v7, %v457_v55 }
 0x118   : > { %v1340_v60 = vunpack.i.h.bf16 %v1338_v57  ;;  %v1339_v61 = vunpack.i.l.bf16 %v1338_v57  ;;  %508 = vmatpush.bf16.msra.mxu0 %v471_v56  ;;  %v468_v62 = vsel %vm289_vm4, %v460_v58, 0  ;;  %v646_v8 = vpop.permute.xlu2 %645 }
 0x119   : > { %494 = vmatpush.bf16.msrb.mxu3 %v468_v62  ;;  %v651_v7 = vsel %vm649_vm9, %v646_v8, %v648_v21  ;;  %v1370_v21 = vmov 0  }
 0x11a   : > { %v829_v1 = vmul.f32 %v1339_v61, %v1458_v36  ;;  %v823_v2 = vsel %vm822_vm7, %v1339_v61, %v1340_v60  ;;  %v659_v10 = vsel %vm289_vm4, %v651_v7, 0  ;;  %1346 = vset.pattern.permute.xlu1 %v1370_v21  ;;  %1347 = vset.pattern.permute.xlu2 %v1370_v21 }
 0x11b   : > { %v830_v3 = vmul.f32 %v823_v2, %v1460_v38  ;;  %1231 = vmatmul.msk.bf16.vlgmr.msra.gmra.mxu0 %vm285_vm5, %v1228_v54  ;;  %v1263_v2 = vld [vmem:[%s1689_s1 + $0x30] sm:$0xf]  ;;  %1348 = vset.pattern.permute.xlu0 %v1370_v21 }
 0x11c   : > { %v833_v4 = vpack.c.bf16 %v829_v1, %v829_v1  ;;  %1230 = vmatmul.msk.bf16.vlgmr.msrb.gmra.mxu3 %vm285_vm5, %v1228_v54 }
 0x11d   : > { %v834_v6 = vpack.c.bf16 %v830_v3, %v830_v3  ;;  %614 = vmatpush.bf16.msra.mxu3 %v577_v12  ;;  %v1295_v3 = vld [vmem:[%s1689_s1 + $0x30] sm:$0x30] }
 0x11e   : > { %849 = vrot.lane.b32.xlu0 %v833_v4, %s1368_s28  ;;  %v821_v11 = vpop.permute.xlu0 %820  ;;  %v336_v4 = vpop.f32.mrf.mxu2  ;;  %v1264_v13 = vor.u32 %v1295_v3, %v1263_v2 }
 0x11f   : > { %v824_v15 = vsel %vm822_vm7, %v1340_v60, %v821_v11  ;;  %851 = vrot.lane.b32.xlu1 %v834_v6, %s1368_s28  ;;  %v561_v16 = vpop.permute.xlu1 %560  ;;  %v832_v30 = vmul.f32 %v821_v11, %v815_v23 }
 0x120   : > { %v831_v17 = vmul.f32 %v824_v15, %v814_v5  ;;  %v566_v18 = vsel %vm564_vm8, %v561_v16, %v563_v0  ;;  %v744_v51 = vpop.permute.xlu2 %743 }
 0x121   : > { %v574_v19 = vsel %vm289_vm4, %v566_v18, 0  ;;  %v836_v34 = vpack.c.bf16 %v832_v30, %v832_v30 }
 0x122   : > { %600 = vmatpush.bf16.msra.mxu2 %v574_v19  ;;  %v835_v24 = vpack.c.bf16 %v831_v17, %v831_v17  ;;  %v1116_v19 = vld [vmem:[%s1690_s2] sm:$0xff] }
 0x125   : > { %1239 = vmatmul.msk.bf16.vlgmr.msra.gmra.mxu2 %vm285_vm5, %v1237_v20 }
 0x126   : > { %699 = vmatpush.bf16.msrb.mxu2 %v662_v22  ;;  %853 = vrot.lane.b32.xlu0 %v835_v24, %s1368_s28  ;;  %v1343_v25 = vpop.permute.xlu0 %1342 }
 0x127   : > { %941 = vrot.lane.b32.xlu1 %v1451_v33, %s1367_s27  ;;  %v1345_v26 = vunpack.i.h.bf16 %v1343_v25  ;;  %v1344_v28 = vunpack.i.l.bf16 %v1343_v25  ;;  %v559_v29 = vpop.permute.xlu1 %558 }
 0x128   : > { %v565_v31 = vsel %vm564_vm8, %v559_v29, %v561_v16 }
 0x129   : > { %v571_v32 = vsel %vm289_vm4, %v565_v31, 0  ;;  %v1019_v9 = vsel %vm1017_vm10, %v1344_v28, %v1345_v26  ;;  %v1027_v41 = vmul.f32 %v1345_v26, %v815_v23  ;;  %v1606_v61 = vpop.f32.mrf.mxu0 }
 0x12a   : > { %586 = vmatpush.bf16.msra.mxu1 %v571_v32  ;;  %v1026_v33 = vmul.f32 %v1019_v9, %v814_v5  ;;  %v322_v60 = vpop.f32.mrf.mxu1  ;;  %v1272_v9 = vld [vmem:[%s1689_s1 + $0x38] sm:$0xf] }
 0x12b   : > { %v1031_v50 = vpack.c.bf16 %v1027_v41, %v1027_v41 }
 0x12c   : > { %1240 = vmatmul.msk.bf16.vlgmr.msra.gmra.mxu3 %vm285_vm5, %v1237_v20  ;;  %v1030_v48 = vpack.c.bf16 %v1026_v33, %v1026_v33 }
 0x12d   : > { %1238 = vmatmul.msk.bf16.vlgmr.msra.gmra.mxu1 %vm285_vm5, %v1237_v20 }
 0x12e   : > { %685 = vmatpush.bf16.msrb.mxu1 %v659_v10  ;;  %855 = vrot.lane.b32.xlu0 %v836_v34, %s1368_s28  ;;  %v1012_v37 = vpop.permute.xlu0 %1011  ;;  %v1296_v10 = vld [vmem:[%s1689_s1 + $0x38] sm:$0x30] }
 0x12f   : > { %939 = vrot.lane.b32.xlu1 %v1455_v35, %s1367_s27  ;;  %v1024_v42 = vmul.f32 %v1012_v37, %v1458_v36  ;;  %v644_v43 = vpop.permute.xlu1 %643  ;;  %v1018_v49 = vsel %vm1017_vm10, %v1012_v37, %v1344_v28  ;;  %v1254_v36 = vld [vmem:[%s1689_s1 + $0x28] sm:$0xf]  ;;  %v338_v28 = vpop.f32.mrf.mxu2  ;;  %v1273_v41 = vor.u32 %v1296_v10, %v1272_v9 }
 0x130   : > { %v650_v44 = vsel %vm649_vm9, %v644_v43, %v646_v8  ;;  %v1025_v35 = vmul.f32 %v1018_v49, %v1460_v38  ;;  %v1255_v55 = vor.u32 %v1294_v52, %v1254_v36 }
 0x131   : > { %v1028_v45 = vpack.c.bf16 %v1024_v42, %v1024_v42  ;;  %v656_v46 = vsel %vm289_vm4, %v650_v44, 0  ;;  %v1608_v0 = vpop.f32.mrf.mxu0  ;;  %v1117_v42 = vld [vmem:[%s1690_s2 + $0x8] sm:$0xf] }
 0x132   : > { %671 = vmatpush.bf16.msrb.mxu0 %v656_v46  ;;  %v1029_v56 = vpack.c.bf16 %v1025_v35, %v1025_v35  ;;  %v324_v62 = vpop.f32.mrf.mxu1 }
 0x133   : > { %1044 = vrot.lane.b32.xlu2 %v1028_v45, %s1369_s12 }
 0x135   : > { %1247 = vmatmul.msk.bf16.vlgmr.msrb.gmra.mxu0 %vm285_vm5, %v1246_v47  ;;  %1249 = vmatmul.msk.bf16.vlgmr.msrb.gmra.mxu2 %vm285_vm5, %v1246_v47 }
 0x136   : > { %1048 = vrot.lane.b32.xlu0 %v1030_v48, %s1369_s12  ;;  %v1297_v48 = vld [vmem:[%s1689_s1 + $0x40] sm:$0x30] }
 0x137   : > { %1050 = vrot.lane.b32.xlu1 %v1031_v50, %s1369_s12  ;;  %v742_v53 = vpop.permute.xlu1 %741 }
 0x138   : > { %v748_v27 = vsel %vm747_vm11, %v742_v53, %v744_v51 }
 0x139   : > { %v754_v54 = vsel %vm289_vm4, %v748_v27, 0  ;;  %v367_v27 = vpop.f32.mrf.mxu3 }
 0x13a   : > { %769 = vmatpush.bf16.msrb.mxu3 %v754_v54  ;;  %v395_v11 = vpop.f32.mrf.mxu1 }
 0x13b   : > { %v1621_v18 = vadd.f32 %v395_v11, %v336_v4  ;;  %1125 = vperm.xlu2 %1347, %v1117_v42  }
 0x13d   : > { %1248 = vmatmul.msk.bf16.vlgmr.msrb.gmra.mxu1 %vm285_vm5, %v1246_v47  ;;  %1256 = vmatmul.msk.bf16.vlgmr.msrb.gmra.mxu3 %vm285_vm5, %v1255_v55  ;;  %v1281_v47 = vld [vmem:[%s1689_s1 + $0x40] sm:$0xf] }
 0x13e   : > { %1046 = vrot.lane.b32.xlu0 %v1029_v56, %s1369_s12  ;;  %v1282_v53 = vor.u32 %v1297_v48, %v1281_v47 }
 0x13f   : > { %1120 = vperm.xlu1 %1346, %v1116_v19  }
 0x141   : > { %v381_v14 = vpop.f32.mrf.mxu0  ;;  %v369_v54 = vpop.f32.mrf.mxu3 }
 0x142   : > { %v1619_v17 = vadd.f32 %v381_v14, %v322_v60  ;;  %v397_v29 = vpop.f32.mrf.mxu1 }
 0x143   : > { %v1632_v32 = vadd.f32 %v397_v29, %v338_v28 }
 0x149   : > { %v383_v31 = vpop.f32.mrf.mxu0 }
 0x14a   : > { %v1634_v8 = vadd.f32 %v383_v31, %v324_v62  ;;  %v370_v31 = vadd.f32 %v369_v54, %v1608_v0 }
 0x160   : > { %v746_v38 = vpop.permute.xlu2 %745 }
 0x161   : > { %v749_v57 = vsel %vm747_vm11, %v744_v51, %v746_v38  ;;  %v760_v58 = vsel %vm289_vm4, %v746_v38, 0 }
 0x162   : > { %v757_v59 = vsel %vm289_vm4, %v749_v57, 0  ;;  %797 = vmatpush.bf16.msra.mxu1 %v760_v58 }
 0x163   : > { %783 = vmatpush.bf16.msra.mxu0 %v757_v59 }
 0x165   : > { %1258 = vmatmul.msk.bf16.vlgmr.msra.gmra.mxu1 %vm285_vm5, %v1255_v55 }
 0x166   : > { %1257 = vmatmul.msk.bf16.vlgmr.msra.gmra.mxu0 %vm285_vm5, %v1255_v55 }
 0x168   : > { %v944_v63 = vpop.permute.xlu2 %943 }
 0x170   : > { %v946_v15 = vpop.permute.xlu2 %945 }
 0x171   : > { %v950_v16 = vsel %vm947_vm13, %v944_v63, %v946_v15 }
 0x172   : > { %v961_v22 = vsel %vm289_vm4, %v950_v16, 0 }
 0x18d   : > { %v1045_v49 = vpop.permute.xlu2 %1044 }
 0x190   : > { %v850_v1 = vpop.permute.xlu0 %849 }
 0x191   : > { %v852_v5 = vpop.permute.xlu1 %851 }
 0x192   : > { %v858_v6 = vsel %vm857_vm12, %v850_v1, %v852_v5 }
 0x193   : > { %v865_v12 = vsel %vm289_vm4, %v858_v6, 0 }
 0x194   : > { %880 = vmatpush.bf16.msra.mxu2 %v865_v12 }
 0x197   : > { %1265 = vmatmul.msk.bf16.vlgmr.msra.gmra.mxu2 %vm285_vm5, %v1264_v13 }
 0x198   : > { %v854_v20 = vpop.permute.xlu0 %853  ;;  %v482_v55 = vpop.f32.mrf.mxu2 }
 0x199   : > { %v859_v23 = vsel %vm857_vm12, %v852_v5, %v854_v20  ;;  %v942_v24 = vpop.permute.xlu1 %941  ;;  %v510_v38 = vpop.f32.mrf.mxu0 }
 0x19a   : > { %v868_v25 = vsel %vm289_vm4, %v859_v23, 0  ;;  %v949_v26 = vsel %vm947_vm13, %v942_v24, %v944_v63  ;;  %v368_v23 = vadd.f32 %v367_v27, %v1606_v61  ;;  %v517_v10 = vadd.f32 %v510_v38, %v1621_v18 }
 0x19b   : > { %v958_v30 = vsel %vm289_vm4, %v949_v26, 0  ;;  %894 = vmatpush.bf16.msra.mxu3 %v868_v25 }
 0x19c   : > { %984 = vmatpush.bf16.msrb.mxu2 %v958_v30  ;;  %v515_v25 = vadd.f32 %v482_v55, %v368_v23 }
 0x19e   : > { %1266 = vmatmul.msk.bf16.vlgmr.msra.gmra.mxu3 %vm285_vm5, %v1264_v13 }
 0x19f   : > { %998 = vmatpush.bf16.msrb.mxu3 %v961_v22  ;;  %v496_v56 = vpop.f32.mrf.mxu3 }
 0x1a0   : > { %v856_v7 = vpop.permute.xlu0 %855  ;;  %v484_v58 = vpop.f32.mrf.mxu2  ;;  %v516_v28 = vadd.f32 %v496_v56, %v1619_v17 }
 0x1a1   : > { %v860_v34 = vsel %vm857_vm12, %v854_v20, %v856_v7  ;;  %v940_v33 = vpop.permute.xlu1 %939  ;;  %v512_v60 = vpop.f32.mrf.mxu0 }
 0x1a2   : > { %v871_v37 = vsel %vm289_vm4, %v860_v34, 0  ;;  %v948_v39 = vsel %vm947_vm13, %v940_v33, %v942_v24  ;;  %v518_v34 = vadd.f32 %v484_v58, %v370_v31 }
 0x1a3   : > { %v955_v40 = vsel %vm289_vm4, %v948_v39, 0  ;;  %908 = vmatpush.bf16.msrb.mxu0 %v871_v37 }
 0x1a4   : > { %970 = vmatpush.bf16.msrb.mxu1 %v955_v40 }
 0x1a6   : > { %1267 = vmatmul.msk.bf16.vlgmr.msrb.gmra.mxu0 %vm285_vm5, %v1264_v13 }
 0x1a7   : > { %1274 = vmatmul.msk.bf16.vlgmr.msrb.gmra.mxu1 %vm285_vm5, %v1273_v41  ;;  %1275 = vmatmul.msk.bf16.vlgmr.msrb.gmra.mxu2 %vm285_vm5, %v1273_v41  ;;  %v498_v59 = vpop.f32.mrf.mxu3 }
 0x1a8   : > { %v1049_v43 = vpop.permute.xlu0 %1048  ;;  %v602_v63 = vpop.f32.mrf.mxu2  ;;  %v519_v42 = vadd.f32 %v498_v59, %v1634_v8 }
 0x1a9   : > { %v1051_v44 = vpop.permute.xlu1 %1050  ;;  %v622_v9 = vadd.f32 %v602_v63, %v516_v28 }
 0x1aa   : > { %v1055_v45 = vsel %vm1052_vm14, %v1049_v43, %v1051_v44  ;;  %v588_v57 = vpop.f32.mrf.mxu1 }
 0x1ab   : > { %v1066_v46 = vsel %vm289_vm4, %v1055_v45, 0  ;;  %v621_v7 = vadd.f32 %v588_v57, %v515_v25 }
 0x1ac   : > { %1103 = vmatpush.bf16.msra.mxu2 %v1066_v46 }
 0x1ae   : > { %1276 = vmatmul.msk.bf16.vlgmr.msrb.gmra.mxu3 %vm285_vm5, %v1273_v41 }
 0x1af   : > { %v616_v1 = vpop.f32.mrf.mxu3 }
 0x1b0   : > { %v1047_v50 = vpop.permute.xlu0 %1046  ;;  %v604_v4 = vpop.f32.mrf.mxu2 }
 0x1b1   : > { %v1053_v51 = vsel %vm1052_vm14, %v1045_v49, %v1047_v50  ;;  %v1054_v35 = vsel %vm1052_vm14, %v1047_v50, %v1049_v43  ;;  %v623_v43 = vadd.f32 %v616_v1, %v517_v10  ;;  %v625_v0 = vadd.f32 %v604_v4, %v519_v42 }
 0x1b2   : > { %v1060_v36 = vsel %vm289_vm4, %v1053_v51, 0  ;;  %v1063_v52 = vsel %vm289_vm4, %v1054_v35, 0  ;;  %v590_v62 = vpop.f32.mrf.mxu1  ;;  %v673_v2 = vpop.f32.mrf.mxu0  ;;  %v520_v51 = vadd.f32 %v512_v60, %v1632_v32 }
 0x1b3   : > { %1075 = vmatpush.bf16.msra.mxu0 %v1060_v36  ;;  %1089 = vmatpush.bf16.msra.mxu1 %v1063_v52  ;;  %v706_v33 = vadd.f32 %v673_v2, %v621_v7  ;;  %v624_v44 = vadd.f32 %v590_v62, %v518_v34  ;;  %v1121_v52 = vpop.permute.xlu1 %1120 }
 0x1b6   : > { %1283 = vmatmul.msk.bf16.vlgmr.msra.gmra.mxu0 %vm285_vm5, %v1282_v53 }
 0x1b7   : > { %1284 = vmatmul.msk.bf16.vlgmr.msra.gmra.mxu1 %vm285_vm5, %v1282_v53  ;;  %1285 = vmatmul.msk.bf16.vlgmr.msra.gmra.mxu2 %vm285_vm5, %v1282_v53  ;;  %v618_v5 = vpop.f32.mrf.mxu3 }
 0x1b8   : > { %v701_v12 = vpop.f32.mrf.mxu2  ;;  %v626_v58 = vadd.f32 %v618_v5, %v520_v51 }
 0x1b9   : > { %v708_v47 = vadd.f32 %v701_v12, %v623_v43 }
 0x1ba   : > { %v687_v3 = vpop.f32.mrf.mxu1  ;;  %v675_v6 = vpop.f32.mrf.mxu0 }
 0x1bb   : > { %v707_v40 = vadd.f32 %v687_v3, %v622_v9  ;;  %v709_v49 = vadd.f32 %v675_v6, %v624_v44 }
 0x1c0   : > { %v771_v13 = vpop.f32.mrf.mxu3  ;;  %v703_v16 = vpop.f32.mrf.mxu2 }
 0x1c1   : > { %v804_v17 = vadd.f32 %v771_v13, %v706_v33  ;;  %v711_v6 = vadd.f32 %v703_v16, %v626_v58  ;;  %v1126_v13 = vpop.permute.xlu2 %1125 }
 0x1c2   : > { %v689_v11 = vpop.f32.mrf.mxu1 }
 0x1c3   : > { %v710_v54 = vadd.f32 %v689_v11, %v625_v0 }
 0x1c8   : > { %v773_v19 = vpop.f32.mrf.mxu3 }
 0x1c9   : > { %v807_v38 = vadd.f32 %v773_v19, %v709_v49 }
 0x1e2   : > { %v799_v15 = vpop.f32.mrf.mxu1 }
 0x1e3   : > { %v785_v14 = vpop.f32.mrf.mxu0  ;;  %v806_v55 = vadd.f32 %v799_v15, %v708_v47 }
 0x1e4   : > { %v805_v45 = vadd.f32 %v785_v14, %v707_v40 }
 0x1ea   : > { %v1666_v22 = vpop.f32.mrf.mxu1 }
 0x1eb   : > { %v787_v21 = vpop.f32.mrf.mxu0  ;;  %v809_v19 = vadd.f32 %v1666_v22, %v711_v6 }
 0x1ec   : > { %v808_v59 = vadd.f32 %v787_v21, %v710_v54 }
 0x21a   : > { %v882_v20 = vpop.f32.mrf.mxu2 }
 0x21b   : > { %v915_v46 = vadd.f32 %v882_v20, %v804_v17 }
 0x221   : > { %v896_v24 = vpop.f32.mrf.mxu3 }
 0x222   : > { %v884_v26 = vpop.f32.mrf.mxu2  ;;  %v916_v48 = vadd.f32 %v896_v24, %v805_v45 }
 0x223   : > { %v910_v29 = vpop.f32.mrf.mxu0  ;;  %v918_v1 = vadd.f32 %v884_v26, %v807_v38 }
 0x224   : > { %v972_v30 = vpop.f32.mrf.mxu1  ;;  %v917_v62 = vadd.f32 %v910_v29, %v806_v55 }
 0x225   : > { %v1005_v18 = vadd.f32 %v972_v30, %v915_v46 }
 0x229   : > { %v898_v37 = vpop.f32.mrf.mxu3 }
 0x22a   : > { %v986_v39 = vpop.f32.mrf.mxu2  ;;  %v919_v32 = vadd.f32 %v898_v37, %v808_v59 }
 0x22b   : > { %v912_v41 = vpop.f32.mrf.mxu0  ;;  %v1006_v35 = vadd.f32 %v986_v39, %v916_v48 }
 0x22c   : > { %v974_v61 = vpop.f32.mrf.mxu1  ;;  %v920_v25 = vadd.f32 %v912_v41, %v809_v19 }
 0x22d   : > { %v1008_v3 = vadd.f32 %v974_v61, %v918_v1 }
 0x231   : > { %v1000_v53 = vpop.f32.mrf.mxu3 }
 0x232   : > { %v988_v50 = vpop.f32.mrf.mxu2  ;;  %v1007_v60 = vadd.f32 %v1000_v53, %v917_v62 }
 0x233   : > { %v1077_v36 = vpop.f32.mrf.mxu0  ;;  %v1009_v11 = vadd.f32 %v988_v50, %v919_v32 }
 0x234   : > { %v1110_v27 = vadd.f32 %v1077_v36, %v1005_v18  ;;  %v1091_v8 = vpop.f32.mrf.mxu1 }
 0x235   : > { %v1111_v56 = vadd.f32 %v1091_v8, %v1006_v35 }
 0x236   : > { %v1128_v57 = vadd.f32 %v1121_v52, %v1110_v27 }
 0x237   : > { %v1129_v63 = vadd.f32 %v1121_v52, %v1111_v56 }
 0x239   : > { %v1134_v2 = vpack.c.bf16 %v1129_v63, %v1128_v57  ;;  %v1002_v23 = vpop.f32.mrf.mxu3 }
 0x23a   : > { %v1105_v4 = vpop.f32.mrf.mxu2  ;;  %v1010_v28 = vadd.f32 %v1002_v23, %v920_v25 }
 0x23b   : > { %1138 = vst [vmem:[%s1678_s13] sm:$0xff] %v1134_v2  ;;  %v1112_v5 = vadd.f32 %v1105_v4, %v1007_v60  ;;  %v1079_v12 = vpop.f32.mrf.mxu0 }
 0x23c   : > { %v1113_v14 = vadd.f32 %v1079_v12, %v1008_v3  ;;  %v1093_v15 = vpop.f32.mrf.mxu1 }
 0x23d   : > { %v1130_v20 = vadd.f32 %v1121_v52, %v1112_v5  ;;  %v1114_v21 = vadd.f32 %v1093_v15, %v1009_v11 }
 0x23e   : > { %v1131_v24 = vadd.f32 %v1126_v13, %v1113_v14 }
 0x23f   : > { %v1135_v26 = vpack.c.bf16 %v1130_v20, %v1130_v20  ;;  %v1132_v16 = vadd.f32 %v1126_v13, %v1114_v21 }
 0x241   : > { %1140 = vst.msk [vmem:[%s1678_s13 + $0x8] sm:$0xf] %vm1139_vm15, %v1135_v26  ;;  %v1136_v29 = vpack.c.bf16 %v1132_v16, %v1131_v24 }
 0x242   : > { %v1107_v30 = vpop.f32.mrf.mxu2 }
 0x243   : > { %1141 = vst [vmem:[%s1678_s13 + $0xc] sm:$0x33] %v1136_v29  ;;  %v1115_v31 = vadd.f32 %v1107_v30, %v1010_v28 }
 0x245   : > { %v1133_v7 = vadd.f32 %v1126_v13, %v1115_v31 }
 0x247   : > { %v1137_v9 = vpack.c.bf16 %v1133_v7, %v1133_v7 }
 0x249   : > { %1143 = vst.msk [vmem:[%s1678_s13 + $0x14] sm:$0x3] %vm1142_vm0, %v1137_v9 }
 0x24a PF: > { %s15_s18 = sadd.s32 1, %s1355_s18  }
 0x24b   : > { %p12_p4 = scmp.ge.s32.totalorder %s15_s18, 4  }
 0x24d   :  { %14 = sbr.rel (!%p12_p4) target bundleno = 1 (0x1), region = 78 }

// kernel: dwt_upsampler_forward.13
= control target key start
LH: loop header
LB: loop body
LE: loop exit
PB: predicated region body
PF: predicated region fallthrough
CT: control target
= control target key end

     0   :  { %s1538_s18 = smov 0   ;;  %s2022_s0 = inlined_call_operand.vmem [shape: bf16[2,24,401], index: 0, kind: input, shape index: {}]   ;;  %s2023_s1 = inlined_call_operand.vmem [shape: bf16[9,8,24], index: 1, kind: input, shape index: {}]   ;;  %s2024_s2 = inlined_call_operand.vmem [shape: f32[8,1], index: 2, kind: input, shape index: {}]   ;;  %s2025_s3 = inlined_call_operand.vmem [shape: bf16[1,361], index: 3, kind: input, shape index: {}]   ;;  %s2026_s4 = inlined_call_operand.vmem [shape: bf16[1,361], index: 4, kind: input, shape index: {}]   ;;  %s2027_s5 = inlined_call_operand.vmem [shape: bf16[2,8,361], index: 5, kind: output, shape index: {}]  }
   0x1 LB: > { %s1341_s19 = sadd.s32 4294967295, %s1492_s18   ;;  %p1345_p0 = scmp.ge.s32.totalorder %s1492_s18, 1  ;;  %s1492_s18 = sphi %s1538_s18, %s15_s18  }
   0x2   : > { %p187_p1 = scmp.lt.s32.totalorder %s1492_s18, 3 }
   0x4   : > { %p188_p2 = pnand %p1345_p0, %p187_p1 }
   0x5   : > { %p215_p3 = scmp.lt.s32.totalorder (!%p188_p2), %s1341_s19, 1  ;;  %s1494_s28 = smov (!%p188_p2), 127  }
   0x6   : > { %191 = sbr.rel (%p188_p2) target bundleno = 561 (0x231), region = 40  ;;  %s1495_s29 = smov (!%p188_p2), 19  }
   0x7   : > { %s1496_s30 = smov (!%p188_p2), 2   ;;  %s1497_s6 = smov (!%p188_p2), 38  }
   0x8   : > { %s1498_s7 = smov (!%p188_p2), 21   ;;  %s1499_s8 = smov (!%p188_p2), 108  }
   0x9   : > { %s1500_s9 = smov (!%p188_p2), 40   ;;  %s1501_s10 = smov (!%p188_p2), 109  }
   0xa   : > { %s1502_s11 = smov (!%p188_p2), 126   ;;  %s1503_s12 = smov (!%p188_p2), 90  }
   0xb   : > { %v226_v0 = vld [vmem:[%s2025_s3] sm:$0x7]  ;;  %s2029_s19 = smov (!%p215_p3, %s1341_s19), 1  ;;  %vm591_vm0 = vcmask 154624   ;;  %vm317_vm1 = vcmask 1039360   ;;  %vm329_vm2 = vcmask 1043456  }
   0xc   : > { %235 = vst [vmem:[#allocation1] ss:$9 sm:$0xff] %v226_v0  ;;  %s1435_s22 = smul.u32 48, %s2029_s19  ;;  %v227_v1 = vld [vmem:[%s2026_s4] sm:$0x7]  ;;  %vm464_vm3 = vcmask 15360  }
   0xd   : > { %vm924_vm4 = vcmask 310272   ;;  %vm797_vm5 = vcmask 171008   ;;  %s1504_s13 = smov 107   ;;  %s1505_s14 = smov 89   ;;  %vm1155_vm6 = vcmask 326656   ;;  %vm325_vm7 = vcmask 195584  }
   0xe   : > { %s1555_s25 = scalar_lea.vmem %s2022_s0, %s1435_s22  ;;  %s1506_s17 = smov 88   ;;  %vm632_vm8 = vcmask 891904   ;;  %vm729_vm9 = vcmask 883712   ;;  %vm505_vm10 = vcmask 1031168   ;;  %vm838_vm11 = vcmask 875520  }
   0xf   : > { %v1561_v2 = vld [vmem:[%s1555_s25 + $0x20] sm:$0xff]  ;;  %v1359_v21 = vld [vmem:[%s1555_s25 + $0x8] sm:$0xf]  ;;  %v1427_v22 = vld [vmem:[%s1555_s25 + $0x14] sm:$0xf0]  ;;  %vm977_vm12 = vcmask 736256  }
  0x10   : > { %v296_v5 = vunpack.c.l.b16 %v1561_v2  ;;  %v1577_v23 = vld [vmem:[%s1555_s25 + $0x28] sm:$0xf]  ;;  %v1360_v25 = vor.u32 %v1427_v22, %v1359_v21  ;;  %v297_v35 = vunpack.c.h.b16 %v1561_v2  ;;  %v1351_v39 = vld [vmem:[%s1555_s25] sm:$0xf]  ;;  %v1426_v40 = vld [vmem:[%s1555_s25 + $0xc] sm:$0xf0]  ;;  %v1622_v57 = vunpack.c.l.bf16 %v1561_v2 }
  0x11   : > { %v298_v28 = vunpack.c.l.b16 %v1577_v23  ;;  %v1352_v41 = vor.u32 %v1426_v40, %v1351_v39  ;;  %v1425_v42 = vld [vmem:[%s1555_s25 + $0x4] sm:$0xf]  ;;  %v1353_v43 = vld [vmem:[%s1555_s25 + $0x10] sm:$0xf0]  ;;  %v1602_v45 = vld [vmem:[%s1555_s25 + $0x28] sm:$0xf] }
  0x12   : > { %v1564_v9 = vpack.c.b16 %v296_v5, %v296_v5  ;;  %309 = vrot.lane.b32.xlu2 %v1360_v25, %s1494_s28  ;;  %v1591_v37 = vpack.c.b16 %v297_v35, %v297_v35  ;;  %v1356_v44 = vor.u32 %v1425_v42, %v1353_v43  ;;  %v710_v46 = vunpack.c.l.b16 %v1602_v45  ;;  %v1386_v48 = vld [vmem:[%s1555_s25 + $0x8] sm:$0xf]  ;;  %v1430_v49 = vld [vmem:[%s1555_s25 + $0x14] sm:$0xf0]  ;;  %v567_v52 = vld [vmem:[%s1555_s25] sm:$0xff] }
  0x13   : > { %v236_v3 = vld [vmem:[#allocation1] sm:$0xff]  ;;  %v237_v4 = vld [vmem:[#allocation1 + $0x9] sm:$0xff]  ;;  %v238_v6 = vld [vmem:[#allocation1 + $0x12] sm:$0xff]  ;;  %v304_v34 = vpack.c.b16 %v298_v28, %v298_v28  ;;  %v1387_v51 = vor.u32 %v1430_v49, %v1386_v48  ;;  %v1617_v55 = vunpack.c.l.bf16 %v567_v52  ;;  %v1634_v5 = vunpack.c.h.bf16 %v1561_v2 }
  0x14   : > { %v239_v7 = vpack.i.b16 %v236_v3, %v236_v3  ;;  %v242_v8 = vpack.i.b16 %v237_v4, %v237_v4  ;;  %430 = vst [vmem:[#allocation1] ss:$9 sm:$0xff] %v227_v1  ;;  %311 = vrot.lane.b32.xlu0 %v1564_v9, %s1494_s28  ;;  %v245_v12 = vpack.i.b16 %v238_v6, %v238_v6  ;;  %v569_v53 = vld [vmem:[%s1555_s25 + $0x10] sm:$0xff]  ;;  %v1628_v0 = vld [vmem:[%s1555_s25 + $0x8] sm:$0xf]  ;;  %vm1085_vm13 = vcmask 728064  }
  0x15   : > { %v716_v47 = vpack.c.b16 %v710_v46, %v710_v46  ;;  %v1619_v56 = vunpack.c.l.bf16 %v569_v53  ;;  %v1631_v1 = vld [vmem:[%s1555_s25 + $0x18] sm:$0xf]  ;;  %v575_v6 = vunpack.c.l.bf16 %v1628_v0  ;;  %v1653_v25 = vunpack.c.h.bf16 %v569_v53 }
  0x16   : > { %v241_v10 = vperm.slane %v239_v7, 0  ;;  %v244_v11 = vperm.slane %v242_v8, 0  ;;  %v247_v16 = vperm.slane %v245_v12, 0  ;;  %v578_v7 = vunpack.c.l.bf16 %v1631_v1 }
  0x17   : > { %v581_v8 = vunpack.c.l.bf16 %v1602_v45  ;;  %vm1208_vm14 = vcmask 719872   ;;  %vm1284_vm15 = vcmask 855040  }
  0x18   : > { %v1568_v13 = vunpack.c.l.bf16 %v241_v10  ;;  %v1570_v14 = vunpack.c.l.bf16 %v244_v11  ;;  %v1583_v29 = vunpack.c.l.bf16 %v247_v16 }
  0x1a   : > { %v1459_v15 = vpack.i.bf16 %v1570_v14, %v1568_v13  ;;  %315 = vrot.lane.b32.xlu2 %v304_v34, %s1494_s28  ;;  %v1380_v34 = vld [vmem:[%s1555_s25 + $0x10] sm:$0xf0] }
  0x1b   : > { %v431_v17 = vld [vmem:[#allocation1] sm:$0xff]  ;;  %v432_v18 = vld [vmem:[#allocation1 + $0x9] sm:$0xff]  ;;  %v433_v24 = vld [vmem:[#allocation1 + $0x12] sm:$0xff] }
  0x1c   : > { %1460 = vrot.lane.b32.xlu1 %v1459_v15, %s1495_s29  ;;  %v434_v19 = vpack.i.b16 %v431_v17, %v431_v17  ;;  %v437_v20 = vpack.i.b16 %v432_v18, %v432_v18  ;;  %v440_v32 = vpack.i.b16 %v433_v24, %v433_v24  ;;  %v1651_v24 = vunpack.c.h.bf16 %v567_v52 }
  0x1e   : > { %v1579_v26 = vperm.slane %v434_v19, 0  ;;  %v439_v27 = vperm.slane %v437_v20, 0  ;;  %v442_v36 = vperm.slane %v440_v32, 0 }
  0x20   : > { %v452_v30 = vunpack.c.l.bf16 %v1579_v26  ;;  %v453_v31 = vunpack.c.l.bf16 %v439_v27  ;;  %v454_v38 = vunpack.c.l.bf16 %v442_v36 }
  0x22   : > { %v1464_v33 = vpack.i.bf16 %v453_v31, %v452_v30  ;;  %305 = vrot.lane.b32.xlu2 %v1352_v41, %s1494_s28  ;;  %v1479_v50 = vpack.i.bf16 %v454_v38, %v453_v31 }
  0x24   : > { %589 = vrot.lane.b32.xlu1 %v1583_v29, %s1495_s29  ;;  %1465 = vrot.lane.b32.xlu0 %v1464_v33, %s1496_s30 }
  0x2a   : > { %922 = vrot.lane.b32.xlu2 %v1583_v29, %s1497_s6 }
  0x2c   : > { %313 = vrot.lane.b32.xlu1 %v1591_v37, %s1494_s28  ;;  %462 = vrot.lane.b32.xlu0 %v454_v38, %s1496_s30 }
  0x32   : > { %727 = vrot.lane.b32.xlu2 %v716_v47, %s1499_s8 }
  0x34   : > { %1475 = vrot.lane.b32.xlu1 %v1459_v15, %s1497_s6  ;;  %307 = vrot.lane.b32.xlu0 %v1356_v44, %s1494_s28 }
  0x3a   : > { %723 = vrot.lane.b32.xlu2 %v1564_v9, %s1499_s8 }
  0x3c   : > { %1470 = vrot.lane.b32.xlu0 %v1464_v33, %s1498_s7  ;;  %795 = vrot.lane.b32.xlu1 %v454_v38, %s1498_s7  ;;  %v1428_v33 = vld [vmem:[%s1555_s25 + $0x4] sm:$0xf] }
  0x3d   : > { %v1383_v43 = vor.u32 %v1428_v33, %v1380_v34 }
  0x44   : > { %1480 = vrot.lane.b32.xlu0 %v1479_v50, %s1500_s9  ;;  %721 = vrot.lane.b32.xlu1 %v1387_v51, %s1499_s8 }
  0x4c   : > { %725 = vrot.lane.b32.xlu0 %v1591_v37, %s1499_s8 }
  0x6c   : > { %v1667_v42 = vpop.permute.xlu2 %309 }
  0x86   : > { %v312_v54 = vpop.permute.xlu0 %311 }
  0x8e   : > { %v1461_v58 = vpop.permute.xlu1 %1460 }
  0x8f   : > { %v1462_v59 = vunpack.i.l.bf16 %v1461_v58  ;;  %v1463_v60 = vunpack.i.h.bf16 %v1461_v58 }
  0x91   : > { %v597_v61 = vmul.f32 %v1462_v59, %v1617_v55  ;;  %v600_v62 = vmul.f32 %v1462_v59, %v1619_v56  ;;  %v603_v63 = vmul.f32 %v1462_v59, %v1622_v57  ;;  %v592_v10 = vsel %vm591_vm0, %v1462_v59, %v1463_v60 }
  0x92   : > { %v604_v16 = vmul.f32 %v592_v10, %v1634_v5  ;;  %v598_v38 = vmul.f32 %v592_v10, %v1651_v24  ;;  %v601_v39 = vmul.f32 %v592_v10, %v1653_v25 }
  0x93   : > { %v606_v3 = vpack.c.bf16 %v600_v62, %v597_v61  ;;  %v609_v4 = vpack.c.bf16 %v603_v63, %v603_v63  ;;  %v1378_v61 = vld [vmem:[%s1555_s25] sm:$0xf]  ;;  %v1429_v62 = vld [vmem:[%s1555_s25 + $0xc] sm:$0xf0] }
  0x94   : > { %v610_v22 = vpack.c.bf16 %v604_v16, %v604_v16  ;;  %v607_v46 = vpack.c.bf16 %v601_v39, %v598_v38 }
  0x95   : > { %620 = vrot.lane.b32.xlu1 %v606_v3, %s1501_s10  ;;  %626 = vrot.lane.b32.xlu0 %v609_v4, %s1501_s10 }
  0x96   : > { %v590_v11 = vpop.permute.xlu1 %589  ;;  %v1641_v12 = vpop.permute.xlu0 %1465 }
  0x97   : > { %v593_v15 = vsel %vm591_vm0, %v1463_v60, %v590_v11  ;;  %v1467_v19 = vunpack.i.l.bf16 %v1641_v12  ;;  %v1468_v31 = vunpack.i.h.bf16 %v1641_v12  ;;  %v1682_v60 = vpop.permute.xlu2 %315  ;;  %v277_v11 = vld [vmem:[%s1555_s25 + $0x8] sm:$0xf]  ;;  %v279_v12 = vld [vmem:[%s1555_s25 + $0x18] sm:$0xf] }
  0x98   : > { %v599_v2 = vmul.f32 %v593_v15, %v575_v6  ;;  %v602_v17 = vmul.f32 %v593_v15, %v578_v7  ;;  %v605_v18 = vmul.f32 %v593_v15, %v581_v8  ;;  %v1379_v15 = vor.u32 %v1429_v62, %v1378_v61 }
  0x99   : > { %v470_v27 = vmul.f32 %v1467_v19, %v1617_v55  ;;  %v473_v28 = vmul.f32 %v1467_v19, %v1619_v56  ;;  %v465_v44 = vsel %vm464_vm3, %v1467_v19, %v1468_v31  ;;  %v476_v48 = vmul.f32 %v1467_v19, %v1622_v57 }
  0x9a   : > { %v608_v20 = vpack.c.bf16 %v602_v17, %v599_v2  ;;  %v611_v21 = vpack.c.bf16 %v605_v18, %v605_v18  ;;  %v477_v47 = vmul.f32 %v1634_v5, %v465_v44  ;;  %v471_v49 = vmul.f32 %v1651_v24, %v465_v44 }
  0x9b   : > { %v479_v41 = vpack.c.bf16 %v473_v28, %v470_v27  ;;  %v474_v50 = vmul.f32 %v1653_v25, %v465_v44  ;;  %v451_v17 = vunpack.c.l.bf16 %v1577_v23  ;;  %v445_v18 = vunpack.c.l.bf16 %v277_v11 }
  0x9c   : > { %624 = vrot.lane.b32.xlu2 %v608_v20, %s1501_s10  ;;  %v483_v53 = vpack.c.bf16 %v477_v47, %v477_v47  ;;  %v448_v19 = vunpack.c.l.bf16 %v279_v12  ;;  %v337_v11 = vsel %vm329_vm2, %v1682_v60, 0 }
  0x9d   : > { %630 = vrot.lane.b32.xlu1 %v611_v21, %s1501_s10  ;;  %628 = vrot.lane.b32.xlu0 %v610_v22, %s1501_s10  ;;  %v480_v58 = vpack.c.bf16 %v474_v50, %v471_v49 }
  0x9e   : > { %v314_v32 = vpop.permute.xlu1 %313  ;;  %v463_v35 = vpop.permute.xlu0 %462  ;;  %371 = vmatpush.bf16.msra.mxu2 %v337_v11  ;;  %v266_v11 = vmul.f32 %v1622_v57, %v1568_v13 }
  0x9f   : > { %v320_v36 = vsel %vm317_vm1, %v312_v54, %v314_v32  ;;  %v482_v54 = vpack.c.bf16 %v476_v48, %v476_v48  ;;  %v321_v3 = vsel %vm317_vm1, %v314_v32, %v1682_v60  ;;  %v466_v20 = vsel %vm464_vm3, %v1468_v31, %v463_v35  ;;  %v306_v21 = vpop.permute.xlu2 %305 }
  0xa0   : > { %v331_v40 = vsel %vm329_vm2, %v320_v36, 0  ;;  %v334_v10 = vsel %vm329_vm2, %v321_v3, 0  ;;  %v478_v28 = vmul.f32 %v466_v20, %v451_v17  ;;  %v472_v32 = vmul.f32 %v466_v20, %v445_v18  ;;  %v1763_v17 = vld [vmem:[%s1555_s25 + $0x8] sm:$0xff]  ;;  %v1766_v18 = vld [vmem:[%s1555_s25 + $0x18] sm:$0xff] }
  0xa1   : > { %345 = vmatpush.bf16.msra.mxu0 %v331_v40  ;;  %358 = vmatpush.bf16.msra.mxu1 %v334_v10  ;;  %v475_v33 = vmul.f32 %v466_v20, %v448_v19  ;;  %v1410_v19 = vld [vmem:[%s1555_s25 + $0x8] sm:$0xf]  ;;  %v1434_v20 = vld [vmem:[%s1555_s25 + $0x14] sm:$0xf0] }
  0xa2   : > { %v484_v34 = vpack.c.bf16 %v478_v28, %v478_v28  ;;  %372 = vmatpush.bf16.msra.mxu2 %v1667_v42 }
  0xa3   : > { %v481_v35 = vpack.c.bf16 %v475_v33, %v472_v32  ;;  %v909_v32 = vunpack.c.h.bf16 %v1763_v17  ;;  %v913_v33 = vunpack.c.h.bf16 %v1766_v18 }
  0xa4   : > { %493 = vrot.lane.b32.xlu2 %v479_v41, %s1502_s11 }
  0xa5   : > { %622 = vrot.lane.b32.xlu1 %v607_v46, %s1501_s10  ;;  %719 = vrot.lane.b32.xlu0 %v1383_v43, %s1499_s8 }
  0xa6   : > { %v1677_v51 = vpop.permute.xlu1 %1475  ;;  %v308_v52 = vpop.permute.xlu0 %307 }
  0xa7   : > { %v1680_v59 = vunpack.i.l.bf16 %v1677_v51  ;;  %v318_v27 = vsel %vm317_vm1, %v306_v21, %v308_v52  ;;  %v319_v23 = vsel %vm317_vm1, %v308_v52, %v1667_v42  ;;  %v1478_v31 = vunpack.i.h.bf16 %v1677_v51  ;;  %v1404_v52 = vld [vmem:[%s1555_s25 + $0x10] sm:$0xf0] }
  0xa8   : > { %346 = vmatpush.bf16.msra.mxu0 %v318_v27  ;;  %359 = vmatpush.bf16.msra.mxu1 %v319_v23  ;;  %v908_v42 = vunpack.c.l.bf16 %v1763_v17  ;;  %v1411_v27 = vor.u32 %v1434_v20, %v1410_v19  ;;  %v264_v19 = vmul.f32 %v1653_v25, %v1570_v14 }
  0xa9   : > { %v939_v63 = vmul.f32 %v1680_v59, %v1622_v57  ;;  %v931_v0 = vmul.f32 %v1680_v59, %v1617_v55  ;;  %v935_v1 = vmul.f32 %v1680_v59, %v1619_v56 }
  0xab   : > { %v947_v16 = vpack.c.bf16 %v939_v63, %v939_v63  ;;  %v943_v61 = vpack.c.bf16 %v935_v1, %v931_v0  ;;  %v231_v0 = vld [vmem:[%s1555_s25 + $0x18] sm:$0xf] }
  0xac   : > { %501 = vrot.lane.b32.xlu2 %v483_v53, %s1502_s11  ;;  %v923_v53 = vpop.permute.xlu2 %922 }
  0xad   : > { %499 = vrot.lane.b32.xlu1 %v482_v54, %s1502_s11  ;;  %495 = vrot.lane.b32.xlu0 %v480_v58, %s1502_s11  ;;  %v926_v63 = vsel %vm924_vm4, %v1478_v31, %v923_v53 }
  0xae   : > { %v1693_v4 = vpop.permute.xlu0 %1470  ;;  %v796_v36 = vpop.permute.xlu1 %795  ;;  %v933_v28 = vmul.f32 %v926_v63, %v908_v42 }
  0xaf   : > { %v1472_v2 = vunpack.i.l.bf16 %v1693_v4  ;;  %v1473_v38 = vunpack.i.h.bf16 %v1693_v4 }
  0xb1   : > { %v809_v22 = vmul.f32 %v1472_v2, %v1622_v57  ;;  %v803_v39 = vmul.f32 %v1472_v2, %v1617_v55  ;;  %v806_v40 = vmul.f32 %v1472_v2, %v1619_v56  ;;  %v799_v43 = vsel %vm797_vm5, %v1473_v38, %v796_v36 }
  0xb2   : > { %v1723_v44 = vmul.f32 %v799_v43, %v575_v6  ;;  %v1727_v46 = vmul.f32 %v799_v43, %v578_v7  ;;  %v1742_v6 = vld [vmem:[%s1555_s25 + $0x28] sm:$0xff]  ;;  %v1431_v7 = vld [vmem:[%s1555_s25 + $0x4] sm:$0xf]  ;;  %v811_v60 = vmul.f32 %v799_v43, %v581_v8  ;;  %v938_v36 = vmul.f32 %v923_v53, %v913_v33 }
  0xb3   : > { %v815_v26 = vpack.c.bf16 %v809_v22, %v809_v22  ;;  %v812_v47 = vpack.c.bf16 %v806_v40, %v803_v39  ;;  %v916_v58 = vunpack.c.l.bf16 %v1742_v6  ;;  %v1407_v62 = vor.u32 %v1431_v7, %v1404_v52  ;;  %v233_v39 = vld [vmem:[%s1555_s25 + $0x28] sm:$0xf] }
  0xb4   : > { %717 = vrot.lane.b32.xlu2 %v1379_v15, %s1499_s8  ;;  %v814_v49 = vpack.c.bf16 %v1727_v46, %v1723_v44  ;;  %v1059_v3 = vunpack.c.l.b16 %v1742_v6  ;;  %v912_v22 = vunpack.c.l.bf16 %v1766_v18  ;;  %v817_v23 = vpack.c.bf16 %v811_v60, %v811_v60  ;;  %v1348_v44 = vld [vmem:[%s2023_s1 + $0x4] sm:$0xf] }
  0xb5   : > { %1149 = vrot.lane.b32.xlu1 %v452_v30, %s1500_s9  ;;  %969 = vrot.lane.b32.xlu0 %v947_v16, %s1503_s12  ;;  %v925_v30 = vsel %vm924_vm4, %v1680_v59, %v1478_v31  ;;  %v941_v59 = vmul.f32 %v926_v63, %v916_v58  ;;  %v917_v8 = vunpack.c.h.bf16 %v1742_v6  ;;  %v256_v43 = vunpack.c.l.bf16 %v233_v39 }
  0xb6   : > { %v940_v41 = vmul.f32 %v925_v30, %v1634_v5  ;;  %v932_v50 = vmul.f32 %v925_v30, %v1651_v24  ;;  %v936_v51 = vmul.f32 %v925_v30, %v1653_v25  ;;  %v1067_v15 = vpack.c.b16 %v1059_v3, %v1059_v3  ;;  %v1788_v30 = vpop.permute.xlu0 %1480  ;;  %1362 = vmatmul.msk.bf16.vlgmr.msra.gmra.mxu1 %vm325_vm7, %v1348_v44  ;;  %v1412_v3 = vld [vmem:[%s1555_s25 + $0x18] sm:$0xf0] }
  0xb7   : > { %v949_v12 = vpack.c.bf16 %v941_v59, %v941_v59  ;;  %v937_v31 = vmul.f32 %v926_v63, %v912_v22  ;;  %v1801_v40 = vunpack.i.h.bf16 %v1788_v30  ;;  %1361 = vmatmul.msk.bf16.vlgmr.msra.gmra.mxu0 %vm325_vm7, %v1348_v44  ;;  %1363 = vmatmul.msk.bf16.vlgmr.msra.gmra.mxu2 %vm325_vm7, %v1348_v44  ;;  %v253_v7 = vunpack.c.l.bf16 %v231_v0  ;;  %v1432_v59 = vld [vmem:[%s1555_s25 + $0xc] sm:$0xf] }
  0xb8   : > { %v948_v48 = vpack.c.bf16 %v940_v41, %v940_v41  ;;  %v944_v54 = vpack.c.bf16 %v936_v51, %v932_v50  ;;  %v1482_v41 = vunpack.i.l.bf16 %v1788_v30  ;;  %v229_v51 = vld [vmem:[%s1555_s25 + $0x8] sm:$0xf]  ;;  %v261_v60 = vmul.f32 %v1651_v24, %v1570_v14 }
  0xb9   : > { %v945_v45 = vpack.c.bf16 %v937_v31, %v933_v28  ;;  %v250_v1 = vunpack.c.l.bf16 %v229_v51  ;;  %v1173_v20 = vmul.f32 %v1801_v40, %v917_v8 }
  0xba   : > { %v270_v28 = vpack.c.bf16 %v264_v19, %v261_v60 }
  0xbb   : > { %v262_v63 = vmul.f32 %v1583_v29, %v250_v1 }
  0xbc   : > { %503 = vrot.lane.b32.xlu2 %v484_v34, %s1502_s11  ;;  %v942_v34 = vmul.f32 %v923_v53, %v917_v8  ;;  %v1181_v8 = vpack.c.bf16 %v1173_v20, %v1173_v20 }
  0xbd   : > { %832 = vrot.lane.b32.xlu1 %v815_v26, %s1504_s13  ;;  %497 = vrot.lane.b32.xlu0 %v481_v35, %s1502_s11  ;;  %v1786_v26 = vpop.permute.xlu2 %727  ;;  %v934_v35 = vmul.f32 %v923_v53, %v909_v32 }
  0xbe   : > { %v950_v46 = vpack.c.bf16 %v942_v34, %v942_v34  ;;  %v747_v30 = vsel %vm329_vm2, %v1786_v26, 0 }
  0xc4   : > { %826 = vrot.lane.b32.xlu2 %v812_v47, %s1504_s13  ;;  %v946_v47 = vpack.c.bf16 %v938_v36, %v934_v35  ;;  %v1868_v35 = vpop.permute.xlu1 %721  ;;  %v726_v36 = vpop.permute.xlu0 %725 }
  0xc5   : > { %971 = vrot.lane.b32.xlu1 %v948_v48, %s1503_s12  ;;  %1079 = vrot.lane.b32.xlu0 %v1591_v37, %s1505_s14  ;;  %v798_v37 = vsel %vm797_vm5, %v1472_v2, %v1473_v38  ;;  %v1060_v38 = vunpack.c.h.b16 %v1742_v6  ;;  %v1818_v52 = vpop.permute.xlu2 %723 }
  0xc6   : > { %v804_v4 = vmul.f32 %v798_v37, %v1651_v24  ;;  %v807_v10 = vmul.f32 %v798_v37, %v1653_v25  ;;  %v810_v2 = vmul.f32 %v798_v37, %v1634_v5  ;;  %v265_v37 = vmul.f32 %v1583_v29, %v253_v7 }
  0xc7   : > { %v1068_v48 = vpack.c.b16 %v1060_v38, %v1060_v38 }
  0xc8   : > { %v813_v16 = vpack.c.bf16 %v807_v10, %v804_v4  ;;  %v816_v21 = vpack.c.bf16 %v810_v2, %v810_v2  ;;  %v267_v4 = vmul.f32 %v1634_v5, %v1570_v14  ;;  %v271_v10 = vpack.c.bf16 %v265_v37, %v262_v63 }
  0xcc   : > { %963 = vrot.lane.b32.xlu2 %v944_v54, %s1503_s12 }
  0xcd   : > { %961 = vrot.lane.b32.xlu1 %v943_v61, %s1503_s12  ;;  %1071 = vrot.lane.b32.xlu0 %v1407_v62, %s1505_s14  ;;  %v1402_v61 = vld [vmem:[%s1555_s25] sm:$0xf]  ;;  %v1433_v62 = vld [vmem:[%s1555_s25 + $0xc] sm:$0xf0] }
  0xd4   : > { %973 = vrot.lane.b32.xlu2 %v949_v12, %s1503_s12  ;;  %v1403_v12 = vor.u32 %v1433_v62, %v1402_v61 }
  0xd5   : > { %1081 = vrot.lane.b32.xlu1 %v1067_v15, %s1505_s14  ;;  %828 = vrot.lane.b32.xlu0 %v813_v16, %s1504_s13  ;;  %v273_v15 = vpack.c.bf16 %v267_v4, %v267_v4  ;;  %v272_v16 = vpack.c.bf16 %v266_v11, %v266_v11 }
  0xd7   : > { %v385_v2 = vsel %vm329_vm2, %v273_v15, 0 }
  0xd8   : > { %409 = vmatpush.bf16.msrb.mxu0 %v385_v2 }
  0xdc   : > { %834 = vrot.lane.b32.xlu2 %v816_v21, %s1504_s13  ;;  %v260_v21 = vmul.f32 %v1617_v55, %v1568_v13  ;;  %410 = vmatpush.bf16.msrb.mxu0 %v270_v28 }
  0xdd   : > { %1073 = vrot.lane.b32.xlu1 %v1411_v27, %s1505_s14  ;;  %836 = vrot.lane.b32.xlu0 %v817_v23, %s1504_s13  ;;  %v263_v27 = vmul.f32 %v1619_v56, %v1568_v13  ;;  %v275_v13 = vld [vmem:[%s2023_s1] sm:$0xf] }
  0xdf   : > { %1365 = vmatmul.msk.bf16.vlgmr.msrb.gmra.mxu0 %vm325_vm7, %v275_v13 }
  0xe4   : > { %965 = vrot.lane.b32.xlu2 %v945_v45, %s1503_s12  ;;  %v269_v45 = vpack.c.bf16 %v263_v27, %v260_v21 }
  0xe5   : > { %830 = vrot.lane.b32.xlu1 %v814_v49, %s1504_s13  ;;  %1077 = vrot.lane.b32.xlu0 %v1564_v9, %s1505_s14  ;;  %v268_v9 = vmul.f32 %v1583_v29, %v256_v43  ;;  %v1157_v49 = vsel %vm1155_vm6, %v1482_v41, %v1801_v40  ;;  %v382_v29 = vsel %vm329_vm2, %v272_v16, 0  ;;  %s1436_s13 = smul.u32 12, %s2029_s19 }
  0xe6   : > { %v1172_v54 = vmul.f32 %v1157_v49, %v916_v58  ;;  %v1415_v58 = vor.u32 %v1432_v59, %v1412_v3  ;;  %396 = vmatpush.bf16.msra.mxu3 %v382_v29  ;;  %v1164_v23 = vmul.f32 %v1157_v49, %v908_v42  ;;  %v1168_v14 = vmul.f32 %v1157_v49, %v912_v22 }
  0xe7   : > { %v274_v50 = vpack.c.bf16 %v268_v9, %v268_v9  ;;  %v1165_v42 = vmul.f32 %v1801_v40, %v909_v32  ;;  %v1169_v22 = vmul.f32 %v1801_v40, %v913_v33  ;;  %v733_v9 = vsel %vm729_vm9, %v726_v36, %v1786_v26  ;;  %s224_s16 = scalar_lea.vmem %s2027_s5, %s1436_s13 }
  0xe8   : > { %v1180_v6 = vpack.c.bf16 %v1172_v54, %v1172_v54  ;;  %v1176_v34 = vpack.c.bf16 %v1168_v14, %v1164_v23 }
  0xe9   : > { %v388_v53 = vsel %vm329_vm2, %v274_v50, 0  ;;  %v1177_v39 = vpack.c.bf16 %v1169_v22, %v1165_v42 }
  0xea   : > { %422 = vmatpush.bf16.msrb.mxu1 %v388_v53  ;;  %397 = vmatpush.bf16.msra.mxu3 %v269_v45  ;;  %v1888_v53 = vld [vmem:[%s2023_s1 + $0xc] sm:$0xf] }
  0xec   : > { %975 = vrot.lane.b32.xlu2 %v950_v46, %s1503_s12 }
  0xed   : > { %967 = vrot.lane.b32.xlu1 %v946_v47, %s1503_s12  ;;  %1083 = vrot.lane.b32.xlu0 %v1068_v48, %s1505_s14  ;;  %v744_v48 = vsel %vm329_vm2, %v733_v9, 0 }
  0xee   : > { %423 = vmatpush.bf16.msrb.mxu1 %v271_v10  ;;  %1364 = vmatmul.msk.bf16.vlgmr.msra.gmra.mxu3 %vm325_vm7, %v275_v13 }
  0xf1   : > { %1366 = vmatmul.msk.bf16.vlgmr.msrb.gmra.mxu1 %vm325_vm7, %v275_v13 }
  0xf4   : > { %1069 = vrot.lane.b32.xlu2 %v1403_v12, %s1505_s14  ;;  %v1367_v12 = vld [vmem:[%s2023_s1 + $0x8] sm:$0xf] }
  0xf5   : > { %1204 = vrot.lane.b32.xlu1 %v1180_v6, %s1506_s17  ;;  %1075 = vrot.lane.b32.xlu0 %v1415_v58, %s1505_s14 }
  0xf6   : > { %v1853_v31 = vpop.permute.xlu2 %624 }
  0xfc   : > { %1206 = vrot.lane.b32.xlu2 %v1181_v8, %s1506_s17 }
  0xfd   : > { %1196 = vrot.lane.b32.xlu1 %v1176_v34, %s1506_s17 }
  0xfe   : > { %v494_v38 = vpop.permute.xlu2 %493 }
 0x104   : > { %1198 = vrot.lane.b32.xlu2 %v1177_v39, %s1506_s17 }
 0x106   : > { %v502_v43 = vpop.permute.xlu2 %501 }
 0x107   : > { %v621_v44 = vpop.permute.xlu1 %620  ;;  %v627_v46 = vpop.permute.xlu0 %626 }
 0x10e   : > { %v1872_v17 = vpop.permute.xlu2 %717 }
 0x10f   : > { %v1874_v32 = vpop.permute.xlu1 %630  ;;  %v629_v18 = vpop.permute.xlu0 %628 }
 0x110   : > { %v635_v33 = vsel %vm632_vm8, %v627_v46, %v629_v18  ;;  %v636_v3 = vsel %vm632_vm8, %v629_v18, %v1874_v32  ;;  %v650_v28 = vsel %vm329_vm2, %v1874_v32, 0 }
 0x111   : > { %v644_v40 = vsel %vm329_vm2, %v635_v33, 0  ;;  %v647_v10 = vsel %vm329_vm2, %v636_v3, 0 }
 0x112   : > { %658 = vmatpush.bf16.msra.mxu1 %v644_v40 }
 0x116   : > { %v504_v47 = vpop.permute.xlu2 %503 }
 0x117   : > { %v523_v49 = vsel %vm329_vm2, %v504_v47, 0  ;;  %v623_v50 = vpop.permute.xlu1 %622  ;;  %v720_v51 = vpop.permute.xlu0 %719  ;;  %v509_v0 = vsel %vm505_vm10, %v502_v43, %v504_v47 }
 0x118   : > { %557 = vmatpush.bf16.msra.mxu0 %v523_v49  ;;  %v520_v1 = vsel %vm329_vm2, %v509_v0, 0  ;;  %v633_v7 = vsel %vm632_vm8, %v621_v44, %v623_v50  ;;  %v731_v54 = vsel %vm729_vm9, %v720_v51, %v1868_v35  ;;  %v634_v19 = vsel %vm632_vm8, %v623_v50, %v1853_v31 }
 0x119   : > { %544 = vmatpush.bf16.msrb.mxu3 %v520_v1  ;;  %659 = vmatpush.bf16.msra.mxu1 %v633_v7  ;;  %v1391_v1 = vld [vmem:[%s2023_s1 + $0x14] sm:$0xf] }
 0x11c   : > { %1372 = vmatmul.msk.bf16.vlgmr.msra.gmra.mxu1 %vm325_vm7, %v1888_v53 }
 0x11d   : > { %768 = vmatpush.bf16.msrb.mxu1 %v744_v48 }
 0x11e   : > { %v1894_v61 = vpop.permute.xlu2 %826 }
 0x11f   : > { %v500_v62 = vpop.permute.xlu1 %499  ;;  %v496_v63 = vpop.permute.xlu0 %495 }
 0x120   : > { %v508_v37 = vsel %vm505_vm10, %v500_v62, %v502_v43  ;;  %v506_v4 = vsel %vm505_vm10, %v494_v38, %v496_v63 }
 0x121   : > { %769 = vmatpush.bf16.msrb.mxu1 %v731_v54  ;;  %v517_v59 = vsel %vm329_vm2, %v508_v37, 0 }
 0x122   : > { %531 = vmatpush.bf16.msrb.mxu2 %v517_v59 }
 0x126   : > { %532 = vmatpush.bf16.msrb.mxu2 %v506_v4  ;;  %v1902_v11 = vpop.permute.xlu2 %963 }
 0x127   : > { %v1150_v15 = vpop.permute.xlu1 %1149  ;;  %v970_v6 = vpop.permute.xlu0 %969 }
 0x128   : > { %v1156_v58 = vsel %vm1155_vm6, %v1150_v15, %v1482_v41  ;;  %v1162_v16 = vmul.f32 %v1150_v15, %v1617_v55  ;;  %v1166_v2 = vmul.f32 %v1150_v15, %v1619_v56  ;;  %v1170_v29 = vmul.f32 %v1150_v15, %v1622_v57  ;;  %v1375_v56 = vld [vmem:[%s2023_s1 + $0x10] sm:$0xf] }
 0x129   : > { %1368 = vmatmul.msk.bf16.vlgmr.msrb.gmra.mxu2 %vm325_vm7, %v1367_v12  ;;  %v1171_v60 = vmul.f32 %v1156_v58, %v1634_v5  ;;  %v732_v55 = vsel %vm729_vm9, %v1818_v52, %v726_v36  ;;  %v1163_v5 = vmul.f32 %v1156_v58, %v1651_v24  ;;  %v1167_v26 = vmul.f32 %v1156_v58, %v1653_v25 }
 0x12a   : > { %671 = vmatpush.bf16.msra.mxu2 %v647_v10  ;;  %v1178_v20 = vpack.c.bf16 %v1170_v29, %v1170_v29  ;;  %v1174_v21 = vpack.c.bf16 %v1166_v2, %v1162_v16  ;;  %v741_v41 = vsel %vm329_vm2, %v732_v55, 0  ;;  %v730_v25 = vsel %vm729_vm9, %v1872_v17, %v720_v51  ;;  %v1399_v16 = vld [vmem:[%s2023_s1 + $0x1c] sm:$0xf]  ;;  %v1272_v2 = vld [vmem:[%s2024_s2] sm:$0xff] }
 0x12b   : > { %v1179_v27 = vpack.c.bf16 %v1171_v60, %v1171_v60  ;;  %v1175_v24 = vpack.c.bf16 %v1167_v26, %v1163_v5 }
 0x12c   : > { %1200 = vrot.lane.b32.xlu0 %v1178_v20, %s1506_s17  ;;  %1192 = vrot.lane.b32.xlu2 %v1174_v21, %s1506_s17  ;;  %v1507_v21 = vmov 0  }
 0x12d   : > { %1202 = vrot.lane.b32.xlu1 %v1179_v27, %s1506_s17  ;;  %1389 = vmatmul.msk.bf16.vlgmr.msrb.gmra.mxu1 %vm325_vm7, %v1375_v56 }
 0x12e   : > { %672 = vmatpush.bf16.msra.mxu2 %v634_v19  ;;  %v1927_v57 = vpop.permute.xlu2 %973  ;;  %1484 = vset.pattern.permute.xlu1 %v1507_v21 }
 0x12f   : > { %v833_v52 = vpop.permute.xlu1 %832  ;;  %v498_v23 = vpop.permute.xlu0 %497  ;;  %1485 = vset.pattern.permute.xlu0 %v1507_v21 }
 0x130   : > { %558 = vmatpush.bf16.msra.mxu0 %v498_v23  ;;  %v507_v14 = vsel %vm505_vm10, %v496_v63, %v498_v23 }
 0x131   : > { %545 = vmatpush.bf16.msrb.mxu3 %v507_v14  ;;  %v1419_v14 = vld [vmem:[%s2023_s1 + $0x20] sm:$0xf] }
 0x132   : > { %781 = vmatpush.bf16.msrb.mxu2 %v747_v30 }
 0x133   : > { %1370 = vmatmul.msk.bf16.vlgmr.msra.gmra.mxu0 %vm325_vm7, %v1367_v12  ;;  %v361_v29 = vpop.f32.mrf.mxu1 }
 0x134   : > { %755 = vmatpush.bf16.msrb.mxu0 %v741_v41  ;;  %1194 = vrot.lane.b32.xlu0 %v1175_v24, %s1506_s17  ;;  %v348_v60 = vpop.f32.mrf.mxu0 }
 0x135   : > { %684 = vmatpush.bf16.msra.mxu3 %v650_v28  ;;  %1275 = vperm.xlu1 %1484, %v1272_v2  }
 0x136   : > { %782 = vmatpush.bf16.msrb.mxu2 %v1868_v35  ;;  %1369 = vmatmul.msk.bf16.vlgmr.msrb.gmra.mxu3 %vm325_vm7, %v1367_v12  ;;  %v835_v45 = vpop.permute.xlu2 %834 }
 0x137   : > { %v841_v8 = vsel %vm838_vm11, %v833_v52, %v835_v45  ;;  %v972_v34 = vpop.permute.xlu1 %971  ;;  %v1080_v13 = vpop.permute.xlu0 %1079 }
 0x138   : > { %756 = vmatpush.bf16.msrb.mxu0 %v730_v25  ;;  %v850_v42 = vsel %vm329_vm2, %v841_v8, 0  ;;  %v981_v22 = vsel %vm977_vm12, %v970_v6, %v972_v34  ;;  %v982_v39 = vsel %vm977_vm12, %v972_v34, %v1927_v57 }
 0x139   : > { %685 = vmatpush.bf16.msra.mxu3 %v1853_v31  ;;  %v991_v35 = vsel %vm329_vm2, %v981_v22, 0  ;;  %1373 = vmatmul.msk.bf16.vlgmr.msra.gmra.mxu2 %vm325_vm7, %v1888_v53  ;;  %v994_v18 = vsel %vm329_vm2, %v982_v39, 0 }
 0x13a   : > { %1005 = vmatpush.bf16.msra.mxu2 %v991_v35 }
 0x13b   : > { %v363_v5 = vpop.f32.mrf.mxu1 }
 0x13c   : > { %v350_v26 = vpop.f32.mrf.mxu0 }
 0x13d   : > { %864 = vmatpush.bf16.msrb.mxu3 %v850_v42 }
 0x13e   : > { %v966_v43 = vpop.permute.xlu2 %965 }
 0x13f   : > { %v962_v36 = vpop.permute.xlu1 %961  ;;  %v1072_v38 = vpop.permute.xlu0 %1071  ;;  %v979_v40 = vsel %vm977_vm12, %v1902_v11, %v966_v43 }
 0x140   : > { %v978_v31 = vsel %vm977_vm12, %v962_v36, %v1902_v11 }
 0x141   : > { %1006 = vmatpush.bf16.msra.mxu2 %v978_v31 }
 0x143   : > { %1388 = vmatmul.msk.bf16.vlgmr.msrb.gmra.mxu0 %vm325_vm7, %v1375_v56 }
 0x146   : > { %1374 = vmatmul.msk.bf16.vlgmr.msra.gmra.mxu3 %vm325_vm7, %v1888_v53  ;;  %v976_v51 = vpop.permute.xlu2 %975  ;;  %v1395_v53 = vld [vmem:[%s2023_s1 + $0x18] sm:$0xf] }
 0x147   : > { %v1082_v44 = vpop.permute.xlu1 %1081  ;;  %v829_v46 = vpop.permute.xlu0 %828  ;;  %v983_v7 = vsel %vm977_vm12, %v1927_v57, %v976_v51 }
 0x148   : > { %v1090_v17 = vsel %vm1085_vm13, %v1080_v13, %v1082_v44  ;;  %v839_v32 = vsel %vm838_vm11, %v1894_v61, %v829_v46  ;;  %v997_v37 = vsel %vm329_vm2, %v983_v7, 0 }
 0x149   : > { %v1102_v33 = vsel %vm329_vm2, %v1090_v17, 0  ;;  %1390 = vmatmul.msk.bf16.vlgmr.msrb.gmra.mxu2 %vm325_vm7, %v1375_v56  ;;  %865 = vmatpush.bf16.msrb.mxu3 %v839_v32  ;;  %v374_v56 = vpop.f32.mrf.mxu2 }
 0x14a   : > { %1126 = vmatpush.bf16.msrb.mxu2 %v1102_v33 }
 0x14d   : > { %1018 = vmatpush.bf16.msra.mxu3 %v994_v18 }
 0x14e   : > { %v1070_v3 = vpop.permute.xlu2 %1069 }
 0x14f   : > { %v1074_v9 = vpop.permute.xlu1 %1073  ;;  %v837_v47 = vpop.permute.xlu0 %836  ;;  %v1086_v4 = vsel %vm1085_vm13, %v1070_v3, %v1072_v38 }
 0x150   : > { %v842_v48 = vsel %vm838_vm11, %v835_v45, %v837_v47  ;;  %v856_v49 = vsel %vm329_vm2, %v837_v47, 0  ;;  %v1087_v50 = vsel %vm1085_vm13, %v1072_v38, %v1074_v9 }
 0x151   : > { %1019 = vmatpush.bf16.msra.mxu3 %v979_v40  ;;  %v853_v0 = vsel %vm329_vm2, %v842_v48, 0  ;;  %890 = vmatpush.bf16.msra.mxu1 %v856_v49  ;;  %v376_v23 = vpop.f32.mrf.mxu2 }
 0x152   : > { %1127 = vmatpush.bf16.msrb.mxu2 %v1087_v50  ;;  %877 = vmatpush.bf16.msra.mxu0 %v853_v0 }
 0x156   : > { %1392 = vmatmul.msk.bf16.vlgmr.msrb.gmra.mxu3 %vm325_vm7, %v1391_v1  ;;  %v1207_v58 = vpop.permute.xlu2 %1206 }
 0x157   : > { %v831_v54 = vpop.permute.xlu1 %830  ;;  %v1078_v61 = vpop.permute.xlu0 %1077 }
 0x158   : > { %891 = vmatpush.bf16.msra.mxu1 %v831_v54  ;;  %v840_v62 = vsel %vm838_vm11, %v829_v46, %v831_v54  ;;  %v1089_v63 = vsel %vm1085_vm13, %v1078_v61, %v1080_v13 }
 0x159   : > { %878 = vmatpush.bf16.msra.mxu0 %v840_v62  ;;  %1396 = vmatmul.msk.bf16.vlgmr.msra.gmra.mxu2 %vm325_vm7, %v1395_v53  ;;  %v1099_v59 = vsel %vm329_vm2, %v1089_v63, 0 }
 0x15b   : > { %1394 = vmatmul.msk.bf16.vlgmr.msra.gmra.mxu1 %vm325_vm7, %v1391_v1 }
 0x15c   : > { %1113 = vmatpush.bf16.msrb.mxu1 %v1099_v59  ;;  %1393 = vmatmul.msk.bf16.vlgmr.msra.gmra.mxu0 %vm325_vm7, %v1391_v1  ;;  %v412_v8 = vpop.f32.mrf.mxu0 }
 0x15d   : > { %1031 = vmatpush.bf16.msrb.mxu0 %v997_v37  ;;  %v413_v34 = vadd.f32 %v412_v8, %v361_v29 }
 0x15e   : > { %v1199_v57 = vpop.permute.xlu2 %1198 }
 0x15f   : > { %v968_v10 = vpop.permute.xlu1 %967  ;;  %v1084_v11 = vpop.permute.xlu0 %1083 }
 0x160   : > { %1114 = vmatpush.bf16.msrb.mxu1 %v1086_v4  ;;  %v980_v12 = vsel %vm977_vm12, %v966_v43, %v968_v10  ;;  %v1091_v15 = vsel %vm1085_vm13, %v1082_v44, %v1084_v11 }
 0x161   : > { %1032 = vmatpush.bf16.msrb.mxu0 %v980_v12  ;;  %v1105_v6 = vsel %vm329_vm2, %v1091_v15, 0 }
 0x162   : > { %1139 = vmatpush.bf16.msrb.mxu3 %v1105_v6 }
 0x164   : > { %v414_v22 = vpop.f32.mrf.mxu0 }
 0x166   : > { %1397 = vmatmul.msk.bf16.vlgmr.msra.gmra.mxu3 %vm325_vm7, %v1395_v53 }
 0x167   : > { %v1205_v19 = vpop.permute.xlu1 %1204  ;;  %v1076_v20 = vpop.permute.xlu0 %1075 }
 0x168   : > { %v1214_v27 = vsel %vm1208_vm14, %v1205_v19, %v1207_v58  ;;  %v1088_v30 = vsel %vm1085_vm13, %v1074_v9, %v1076_v20 }
 0x169   : > { %1417 = vmatmul.msk.bf16.vlgmr.msrb.gmra.mxu2 %vm325_vm7, %v1399_v16  ;;  %v1228_v55 = vsel %vm329_vm2, %v1214_v27, 0  ;;  %1140 = vmatpush.bf16.msrb.mxu3 %v1088_v30 }
 0x16a   : > { %1262 = vmatpush.bf16.msra.mxu2 %v1228_v55 }
 0x16b   : > { %1416 = vmatmul.msk.bf16.vlgmr.msrb.gmra.mxu1 %vm325_vm7, %v1399_v16 }
 0x16c   : > { %1398 = vmatmul.msk.bf16.vlgmr.msrb.gmra.mxu0 %vm325_vm7, %v1395_v53 }
 0x16e   : > { %v425_v25 = vpop.f32.mrf.mxu1 }
 0x16f   : > { %v1197_v41 = vpop.permute.xlu1 %1196  ;;  %v426_v45 = vadd.f32 %v425_v25, %v374_v56 }
 0x170   : > { %v1211_v52 = vsel %vm1208_vm14, %v1197_v41, %v1199_v57 }
 0x171   : > { %1263 = vmatpush.bf16.msra.mxu2 %v1211_v52  ;;  %v399_v28 = vpop.f32.mrf.mxu3 }
 0x172   : > { %v400_v24 = vadd.f32 %v399_v28, %v348_v60 }
 0x176   : > { %1418 = vmatmul.msk.bf16.vlgmr.msrb.gmra.mxu3 %vm325_vm7, %v1399_v16  ;;  %v427_v42 = vpop.f32.mrf.mxu1 }
 0x179   : > { %1422 = vmatmul.msk.bf16.vlgmr.msra.gmra.mxu2 %vm325_vm7, %v1419_v14  ;;  %v401_v13 = vpop.f32.mrf.mxu3 }
 0x186   : > { %v1193_v17 = vpop.permute.xlu2 %1192 }
 0x199   : > { %v661_v35 = vpop.f32.mrf.mxu1 }
 0x19e   : > { %v1201_v36 = vpop.permute.xlu0 %1200 }
 0x19f   : > { %v1203_v38 = vpop.permute.xlu1 %1202 }
 0x1a0   : > { %v1212_v31 = vsel %vm1208_vm14, %v1201_v36, %v1203_v38  ;;  %v1213_v39 = vsel %vm1208_vm14, %v1203_v38, %v1205_v19 }
 0x1a1   : > { %v1222_v43 = vsel %vm329_vm2, %v1212_v31, 0  ;;  %v1225_v44 = vsel %vm329_vm2, %v1213_v39, 0  ;;  %v663_v46 = vpop.f32.mrf.mxu1 }
 0x1a2   : > { %1236 = vmatpush.bf16.msra.mxu0 %v1222_v43  ;;  %1249 = vmatpush.bf16.msra.mxu1 %v1225_v44 }
 0x1a6   : > { %v1195_v32 = vpop.permute.xlu0 %1194 }
 0x1a7   : > { %v1209_v18 = vsel %vm1208_vm14, %v1193_v17, %v1195_v32  ;;  %v1210_v33 = vsel %vm1208_vm14, %v1195_v32, %v1197_v41  ;;  %v1276_v13 = vpop.permute.xlu1 %1275 }
 0x1a8   : > { %1237 = vmatpush.bf16.msra.mxu0 %v1209_v18  ;;  %1250 = vmatpush.bf16.msra.mxu1 %v1210_v33 }
 0x1aa   : > { %v771_v40 = vpop.f32.mrf.mxu1 }
 0x1ab   : > { %1420 = vmatmul.msk.bf16.vlgmr.msra.gmra.mxu0 %vm325_vm7, %v1419_v14  ;;  %1421 = vmatmul.msk.bf16.vlgmr.msra.gmra.mxu1 %vm325_vm7, %v1419_v14 }
 0x1ac   : > { %v534_v9 = vpop.f32.mrf.mxu2 }
 0x1ad   : > { %v564_v47 = vadd.f32 %v534_v9, %v400_v24 }
 0x1af   : > { %v691_v48 = vadd.f32 %v661_v35, %v564_v47 }
 0x1b0   : > { %v560_v49 = vpop.f32.mrf.mxu0 }
 0x1b1   : > { %v566_v50 = vadd.f32 %v560_v49, %v426_v45 }
 0x1b2   : > { %v773_v51 = vpop.f32.mrf.mxu1 }
 0x1b4   : > { %v536_v0 = vpop.f32.mrf.mxu2 }
 0x1b8   : > { %v562_v53 = vpop.f32.mrf.mxu0 }
 0x1b9   : > { %v547_v1 = vpop.f32.mrf.mxu3 }
 0x1ba   : > { %v565_v7 = vadd.f32 %v547_v1, %v413_v34 }
 0x1bc   : > { %v674_v54 = vpop.f32.mrf.mxu2 }
 0x1bd   : > { %v692_v61 = vadd.f32 %v674_v54, %v565_v7 }
 0x1bf   : > { %v789_v63 = vadd.f32 %v771_v40, %v692_v61 }
 0x1c0   : > { %v758_v37 = vpop.f32.mrf.mxu0 }
 0x1c1   : > { %v549_v62 = vpop.f32.mrf.mxu3  ;;  %v788_v59 = vadd.f32 %v758_v37, %v691_v48 }
 0x1c4   : > { %v676_v3 = vpop.f32.mrf.mxu2 }
 0x1c8   : > { %v760_v10 = vpop.f32.mrf.mxu0 }
 0x1c9   : > { %v687_v4 = vpop.f32.mrf.mxu3 }
 0x1ca   : > { %v693_v52 = vadd.f32 %v687_v4, %v566_v50 }
 0x1cc   : > { %v784_v11 = vpop.f32.mrf.mxu2 }
 0x1cd   : > { %v790_v28 = vadd.f32 %v784_v11, %v693_v52 }
 0x1d1   : > { %v689_v12 = vpop.f32.mrf.mxu3 }
 0x1d4   : > { %v786_v15 = vpop.f32.mrf.mxu2 }
 0x1d8   : > { %v893_v16 = vpop.f32.mrf.mxu1 }
 0x1d9   : > { %v867_v6 = vpop.f32.mrf.mxu3  ;;  %v880_v2 = vpop.f32.mrf.mxu0  ;;  %v899_v24 = vadd.f32 %v893_v16, %v790_v28 }
 0x1da   : > { %v897_v58 = vadd.f32 %v867_v6, %v788_v59  ;;  %v898_v29 = vadd.f32 %v880_v2, %v789_v63 }
 0x1dc   : > { %v1008_v60 = vpop.f32.mrf.mxu2 }
 0x1dd   : > { %v1038_v19 = vadd.f32 %v1008_v60, %v897_v58 }
 0x1e0   : > { %v895_v21 = vpop.f32.mrf.mxu1 }
 0x1e1   : > { %v869_v20 = vpop.f32.mrf.mxu3  ;;  %v882_v27 = vpop.f32.mrf.mxu0 }
 0x1e4   : > { %v1010_v30 = vpop.f32.mrf.mxu2 }
 0x1e8   : > { %v1116_v56 = vpop.f32.mrf.mxu1 }
 0x1e9   : > { %v1021_v55 = vpop.f32.mrf.mxu3  ;;  %v1034_v57 = vpop.f32.mrf.mxu0  ;;  %v1146_v39 = vadd.f32 %v1116_v56, %v1038_v19 }
 0x1ea   : > { %v1040_v45 = vadd.f32 %v1034_v57, %v899_v24  ;;  %v1039_v31 = vadd.f32 %v1021_v55, %v898_v29 }
 0x1ec   : > { %v1129_v5 = vpop.f32.mrf.mxu2 }
 0x1ed   : > { %v1147_v43 = vadd.f32 %v1129_v5, %v1039_v31 }
 0x1f0   : > { %v1118_v41 = vpop.f32.mrf.mxu1 }
 0x1f1   : > { %v1023_v26 = vpop.f32.mrf.mxu3  ;;  %v1036_v23 = vpop.f32.mrf.mxu0 }
 0x1f4   : > { %v1131_v14 = vpop.f32.mrf.mxu2 }
 0x1f9   : > { %v1142_v25 = vpop.f32.mrf.mxu3 }
 0x1fa   : > { %v1148_v8 = vadd.f32 %v1142_v25, %v1040_v45 }
 0x1fc   : > { %v1265_v34 = vpop.f32.mrf.mxu2 }
 0x1fd   : > { %v1271_v42 = vadd.f32 %v1265_v34, %v1148_v8 }
 0x1ff   : > { %v1280_v22 = vadd.f32 %v1276_v13, %v1271_v42 }
 0x201   : > { %v1144_v35 = vpop.f32.mrf.mxu3  ;;  %v1282_v36 = vpack.c.bf16 %v1280_v22, %v1280_v22 }
 0x203   : > { %1285 = vst.msk [vmem:[%s224_s16 + $0x8] sm:$0xf] %vm1284_vm15, %v1282_v36 }
 0x204   : > { %v1267_v38 = vpop.f32.mrf.mxu2 }
 0x228   : > { %v1239_v44 = vpop.f32.mrf.mxu0  ;;  %v1252_v46 = vpop.f32.mrf.mxu1 }
 0x229   : > { %v1269_v17 = vadd.f32 %v1239_v44, %v1146_v39  ;;  %v1270_v32 = vadd.f32 %v1252_v46, %v1147_v43 }
 0x22b   : > { %v1278_v18 = vadd.f32 %v1276_v13, %v1269_v17  ;;  %v1279_v33 = vadd.f32 %v1276_v13, %v1270_v32 }
 0x22d   : > { %v1281_v40 = vpack.c.bf16 %v1279_v33, %v1278_v18 }
 0x22f   : > { %1283 = vst [vmem:[%s224_s16] sm:$0xff] %v1281_v40 }
 0x230   : > { %v1241_v9 = vpop.f32.mrf.mxu0  ;;  %v1254_v47 = vpop.f32.mrf.mxu1 }
 0x231 PF: > { %s15_s18 = sadd.s32 1, %s1492_s18  }
 0x232   : > { %p12_p4 = scmp.ge.s32.totalorder %s15_s18, 4  }
 0x234   :  { %14 = sbr.rel (!%p12_p4) target bundleno = 1 (0x1), region = 78 }

// kernel: dwt_upsampler_forward.11
= control target key start
LH: loop header
LB: loop body
LE: loop exit
PB: predicated region body
PF: predicated region fallthrough
CT: control target
= control target key end

     0   :  { %s1231_s18 = smov 0   ;;  %s1460_s0 = inlined_call_operand.vmem [shape: bf16[2,8,401], index: 0, kind: input, shape index: {}]   ;;  %s1461_s1 = inlined_call_operand.vmem [shape: bf16[9,8,8], index: 1, kind: input, shape index: {}]   ;;  %s1462_s2 = inlined_call_operand.vmem [shape: f32[8,1], index: 2, kind: input, shape index: {}]   ;;  %s1463_s3 = inlined_call_operand.vmem [shape: bf16[1,361], index: 3, kind: input, shape index: {}]   ;;  %s1464_s4 = inlined_call_operand.vmem [shape: bf16[1,361], index: 4, kind: input, shape index: {}]   ;;  %s1465_s5 = inlined_call_operand.vmem [shape: bf16[2,8,361], index: 5, kind: output, shape index: {}]  }
   0x1 LB: > { %s1083_s19 = sadd.s32 4294967295, %s1185_s18   ;;  %p1087_p0 = scmp.ge.s32.totalorder %s1185_s18, 1  ;;  %s1185_s18 = sphi %s1231_s18, %s15_s18  }
   0x2   : > { %p187_p1 = scmp.lt.s32.totalorder %s1185_s18, 3 }
   0x4   : > { %p188_p2 = pnand %p1087_p0, %p187_p1 }
   0x5   : > { %p215_p3 = scmp.lt.s32.totalorder (!%p188_p2), %s1083_s19, 1  ;;  %s1187_s28 = smov (!%p188_p2), 19  }
   0x6   : > { %191 = sbr.rel (%p188_p2) target bundleno = 579 (0x243), region = 40  ;;  %s1188_s29 = smov (!%p188_p2), 127  }
   0x7   : > { %s1189_s30 = smov (!%p188_p2), 2   ;;  %s1190_s6 = smov (!%p188_p2), 21  }
   0x8   : > { %s1191_s7 = smov (!%p188_p2), 126   ;;  %s1192_s8 = smov (!%p188_p2), 38  }
   0x9   : > { %s1193_s9 = smov (!%p188_p2), 109   ;;  %s1194_s10 = smov (!%p188_p2), 40  }
   0xa   : > { %s1195_s11 = smov (!%p188_p2), 108   ;;  %s1196_s12 = smov (!%p188_p2), 107  }
   0xb   : > { %v226_v0 = vld [vmem:[%s1463_s3] sm:$0x7]  ;;  %s1467_s19 = smov (!%p215_p3, %s1083_s19), 1  ;;  %vm411_vm0 = vcmask 15360   ;;  %vm505_vm1 = vcmask 154624   ;;  %vm664_vm2 = vcmask 171008  }
   0xc   : > { %231 = vst [vmem:[#allocation1] ss:$9 sm:$0xff] %v226_v0  ;;  %v227_v1 = vld [vmem:[%s1464_s4] sm:$0x7]  ;;  %s1128_s24 = sshll.u32 %s1467_s19, 4  ;;  %vm275_vm3 = vcmask 1039360  }
   0xd   : > { %s1263_s27 = scalar_lea.vmem %s1460_s0, %s1128_s24  ;;  %vm282_vm4 = vcmask 1043456   ;;  %vm278_vm5 = vcmask 64512   ;;  %vm434_vm6 = vcmask 1031168   ;;  %s1197_s17 = smov 89   ;;  %vm756_vm7 = vcmask 310272  }
   0xe   : > { %v258_v18 = vld [vmem:[%s1263_s27 + $0x8] sm:$0xf]  ;;  %v257_v31 = vld [vmem:[%s1263_s27] sm:$0xff]  ;;  %s1198_s22 = smov 90   ;;  %vm528_vm8 = vcmask 891904   ;;  %vm927_vm9 = vcmask 326656  }
   0xf   : > { %v265_v20 = vunpack.c.l.b16 %v258_v18  ;;  %v264_v32 = vunpack.c.h.b16 %v257_v31  ;;  %v263_v34 = vunpack.c.l.b16 %v257_v31  ;;  %v1288_v36 = vunpack.c.l.bf16 %v257_v31  ;;  %v1297_v52 = vld [vmem:[%s1263_s27 + $0x8] sm:$0xf]  ;;  %s1129_s13 = smul.u32 12, %s1467_s19 }
  0x10   : > { %v1290_v38 = vunpack.c.h.bf16 %v257_v31  ;;  %v398_v45 = vunpack.c.l.bf16 %v258_v18  ;;  %v495_v56 = vunpack.c.l.bf16 %v1297_v52  ;;  %vm601_vm10 = vcmask 883712  }
  0x11   : > { %v268_v23 = vpack.c.b16 %v265_v20, %v265_v20  ;;  %v1281_v33 = vpack.c.b16 %v264_v32, %v264_v32  ;;  %v1285_v35 = vpack.c.b16 %v263_v34, %v263_v34  ;;  %v229_v34 = vld [vmem:[%s1263_s27 + $0x8] sm:$0xf]  ;;  %vm687_vm11 = vcmask 875520   ;;  %s224_s16 = scalar_lea.vmem %s1465_s5, %s1129_s13 }
  0x12   : > { %vm785_vm12 = vcmask 736256   ;;  %vm863_vm13 = vcmask 728064   ;;  %vm956_vm14 = vcmask 719872   ;;  %vm1026_vm15 = vcmask 855040  }
  0x13   : > { %v232_v2 = vld [vmem:[#allocation1] sm:$0xff]  ;;  %v233_v3 = vld [vmem:[#allocation1 + $0x9] sm:$0xff]  ;;  %v234_v4 = vld [vmem:[#allocation1 + $0x12] sm:$0xff]  ;;  %273 = vrot.lane.b32.xlu2 %v268_v23, %s1188_s29 }
  0x14   : > { %383 = vst [vmem:[#allocation1] ss:$9 sm:$0xff] %v227_v1  ;;  %v235_v5 = vpack.i.b16 %v232_v2, %v232_v2  ;;  %v238_v6 = vpack.i.b16 %v233_v3, %v233_v3  ;;  %v241_v11 = vpack.i.b16 %v234_v4, %v234_v4 }
  0x16   : > { %v1247_v7 = vperm.slane %v235_v5, 0  ;;  %v1249_v8 = vperm.slane %v238_v6, 0  ;;  %v243_v17 = vperm.slane %v241_v11, 0  ;;  %v591_v11 = vunpack.c.l.b16 %v1297_v52 }
  0x18   : > { %v247_v9 = vunpack.c.l.bf16 %v1247_v7  ;;  %v248_v10 = vunpack.c.l.bf16 %v1249_v8  ;;  %v1273_v27 = vunpack.c.l.bf16 %v243_v17 }
  0x1a   : > { %v1258_v12 = vpack.i.bf16 %v248_v10, %v247_v9 }
  0x1b   : > { %v384_v13 = vld [vmem:[#allocation1] sm:$0xff]  ;;  %v385_v14 = vld [vmem:[#allocation1 + $0x9] sm:$0xff]  ;;  %v386_v19 = vld [vmem:[#allocation1 + $0x12] sm:$0xff]  ;;  %269 = vrot.lane.b32.xlu2 %v1285_v35, %s1188_s29 }
  0x1c   : > { %v387_v15 = vpack.i.b16 %v384_v13, %v384_v13  ;;  %v390_v16 = vpack.i.b16 %v385_v14, %v385_v14  ;;  %1158 = vrot.lane.b32.xlu1 %v1258_v12, %s1187_s28  ;;  %v393_v26 = vpack.i.b16 %v386_v19, %v386_v19 }
  0x1e   : > { %v1267_v21 = vperm.slane %v387_v15, 0  ;;  %v1269_v22 = vperm.slane %v390_v16, 0  ;;  %v395_v29 = vperm.slane %v393_v26, 0 }
  0x20   : > { %v399_v24 = vunpack.c.l.bf16 %v1267_v21  ;;  %v400_v25 = vunpack.c.l.bf16 %v1269_v22  ;;  %v401_v30 = vunpack.c.l.bf16 %v395_v29 }
  0x22   : > { %v1152_v28 = vpack.i.bf16 %v400_v25, %v399_v24  ;;  %v1172_v1 = vpack.i.bf16 %v401_v30, %v400_v25  ;;  %v250_v25 = vmul.f32 %v1288_v36, %v247_v9 }
  0x24   : > { %1153 = vrot.lane.b32.xlu0 %v1152_v28, %s1189_s30  ;;  %503 = vrot.lane.b32.xlu1 %v1273_v27, %s1187_s28 }
  0x2c   : > { %409 = vrot.lane.b32.xlu0 %v401_v30, %s1189_s30 }
  0x34   : > { %271 = vrot.lane.b32.xlu0 %v1281_v33, %s1188_s29 }
  0x3c   : > { %1163 = vrot.lane.b32.xlu0 %v1152_v28, %s1190_s6  ;;  %v253_v28 = vpack.c.bf16 %v250_v25, %v250_v25 }
  0x3e   : > { %v335_v8 = vsel %vm282_vm4, %v253_v28, 0 }
  0x3f   : > { %350 = vmatpush.bf16.msra.mxu3 %v335_v8 }
  0x6d   : > { %v274_v13 = vpop.permute.xlu2 %273 }
  0x6e   : > { %v290_v23 = vsel %vm282_vm4, %v274_v13, 0 }
  0x6f   : > { %325 = vmatpush.bf16.msra.mxu2 %v290_v23  ;;  %v1102_v23 = vld [vmem:[%s1461_s1 + $0xc] sm:$0xf] }
  0x75   : > { %v270_v15 = vpop.permute.xlu2 %269 }
  0x8e   : > { %v1159_v47 = vpop.permute.xlu1 %1158 }
  0x8f   : > { %v1161_v49 = vunpack.i.h.bf16 %v1159_v47  ;;  %v1160_v50 = vunpack.i.l.bf16 %v1159_v47 }
  0x91   : > { %v506_v55 = vsel %vm505_vm1, %v1160_v50, %v1161_v49  ;;  %v511_v0 = vmul.f32 %v1160_v50, %v1288_v36 }
  0x92   : > { %v512_v58 = vmul.f32 %v506_v55, %v1290_v38 }
  0x93   : > { %v514_v2 = vpack.c.bf16 %v511_v0, %v511_v0 }
  0x94   : > { %v515_v61 = vpack.c.bf16 %v512_v58, %v512_v58 }
  0x96   : > { %v1154_v37 = vpop.permute.xlu0 %1153  ;;  %v504_v57 = vpop.permute.xlu1 %503 }
  0x97   : > { %v1156_v39 = vunpack.i.h.bf16 %v1154_v37  ;;  %v1155_v40 = vunpack.i.l.bf16 %v1154_v37  ;;  %v507_v59 = vsel %vm505_vm1, %v1161_v49, %v504_v57  ;;  %v246_v37 = vunpack.c.l.bf16 %v229_v34 }
  0x98   : > { %v513_v60 = vmul.f32 %v507_v59, %v495_v56 }
  0x99   : > { %v417_v41 = vmul.f32 %v1155_v40, %v1288_v36  ;;  %v412_v42 = vsel %vm411_vm0, %v1155_v40, %v1156_v39  ;;  %v1343_v40 = vld [vmem:[%s1263_s27 + $0x8] sm:$0xff]  ;;  %s1199_s27 = smov 88  }
  0x9a   : > { %v418_v43 = vmul.f32 %v412_v42, %v1290_v38  ;;  %v516_v62 = vpack.c.bf16 %v513_v60, %v513_v60  ;;  %v850_v52 = vunpack.c.h.b16 %v1343_v40 }
  0x9b   : > { %v420_v44 = vpack.c.bf16 %v417_v41, %v417_v41  ;;  %v256_v41 = vld [vmem:[%s1461_s1] sm:$0xf] }
  0x9c   : > { %v421_v46 = vpack.c.bf16 %v418_v43, %v418_v43  ;;  %v849_v43 = vunpack.c.l.b16 %v1343_v40  ;;  %1095 = vmatmul.msk.bf16.vlgmr.msra.gmra.mxu3 %vm278_vm5, %v256_v41 }
  0x9d   : > { %428 = vrot.lane.b32.xlu1 %v420_v44, %s1191_s7 }
  0x9e   : > { %v410_v48 = vpop.permute.xlu0 %409  ;;  %430 = vrot.lane.b32.xlu2 %v421_v46, %s1191_s7  ;;  %v853_v47 = vpack.c.b16 %v849_v43, %v849_v43 }
  0x9f   : > { %v413_v51 = vsel %vm411_vm0, %v1156_v39, %v410_v48  ;;  %v252_v39 = vmul.f32 %v1273_v27, %v246_v37 }
  0xa0   : > { %v419_v53 = vmul.f32 %v413_v51, %v398_v45 }
  0xa1   : > { %v255_v44 = vpack.c.bf16 %v252_v39, %v252_v39 }
  0xa2   : > { %v422_v54 = vpack.c.bf16 %v419_v53, %v419_v53 }
  0xa4   : > { %432 = vrot.lane.b32.xlu0 %v422_v54, %s1191_s7 }
  0xa5   : > { %1168 = vrot.lane.b32.xlu1 %v1258_v12, %s1192_s8  ;;  %v594_v12 = vpack.c.b16 %v591_v11, %v591_v11 }
  0xa6   : > { %662 = vrot.lane.b32.xlu2 %v401_v30, %s1190_s6  ;;  %v272_v63 = vpop.permute.xlu0 %271  ;;  %v1091_v30 = vld [vmem:[%s1461_s1 + $0x4] sm:$0xf] }
  0xa7   : > { %v276_v17 = vsel %vm275_vm3, %v270_v15, %v272_v63  ;;  %v277_v18 = vsel %vm275_vm3, %v272_v63, %v274_v13  ;;  %1094 = vmatmul.msk.bf16.vlgmr.msra.gmra.mxu2 %vm278_vm5, %v1091_v30 }
  0xa8   : > { %v284_v20 = vsel %vm282_vm4, %v276_v17, 0  ;;  %v287_v21 = vsel %vm282_vm4, %v277_v18, 0 }
  0xa9   : > { %299 = vmatpush.bf16.msra.mxu0 %v284_v20  ;;  %312 = vmatpush.bf16.msra.mxu1 %v287_v21 }
  0xac   : > { %754 = vrot.lane.b32.xlu0 %v1273_v27, %s1192_s8  ;;  %1092 = vmatmul.msk.bf16.vlgmr.msra.gmra.mxu0 %vm278_vm5, %v1091_v30  ;;  %v341_v27 = vsel %vm282_vm4, %v255_v44, 0 }
  0xad   : > { %524 = vrot.lane.b32.xlu1 %v515_v61, %s1193_s9  ;;  %1093 = vmatmul.msk.bf16.vlgmr.msra.gmra.mxu1 %vm278_vm5, %v1091_v30  ;;  %v748_v61 = vunpack.c.l.bf16 %v1343_v40 }
  0xae   : > { %526 = vrot.lane.b32.xlu2 %v516_v62, %s1193_s9  ;;  %v1164_v3 = vpop.permute.xlu0 %1163  ;;  %376 = vmatpush.bf16.msrb.mxu1 %v341_v27  ;;  %v1098_v62 = vld [vmem:[%s1461_s1 + $0x8] sm:$0xf] }
  0xaf   : > { %v1165_v4 = vunpack.i.l.bf16 %v1164_v3  ;;  %v1166_v14 = vunpack.i.h.bf16 %v1164_v3 }
  0xb1   : > { %v670_v5 = vmul.f32 %v1165_v4, %v1288_v36  ;;  %v665_v16 = vsel %vm664_vm2, %v1165_v4, %v1166_v14 }
  0xb2   : > { %v671_v19 = vmul.f32 %v665_v16, %v1290_v38 }
  0xb3   : > { %v673_v6 = vpack.c.bf16 %v670_v5, %v670_v5 }
  0xb4   : > { %1173 = vrot.lane.b32.xlu0 %v1172_v1, %s1194_s10  ;;  %v674_v22 = vpack.c.bf16 %v671_v19, %v671_v19 }
  0xb5   : > { %522 = vrot.lane.b32.xlu1 %v514_v2, %s1193_s9 }
  0xb6   : > { %599 = vrot.lane.b32.xlu2 %v594_v12, %s1195_s11  ;;  %v749_v12 = vunpack.c.h.bf16 %v1343_v40 }
  0xbc   : > { %921 = vrot.lane.b32.xlu0 %v399_v24, %s1194_s10  ;;  %v251_v24 = vmul.f32 %v1290_v38, %v248_v10 }
  0xbd   : > { %595 = vrot.lane.b32.xlu1 %v1285_v35, %s1195_s11  ;;  %1097 = vmatmul.msk.bf16.vlgmr.msrb.gmra.mxu1 %vm278_vm5, %v256_v41 }
  0xbe   : > { %597 = vrot.lane.b32.xlu2 %v1281_v33, %s1195_s11  ;;  %v254_v26 = vpack.c.bf16 %v251_v24, %v251_v24 }
  0xc0   : > { %v338_v29 = vsel %vm282_vm4, %v254_v26, 0 }
  0xc1   : > { %363 = vmatpush.bf16.msrb.mxu0 %v338_v29 }
  0xc4   : > { %1096 = vmatmul.msk.bf16.vlgmr.msrb.gmra.mxu0 %vm278_vm5, %v256_v41 }
  0xc5   : > { %681 = vrot.lane.b32.xlu1 %v673_v6, %s1196_s12 }
  0xc6   : > { %683 = vrot.lane.b32.xlu2 %v674_v22, %s1196_s12 }
  0xf8   : > { %v431_v31 = vpop.permute.xlu2 %430 }
 0x100   : > { %v663_v7 = vpop.permute.xlu2 %662 }
 0x101   : > { %v666_v9 = vsel %vm664_vm2, %v1166_v14, %v663_v7 }
 0x102   : > { %v672_v10 = vmul.f32 %v666_v9, %v495_v56  ;;  %v854_v56 = vpack.c.b16 %v850_v52, %v850_v52 }
 0x104   : > { %v675_v32 = vpack.c.bf16 %v672_v10, %v672_v10 }
 0x106   : > { %685 = vrot.lane.b32.xlu2 %v675_v32, %s1196_s12 }
 0x108   : > { %v527_v1 = vpop.permute.xlu2 %526 }
 0x109   : > { %v541_v4 = vsel %vm282_vm4, %v527_v1, 0 }
 0x10e   : > { %859 = vrot.lane.b32.xlu2 %v853_v47, %s1197_s17 }
 0x10f   : > { %v429_v42 = vpop.permute.xlu1 %428 }
 0x110   : > { %v435_v45 = vsel %vm434_vm6, %v429_v42, %v431_v31  ;;  %v600_v18 = vpop.permute.xlu2 %599 }
 0x111   : > { %v441_v46 = vsel %vm282_vm4, %v435_v45, 0  ;;  %v614_v21 = vsel %vm282_vm4, %v600_v18, 0  ;;  %v1110_v45 = vld [vmem:[%s1461_s1 + $0x14] sm:$0xf] }
 0x112   : > { %456 = vmatpush.bf16.msrb.mxu2 %v441_v46 }
 0x115   : > { %1099 = vmatmul.msk.bf16.vlgmr.msrb.gmra.mxu2 %vm278_vm5, %v1098_v62 }
 0x116   : > { %v433_v48 = vpop.permute.xlu0 %432  ;;  %861 = vrot.lane.b32.xlu2 %v854_v56, %s1197_s17 }
 0x117   : > { %v447_v49 = vsel %vm282_vm4, %v433_v48, 0  ;;  %v1169_v50 = vpop.permute.xlu1 %1168  ;;  %v436_v51 = vsel %vm434_vm6, %v431_v31, %v433_v48 }
 0x118   : > { %v1171_v53 = vunpack.i.h.bf16 %v1169_v50  ;;  %v1170_v54 = vunpack.i.l.bf16 %v1169_v50  ;;  %482 = vmatpush.bf16.msra.mxu0 %v447_v49  ;;  %v444_v55 = vsel %vm282_vm4, %v436_v51, 0  ;;  %v598_v8 = vpop.permute.xlu2 %597 }
 0x119   : > { %469 = vmatpush.bf16.msrb.mxu3 %v444_v55  ;;  %v603_v7 = vsel %vm601_vm10, %v598_v8, %v600_v18 }
 0x11a   : > { %v763_v57 = vmul.f32 %v1170_v54, %v1288_v36  ;;  %v757_v58 = vsel %vm756_vm7, %v1170_v54, %v1171_v53  ;;  %v611_v32 = vsel %vm282_vm4, %v603_v7, 0 }
 0x11b   : > { %v764_v59 = vmul.f32 %v757_v58, %v1290_v38  ;;  %1101 = vmatmul.msk.bf16.vlgmr.msra.gmra.mxu0 %vm278_vm5, %v1098_v62 }
 0x11c   : > { %v767_v60 = vpack.c.bf16 %v763_v57, %v763_v57  ;;  %1100 = vmatmul.msk.bf16.vlgmr.msrb.gmra.mxu3 %vm278_vm5, %v1098_v62 }
 0x11d   : > { %v768_v63 = vpack.c.bf16 %v764_v59, %v764_v59  ;;  %576 = vmatpush.bf16.msra.mxu3 %v541_v4 }
 0x11e   : > { %777 = vrot.lane.b32.xlu0 %v767_v60, %s1198_s22  ;;  %v755_v0 = vpop.permute.xlu0 %754 }
 0x11f   : > { %v758_v2 = vsel %vm756_vm7, %v1171_v53, %v755_v0  ;;  %779 = vrot.lane.b32.xlu1 %v768_v63, %s1198_s22  ;;  %v525_v3 = vpop.permute.xlu1 %524  ;;  %v766_v19 = vmul.f32 %v755_v0, %v749_v12  ;;  %v352_v57 = vpop.f32.mrf.mxu3 }
 0x120   : > { %v765_v5 = vmul.f32 %v758_v2, %v748_v61  ;;  %v530_v6 = vsel %vm528_vm8, %v525_v3, %v527_v1  ;;  %v684_v41 = vpop.permute.xlu2 %683 }
 0x121   : > { %v538_v11 = vsel %vm282_vm4, %v530_v6, 0  ;;  %v770_v24 = vpack.c.bf16 %v766_v19, %v766_v19 }
 0x122   : > { %563 = vmatpush.bf16.msra.mxu2 %v538_v11  ;;  %v769_v13 = vpack.c.bf16 %v765_v5, %v765_v5  ;;  %v1200_v5 = vmov 0  }
 0x123   : > { %1177 = vset.pattern.permute.xlu1 %v1200_v5  ;;  %1178 = vset.pattern.permute.xlu0 %v1200_v5 }
 0x125   : > { %1104 = vmatmul.msk.bf16.vlgmr.msra.gmra.mxu2 %vm278_vm5, %v1102_v23 }
 0x126   : > { %781 = vrot.lane.b32.xlu0 %v769_v13, %s1198_s22  ;;  %v1174_v14 = vpop.permute.xlu0 %1173  ;;  %649 = vmatpush.bf16.msrb.mxu2 %v614_v21 }
 0x127   : > { %857 = vrot.lane.b32.xlu1 %v1281_v33, %s1197_s17  ;;  %v1176_v15 = vunpack.i.h.bf16 %v1174_v14  ;;  %v1175_v16 = vunpack.i.l.bf16 %v1174_v14  ;;  %v523_v17 = vpop.permute.xlu1 %522 }
 0x128   : > { %v529_v20 = vsel %vm528_vm8, %v523_v17, %v525_v3  ;;  %v1014_v3 = vld [vmem:[%s1462_s2] sm:$0xff] }
 0x129   : > { %v535_v22 = vsel %vm282_vm4, %v529_v20, 0  ;;  %v929_v33 = vsel %vm927_vm9, %v1175_v16, %v1176_v15  ;;  %v937_v28 = vmul.f32 %v1176_v15, %v749_v12  ;;  %v301_v49 = vpop.f32.mrf.mxu0 }
 0x12a   : > { %550 = vmatpush.bf16.msra.mxu1 %v535_v22  ;;  %v936_v25 = vmul.f32 %v929_v33, %v748_v61  ;;  %v314_v48 = vpop.f32.mrf.mxu1  ;;  %v327_v54 = vpop.f32.mrf.mxu2  ;;  %v1114_v61 = vld [vmem:[%s1461_s1 + $0x18] sm:$0xf]  ;;  %v353_v0 = vadd.f32 %v352_v57, %v301_v49 }
 0x12b   : > { %v941_v37 = vpack.c.bf16 %v937_v28, %v937_v28 }
 0x12c   : > { %1105 = vmatmul.msk.bf16.vlgmr.msra.gmra.mxu3 %vm278_vm5, %v1102_v23  ;;  %v940_v34 = vpack.c.bf16 %v936_v25, %v936_v25 }
 0x12d   : > { %1103 = vmatmul.msk.bf16.vlgmr.msra.gmra.mxu1 %vm278_vm5, %v1102_v23 }
 0x12e   : > { %783 = vrot.lane.b32.xlu0 %v770_v24, %s1198_s22  ;;  %v922_v26 = vpop.permute.xlu0 %921  ;;  %636 = vmatpush.bf16.msrb.mxu1 %v611_v32 }
 0x12f   : > { %855 = vrot.lane.b32.xlu1 %v1285_v35, %s1197_s17  ;;  %v934_v29 = vmul.f32 %v922_v26, %v1288_v36  ;;  %v596_v30 = vpop.permute.xlu1 %595  ;;  %v1106_v35 = vld [vmem:[%s1461_s1 + $0x10] sm:$0xf]  ;;  %v928_v36 = vsel %vm927_vm9, %v922_v26, %v1175_v16  ;;  %v354_v16 = vpop.f32.mrf.mxu3 }
 0x130   : > { %v602_v31 = vsel %vm601_vm10, %v596_v30, %v598_v8  ;;  %v935_v39 = vmul.f32 %v928_v36, %v1290_v38  ;;  %v1118_v8 = vld [vmem:[%s1461_s1 + $0x1c] sm:$0xf] }
 0x131   : > { %v938_v9 = vpack.c.bf16 %v934_v29, %v934_v29  ;;  %v608_v10 = vsel %vm282_vm4, %v602_v31, 0  ;;  %v303_v52 = vpop.f32.mrf.mxu0 }
 0x132   : > { %623 = vmatpush.bf16.msrb.mxu0 %v608_v10  ;;  %v939_v43 = vpack.c.bf16 %v935_v39, %v935_v39  ;;  %v316_v50 = vpop.f32.mrf.mxu1  ;;  %v329_v6 = vpop.f32.mrf.mxu2 }
 0x133   : > { %948 = vrot.lane.b32.xlu2 %v938_v9, %s1199_s27 }
 0x135   : > { %1107 = vmatmul.msk.bf16.vlgmr.msrb.gmra.mxu0 %vm278_vm5, %v1106_v35  ;;  %1109 = vmatmul.msk.bf16.vlgmr.msrb.gmra.mxu2 %vm278_vm5, %v1106_v35 }
 0x136   : > { %952 = vrot.lane.b32.xlu0 %v940_v34, %s1199_s27 }
 0x137   : > { %954 = vrot.lane.b32.xlu1 %v941_v37, %s1199_s27  ;;  %v682_v40 = vpop.permute.xlu1 %681 }
 0x138   : > { %v688_v42 = vsel %vm687_vm11, %v682_v40, %v684_v41 }
 0x139   : > { %v694_v44 = vsel %vm282_vm4, %v688_v42, 0 }
 0x13a   : > { %709 = vmatpush.bf16.msrb.mxu3 %v694_v44  ;;  %v378_v58 = vpop.f32.mrf.mxu1 }
 0x13b   : > { %v379_v2 = vadd.f32 %v378_v58, %v327_v54 }
 0x13d   : > { %1108 = vmatmul.msk.bf16.vlgmr.msrb.gmra.mxu1 %vm278_vm5, %v1106_v35  ;;  %1111 = vmatmul.msk.bf16.vlgmr.msrb.gmra.mxu3 %vm278_vm5, %v1110_v45 }
 0x13e   : > { %950 = vrot.lane.b32.xlu0 %v939_v43, %s1199_s27 }
 0x13f   : > { %1017 = vperm.xlu1 %1177, %v1014_v3  }
 0x141   : > { %v365_v60 = vpop.f32.mrf.mxu0 }
 0x142   : > { %v366_v1 = vadd.f32 %v365_v60, %v314_v48  ;;  %v380_v17 = vpop.f32.mrf.mxu1  ;;  %v1122_v48 = vld [vmem:[%s1461_s1 + $0x20] sm:$0xf] }
 0x149   : > { %v367_v19 = vpop.f32.mrf.mxu0 }
 0x160   : > { %v686_v38 = vpop.permute.xlu2 %685 }
 0x161   : > { %v689_v46 = vsel %vm687_vm11, %v684_v41, %v686_v38  ;;  %v700_v47 = vsel %vm282_vm4, %v686_v38, 0 }
 0x162   : > { %v697_v27 = vsel %vm282_vm4, %v689_v46, 0  ;;  %735 = vmatpush.bf16.msra.mxu1 %v700_v47 }
 0x163   : > { %722 = vmatpush.bf16.msra.mxu0 %v697_v27 }
 0x165   : > { %1113 = vmatmul.msk.bf16.vlgmr.msra.gmra.mxu1 %vm278_vm5, %v1110_v45 }
 0x166   : > { %1112 = vmatmul.msk.bf16.vlgmr.msra.gmra.mxu0 %vm278_vm5, %v1110_v45 }
 0x168   : > { %v860_v51 = vpop.permute.xlu2 %859 }
 0x170   : > { %v862_v62 = vpop.permute.xlu2 %861 }
 0x171   : > { %v866_v63 = vsel %vm863_vm13, %v860_v51, %v862_v62 }
 0x172   : > { %v877_v11 = vsel %vm282_vm4, %v866_v63, 0 }
 0x18d   : > { %v949_v40 = vpop.permute.xlu2 %948 }
 0x190   : > { %v778_v53 = vpop.permute.xlu0 %777 }
 0x191   : > { %v780_v55 = vpop.permute.xlu1 %779 }
 0x192   : > { %v786_v56 = vsel %vm785_vm12, %v778_v53, %v780_v55 }
 0x193   : > { %v793_v59 = vsel %vm282_vm4, %v786_v56, 0 }
 0x194   : > { %808 = vmatpush.bf16.msra.mxu2 %v793_v59 }
 0x197   : > { %1115 = vmatmul.msk.bf16.vlgmr.msra.gmra.mxu2 %vm278_vm5, %v1114_v61 }
 0x198   : > { %v782_v4 = vpop.permute.xlu0 %781  ;;  %v458_v21 = vpop.f32.mrf.mxu2 }
 0x199   : > { %v787_v12 = vsel %vm785_vm12, %v780_v55, %v782_v4  ;;  %v858_v13 = vpop.permute.xlu1 %857  ;;  %v488_v33 = vadd.f32 %v458_v21, %v353_v0  ;;  %v484_v30 = vpop.f32.mrf.mxu0 }
 0x19a   : > { %v796_v14 = vsel %vm282_vm4, %v787_v12, 0  ;;  %v865_v15 = vsel %vm863_vm13, %v858_v13, %v860_v51  ;;  %v490_v31 = vadd.f32 %v484_v30, %v379_v2 }
 0x19b   : > { %v874_v18 = vsel %vm282_vm4, %v865_v15, 0  ;;  %821 = vmatpush.bf16.msra.mxu3 %v796_v14 }
 0x19c   : > { %899 = vmatpush.bf16.msrb.mxu2 %v874_v18 }
 0x19e   : > { %1116 = vmatmul.msk.bf16.vlgmr.msra.gmra.mxu3 %vm278_vm5, %v1114_v61 }
 0x19f   : > { %912 = vmatpush.bf16.msrb.mxu3 %v877_v11  ;;  %v471_v26 = vpop.f32.mrf.mxu3 }
 0x1a0   : > { %v784_v20 = vpop.permute.xlu0 %783  ;;  %v489_v29 = vadd.f32 %v471_v26, %v366_v1  ;;  %v460_v9 = vpop.f32.mrf.mxu2 }
 0x1a1   : > { %v788_v22 = vsel %vm785_vm12, %v782_v4, %v784_v20  ;;  %v856_v23 = vpop.permute.xlu1 %855  ;;  %v486_v39 = vpop.f32.mrf.mxu0 }
 0x1a2   : > { %v799_v24 = vsel %vm282_vm4, %v788_v22, 0  ;;  %v864_v25 = vsel %vm863_vm13, %v856_v23, %v858_v13 }
 0x1a3   : > { %v871_v28 = vsel %vm282_vm4, %v864_v25, 0  ;;  %834 = vmatpush.bf16.msrb.mxu0 %v799_v24 }
 0x1a4   : > { %886 = vmatpush.bf16.msrb.mxu1 %v871_v28 }
 0x1a6   : > { %1117 = vmatmul.msk.bf16.vlgmr.msrb.gmra.mxu0 %vm278_vm5, %v1114_v61 }
 0x1a7   : > { %1119 = vmatmul.msk.bf16.vlgmr.msrb.gmra.mxu1 %vm278_vm5, %v1118_v8  ;;  %1120 = vmatmul.msk.bf16.vlgmr.msrb.gmra.mxu2 %vm278_vm5, %v1118_v8  ;;  %v473_v35 = vpop.f32.mrf.mxu3 }
 0x1a8   : > { %v953_v7 = vpop.permute.xlu0 %952  ;;  %v565_v42 = vpop.f32.mrf.mxu2 }
 0x1a9   : > { %v955_v10 = vpop.permute.xlu1 %954  ;;  %v583_v45 = vadd.f32 %v565_v42, %v489_v29 }
 0x1aa   : > { %v959_v32 = vsel %vm956_vm14, %v953_v7, %v955_v10  ;;  %v552_v34 = vpop.f32.mrf.mxu1 }
 0x1ab   : > { %v970_v36 = vsel %vm282_vm4, %v959_v32, 0  ;;  %v582_v37 = vadd.f32 %v552_v34, %v488_v33 }
 0x1ac   : > { %1005 = vmatpush.bf16.msra.mxu2 %v970_v36 }
 0x1ae   : > { %1121 = vmatmul.msk.bf16.vlgmr.msrb.gmra.mxu3 %vm278_vm5, %v1118_v8 }
 0x1af   : > { %v578_v27 = vpop.f32.mrf.mxu3 }
 0x1b0   : > { %v951_v41 = vpop.permute.xlu0 %950  ;;  %v584_v49 = vadd.f32 %v578_v27, %v490_v31  ;;  %v567_v52 = vpop.f32.mrf.mxu2 }
 0x1b1   : > { %v957_v43 = vsel %vm956_vm14, %v949_v40, %v951_v41  ;;  %v958_v44 = vsel %vm956_vm14, %v951_v41, %v953_v7  ;;  %v1018_v25 = vpop.permute.xlu1 %1017 }
 0x1b2   : > { %v964_v38 = vsel %vm282_vm4, %v957_v43, 0  ;;  %v967_v46 = vsel %vm282_vm4, %v958_v44, 0  ;;  %v554_v47 = vpop.f32.mrf.mxu1  ;;  %v625_v50 = vpop.f32.mrf.mxu0 }
 0x1b3   : > { %979 = vmatpush.bf16.msra.mxu0 %v964_v38  ;;  %992 = vmatpush.bf16.msra.mxu1 %v967_v46  ;;  %v655_v51 = vadd.f32 %v625_v50, %v582_v37 }
 0x1b6   : > { %1123 = vmatmul.msk.bf16.vlgmr.msra.gmra.mxu0 %vm278_vm5, %v1122_v48 }
 0x1b7   : > { %1124 = vmatmul.msk.bf16.vlgmr.msra.gmra.mxu1 %vm278_vm5, %v1122_v48  ;;  %1125 = vmatmul.msk.bf16.vlgmr.msra.gmra.mxu2 %vm278_vm5, %v1122_v48  ;;  %v580_v54 = vpop.f32.mrf.mxu3 }
 0x1b8   : > { %v651_v57 = vpop.f32.mrf.mxu2 }
 0x1b9   : > { %v657_v58 = vadd.f32 %v651_v57, %v584_v49 }
 0x1ba   : > { %v638_v53 = vpop.f32.mrf.mxu1  ;;  %v627_v56 = vpop.f32.mrf.mxu0 }
 0x1bb   : > { %v656_v55 = vadd.f32 %v638_v53, %v583_v45 }
 0x1c0   : > { %v711_v60 = vpop.f32.mrf.mxu3  ;;  %v653_v62 = vpop.f32.mrf.mxu2 }
 0x1c1   : > { %v741_v61 = vadd.f32 %v711_v60, %v655_v51 }
 0x1c2   : > { %v640_v59 = vpop.f32.mrf.mxu1 }
 0x1c8   : > { %v713_v63 = vpop.f32.mrf.mxu3 }
 0x1e2   : > { %v737_v0 = vpop.f32.mrf.mxu1 }
 0x1e3   : > { %v724_v1 = vpop.f32.mrf.mxu0  ;;  %v743_v2 = vadd.f32 %v737_v0, %v657_v58 }
 0x1e4   : > { %v742_v3 = vadd.f32 %v724_v1, %v656_v55 }
 0x1ea   : > { %v739_v4 = vpop.f32.mrf.mxu1 }
 0x1eb   : > { %v726_v5 = vpop.f32.mrf.mxu0 }
 0x21a   : > { %v810_v6 = vpop.f32.mrf.mxu2 }
 0x21b   : > { %v840_v19 = vadd.f32 %v810_v6, %v741_v61 }
 0x221   : > { %v823_v11 = vpop.f32.mrf.mxu3 }
 0x222   : > { %v812_v12 = vpop.f32.mrf.mxu2  ;;  %v841_v20 = vadd.f32 %v823_v11, %v742_v3 }
 0x223   : > { %v836_v13 = vpop.f32.mrf.mxu0 }
 0x224   : > { %v888_v14 = vpop.f32.mrf.mxu1  ;;  %v842_v8 = vadd.f32 %v836_v13, %v743_v2 }
 0x225   : > { %v918_v22 = vadd.f32 %v888_v14, %v840_v19 }
 0x229   : > { %v825_v15 = vpop.f32.mrf.mxu3 }
 0x22a   : > { %v901_v16 = vpop.f32.mrf.mxu2 }
 0x22b   : > { %v838_v17 = vpop.f32.mrf.mxu0  ;;  %v919_v33 = vadd.f32 %v901_v16, %v841_v20 }
 0x22c   : > { %v890_v18 = vpop.f32.mrf.mxu1 }
 0x231   : > { %v914_v21 = vpop.f32.mrf.mxu3 }
 0x232   : > { %v903_v23 = vpop.f32.mrf.mxu2  ;;  %v920_v7 = vadd.f32 %v914_v21, %v842_v8 }
 0x233   : > { %v981_v24 = vpop.f32.mrf.mxu0 }
 0x234   : > { %v1011_v26 = vadd.f32 %v981_v24, %v918_v22  ;;  %v994_v28 = vpop.f32.mrf.mxu1 }
 0x235   : > { %v1012_v29 = vadd.f32 %v994_v28, %v919_v33 }
 0x236   : > { %v1020_v30 = vadd.f32 %v1018_v25, %v1011_v26 }
 0x237   : > { %v1021_v31 = vadd.f32 %v1018_v25, %v1012_v29 }
 0x239   : > { %v1023_v9 = vpack.c.bf16 %v1021_v31, %v1020_v30  ;;  %v916_v10 = vpop.f32.mrf.mxu3 }
 0x23a   : > { %v1007_v32 = vpop.f32.mrf.mxu2 }
 0x23b   : > { %1025 = vst [vmem:[%s224_s16] sm:$0xff] %v1023_v9  ;;  %v1013_v34 = vadd.f32 %v1007_v32, %v920_v7  ;;  %v983_v35 = vpop.f32.mrf.mxu0 }
 0x23c   : > { %v996_v36 = vpop.f32.mrf.mxu1 }
 0x23d   : > { %v1022_v37 = vadd.f32 %v1018_v25, %v1013_v34 }
 0x23f   : > { %v1024_v39 = vpack.c.bf16 %v1022_v37, %v1022_v37 }
 0x241   : > { %1027 = vst.msk [vmem:[%s224_s16 + $0x8] sm:$0xf] %vm1026_vm15, %v1024_v39 }
 0x242   : > { %v1009_v40 = vpop.f32.mrf.mxu2 }
 0x243 PF: > { %s15_s18 = sadd.s32 1, %s1185_s18  }
 0x244   : > { %p12_p4 = scmp.ge.s32.totalorder %s15_s18, 4  }
 0x246   :  { %14 = sbr.rel (!%p12_p4) target bundleno = 1 (0x1), region = 78 }

// kernel: dwt_upsampler_forward.12
= control target key start
LH: loop header
LB: loop body
LE: loop exit
PB: predicated region body
PF: predicated region fallthrough
CT: control target
= control target key end

     0   :  { %s1248_s18 = smov 0   ;;  %s1478_s0 = inlined_call_operand.vmem [shape: bf16[2,8,401], index: 0, kind: input, shape index: {}]   ;;  %s1479_s1 = inlined_call_operand.vmem [shape: bf16[9,4,8], index: 1, kind: input, shape index: {}]   ;;  %s1480_s2 = inlined_call_operand.vmem [shape: f32[4,1], index: 2, kind: input, shape index: {}]   ;;  %s1481_s3 = inlined_call_operand.vmem [shape: bf16[1,361], index: 3, kind: input, shape index: {}]   ;;  %s1482_s4 = inlined_call_operand.vmem [shape: bf16[1,361], index: 4, kind: input, shape index: {}]   ;;  %s1483_s5 = inlined_call_operand.vmem [shape: bf16[2,4,361], index: 5, kind: output, shape index: {}]  }
   0x1 LB: > { %s1100_s19 = sadd.s32 4294967295, %s1202_s18   ;;  %p1104_p0 = scmp.ge.s32.totalorder %s1202_s18, 1  ;;  %s1202_s18 = sphi %s1248_s18, %s15_s18  }
   0x2   : > { %p187_p1 = scmp.lt.s32.totalorder %s1202_s18, 3 }
   0x4   : > { %p188_p2 = pnand %p1104_p0, %p187_p1 }
   0x5   : > { %p215_p3 = scmp.lt.s32.totalorder (!%p188_p2), %s1100_s19, 1  ;;  %s1204_s28 = smov (!%p188_p2), 19  }
   0x6   : > { %191 = sbr.rel (%p188_p2) target bundleno = 582 (0x246), region = 40  ;;  %s1205_s29 = smov (!%p188_p2), 127  }
   0x7   : > { %s1206_s30 = smov (!%p188_p2), 2   ;;  %s1207_s6 = smov (!%p188_p2), 21  }
   0x8   : > { %s1208_s7 = smov (!%p188_p2), 126   ;;  %s1209_s8 = smov (!%p188_p2), 38  }
   0x9   : > { %s1210_s9 = smov (!%p188_p2), 109   ;;  %s1211_s10 = smov (!%p188_p2), 40  }
   0xa   : > { %s1212_s11 = smov (!%p188_p2), 108   ;;  %s1213_s12 = smov (!%p188_p2), 107  }
   0xb   : > { %v226_v0 = vld [vmem:[%s1481_s3] sm:$0x7]  ;;  %s1485_s19 = smov (!%p215_p3, %s1100_s19), 1  ;;  %vm411_vm0 = vcmask 15360   ;;  %vm505_vm1 = vcmask 154624   ;;  %vm664_vm2 = vcmask 171008  }
   0xc   : > { %231 = vst [vmem:[#allocation1] ss:$9 sm:$0xff] %v226_v0  ;;  %v227_v1 = vld [vmem:[%s1482_s4] sm:$0x7]  ;;  %s1145_s24 = sshll.u32 %s1485_s19, 4  ;;  %vm275_vm3 = vcmask 1039360  }
   0xd   : > { %s1280_s27 = scalar_lea.vmem %s1478_s0, %s1145_s24  ;;  %vm282_vm4 = vcmask 1043456   ;;  %vm278_vm5 = vcmask 64512   ;;  %vm434_vm6 = vcmask 1031168   ;;  %s1214_s17 = smov 89   ;;  %vm756_vm7 = vcmask 310272  }
   0xe   : > { %v258_v18 = vld [vmem:[%s1280_s27 + $0x8] sm:$0xf]  ;;  %v257_v31 = vld [vmem:[%s1280_s27] sm:$0xff]  ;;  %s1215_s22 = smov 90   ;;  %vm528_vm8 = vcmask 891904   ;;  %vm927_vm9 = vcmask 326656  }
   0xf   : > { %v265_v20 = vunpack.c.l.b16 %v258_v18  ;;  %v264_v32 = vunpack.c.h.b16 %v257_v31  ;;  %v263_v34 = vunpack.c.l.b16 %v257_v31  ;;  %v1305_v36 = vunpack.c.l.bf16 %v257_v31  ;;  %v1314_v52 = vld [vmem:[%s1280_s27 + $0x8] sm:$0xf]  ;;  %s1146_s13 = smul.u32 6, %s1485_s19 }
  0x10   : > { %v1307_v38 = vunpack.c.h.bf16 %v257_v31  ;;  %v398_v45 = vunpack.c.l.bf16 %v258_v18  ;;  %v495_v56 = vunpack.c.l.bf16 %v1314_v52  ;;  %vm601_vm10 = vcmask 883712  }
  0x11   : > { %v268_v23 = vpack.c.b16 %v265_v20, %v265_v20  ;;  %v1298_v33 = vpack.c.b16 %v264_v32, %v264_v32  ;;  %v1302_v35 = vpack.c.b16 %v263_v34, %v263_v34  ;;  %v229_v34 = vld [vmem:[%s1280_s27 + $0x8] sm:$0xf]  ;;  %vm687_vm11 = vcmask 875520   ;;  %s224_s16 = scalar_lea.vmem %s1483_s5, %s1146_s13 }
  0x12   : > { %vm785_vm12 = vcmask 736256   ;;  %vm863_vm13 = vcmask 728064   ;;  %vm956_vm14 = vcmask 719872   ;;  %vm1040_vm15 = vcmask 1043458  }
  0x13   : > { %v232_v2 = vld [vmem:[#allocation1] sm:$0xff]  ;;  %v233_v3 = vld [vmem:[#allocation1 + $0x9] sm:$0xff]  ;;  %v234_v4 = vld [vmem:[#allocation1 + $0x12] sm:$0xff]  ;;  %273 = vrot.lane.b32.xlu2 %v268_v23, %s1205_s29 }
  0x14   : > { %383 = vst [vmem:[#allocation1] ss:$9 sm:$0xff] %v227_v1  ;;  %v235_v5 = vpack.i.b16 %v232_v2, %v232_v2  ;;  %v238_v6 = vpack.i.b16 %v233_v3, %v233_v3  ;;  %v241_v11 = vpack.i.b16 %v234_v4, %v234_v4 }
  0x16   : > { %v1264_v7 = vperm.slane %v235_v5, 0  ;;  %v1266_v8 = vperm.slane %v238_v6, 0  ;;  %v243_v17 = vperm.slane %v241_v11, 0  ;;  %v591_v11 = vunpack.c.l.b16 %v1314_v52 }
  0x18   : > { %v247_v9 = vunpack.c.l.bf16 %v1264_v7  ;;  %v248_v10 = vunpack.c.l.bf16 %v1266_v8  ;;  %v1290_v27 = vunpack.c.l.bf16 %v243_v17 }
  0x1a   : > { %v1275_v12 = vpack.i.bf16 %v248_v10, %v247_v9 }
  0x1b   : > { %v384_v13 = vld [vmem:[#allocation1] sm:$0xff]  ;;  %v385_v14 = vld [vmem:[#allocation1 + $0x9] sm:$0xff]  ;;  %v386_v19 = vld [vmem:[#allocation1 + $0x12] sm:$0xff]  ;;  %269 = vrot.lane.b32.xlu2 %v1302_v35, %s1205_s29 }
  0x1c   : > { %v387_v15 = vpack.i.b16 %v384_v13, %v384_v13  ;;  %v390_v16 = vpack.i.b16 %v385_v14, %v385_v14  ;;  %1175 = vrot.lane.b32.xlu1 %v1275_v12, %s1204_s28  ;;  %v393_v26 = vpack.i.b16 %v386_v19, %v386_v19 }
  0x1e   : > { %v1284_v21 = vperm.slane %v387_v15, 0  ;;  %v1286_v22 = vperm.slane %v390_v16, 0  ;;  %v395_v29 = vperm.slane %v393_v26, 0 }
  0x20   : > { %v399_v24 = vunpack.c.l.bf16 %v1284_v21  ;;  %v400_v25 = vunpack.c.l.bf16 %v1286_v22  ;;  %v401_v30 = vunpack.c.l.bf16 %v395_v29 }
  0x22   : > { %v1169_v28 = vpack.i.bf16 %v400_v25, %v399_v24  ;;  %v1189_v1 = vpack.i.bf16 %v401_v30, %v400_v25  ;;  %v250_v25 = vmul.f32 %v1305_v36, %v247_v9 }
  0x24   : > { %1170 = vrot.lane.b32.xlu0 %v1169_v28, %s1206_s30  ;;  %503 = vrot.lane.b32.xlu1 %v1290_v27, %s1204_s28 }
  0x2c   : > { %409 = vrot.lane.b32.xlu0 %v401_v30, %s1206_s30 }
  0x34   : > { %271 = vrot.lane.b32.xlu0 %v1298_v33, %s1205_s29 }
  0x3c   : > { %1180 = vrot.lane.b32.xlu0 %v1169_v28, %s1207_s6  ;;  %v253_v28 = vpack.c.bf16 %v250_v25, %v250_v25 }
  0x3e   : > { %v335_v8 = vsel %vm282_vm4, %v253_v28, 0 }
  0x3f   : > { %350 = vmatpush.bf16.msra.mxu3 %v335_v8 }
  0x6d   : > { %v274_v13 = vpop.permute.xlu2 %273 }
  0x6e   : > { %v290_v23 = vsel %vm282_vm4, %v274_v13, 0 }
  0x6f   : > { %325 = vmatpush.bf16.msra.mxu2 %v290_v23  ;;  %v1119_v23 = vld [vmem:[%s1479_s1 + $0x6] sm:$0x3] }
  0x75   : > { %v270_v15 = vpop.permute.xlu2 %269 }
  0x8e   : > { %v1176_v47 = vpop.permute.xlu1 %1175 }
  0x8f   : > { %v1178_v49 = vunpack.i.h.bf16 %v1176_v47  ;;  %v1177_v50 = vunpack.i.l.bf16 %v1176_v47 }
  0x91   : > { %v506_v55 = vsel %vm505_vm1, %v1177_v50, %v1178_v49  ;;  %v511_v0 = vmul.f32 %v1177_v50, %v1305_v36 }
  0x92   : > { %v512_v58 = vmul.f32 %v506_v55, %v1307_v38 }
  0x93   : > { %v514_v2 = vpack.c.bf16 %v511_v0, %v511_v0 }
  0x94   : > { %v515_v61 = vpack.c.bf16 %v512_v58, %v512_v58 }
  0x96   : > { %v1171_v37 = vpop.permute.xlu0 %1170  ;;  %v504_v57 = vpop.permute.xlu1 %503 }
  0x97   : > { %v1173_v39 = vunpack.i.h.bf16 %v1171_v37  ;;  %v1172_v40 = vunpack.i.l.bf16 %v1171_v37  ;;  %v507_v59 = vsel %vm505_vm1, %v1178_v49, %v504_v57  ;;  %v246_v37 = vunpack.c.l.bf16 %v229_v34 }
  0x98   : > { %v513_v60 = vmul.f32 %v507_v59, %v495_v56 }
  0x99   : > { %v417_v41 = vmul.f32 %v1172_v40, %v1305_v36  ;;  %v412_v42 = vsel %vm411_vm0, %v1172_v40, %v1173_v39  ;;  %v1360_v40 = vld [vmem:[%s1280_s27 + $0x8] sm:$0xff]  ;;  %s1216_s27 = smov 88  }
  0x9a   : > { %v418_v43 = vmul.f32 %v412_v42, %v1307_v38  ;;  %v516_v62 = vpack.c.bf16 %v513_v60, %v513_v60  ;;  %v850_v52 = vunpack.c.h.b16 %v1360_v40 }
  0x9b   : > { %v420_v44 = vpack.c.bf16 %v417_v41, %v417_v41  ;;  %v256_v41 = vld [vmem:[%s1479_s1] sm:$0x3] }
  0x9c   : > { %v421_v46 = vpack.c.bf16 %v418_v43, %v418_v43  ;;  %v849_v43 = vunpack.c.l.b16 %v1360_v40  ;;  %1112 = vmatmul.msk.bf16.vlgmr.msra.gmra.mxu3 %vm278_vm5, %v256_v41 }
  0x9d   : > { %428 = vrot.lane.b32.xlu1 %v420_v44, %s1208_s7 }
  0x9e   : > { %v410_v48 = vpop.permute.xlu0 %409  ;;  %430 = vrot.lane.b32.xlu2 %v421_v46, %s1208_s7  ;;  %v853_v47 = vpack.c.b16 %v849_v43, %v849_v43 }
  0x9f   : > { %v413_v51 = vsel %vm411_vm0, %v1173_v39, %v410_v48  ;;  %v252_v39 = vmul.f32 %v1290_v27, %v246_v37  ;;  %vm1030_vm0 = vcmask 1041408  }
  0xa0   : > { %v419_v53 = vmul.f32 %v413_v51, %v398_v45  ;;  %vm1041_vm1 = vmor %vm1040_vm15, %vm1030_vm0 }
  0xa1   : > { %v255_v44 = vpack.c.bf16 %v252_v39, %v252_v39 }
  0xa2   : > { %v422_v54 = vpack.c.bf16 %v419_v53, %v419_v53 }
  0xa4   : > { %432 = vrot.lane.b32.xlu0 %v422_v54, %s1208_s7 }
  0xa5   : > { %1185 = vrot.lane.b32.xlu1 %v1275_v12, %s1209_s8  ;;  %v594_v12 = vpack.c.b16 %v591_v11, %v591_v11 }
  0xa6   : > { %662 = vrot.lane.b32.xlu2 %v401_v30, %s1207_s6  ;;  %v272_v63 = vpop.permute.xlu0 %271  ;;  %v1108_v30 = vld [vmem:[%s1479_s1 + $0x2] sm:$0x3] }
  0xa7   : > { %v276_v17 = vsel %vm275_vm3, %v270_v15, %v272_v63  ;;  %v277_v18 = vsel %vm275_vm3, %v272_v63, %v274_v13  ;;  %1111 = vmatmul.msk.bf16.vlgmr.msra.gmra.mxu2 %vm278_vm5, %v1108_v30  ;;  %vm1034_vm3 = vcmask 1045508  }
  0xa8   : > { %v284_v20 = vsel %vm282_vm4, %v276_v17, 0  ;;  %v287_v21 = vsel %vm282_vm4, %v277_v18, 0 }
  0xa9   : > { %299 = vmatpush.bf16.msra.mxu0 %v284_v20  ;;  %312 = vmatpush.bf16.msra.mxu1 %v287_v21 }
  0xac   : > { %754 = vrot.lane.b32.xlu0 %v1290_v27, %s1209_s8  ;;  %1109 = vmatmul.msk.bf16.vlgmr.msra.gmra.mxu0 %vm278_vm5, %v1108_v30  ;;  %v341_v27 = vsel %vm282_vm4, %v255_v44, 0 }
  0xad   : > { %524 = vrot.lane.b32.xlu1 %v515_v61, %s1210_s9  ;;  %1110 = vmatmul.msk.bf16.vlgmr.msra.gmra.mxu1 %vm278_vm5, %v1108_v30  ;;  %v748_v61 = vunpack.c.l.bf16 %v1360_v40 }
  0xae   : > { %526 = vrot.lane.b32.xlu2 %v516_v62, %s1210_s9  ;;  %v1181_v3 = vpop.permute.xlu0 %1180  ;;  %376 = vmatpush.bf16.msrb.mxu1 %v341_v27  ;;  %v1115_v62 = vld [vmem:[%s1479_s1 + $0x4] sm:$0x3] }
  0xaf   : > { %v1182_v4 = vunpack.i.l.bf16 %v1181_v3  ;;  %v1183_v14 = vunpack.i.h.bf16 %v1181_v3 }
  0xb1   : > { %v670_v5 = vmul.f32 %v1182_v4, %v1305_v36  ;;  %v665_v16 = vsel %vm664_vm2, %v1182_v4, %v1183_v14 }
  0xb2   : > { %v671_v19 = vmul.f32 %v665_v16, %v1307_v38 }
  0xb3   : > { %v673_v6 = vpack.c.bf16 %v670_v5, %v670_v5 }
  0xb4   : > { %1190 = vrot.lane.b32.xlu0 %v1189_v1, %s1211_s10  ;;  %v674_v22 = vpack.c.bf16 %v671_v19, %v671_v19 }
  0xb5   : > { %522 = vrot.lane.b32.xlu1 %v514_v2, %s1210_s9 }
  0xb6   : > { %599 = vrot.lane.b32.xlu2 %v594_v12, %s1212_s11  ;;  %v749_v12 = vunpack.c.h.bf16 %v1360_v40 }
  0xbc   : > { %921 = vrot.lane.b32.xlu0 %v399_v24, %s1211_s10  ;;  %v251_v24 = vmul.f32 %v1307_v38, %v248_v10 }
  0xbd   : > { %595 = vrot.lane.b32.xlu1 %v1302_v35, %s1212_s11  ;;  %1114 = vmatmul.msk.bf16.vlgmr.msrb.gmra.mxu1 %vm278_vm5, %v256_v41 }
  0xbe   : > { %597 = vrot.lane.b32.xlu2 %v1298_v33, %s1212_s11  ;;  %v254_v26 = vpack.c.bf16 %v251_v24, %v251_v24 }
  0xc0   : > { %v338_v29 = vsel %vm282_vm4, %v254_v26, 0 }
  0xc1   : > { %363 = vmatpush.bf16.msrb.mxu0 %v338_v29 }
  0xc4   : > { %1113 = vmatmul.msk.bf16.vlgmr.msrb.gmra.mxu0 %vm278_vm5, %v256_v41 }
  0xc5   : > { %681 = vrot.lane.b32.xlu1 %v673_v6, %s1213_s12 }
  0xc6   : > { %683 = vrot.lane.b32.xlu2 %v674_v22, %s1213_s12 }
  0xf8   : > { %v431_v31 = vpop.permute.xlu2 %430 }
 0x100   : > { %v663_v7 = vpop.permute.xlu2 %662 }
 0x101   : > { %v666_v9 = vsel %vm664_vm2, %v1183_v14, %v663_v7  ;;  %vm1042_vm2 = vcmask 857092  }
 0x102   : > { %v672_v10 = vmul.f32 %v666_v9, %v495_v56  ;;  %v854_v56 = vpack.c.b16 %v850_v52, %v850_v52 }
 0x104   : > { %v675_v32 = vpack.c.bf16 %v672_v10, %v672_v10 }
 0x106   : > { %685 = vrot.lane.b32.xlu2 %v675_v32, %s1213_s12 }
 0x108   : > { %v527_v1 = vpop.permute.xlu2 %526 }
 0x109   : > { %v541_v4 = vsel %vm282_vm4, %v527_v1, 0 }
 0x10e   : > { %859 = vrot.lane.b32.xlu2 %v853_v47, %s1214_s17 }
 0x10f   : > { %v429_v42 = vpop.permute.xlu1 %428 }
 0x110   : > { %v435_v45 = vsel %vm434_vm6, %v429_v42, %v431_v31  ;;  %v600_v18 = vpop.permute.xlu2 %599 }
 0x111   : > { %v441_v46 = vsel %vm282_vm4, %v435_v45, 0  ;;  %v614_v21 = vsel %vm282_vm4, %v600_v18, 0  ;;  %v1127_v45 = vld [vmem:[%s1479_s1 + $0xa] sm:$0x3] }
 0x112   : > { %456 = vmatpush.bf16.msrb.mxu2 %v441_v46 }
 0x115   : > { %1116 = vmatmul.msk.bf16.vlgmr.msrb.gmra.mxu2 %vm278_vm5, %v1115_v62 }
 0x116   : > { %v433_v48 = vpop.permute.xlu0 %432  ;;  %861 = vrot.lane.b32.xlu2 %v854_v56, %s1214_s17 }
 0x117   : > { %v447_v49 = vsel %vm282_vm4, %v433_v48, 0  ;;  %v1186_v50 = vpop.permute.xlu1 %1185  ;;  %v436_v51 = vsel %vm434_vm6, %v431_v31, %v433_v48 }
 0x118   : > { %v1188_v53 = vunpack.i.h.bf16 %v1186_v50  ;;  %v1187_v54 = vunpack.i.l.bf16 %v1186_v50  ;;  %482 = vmatpush.bf16.msra.mxu0 %v447_v49  ;;  %v444_v55 = vsel %vm282_vm4, %v436_v51, 0  ;;  %v598_v8 = vpop.permute.xlu2 %597 }
 0x119   : > { %469 = vmatpush.bf16.msrb.mxu3 %v444_v55  ;;  %v603_v7 = vsel %vm601_vm10, %v598_v8, %v600_v18 }
 0x11a   : > { %v763_v57 = vmul.f32 %v1187_v54, %v1305_v36  ;;  %v757_v58 = vsel %vm756_vm7, %v1187_v54, %v1188_v53  ;;  %v611_v32 = vsel %vm282_vm4, %v603_v7, 0 }
 0x11b   : > { %v764_v59 = vmul.f32 %v757_v58, %v1307_v38  ;;  %1118 = vmatmul.msk.bf16.vlgmr.msra.gmra.mxu0 %vm278_vm5, %v1115_v62 }
 0x11c   : > { %v767_v60 = vpack.c.bf16 %v763_v57, %v763_v57  ;;  %1117 = vmatmul.msk.bf16.vlgmr.msrb.gmra.mxu3 %vm278_vm5, %v1115_v62 }
 0x11d   : > { %v768_v63 = vpack.c.bf16 %v764_v59, %v764_v59  ;;  %576 = vmatpush.bf16.msra.mxu3 %v541_v4 }
 0x11e   : > { %777 = vrot.lane.b32.xlu0 %v767_v60, %s1215_s22  ;;  %v755_v0 = vpop.permute.xlu0 %754 }
 0x11f   : > { %v758_v2 = vsel %vm756_vm7, %v1188_v53, %v755_v0  ;;  %779 = vrot.lane.b32.xlu1 %v768_v63, %s1215_s22  ;;  %v525_v3 = vpop.permute.xlu1 %524  ;;  %v766_v19 = vmul.f32 %v755_v0, %v749_v12  ;;  %v352_v57 = vpop.f32.mrf.mxu3 }
 0x120   : > { %v765_v5 = vmul.f32 %v758_v2, %v748_v61  ;;  %v530_v6 = vsel %vm528_vm8, %v525_v3, %v527_v1  ;;  %v684_v41 = vpop.permute.xlu2 %683 }
 0x121   : > { %v538_v11 = vsel %vm282_vm4, %v530_v6, 0  ;;  %v770_v24 = vpack.c.bf16 %v766_v19, %v766_v19 }
 0x122   : > { %563 = vmatpush.bf16.msra.mxu2 %v538_v11  ;;  %v769_v13 = vpack.c.bf16 %v765_v5, %v765_v5  ;;  %v1217_v5 = vmov 0  }
 0x123   : > { %1194 = vset.pattern.permute.xlu1 %v1217_v5  ;;  %1195 = vset.pattern.permute.xlu0 %v1217_v5 }
 0x125   : > { %1121 = vmatmul.msk.bf16.vlgmr.msra.gmra.mxu2 %vm278_vm5, %v1119_v23 }
 0x126   : > { %781 = vrot.lane.b32.xlu0 %v769_v13, %s1215_s22  ;;  %v1191_v14 = vpop.permute.xlu0 %1190  ;;  %649 = vmatpush.bf16.msrb.mxu2 %v614_v21 }
 0x127   : > { %857 = vrot.lane.b32.xlu1 %v1298_v33, %s1214_s17  ;;  %v1193_v15 = vunpack.i.h.bf16 %v1191_v14  ;;  %v1192_v16 = vunpack.i.l.bf16 %v1191_v14  ;;  %v523_v17 = vpop.permute.xlu1 %522 }
 0x128   : > { %v529_v20 = vsel %vm528_vm8, %v523_v17, %v525_v3  ;;  %v1014_v3 = vld [vmem:[%s1480_s2] sm:$0xf] }
 0x129   : > { %v535_v22 = vsel %vm282_vm4, %v529_v20, 0  ;;  %v929_v33 = vsel %vm927_vm9, %v1192_v16, %v1193_v15  ;;  %v937_v28 = vmul.f32 %v1193_v15, %v749_v12  ;;  %v301_v49 = vpop.f32.mrf.mxu0 }
 0x12a   : > { %550 = vmatpush.bf16.msra.mxu1 %v535_v22  ;;  %v936_v25 = vmul.f32 %v929_v33, %v748_v61  ;;  %v314_v48 = vpop.f32.mrf.mxu1  ;;  %v327_v54 = vpop.f32.mrf.mxu2  ;;  %v1131_v61 = vld [vmem:[%s1479_s1 + $0xc] sm:$0x3]  ;;  %v353_v0 = vadd.f32 %v352_v57, %v301_v49 }
 0x12b   : > { %v941_v37 = vpack.c.bf16 %v937_v28, %v937_v28 }
 0x12c   : > { %1122 = vmatmul.msk.bf16.vlgmr.msra.gmra.mxu3 %vm278_vm5, %v1119_v23  ;;  %v940_v34 = vpack.c.bf16 %v936_v25, %v936_v25 }
 0x12d   : > { %1120 = vmatmul.msk.bf16.vlgmr.msra.gmra.mxu1 %vm278_vm5, %v1119_v23 }
 0x12e   : > { %783 = vrot.lane.b32.xlu0 %v770_v24, %s1215_s22  ;;  %v922_v26 = vpop.permute.xlu0 %921  ;;  %636 = vmatpush.bf16.msrb.mxu1 %v611_v32 }
 0x12f   : > { %855 = vrot.lane.b32.xlu1 %v1302_v35, %s1214_s17  ;;  %v934_v29 = vmul.f32 %v922_v26, %v1305_v36  ;;  %v596_v30 = vpop.permute.xlu1 %595  ;;  %v1123_v35 = vld [vmem:[%s1479_s1 + $0x8] sm:$0x3]  ;;  %v928_v36 = vsel %vm927_vm9, %v922_v26, %v1192_v16  ;;  %v354_v16 = vpop.f32.mrf.mxu3 }
 0x130   : > { %v602_v31 = vsel %vm601_vm10, %v596_v30, %v598_v8  ;;  %v935_v39 = vmul.f32 %v928_v36, %v1307_v38  ;;  %v1135_v8 = vld [vmem:[%s1479_s1 + $0xe] sm:$0x3] }
 0x131   : > { %v938_v9 = vpack.c.bf16 %v934_v29, %v934_v29  ;;  %v608_v10 = vsel %vm282_vm4, %v602_v31, 0  ;;  %v303_v52 = vpop.f32.mrf.mxu0 }
 0x132   : > { %623 = vmatpush.bf16.msrb.mxu0 %v608_v10  ;;  %v939_v43 = vpack.c.bf16 %v935_v39, %v935_v39  ;;  %v316_v50 = vpop.f32.mrf.mxu1  ;;  %v329_v6 = vpop.f32.mrf.mxu2 }
 0x133   : > { %948 = vrot.lane.b32.xlu2 %v938_v9, %s1216_s27 }
 0x135   : > { %1124 = vmatmul.msk.bf16.vlgmr.msrb.gmra.mxu0 %vm278_vm5, %v1123_v35  ;;  %1126 = vmatmul.msk.bf16.vlgmr.msrb.gmra.mxu2 %vm278_vm5, %v1123_v35 }
 0x136   : > { %952 = vrot.lane.b32.xlu0 %v940_v34, %s1216_s27 }
 0x137   : > { %954 = vrot.lane.b32.xlu1 %v941_v37, %s1216_s27  ;;  %v682_v40 = vpop.permute.xlu1 %681 }
 0x138   : > { %v688_v42 = vsel %vm687_vm11, %v682_v40, %v684_v41 }
 0x139   : > { %v694_v44 = vsel %vm282_vm4, %v688_v42, 0 }
 0x13a   : > { %709 = vmatpush.bf16.msrb.mxu3 %v694_v44  ;;  %v378_v58 = vpop.f32.mrf.mxu1 }
 0x13b   : > { %v379_v2 = vadd.f32 %v378_v58, %v327_v54 }
 0x13d   : > { %1125 = vmatmul.msk.bf16.vlgmr.msrb.gmra.mxu1 %vm278_vm5, %v1123_v35  ;;  %1128 = vmatmul.msk.bf16.vlgmr.msrb.gmra.mxu3 %vm278_vm5, %v1127_v45 }
 0x13e   : > { %950 = vrot.lane.b32.xlu0 %v939_v43, %s1216_s27 }
 0x13f   : > { %1017 = vperm.xlu1 %1194, %v1014_v3  }
 0x141   : > { %v365_v60 = vpop.f32.mrf.mxu0 }
 0x142   : > { %v366_v1 = vadd.f32 %v365_v60, %v314_v48  ;;  %v380_v17 = vpop.f32.mrf.mxu1  ;;  %v1139_v48 = vld [vmem:[%s1479_s1 + $0x10] sm:$0x3] }
 0x149   : > { %v367_v19 = vpop.f32.mrf.mxu0 }
 0x160   : > { %v686_v38 = vpop.permute.xlu2 %685 }
 0x161   : > { %v689_v46 = vsel %vm687_vm11, %v684_v41, %v686_v38  ;;  %v700_v47 = vsel %vm282_vm4, %v686_v38, 0 }
 0x162   : > { %v697_v27 = vsel %vm282_vm4, %v689_v46, 0  ;;  %735 = vmatpush.bf16.msra.mxu1 %v700_v47 }
 0x163   : > { %722 = vmatpush.bf16.msra.mxu0 %v697_v27 }
 0x165   : > { %1130 = vmatmul.msk.bf16.vlgmr.msra.gmra.mxu1 %vm278_vm5, %v1127_v45 }
 0x166   : > { %1129 = vmatmul.msk.bf16.vlgmr.msra.gmra.mxu0 %vm278_vm5, %v1127_v45 }
 0x168   : > { %v860_v51 = vpop.permute.xlu2 %859 }
 0x170   : > { %v862_v62 = vpop.permute.xlu2 %861 }
 0x171   : > { %v866_v63 = vsel %vm863_vm13, %v860_v51, %v862_v62 }
 0x172   : > { %v877_v11 = vsel %vm282_vm4, %v866_v63, 0 }
 0x18d   : > { %v949_v40 = vpop.permute.xlu2 %948 }
 0x190   : > { %v778_v53 = vpop.permute.xlu0 %777 }
 0x191   : > { %v780_v55 = vpop.permute.xlu1 %779 }
 0x192   : > { %v786_v56 = vsel %vm785_vm12, %v778_v53, %v780_v55 }
 0x193   : > { %v793_v59 = vsel %vm282_vm4, %v786_v56, 0 }
 0x194   : > { %808 = vmatpush.bf16.msra.mxu2 %v793_v59 }
 0x197   : > { %1132 = vmatmul.msk.bf16.vlgmr.msra.gmra.mxu2 %vm278_vm5, %v1131_v61 }
 0x198   : > { %v782_v4 = vpop.permute.xlu0 %781  ;;  %v458_v21 = vpop.f32.mrf.mxu2 }
 0x199   : > { %v787_v12 = vsel %vm785_vm12, %v780_v55, %v782_v4  ;;  %v858_v13 = vpop.permute.xlu1 %857  ;;  %v488_v33 = vadd.f32 %v458_v21, %v353_v0  ;;  %v484_v30 = vpop.f32.mrf.mxu0 }
 0x19a   : > { %v796_v14 = vsel %vm282_vm4, %v787_v12, 0  ;;  %v865_v15 = vsel %vm863_vm13, %v858_v13, %v860_v51  ;;  %v490_v31 = vadd.f32 %v484_v30, %v379_v2 }
 0x19b   : > { %v874_v18 = vsel %vm282_vm4, %v865_v15, 0  ;;  %821 = vmatpush.bf16.msra.mxu3 %v796_v14 }
 0x19c   : > { %899 = vmatpush.bf16.msrb.mxu2 %v874_v18 }
 0x19e   : > { %1133 = vmatmul.msk.bf16.vlgmr.msra.gmra.mxu3 %vm278_vm5, %v1131_v61 }
 0x19f   : > { %912 = vmatpush.bf16.msrb.mxu3 %v877_v11  ;;  %v471_v26 = vpop.f32.mrf.mxu3 }
 0x1a0   : > { %v784_v20 = vpop.permute.xlu0 %783  ;;  %v489_v29 = vadd.f32 %v471_v26, %v366_v1  ;;  %v460_v9 = vpop.f32.mrf.mxu2 }
 0x1a1   : > { %v788_v22 = vsel %vm785_vm12, %v782_v4, %v784_v20  ;;  %v856_v23 = vpop.permute.xlu1 %855  ;;  %v486_v39 = vpop.f32.mrf.mxu0 }
 0x1a2   : > { %v799_v24 = vsel %vm282_vm4, %v788_v22, 0  ;;  %v864_v25 = vsel %vm863_vm13, %v856_v23, %v858_v13 }
 0x1a3   : > { %v871_v28 = vsel %vm282_vm4, %v864_v25, 0  ;;  %834 = vmatpush.bf16.msrb.mxu0 %v799_v24 }
 0x1a4   : > { %886 = vmatpush.bf16.msrb.mxu1 %v871_v28 }
 0x1a6   : > { %1134 = vmatmul.msk.bf16.vlgmr.msrb.gmra.mxu0 %vm278_vm5, %v1131_v61 }
 0x1a7   : > { %1136 = vmatmul.msk.bf16.vlgmr.msrb.gmra.mxu1 %vm278_vm5, %v1135_v8  ;;  %1137 = vmatmul.msk.bf16.vlgmr.msrb.gmra.mxu2 %vm278_vm5, %v1135_v8  ;;  %v473_v35 = vpop.f32.mrf.mxu3 }
 0x1a8   : > { %v953_v7 = vpop.permute.xlu0 %952  ;;  %v565_v42 = vpop.f32.mrf.mxu2 }
 0x1a9   : > { %v955_v10 = vpop.permute.xlu1 %954  ;;  %v583_v45 = vadd.f32 %v565_v42, %v489_v29 }
 0x1aa   : > { %v959_v32 = vsel %vm956_vm14, %v953_v7, %v955_v10  ;;  %v552_v34 = vpop.f32.mrf.mxu1 }
 0x1ab   : > { %v970_v36 = vsel %vm282_vm4, %v959_v32, 0  ;;  %v582_v37 = vadd.f32 %v552_v34, %v488_v33 }
 0x1ac   : > { %1005 = vmatpush.bf16.msra.mxu2 %v970_v36 }
 0x1ae   : > { %1138 = vmatmul.msk.bf16.vlgmr.msrb.gmra.mxu3 %vm278_vm5, %v1135_v8 }
 0x1af   : > { %v578_v27 = vpop.f32.mrf.mxu3 }
 0x1b0   : > { %v951_v41 = vpop.permute.xlu0 %950  ;;  %v584_v49 = vadd.f32 %v578_v27, %v490_v31  ;;  %v567_v52 = vpop.f32.mrf.mxu2 }
 0x1b1   : > { %v957_v43 = vsel %vm956_vm14, %v949_v40, %v951_v41  ;;  %v958_v44 = vsel %vm956_vm14, %v951_v41, %v953_v7  ;;  %v1018_v25 = vpop.permute.xlu1 %1017 }
 0x1b2   : > { %v964_v38 = vsel %vm282_vm4, %v957_v43, 0  ;;  %v967_v46 = vsel %vm282_vm4, %v958_v44, 0  ;;  %v554_v47 = vpop.f32.mrf.mxu1  ;;  %v625_v50 = vpop.f32.mrf.mxu0 }
 0x1b3   : > { %979 = vmatpush.bf16.msra.mxu0 %v964_v38  ;;  %992 = vmatpush.bf16.msra.mxu1 %v967_v46  ;;  %v655_v51 = vadd.f32 %v625_v50, %v582_v37 }
 0x1b6   : > { %1140 = vmatmul.msk.bf16.vlgmr.msra.gmra.mxu0 %vm278_vm5, %v1139_v48 }
 0x1b7   : > { %1141 = vmatmul.msk.bf16.vlgmr.msra.gmra.mxu1 %vm278_vm5, %v1139_v48  ;;  %1142 = vmatmul.msk.bf16.vlgmr.msra.gmra.mxu2 %vm278_vm5, %v1139_v48  ;;  %v580_v54 = vpop.f32.mrf.mxu3  ;;  %vm1043_vm5 = vmor %vm1042_vm2, %vm1041_vm1 }
 0x1b8   : > { %v651_v57 = vpop.f32.mrf.mxu2 }
 0x1b9   : > { %v657_v58 = vadd.f32 %v651_v57, %v584_v49 }
 0x1ba   : > { %v638_v53 = vpop.f32.mrf.mxu1  ;;  %v627_v56 = vpop.f32.mrf.mxu0 }
 0x1bb   : > { %v656_v55 = vadd.f32 %v638_v53, %v583_v45 }
 0x1c0   : > { %v711_v60 = vpop.f32.mrf.mxu3  ;;  %v653_v62 = vpop.f32.mrf.mxu2 }
 0x1c1   : > { %v741_v61 = vadd.f32 %v711_v60, %v655_v51 }
 0x1c2   : > { %v640_v59 = vpop.f32.mrf.mxu1 }
 0x1c8   : > { %v713_v63 = vpop.f32.mrf.mxu3 }
 0x1e2   : > { %v737_v0 = vpop.f32.mrf.mxu1 }
 0x1e3   : > { %v724_v1 = vpop.f32.mrf.mxu0  ;;  %v743_v2 = vadd.f32 %v737_v0, %v657_v58 }
 0x1e4   : > { %v742_v3 = vadd.f32 %v724_v1, %v656_v55 }
 0x1ea   : > { %v739_v4 = vpop.f32.mrf.mxu1 }
 0x1eb   : > { %v726_v5 = vpop.f32.mrf.mxu0 }
 0x21a   : > { %v810_v6 = vpop.f32.mrf.mxu2 }
 0x21b   : > { %v840_v19 = vadd.f32 %v810_v6, %v741_v61 }
 0x221   : > { %v823_v11 = vpop.f32.mrf.mxu3 }
 0x222   : > { %v812_v12 = vpop.f32.mrf.mxu2  ;;  %v841_v20 = vadd.f32 %v823_v11, %v742_v3 }
 0x223   : > { %v836_v13 = vpop.f32.mrf.mxu0 }
 0x224   : > { %v888_v14 = vpop.f32.mrf.mxu1  ;;  %v842_v8 = vadd.f32 %v836_v13, %v743_v2 }
 0x225   : > { %v918_v22 = vadd.f32 %v888_v14, %v840_v19 }
 0x229   : > { %v825_v15 = vpop.f32.mrf.mxu3 }
 0x22a   : > { %v901_v16 = vpop.f32.mrf.mxu2 }
 0x22b   : > { %v838_v17 = vpop.f32.mrf.mxu0  ;;  %v919_v33 = vadd.f32 %v901_v16, %v841_v20 }
 0x22c   : > { %v890_v18 = vpop.f32.mrf.mxu1 }
 0x231   : > { %v914_v21 = vpop.f32.mrf.mxu3 }
 0x232   : > { %v903_v23 = vpop.f32.mrf.mxu2  ;;  %v920_v7 = vadd.f32 %v914_v21, %v842_v8 }
 0x233   : > { %v981_v24 = vpop.f32.mrf.mxu0 }
 0x234   : > { %v1011_v26 = vadd.f32 %v981_v24, %v918_v22  ;;  %v994_v28 = vpop.f32.mrf.mxu1 }
 0x235   : > { %v1012_v29 = vadd.f32 %v994_v28, %v919_v33 }
 0x236   : > { %v1020_v30 = vadd.f32 %v1018_v25, %v1011_v26 }
 0x237   : > { %v1021_v31 = vadd.f32 %v1018_v25, %v1012_v29 }
 0x239   : > { %v1023_v9 = vpack.c.bf16 %v1021_v31, %v1020_v30  ;;  %v916_v10 = vpop.f32.mrf.mxu3 }
 0x23a   : > { %v1007_v32 = vpop.f32.mrf.mxu2 }
 0x23b   : > { %v1013_v34 = vadd.f32 %v1007_v32, %v920_v7  ;;  %v983_v35 = vpop.f32.mrf.mxu0  ;;  %v1027_v39 = vrot.slane %v1023_v9, 2 }
 0x23c   : > { %v996_v36 = vpop.f32.mrf.mxu1 }
 0x23d   : > { %v1022_v37 = vadd.f32 %v1018_v25, %v1013_v34  ;;  %v1033_v44 = vsel %vm1030_vm0, %v1023_v9, %v1027_v39 }
 0x23f   : > { %v1024_v40 = vpack.c.bf16 %v1022_v37, %v1022_v37 }
 0x241   : > { %v1028_v41 = vrot.slane %v1024_v40, 4  ;;  %v1029_v42 = vrot.slane %v1024_v40, 6 }
 0x242   : > { %v1009_v43 = vpop.f32.mrf.mxu2 }
 0x243   : > { %v1037_v45 = vsel %vm1034_vm3, %v1028_v41, %v1029_v42 }
 0x244   : > { %v1038_v38 = vsel %vm282_vm4, %v1033_v44, %v1037_v45 }
 0x245   : > { %1044 = vst.msk [vmem:[%s224_s16] sm:$0x3f] %vm1043_vm5, %v1038_v38 }
 0x246 PF: > { %s15_s18 = sadd.s32 1, %s1202_s18  }
 0x247   : > { %p12_p4 = scmp.ge.s32.totalorder %s15_s18, 4  }
 0x249   :  { %14 = sbr.rel (!%p12_p4) target bundleno = 1 (0x1), region = 78 }

// kernel: dwt_upsampler_forward.15
= control target key start
LH: loop header
LB: loop body
LE: loop exit
PB: predicated region body
PF: predicated region fallthrough
CT: control target
= control target key end

     0   :  { %11 = vsyncpa [#allocation3], 0  ;;  %s1920_s0 = inlined_call_operand.vmem [shape: bf16[2,4,19,19], index: 0, kind: input, shape index: {}]   ;;  %s1921_s1 = inlined_call_operand.vmem [shape: bf16[2,12,19,19], index: 1, kind: input, shape index: {}]   ;;  %s1922_s2 = inlined_call_operand.vmem [shape: bf16[32,19], index: 2, kind: input, shape index: {}]   ;;  %s1923_s3 = inlined_call_operand.vmem [shape: bf16[32,19], index: 3, kind: input, shape index: {}]   ;;  %s1924_s4 = inlined_call_operand.vmem [shape: bf16[19,32], index: 4, kind: input, shape index: {}]   ;;  %s1925_s5 = inlined_call_operand.vmem [shape: bf16[19,32], index: 5, kind: input, shape index: {}]   ;;  %s1926_s6 = inlined_call_operand.hbm [shape: f32[2,4,32,32], index: 6, kind: output, shape index: {}]  }
   0x1   :  { %13 = vsyncpa [#allocation3 + $0x1], 0  ;;  %s1601_s21 = smov 0   ;;  %s1603_s22 = smov 0  }
   0x2   :  { %s1605_s23 = smov 0   ;;  %s1607_s24 = smov 0  }
   0x3 LB: > { %s1622_s25 = sadd.s32 4294967295, %s1561_s24   ;;  %s1230_s26 = sadd.s32 4294967294, %s1561_s24   ;;  %s1561_s24 = sphi %s1607_s24, %s1932_s24   ;;  %s1557_s23 = sphi %s1605_s23, %s1931_s23   ;;  %s1553_s22 = sphi %s1603_s22, %s1930_s22   ;;  %s1549_s21 = sphi %s1601_s21, %s1929_s21  }
   0x4   : > { %s1626_s27 = sadd.s32 1, %s1561_s24   ;;  %s162_s28 = sadd.s32 1, %s1557_s23 }
   0x5   : > { %s159_s29 = ssub.s32 %s1561_s24, %s1626_s27  ;;  %p172_p0 = scmp.ne.s32.totalorder %s1557_s23, %s1553_s22 }
   0x6   : > { %p160_p1 = scmp.eq.s32.totalorder %s159_s29, 0  ;;  %p173_p2 = scmp.eq.s32.totalorder %s1622_s25, 1 }
   0x7   : > { %p178_p3 = scmp.ne.s32.totalorder %s1553_s22, %s1549_s21  ;;  %p179_p4 = scmp.eq.s32.totalorder %s1230_s26, 1 }
   0x8   : > { %s1637_s30 = scalar_select %p160_p1, %s1557_s23, %s162_s28  }
   0x9   : > { %p1639_p5 = por %p173_p2, %p172_p0  ;;  %p1643_p6 = por %p179_p4, %p178_p3 }
   0xa   : > { %p1233_p7 = scmp.ge.s32.totalorder %s1561_s24, 1  ;;  %p225_p8 = scmp.lt.s32.totalorder %s1561_s24, 3 }
   0xc   : > { %p226_p9 = pnand %p1233_p7, %p225_p8 }
   0xd   : > { %p260_p10 = scmp.lt.s32.totalorder (!%p226_p9), %s1622_s25, 1  ;;  %s257_s20 = sand.u32 (!%p226_p9), 1, %s1553_s22  }
   0xe   : > { %229 = sbr.rel (%p226_p9) target bundleno = 861 (0x35d), region = 44  ;;  %s1234_s28 = sshll.u32 (!%p226_p9), %s257_s20, 7 }
   0xf   : > { %s1777_s29 = scalar_lea.vmem (!%p226_p9), [#allocation2], %s1234_s28  ;;  %s1519_s18 = scalar_lea.hbm (!%p226_p9), %s1926_s6, 256 }
  0x13   : > { %s261_s9 = scalar_select %p260_p10, %s1622_s25, 1  ;;  %vm325_vm0 = vcmask 1040384   ;;  %vm326_vm1 = vcmask 1041408   ;;  %v1563_v0 = vmov 65535   ;;  %v284_v2 = vld [vmem:[%s1925_s5 + $0x8] sm:$0x3] }
  0x14   : > { %v327_v1 = vsel %vm325_vm0, 4294967295, %v1563_v0  ;;  %v281_v3 = vld [vmem:[%s1924_s4 + $0x8] sm:$0x3]  ;;  %v469_v7 = vunpack.c.l.b16 %v284_v2  ;;  %v1690_v31 = vld [vmem:[%s1923_s3] sm:$0xff]  ;;  %vm318_vm2 = vcmask 154624   ;;  %vm538_vm3 = vcmask 261120  }
  0x15   : > { %s1456_s10 = smul.u32 144, %s261_s9  ;;  %v506_v12 = vunpack.c.l.b16 %v281_v3  ;;  %v1671_v13 = vsel %vm326_vm1, %v327_v1, 0  ;;  %v1695_v32 = vld [vmem:[%s1922_s2] sm:$0xff]  ;;  %v1710_v33 = vld [vmem:[%s1923_s3 + $0x8] sm:$0xff] }
  0x16   : > { %s1455_s11 = smul.u32 48, %s261_s9  ;;  %v471_v19 = vpack.c.b16 %v469_v7, %v469_v7  ;;  %v1715_v34 = vld [vmem:[%s1922_s2 + $0x8] sm:$0xff]  ;;  %v1728_v35 = vld [vmem:[%s1925_s5] sm:$0xff] }
  0x17   : > { %s1654_s14 = scalar_lea.vmem %s1921_s1, %s1456_s10  ;;  %v508_v23 = vpack.c.b16 %v506_v12, %v506_v12  ;;  %v1733_v36 = vld [vmem:[%s1924_s4] sm:$0xff] }
  0x18   : > { %v290_v4 = vld [vmem:[%s1654_s14 + $0x8] sm:$0x3]  ;;  %s1666_s26 = scalar_lea.vmem %s1920_s0, %s1455_s11  ;;  %v1239_v6 = vld [vmem:[%s1654_s14 + $0x38] sm:$0x3]  ;;  %v1439_v25 = vld [vmem:[%s1654_s14] sm:$0xff]  ;;  %v1682_v29 = vand.u32 %v471_v19, %v1671_v13  ;;  %s1153_s11 = sshll.u32 %s1777_s29, 4  ;;  %s1154_s11 = int_to_ptr.vmem [resolvable:$true] %s1153_s11 }
  0x19   : > { %v1242_v5 = vld [vmem:[%s1654_s14 + $0x68] sm:$0x3]  ;;  %v314_v8 = vunpack.c.l.b16 %v290_v4  ;;  %v436_v11 = vunpack.c.l.b16 %v1239_v6  ;;  %v1441_v26 = vld [vmem:[%s1654_s14 + $0x60] sm:$0xff]  ;;  %v1440_v28 = vld [vmem:[%s1654_s14 + $0x30] sm:$0xff]  ;;  %v1685_v30 = vand.u32 %v508_v23, %v1671_v13 }
  0x1a   : > { %v287_v9 = vld [vmem:[%s1666_s26 + $0x8] sm:$0x3]  ;;  %v405_v10 = vunpack.c.l.b16 %v1242_v5  ;;  %v1438_v27 = vld [vmem:[%s1666_s26] sm:$0xff]  ;;  %v1300_v37 = vld [vmem:[%s1654_s14 + $0x14] sm:$0x3] }
  0x1b   : > { %v366_v14 = vunpack.c.l.b16 %v287_v9  ;;  %v316_v15 = vpack.c.b16 %v314_v8, %v314_v8  ;;  %v438_v17 = vpack.c.b16 %v436_v11, %v436_v11  ;;  %v1297_v38 = vld [vmem:[%s1666_s26 + $0x14] sm:$0x3]  ;;  %v564_v39 = vunpack.c.l.b16 %v1300_v37  ;;  %v1303_v46 = vld [vmem:[%s1654_s14 + $0x44] sm:$0x3]  ;;  %v1443_v53 = vld [vmem:[%s1654_s14 + $0xc] sm:$0xff] }
  0x1c   : > { %v407_v16 = vpack.c.b16 %v405_v10, %v405_v10  ;;  %v595_v40 = vunpack.c.l.b16 %v1297_v38  ;;  %v1306_v45 = vld [vmem:[%s1654_s14 + $0x74] sm:$0x3]  ;;  %v659_v48 = vunpack.c.l.b16 %v1303_v46  ;;  %v1442_v54 = vld [vmem:[%s1666_s26 + $0xc] sm:$0xff]  ;;  %v1444_v58 = vld [vmem:[%s1654_s14 + $0x3c] sm:$0xff] }
  0x1d   : > { %v368_v18 = vpack.c.b16 %v366_v14, %v366_v14  ;;  %v330_v20 = vand.u32 %v1671_v13, %v316_v15  ;;  %v441_v22 = vand.u32 %v438_v17, %v1671_v13  ;;  %v566_v41 = vpack.c.b16 %v564_v39, %v564_v39  ;;  %v1445_v57 = vld [vmem:[%s1654_s14 + $0x6c] sm:$0xff] }
  0x1e   : > { %v410_v21 = vand.u32 %v407_v16, %v1671_v13  ;;  %v597_v42 = vpack.c.b16 %v595_v40, %v595_v40  ;;  %v628_v47 = vunpack.c.l.b16 %v1306_v45  ;;  %v661_v50 = vpack.c.b16 %v659_v48, %v659_v48 }
  0x1f   : > { %v377_v24 = vand.u32 %v368_v18, %v1671_v13  ;;  %338 = vmatpush.bf16.msra.mxu0 %v330_v20  ;;  %449 = vmatpush.bf16.msra.mxu3 %v441_v22  ;;  %v569_v43 = vand.u32 %v566_v41, %v1671_v13 }
  0x20   : > { %418 = vmatpush.bf16.msra.mxu2 %v410_v21  ;;  %v600_v44 = vand.u32 %v597_v42, %v1671_v13  ;;  %v630_v49 = vpack.c.b16 %v628_v47, %v628_v47  ;;  %v664_v52 = vand.u32 %v661_v50, %v1671_v13 }
  0x21   : > { %385 = vmatpush.bf16.msra.mxu1 %v377_v24 }
  0x22   : > { %v633_v51 = vand.u32 %v630_v49, %v1671_v13 }
  0x23   : > { %339 = vmatpush.bf16.msra.mxu0 %v1439_v25  ;;  %450 = vmatpush.bf16.msra.mxu3 %v1440_v28 }
  0x24   : > { %419 = vmatpush.bf16.msra.mxu2 %v1441_v26 }
  0x25   : > { %386 = vmatpush.bf16.msra.mxu1 %v1438_v27 }
  0x26   : > { %1255 = vmatmul.msk.bf16.vlgmr.msra.gmra.mxu0 %vm318_vm2, %v1690_v31  ;;  %1281 = vmatmul.msk.bf16.vlgmr.msra.gmra.mxu3 %vm318_vm2, %v1695_v32 }
  0x27   : > { %488 = vmatpush.bf16.msrb.mxu0 %v1682_v29  ;;  %1275 = vmatmul.msk.bf16.vlgmr.msra.gmra.mxu2 %vm318_vm2, %v1690_v31 }
  0x28   : > { %1269 = vmatmul.msk.bf16.vlgmr.msra.gmra.mxu1 %vm318_vm2, %v1695_v32  ;;  %577 = vmatpush.bf16.msrb.mxu2 %v569_v43 }
  0x29   : > { %525 = vmatpush.bf16.msrb.mxu1 %v1685_v30  ;;  %608 = vmatpush.bf16.msrb.mxu3 %v600_v44 }
  0x2b   : > { %489 = vmatpush.bf16.msrb.mxu0 %v1728_v35 }
  0x2c   : > { %578 = vmatpush.bf16.msrb.mxu2 %v1443_v53 }
  0x2d   : > { %526 = vmatpush.bf16.msrb.mxu1 %v1733_v36  ;;  %609 = vmatpush.bf16.msrb.mxu3 %v1442_v54 }
  0x2f   : > { %641 = vmatpush.bf16.msra.mxu0 %v633_v51  ;;  %v1350_v51 = vld [vmem:[%s1654_s14 + $0x80] sm:$0x3] }
  0x30   : > { %699 = vmatpush.bf16.msra.mxu2 %v1682_v29  ;;  %v827_v53 = vunpack.c.l.b16 %v1350_v51 }
  0x31   : > { %672 = vmatpush.bf16.msra.mxu1 %v664_v52  ;;  %724 = vmatpush.bf16.msra.mxu3 %v1685_v30  ;;  %v1347_v52 = vld [vmem:[%s1654_s14 + $0x50] sm:$0x3] }
  0x32   : > { %v858_v54 = vunpack.c.l.b16 %v1347_v52 }
  0x33   : > { %642 = vmatpush.bf16.msra.mxu0 %v1445_v57 }
  0x34   : > { %700 = vmatpush.bf16.msra.mxu2 %v1728_v35  ;;  %v860_v57 = vpack.c.b16 %v858_v54, %v858_v54 }
  0x35   : > { %725 = vmatpush.bf16.msra.mxu3 %v1733_v36  ;;  %673 = vmatpush.bf16.msra.mxu1 %v1444_v58 }
  0x36   : > { %1256 = vmatmul.msk.bf16.gmra.mxu0 %vm318_vm2, %v1710_v33  ;;  %1282 = vmatmul.msk.bf16.gmra.mxu3 %vm318_vm2, %v1715_v34 }
  0x37   : > { %1276 = vmatmul.msk.bf16.gmra.mxu2 %vm318_vm2, %v1710_v33 }
  0x38   : > { %1270 = vmatmul.msk.bf16.gmra.mxu1 %vm318_vm2, %v1715_v34 }
  0x46   : > { %1317 = vmatmul.msk.bf16.vlgmr.msrb.gmra.mxu3 %vm318_vm2, %v1695_v32 }
  0x47   : > { %1311 = vmatmul.msk.bf16.vlgmr.msrb.gmra.mxu2 %vm318_vm2, %v1690_v31 }
  0x56   : > { %1318 = vmatmul.msk.bf16.gmra.mxu3 %vm318_vm2, %v1715_v34 }
  0x57   : > { %1312 = vmatmul.msk.bf16.gmra.mxu2 %vm318_vm2, %v1710_v33 }
  0xa3   : > { %v341_v55 = vpop.f32.mrf.mxu0 }
  0xa5   : > { %v388_v56 = vpop.f32.mrf.mxu1 }
  0xa6   : > { %v389_v63 = vadd.f32 %v388_v56, %v341_v55  ;;  %v829_v56 = vpack.c.b16 %v827_v53, %v827_v53 }
  0xa9   : > { %v452_v60 = vpop.f32.mrf.mxu3 }
  0xaa   : > { %v421_v59 = vpop.f32.mrf.mxu2 }
  0xab   : > { %v343_v61 = vpop.f32.mrf.mxu0  ;;  %v453_v4 = vadd.f32 %v452_v60, %v421_v59  ;;  %v832_v60 = vand.u32 %v829_v56, %v1671_v13 }
  0xad   : > { %v390_v62 = vpop.f32.mrf.mxu1  ;;  %840 = vmatpush.bf16.msrb.mxu2 %v832_v60 }
  0xae   : > { %v391_v0 = vadd.f32 %v390_v62, %v343_v61  ;;  %v863_v61 = vand.u32 %v860_v57, %v1671_v13  ;;  %v1344_v62 = vld [vmem:[%s1654_s14 + $0x20] sm:$0x3] }
  0xb0   : > { %v398_v1 = vpack.c.bf16 %v391_v0, %v389_v63  ;;  %v1341_v63 = vld [vmem:[%s1666_s26 + $0x20] sm:$0x3]  ;;  %v763_v0 = vunpack.c.l.b16 %v1344_v62  ;;  %871 = vmatpush.bf16.msrb.mxu3 %v863_v61 }
  0xb1   : > { %v454_v3 = vpop.f32.mrf.mxu3 }
  0xb2   : > { %1293 = vmatmul.msk.bf16.vlgmr.msrb.gmra.mxu1 %vm318_vm2, %v398_v1  ;;  %v423_v2 = vpop.f32.mrf.mxu2  ;;  %v794_v1 = vunpack.c.l.b16 %v1341_v63 }
  0xb3   : > { %v455_v5 = vadd.f32 %v454_v3, %v423_v2  ;;  %v346_v6 = vpop.f32.mrf.mxu0  ;;  %v765_v2 = vpack.c.b16 %v763_v0, %v763_v0  ;;  %v1394_v0 = vld [vmem:[%s1654_s14 + $0x8c] sm:$0x3] }
  0xb4   : > { %v796_v3 = vpack.c.b16 %v794_v1, %v794_v1  ;;  %v1391_v1 = vld [vmem:[%s1654_s14 + $0x5c] sm:$0x3] }
  0xb5   : > { %v393_v7 = vpop.f32.mrf.mxu1  ;;  %v462_v8 = vpack.c.bf16 %v455_v5, %v453_v4  ;;  %v768_v4 = vand.u32 %v765_v2, %v1671_v13  ;;  %v1026_v2 = vunpack.c.l.b16 %v1394_v0 }
  0xb6   : > { %v394_v14 = vadd.f32 %v393_v7, %v346_v6  ;;  %v799_v5 = vand.u32 %v796_v3, %v1671_v13  ;;  %v1057_v3 = vunpack.c.l.b16 %v1391_v1 }
  0xb7   : > { %1287 = vmatmul.msk.bf16.vlgmr.msrb.gmra.mxu0 %vm318_vm2, %v462_v8 }
  0xb8   : > { %776 = vmatpush.bf16.msrb.mxu0 %v768_v4  ;;  %807 = vmatpush.bf16.msrb.mxu1 %v799_v5  ;;  %v1028_v5 = vpack.c.b16 %v1026_v2, %v1026_v2 }
  0xb9   : > { %v457_v10 = vpop.f32.mrf.mxu3 }
  0xba   : > { %v426_v9 = vpop.f32.mrf.mxu2 }
  0xbb   : > { %v348_v11 = vpop.f32.mrf.mxu0  ;;  %v458_v19 = vadd.f32 %v457_v10, %v426_v9  ;;  %v1449_v9 = vld [vmem:[%s1654_s14 + $0x78] sm:$0xff]  ;;  %v1448_v10 = vld [vmem:[%s1654_s14 + $0x48] sm:$0xff] }
  0xbc   : > { %841 = vmatpush.bf16.msrb.mxu2 %v1449_v9  ;;  %872 = vmatpush.bf16.msrb.mxu3 %v1448_v10  ;;  %v1450_v9 = vld [vmem:[%s1666_s26 + $0x24] sm:$0xff] }
  0xbd   : > { %v395_v12 = vpop.f32.mrf.mxu1 }
  0xbe   : > { %v396_v15 = vadd.f32 %v395_v12, %v348_v11  ;;  %v1447_v11 = vld [vmem:[%s1654_s14 + $0x18] sm:$0xff] }
  0xbf   : > { %v1446_v12 = vld [vmem:[%s1666_s26 + $0x18] sm:$0xff]  ;;  %777 = vmatpush.bf16.msrb.mxu0 %v1447_v11  ;;  %v1031_v11 = vand.u32 %v1028_v5, %v1671_v13 }
  0xc0   : > { %v399_v16 = vpack.c.bf16 %v396_v15, %v394_v14  ;;  %808 = vmatpush.bf16.msrb.mxu1 %v1446_v12 }
  0xc1   : > { %v459_v18 = vpop.f32.mrf.mxu3 }
  0xc2   : > { %1294 = vmatmul.msk.bf16.gmra.mxu1 %vm318_vm2, %v399_v16  ;;  %v428_v17 = vpop.f32.mrf.mxu2 }
  0xc3   : > { %v460_v20 = vadd.f32 %v459_v18, %v428_v17 }
  0xc5   : > { %v463_v21 = vpack.c.bf16 %v460_v20, %v458_v19 }
  0xc7   : > { %1288 = vmatmul.msk.bf16.gmra.mxu0 %vm318_vm2, %v463_v21 }
  0xc9   : > { %v611_v23 = vpop.f32.mrf.mxu3 }
  0xca   : > { %v580_v22 = vpop.f32.mrf.mxu2 }
  0xcb   : > { %v612_v24 = vadd.f32 %v611_v23, %v580_v22 }
  0xd1   : > { %v613_v26 = vpop.f32.mrf.mxu3 }
  0xd2   : > { %1329 = vmatmul.msk.bf16.vlgmr.msra.gmra.mxu1 %vm318_vm2, %v1695_v32  ;;  %v582_v25 = vpop.f32.mrf.mxu2 }
  0xd3   : > { %v614_v28 = vadd.f32 %v613_v26, %v582_v25  ;;  %923 = vmatpush.bf16.msra.mxu1 %v1685_v30 }
  0xd5   : > { %v621_v37 = vpack.c.bf16 %v614_v28, %v612_v24 }
  0xd7   : > { %1323 = vmatmul.msk.bf16.vlgmr.msra.gmra.mxu0 %vm318_vm2, %v1690_v31  ;;  %1333 = vmatmul.msk.bf16.vlgmr.msra.gmra.mxu3 %vm318_vm2, %v621_v37 }
  0xd8   : > { %898 = vmatpush.bf16.msra.mxu0 %v1682_v29  ;;  %924 = vmatpush.bf16.msra.mxu1 %v1733_v36 }
  0xd9   : > { %v616_v41 = vpop.f32.mrf.mxu3 }
  0xda   : > { %v585_v40 = vpop.f32.mrf.mxu2 }
  0xdb   : > { %v617_v44 = vadd.f32 %v616_v41, %v585_v40 }
  0xdc   : > { %899 = vmatpush.bf16.msra.mxu0 %v1728_v35 }
  0xe1   : > { %v618_v47 = vpop.f32.mrf.mxu3 }
  0xe2   : > { %1330 = vmatmul.msk.bf16.gmra.mxu1 %vm318_vm2, %v1715_v34  ;;  %v587_v46 = vpop.f32.mrf.mxu2 }
  0xe3   : > { %v619_v49 = vadd.f32 %v618_v47, %v587_v46 }
  0xe5   : > { %v622_v50 = vpack.c.bf16 %v619_v49, %v617_v44  ;;  %v1385_v49 = vld [vmem:[%s1666_s26 + $0x2c] sm:$0x3] }
  0xe6   : > { %v993_v51 = vunpack.c.l.b16 %v1385_v49 }
  0xe7   : > { %1324 = vmatmul.msk.bf16.gmra.mxu0 %vm318_vm2, %v1710_v33  ;;  %1334 = vmatmul.msk.bf16.gmra.mxu3 %vm318_vm2, %v622_v50 }
  0xe8   : > { %v995_v53 = vpack.c.b16 %v993_v51, %v993_v51 }
  0xf2   : > { %1361 = vmatmul.msk.bf16.vlgmr.msrb.gmra.mxu1 %vm318_vm2, %v1695_v32 }
  0xf7   : > { %1373 = vmatmul.msk.bf16.vlgmr.msrb.gmra.mxu3 %vm318_vm2, %v1695_v32  ;;  %1355 = vmatmul.msk.bf16.vlgmr.msrb.gmra.mxu0 %vm318_vm2, %v1690_v31 }
  0xf8   : > { %1039 = vmatpush.bf16.msrb.mxu0 %v1031_v11 }
 0x102   : > { %1362 = vmatmul.msk.bf16.gmra.mxu1 %vm318_vm2, %v1715_v34 }
 0x107   : > { %1374 = vmatmul.msk.bf16.gmra.mxu3 %vm318_vm2, %v1715_v34  ;;  %1356 = vmatmul.msk.bf16.gmra.mxu0 %vm318_vm2, %v1710_v33 }
 0x12f   : > { %v528_v27 = vpop.f32.mrf.mxu1 }
 0x134   : > { %v491_v38 = vpop.f32.mrf.mxu0 }
 0x135   : > { %v529_v39 = vadd.f32 %v528_v27, %v491_v38 }
 0x137   : > { %v530_v42 = vpop.f32.mrf.mxu1  ;;  %539 = vst.msk [vmem:[%s1777_s29] sm:$0xff] %vm538_vm3, %v529_v39 }
 0x13c   : > { %v493_v43 = vpop.f32.mrf.mxu0 }
 0x13d   : > { %v531_v45 = vadd.f32 %v530_v42, %v493_v43 }
 0x13f   : > { %v533_v48 = vpop.f32.mrf.mxu1  ;;  %540 = vst.msk [vmem:[%s1777_s29 + $0x8] sm:$0xff] %vm538_vm3, %v531_v45 }
 0x144   : > { %v496_v55 = vpop.f32.mrf.mxu0 }
 0x145   : > { %v534_v58 = vadd.f32 %v533_v48, %v496_v55  ;;  %v1388_v48 = vld [vmem:[%s1654_s14 + $0x2c] sm:$0x3]  ;;  %v998_v55 = vand.u32 %v995_v53, %v1671_v13 }
 0x146   : > { %v962_v50 = vunpack.c.l.b16 %v1388_v48 }
 0x147   : > { %v535_v59 = vpop.f32.mrf.mxu1  ;;  %541 = vst.msk [vmem:[%s1777_s29 + $0x10] sm:$0xff] %vm538_vm3, %v534_v58  ;;  %1006 = vmatpush.bf16.msra.mxu3 %v998_v55 }
 0x148   : > { %v964_v52 = vpack.c.b16 %v962_v50, %v962_v50 }
 0x14a   : > { %v967_v54 = vand.u32 %v964_v52, %v1671_v13 }
 0x14b   : > { %1007 = vmatpush.bf16.msra.mxu3 %v1450_v9 }
 0x14c   : > { %v498_v6 = vpop.f32.mrf.mxu0 }
 0x14d   : > { %v536_v7 = vadd.f32 %v535_v59, %v498_v6  ;;  %v1059_v6 = vpack.c.b16 %v1057_v3, %v1057_v3 }
 0x14e   : > { %1405 = vmatmul.msk.bf16.vlgmr.msra.gmra.mxu3 %vm318_vm2, %v1695_v32 }
 0x14f   : > { %v675_v8 = vpop.f32.mrf.mxu1  ;;  %542 = vst.msk [vmem:[%s1777_s29 + $0x18] sm:$0xff] %vm538_vm3, %v536_v7  ;;  %v1062_v12 = vand.u32 %v1059_v6, %v1671_v13  ;;  %1122 = vmatpush.bf16.msrb.mxu3 %v1685_v30 }
 0x151   : > { %1070 = vmatpush.bf16.msrb.mxu1 %v1062_v12 }
 0x153   : > { %1123 = vmatpush.bf16.msrb.mxu3 %v1733_v36 }
 0x154   : > { %v644_v14 = vpop.f32.mrf.mxu0 }
 0x155   : > { %v676_v17 = vadd.f32 %v675_v8, %v644_v14  ;;  %v1451_v8 = vld [vmem:[%s1654_s14 + $0x24] sm:$0xff] }
 0x157   : > { %v677_v15 = vpop.f32.mrf.mxu1 }
 0x15a   : > { %v727_v37 = vpop.f32.mrf.mxu3 }
 0x15c   : > { %v646_v16 = vpop.f32.mrf.mxu0 }
 0x15d   : > { %v678_v18 = vadd.f32 %v677_v15, %v646_v16  ;;  %v1453_v16 = vld [vmem:[%s1654_s14 + $0x84] sm:$0xff] }
 0x15e   : > { %1040 = vmatpush.bf16.msrb.mxu0 %v1453_v16  ;;  %1406 = vmatmul.msk.bf16.gmra.mxu3 %vm318_vm2, %v1715_v34 }
 0x15f   : > { %v685_v19 = vpack.c.bf16 %v678_v18, %v676_v17  ;;  %v680_v20 = vpop.f32.mrf.mxu1  ;;  %v1452_v17 = vld [vmem:[%s1654_s14 + $0x54] sm:$0xff]  ;;  %s1454_s14 = sshll.u32 %s1622_s25, 7  ;;  %s1141_s25 = scalar_lea.sflag [#allocation3], %s257_s20 }
 0x160   : > { %1071 = vmatpush.bf16.msrb.mxu1 %v1452_v17  ;;  %s1152_s10 = scalar_lea.hbm %s1926_s6, %s1454_s14 }
 0x161   : > { %1331 = vmatmul.msk.bf16.vlgmr.msra.gmra.mxu2 %vm318_vm2, %v685_v19  ;;  %s1155_s12 = sshll.u32 %s1152_s10, 4  ;;  %s1156_s12 = int_to_ptr.hbm [resolvable:$true] %s1155_s12 }
 0x162   : > { %v729_v43 = vpop.f32.mrf.mxu3  ;;  %975 = vmatpush.bf16.msra.mxu2 %v967_v54  ;;  %s1513_s13 = sshra.s32 %s1156_s12, 4  ;;  %s1514_s13 = int_to_ptr.hbm [resolvable:$true] %s1513_s13 }
 0x163   : > { %s1515_s15 = scalar_lea.hbm %s1514_s13, 128  ;;  %p1520_p0 = scmp.lt.s32.totalorder %s1514_s13, %s1926_s6 }
 0x164   : > { %v649_v21 = vpop.f32.mrf.mxu0  ;;  %p1516_p11 = scmp.ne.s32.totalorder %s1514_s13, %s1515_s15  ;;  %p1521_p1 = scmp.lt.s32.totalorder %s1519_s18, %s1515_s15 }
 0x165   : > { %v681_v24 = vadd.f32 %v680_v20, %v649_v21 }
 0x166   : > { %976 = vmatpush.bf16.msra.mxu2 %v1451_v8  ;;  %p1517_p12 = pnand %p1516_p11, %p1639_p5  ;;  %p1522_p2 = por %p1521_p1, %p1520_p0 }
 0x167   : > { %v682_v22 = vpop.f32.mrf.mxu1 }
 0x168   : > { %p1518_p13 = pneg %p1517_p12 }
 0x16a   : > { %v732_v56 = vpop.f32.mrf.mxu3  ;;  %p1523_p3 = pnand %p1522_p2, %p1518_p13 }
 0x16c   : > { %v651_v23 = vpop.f32.mrf.mxu0 }
 0x16d   : > { %v683_v25 = vadd.f32 %v682_v22, %v651_v23 }
 0x16f   : > { %v686_v26 = vpack.c.bf16 %v683_v25, %v681_v24  ;;  %v810_v28 = vpop.f32.mrf.mxu1 }
 0x171   : > { %1332 = vmatmul.msk.bf16.gmra.mxu2 %vm318_vm2, %v686_v26 }
 0x172   : > { %v734_v10 = vpop.f32.mrf.mxu3 }
 0x174   : > { %v779_v27 = vpop.f32.mrf.mxu0 }
 0x175   : > { %v811_v38 = vadd.f32 %v810_v28, %v779_v27 }
 0x177   : > { %v812_v40 = vpop.f32.mrf.mxu1 }
 0x17a   : > { %v874_v15 = vpop.f32.mrf.mxu3 }
 0x17c   : > { %v781_v39 = vpop.f32.mrf.mxu0 }
 0x17d   : > { %v813_v41 = vadd.f32 %v812_v40, %v781_v39 }
 0x17f   : > { %v820_v42 = vpack.c.bf16 %v813_v41, %v811_v38  ;;  %v815_v47 = vpop.f32.mrf.mxu1 }
 0x181   : > { %1367 = vmatmul.msk.bf16.vlgmr.msrb.gmra.mxu2 %vm318_vm2, %v1690_v31  ;;  %1377 = vmatmul.msk.bf16.vlgmr.msra.gmra.mxu1 %vm318_vm2, %v820_v42 }
 0x182   : > { %1097 = vmatpush.bf16.msrb.mxu2 %v1682_v29  ;;  %v876_v30 = vpop.f32.mrf.mxu3 }
 0x184   : > { %v784_v45 = vpop.f32.mrf.mxu0 }
 0x185   : > { %v816_v58 = vadd.f32 %v815_v47, %v784_v45 }
 0x186   : > { %1098 = vmatpush.bf16.msrb.mxu2 %v1728_v35 }
 0x187   : > { %v817_v61 = vpop.f32.mrf.mxu1 }
 0x18a   : > { %v879_v20 = vpop.f32.mrf.mxu3 }
 0x18c   : > { %v786_v59 = vpop.f32.mrf.mxu0 }
 0x18d   : > { %v818_v62 = vadd.f32 %v817_v61, %v786_v59 }
 0x18f   : > { %v821_v63 = vpack.c.bf16 %v818_v62, %v816_v58 }
 0x191   : > { %1368 = vmatmul.msk.bf16.gmra.mxu2 %vm318_vm2, %v1710_v33  ;;  %1378 = vmatmul.msk.bf16.gmra.mxu1 %vm318_vm2, %v821_v63 }
 0x192   : > { %v881_v22 = vpop.f32.mrf.mxu3 }
 0x1a1   : > { %1399 = vmatmul.msk.bf16.vlgmr.msra.gmra.mxu2 %vm318_vm2, %v1690_v31  ;;  %1417 = vmatmul.msk.bf16.vlgmr.msrb.gmra.mxu1 %vm318_vm2, %v1695_v32 }
 0x1b1   : > { %1400 = vmatmul.msk.bf16.gmra.mxu2 %vm318_vm2, %v1710_v33  ;;  %1418 = vmatmul.msk.bf16.gmra.mxu1 %vm318_vm2, %v1715_v34 }
 0x1d1   : > { %v1009_v27 = vpop.f32.mrf.mxu3 }
 0x1d9   : > { %v1011_v34 = vpop.f32.mrf.mxu3 }
 0x1e4   : > { %v702_v44 = vpop.f32.mrf.mxu2 }
 0x1e5   : > { %v728_v46 = vadd.f32 %v727_v37, %v702_v44 }
 0x1e7   : > { %1335 = vst.msk [vmem:[%s1777_s29 + $0x20] sm:$0xff] %vm538_vm3, %v728_v46 }
 0x1ec   : > { %v704_v57 = vpop.f32.mrf.mxu2 }
 0x1ed   : > { %v730_v60 = vadd.f32 %v729_v43, %v704_v57 }
 0x1ef   : > { %1336 = vst.msk [vmem:[%s1777_s29 + $0x28] sm:$0xff] %vm538_vm3, %v730_v60 }
 0x1f4   : > { %v707_v4 = vpop.f32.mrf.mxu2 }
 0x1f5   : > { %v733_v7 = vadd.f32 %v732_v56, %v707_v4 }
 0x1f7   : > { %1337 = vst.msk [vmem:[%s1777_s29 + $0x30] sm:$0xff] %vm538_vm3, %v733_v7 }
 0x1fc   : > { %v709_v14 = vpop.f32.mrf.mxu2 }
 0x1fd   : > { %v735_v13 = vadd.f32 %v734_v10, %v709_v14 }
 0x1fe   : > { %v926_v28 = vpop.f32.mrf.mxu1 }
 0x1ff   : > { %1338 = vst.msk [vmem:[%s1777_s29 + $0x38] sm:$0xff] %vm538_vm3, %v735_v13 }
 0x204   : > { %v843_v29 = vpop.f32.mrf.mxu2 }
 0x205   : > { %v875_v35 = vadd.f32 %v874_v15, %v843_v29 }
 0x206   : > { %v928_v41 = vpop.f32.mrf.mxu1 }
 0x20c   : > { %v845_v36 = vpop.f32.mrf.mxu2 }
 0x20d   : > { %v877_v18 = vadd.f32 %v876_v30, %v845_v36 }
 0x20f   : > { %v884_v19 = vpack.c.bf16 %v877_v18, %v875_v35 }
 0x211   : > { %1375 = vmatmul.msk.bf16.vlgmr.msra.gmra.mxu0 %vm318_vm2, %v884_v19 }
 0x214   : > { %v848_v21 = vpop.f32.mrf.mxu2 }
 0x215   : > { %v880_v23 = vadd.f32 %v879_v20, %v848_v21 }
 0x21c   : > { %v850_v32 = vpop.f32.mrf.mxu2 }
 0x21d   : > { %v882_v24 = vadd.f32 %v881_v22, %v850_v32 }
 0x21f   : > { %v885_v25 = vpack.c.bf16 %v882_v24, %v880_v23 }
 0x221   : > { %1376 = vmatmul.msk.bf16.gmra.mxu0 %vm318_vm2, %v885_v25 }
 0x224   : > { %v978_v26 = vpop.f32.mrf.mxu2 }
 0x225   : > { %v1010_v37 = vadd.f32 %v1009_v27, %v978_v26 }
 0x22c   : > { %v980_v38 = vpop.f32.mrf.mxu2 }
 0x22d   : > { %v1012_v39 = vadd.f32 %v1011_v34, %v980_v38 }
 0x22f   : > { %v1019_v40 = vpack.c.bf16 %v1012_v39, %v1010_v37 }
 0x231   : > { %1411 = vmatmul.msk.bf16.vlgmr.msrb.gmra.mxu0 %vm318_vm2, %v1690_v31  ;;  %1421 = vmatmul.msk.bf16.vlgmr.msrb.gmra.mxu3 %vm318_vm2, %v1019_v40  ;;  %v1014_v31 = vpop.f32.mrf.mxu3 }
 0x234   : > { %v983_v43 = vpop.f32.mrf.mxu2 }
 0x235   : > { %v1015_v46 = vadd.f32 %v1014_v31, %v983_v43 }
 0x239   : > { %v1016_v49 = vpop.f32.mrf.mxu3 }
 0x23c   : > { %v985_v47 = vpop.f32.mrf.mxu2 }
 0x23d   : > { %v1017_v50 = vadd.f32 %v1016_v49, %v985_v47 }
 0x23f   : > { %v1020_v51 = vpack.c.bf16 %v1017_v50, %v1015_v46 }
 0x241   : > { %1412 = vmatmul.msk.bf16.gmra.mxu0 %vm318_vm2, %v1710_v33  ;;  %v931_v33 = vpop.f32.mrf.mxu1  ;;  %1422 = vmatmul.msk.bf16.gmra.mxu3 %vm318_vm2, %v1020_v51 }
 0x249   : > { %v933_v54 = vpop.f32.mrf.mxu1 }
 0x251   : > { %v1073_v57 = vpop.f32.mrf.mxu1 }
 0x259   : > { %v1075_v59 = vpop.f32.mrf.mxu1 }
 0x261   : > { %v1078_v0 = vpop.f32.mrf.mxu1 }
 0x269   : > { %v1080_v2 = vpop.f32.mrf.mxu1 }
 0x28e   : > { %v901_v42 = vpop.f32.mrf.mxu0 }
 0x28f   : > { %v927_v44 = vadd.f32 %v926_v28, %v901_v42 }
 0x291   : > { %1379 = vst.msk [vmem:[%s1777_s29 + $0x40] sm:$0xff] %vm538_vm3, %v927_v44 }
 0x296   : > { %v903_v45 = vpop.f32.mrf.mxu0 }
 0x297   : > { %v929_v48 = vadd.f32 %v928_v41, %v903_v45 }
 0x299   : > { %1380 = vst.msk [vmem:[%s1777_s29 + $0x48] sm:$0xff] %vm538_vm3, %v929_v48 }
 0x29e   : > { %v906_v52 = vpop.f32.mrf.mxu0 }
 0x29f   : > { %v932_v53 = vadd.f32 %v931_v33, %v906_v52 }
 0x2a1   : > { %1381 = vst.msk [vmem:[%s1777_s29 + $0x50] sm:$0xff] %vm538_vm3, %v932_v53 }
 0x2a6   : > { %v908_v55 = vpop.f32.mrf.mxu0 }
 0x2a7   : > { %v934_v56 = vadd.f32 %v933_v54, %v908_v55 }
 0x2a9   : > { %1382 = vst.msk [vmem:[%s1777_s29 + $0x58] sm:$0xff] %vm538_vm3, %v934_v56 }
 0x2ae   : > { %v1042_v58 = vpop.f32.mrf.mxu0 }
 0x2af   : > { %v1074_v61 = vadd.f32 %v1073_v57, %v1042_v58 }
 0x2b4   : > { %v1125_v7 = vpop.f32.mrf.mxu3 }
 0x2b6   : > { %v1044_v60 = vpop.f32.mrf.mxu0 }
 0x2b7   : > { %v1076_v62 = vadd.f32 %v1075_v59, %v1044_v60 }
 0x2b9   : > { %v1083_v63 = vpack.c.bf16 %v1076_v62, %v1074_v61 }
 0x2bb   : > { %1419 = vmatmul.msk.bf16.vlgmr.msrb.gmra.mxu2 %vm318_vm2, %v1083_v63 }
 0x2bc   : > { %v1127_v10 = vpop.f32.mrf.mxu3 }
 0x2be   : > { %v1047_v1 = vpop.f32.mrf.mxu0 }
 0x2bf   : > { %v1079_v4 = vadd.f32 %v1078_v0, %v1047_v1 }
 0x2c4   : > { %v1130_v14 = vpop.f32.mrf.mxu3 }
 0x2c6   : > { %v1049_v3 = vpop.f32.mrf.mxu0 }
 0x2c7   : > { %v1081_v5 = vadd.f32 %v1080_v2, %v1049_v3 }
 0x2c9   : > { %v1084_v6 = vpack.c.bf16 %v1081_v5, %v1079_v4 }
 0x2cb   : > { %1420 = vmatmul.msk.bf16.gmra.mxu2 %vm318_vm2, %v1084_v6 }
 0x2cc   : > { %v1132_v16 = vpop.f32.mrf.mxu3 }
 0x33e   : > { %v1100_v8 = vpop.f32.mrf.mxu2 }
 0x33f   : > { %v1126_v9 = vadd.f32 %v1125_v7, %v1100_v8 }
 0x341   : > { %1423 = vst.msk [vmem:[%s1777_s29 + $0x60] sm:$0xff] %vm538_vm3, %v1126_v9 }
 0x346   : > { %v1102_v11 = vpop.f32.mrf.mxu2 }
 0x347   : > { %v1128_v12 = vadd.f32 %v1127_v10, %v1102_v11 }
 0x349   : > { %1424 = vst.msk [vmem:[%s1777_s29 + $0x68] sm:$0xff] %vm538_vm3, %v1128_v12 }
 0x34e   : > { %v1105_v13 = vpop.f32.mrf.mxu2 }
 0x34f   : > { %v1131_v15 = vadd.f32 %v1130_v14, %v1105_v13 }
 0x351   : > { %1425 = vst.msk [vmem:[%s1777_s29 + $0x70] sm:$0xff] %vm538_vm3, %v1131_v15 }
 0x356   : > { %v1107_v17 = vpop.f32.mrf.mxu2 }
 0x357   : > { %v1133_v29 = vadd.f32 %v1132_v16, %v1107_v17 }
 0x359   : > { %1426 = vst.msk [vmem:[%s1777_s29 + $0x78] sm:$0xff] %vm538_vm3, %v1133_v29 }
 0x35a   : > { %1526 = shalt.err (!%p1523_p3)
}
 0x35b   : > { %s1564_s20 = smov 128   ;;  %s1565_s29 = smov 8  }
 0x35c   : > { %1457 = dma.vmem_to_hbm [thread:$0]  (%p1639_p5), %s1154_s11, 2048, %s1156_s12, %s1141_s25, %s1564_s20, %s1564_s20, %s1565_s29  }
 0x35d PF: > { %p1463_p4 = scmp.ge.s32.totalorder %s1561_s24, 2  ;;  %s1170_s14 = sand.u32 1, %s1549_s21  }
 0x35e   : > { %s1171_s26 = scalar_lea.sflag [#allocation3], %s1170_s14 }
 0x35f   : > { %p1460_p7 = pnand %p1463_p4, %p1643_p6 }
 0x361   : > { %p1461_p8 = pneg %p1460_p7 }
 0x363   : > { %1544 = dma.done.wait (%p1461_p8), %s1171_s26, 2048  }
 0x364   : > { %1546 = vsyncadd (%p1461_p8), %s1171_s26, 4294965248  ;;  %p16_p9 = scmp.ge.s32.totalorder %s1626_s27, 4   ;;  %s1929_s21 = smov %s1553_s22 }
 0x365   : > { %s1930_s22 = smov %s1557_s23  ;;  %s1931_s23 = smov %s1637_s30 }
 0x366   : > { %s1932_s24 = smov %s1626_s27  ;;  %18 = sbr.rel (!%p16_p9) target bundleno = 3 (0x3), region = 99 }
 0x36b   :  { %1177 = vsyncpa [#allocation3], 1 }
 0x36c   :  { %1179 = vsyncpa [#allocation3 + $0x1], 1 }

</bundles_post_ra>
